<compile_context>
chip_gen: v7x
topology: tpu7x:2x2x1
jax: 0.10.0
libtpu: 0.0.40
codegen_flags: <defaults>
</compile_context>

<pallas_src>
import math

import jax
import jax.numpy as jnp
from jax import lax
from jax.experimental import pallas as pl
from jax.experimental.pallas import tpu as pltpu

HIDDEN = 768                 # bert-base-cased embedding_dim (hard-coded in module)
NUM_HEADS = 12
HEAD_DIM = HIDDEN // NUM_HEADS
LN_EPS = 1e-12
LANES = 128


def _layer_norm_f32(h, g, b):
    mu = jnp.mean(h, axis=-1, keepdims=True)
    var = jnp.mean((h - mu) ** 2, axis=-1, keepdims=True)
    return (h - mu) * lax.rsqrt(var + LN_EPS) * g + b


# ----------------------------------------------------------------------------
# Fused kernel: last-layer multi-head attention + BertSelfOutput + classifier
# ----------------------------------------------------------------------------
def _fused_kernel(x_ref, mask_ref,
                  wqkv_ref, bqkv_ref, wo_ref, bo_ref, g1_ref, b1_ref,
                  ow_ref, ob_ref, g2_ref, b2_ref, cw_ref, cb_ref,
                  o_ref, ctx_ref):
    x = x_ref[...]                                   # [N, H] f32
    xb = x.astype(jnp.bfloat16)                      # bf16 operand for MXU
    bias = (mask_ref[...] - 1.0) * 1e9               # [1, N] additive key mask

    # Fused lane-dense QKV projection (1/sqrt(head_dim) folded into q weights).
    qkv = jnp.dot(xb, wqkv_ref[...],
                  preferred_element_type=jnp.float32) + bqkv_ref[...]   # [N, 3H]

    # Fully unrolled head loop; static 64-lane slices of the fused projection.
    for h in range(NUM_HEADS):
        lo = h * HEAD_DIM
        q_h = qkv[:, lo:lo + HEAD_DIM].astype(jnp.bfloat16)
        k_h = qkv[:, HIDDEN + lo:HIDDEN + lo + HEAD_DIM].astype(jnp.bfloat16)
        v_h = qkv[:, 2 * HIDDEN + lo:2 * HIDDEN + lo + HEAD_DIM].astype(jnp.bfloat16)

        s = lax.dot_general(q_h, k_h, (((1,), (1,)), ((), ())),
                            preferred_element_type=jnp.float32)          # [N, N]
        s = s + bias
        s = s - jnp.max(s, axis=-1, keepdims=True)
        probs = jnp.exp(s)                                               # f32 (EUP)
        denom = jnp.sum(probs, axis=-1, keepdims=True)                   # [N, 1]

        ctx = jnp.dot(probs.astype(jnp.bfloat16), v_h,
                      preferred_element_type=jnp.float32)                # [N, 64]
        # Normalize after the PV matmul ([N,64] multiply instead of [N,N]).
        ctx = ctx * pl.reciprocal(denom, approx=True)
        ctx_ref[:, lo:lo + HEAD_DIM] = ctx.astype(jnp.bfloat16)

    # Single full-depth output projection with the original (un-split) wo.
    proj = jnp.dot(ctx_ref[...], wo_ref[...],
                   preferred_element_type=jnp.float32) + bo_ref[...]

    # BigBird attention output: residual + LayerNorm (dropout = identity).
    y = _layer_norm_f32(proj + x, g1_ref[...], b1_ref[...])

    # BertSelfOutput: dense + LayerNorm (no residual, per module spec).
    z = jnp.dot(y.astype(jnp.bfloat16), ow_ref[...],
                preferred_element_type=jnp.float32) + ob_ref[...]
    z = _layer_norm_f32(z, g2_ref[...], b2_ref[...])

    # Classifier, lane-padded to 128 outputs (sliced back in the wrapper).
    logits = jnp.dot(z.astype(jnp.bfloat16), cw_ref[...],
                     preferred_element_type=jnp.float32) + cb_ref[...]
    o_ref[...] = logits.astype(o_ref.dtype)


def fused_attention_and_head(x_last, mask, params, classes):
    """x_last: [N, H] f32 (last hidden state), mask: [1, N] f32 -> [N, classes]."""
    N, H = x_last.shape
    Np = ((N + 15) // 16) * 16                       # bf16 sublane alignment
    if Np != N:
        x_last = jnp.pad(x_last, ((0, Np - N), (0, 0)))
        mask = jnp.pad(mask, ((0, 0), (0, Np - N)))  # padded keys get -1e9 bias
    cpad = max(LANES, ((classes + LANES - 1) // LANES) * LANES)
    bf16 = jnp.bfloat16
    scale = 1.0 / math.sqrt(HEAD_DIM)

    # One-time host-side weight prep: fused q|k|v (scale folded into q), bf16.
    wqkv = jnp.concatenate([params["wq"] * scale, params["wk"], params["wv"]],
                           axis=1).astype(bf16)                        # [H, 3H]
    bqkv = jnp.concatenate([params["bq"] * scale, params["bk"], params["bv"]],
                           axis=1)                                     # [1, 3H]
    wo = params["wo"].astype(bf16)
    ow = params["out_w"].astype(bf16)
    cw = jnp.pad(params["cls_w"], ((0, 0), (0, cpad - classes))).astype(bf16)
    cb = jnp.pad(params["cls_b"], ((0, 0), (0, cpad - classes)))

    def full(shape):
        nd = len(shape)
        return pl.BlockSpec(shape, lambda i, _nd=nd: (0,) * _nd)

    in_specs = [
        full((Np, H)),                       # x (last layer)
        full((1, Np)),                       # mask
        full((H, 3 * H)), full((1, 3 * H)),  # fused qkv weight / bias
        full((H, H)), full((1, H)),          # wo, bo
        full((1, H)), full((1, H)),          # attn LN
        full((H, H)), full((1, H)),          # BertSelfOutput dense
        full((1, H)), full((1, H)),          # BertSelfOutput LN
        full((H, cpad)), full((1, cpad)),    # classifier
    ]

    out = pl.pallas_call(
        _fused_kernel,
        out_shape=jax.ShapeDtypeStruct((Np, cpad), jnp.float32),
        grid=(1,),
        in_specs=in_specs,
        out_specs=pl.BlockSpec((Np, cpad), lambda i: (0, 0)),
        scratch_shapes=[pltpu.VMEM((Np, HIDDEN), jnp.bfloat16)],       # ctx buffer
        compiler_params=pltpu.CompilerParams(
            dimension_semantics=("arbitrary",),
            vmem_limit_bytes=48 * 1024 * 1024),      # fits v7x's 64 MiB VMEM
    )(x_last, mask, wqkv, bqkv, wo, params["bo"],
      params["attn_ln_g"], params["attn_ln_b"],
      ow, params["out_b"], params["out_ln_g"], params["out_ln_b"], cw, cb)

    return out[:N, :classes]


# ----------------------------------------------------------------------------
# Full forward (mirrors LongAttentionBERT.forward)
# ----------------------------------------------------------------------------
def long_attention_bert_forward(input_ids, attention_mask, params, classes):
    B, S = input_ids.shape
    N = B * S

    # TODO(synk): pretrained BertModel backbone (from_pretrained) is not
    # replicated; hidden states come from a deterministic embedding +
    # per-layer tanh-linear stand-in with the same [L, B, S, H] semantics.
    hs = [params["emb"][input_ids]]                       # [B, S, H]
    for wl in params["layer_w"]:
        hs.append(jnp.tanh(hs[-1] @ wl))

    # torch.stack([cat(tensor_split(h, B), dim=1).squeeze()]) == reshape(B*S, H).
    # Only hidden_states[-1] reaches the classifier (`self.output(...)[-1]`), so
    # only the last layer is run through attention/output/classifier — identical
    # output, (L-1)/L less work.
    x_last = hs[-1].reshape(N, HIDDEN)                                     # [N, H]
    mask_one_row = attention_mask.reshape(1, N).astype(jnp.float32)        # [1, N]

    # TODO(synk): BigBird block-sparse pattern not replicated; full multi-head
    # attention with additive padding mask (BigBird behaviour for short seqs).
    logits = fused_attention_and_head(x_last, mask_one_row, params, classes)

    return logits.reshape(B, S, classes)


# ----------------------------------------------------------------------------
# Deterministic parameter init
# ----------------------------------------------------------------------------
def init_params(key, vocab, num_hidden_states, classes):
    ks = jax.random.split(key, 12)
    nrm = lambda k, shp, s: jax.random.normal(k, shp, jnp.float32) * s
    zeros = lambda shp: jnp.zeros(shp, jnp.float32)
    ones = lambda shp: jnp.ones(shp, jnp.float32)
    return {
        # synthetic backbone
        "emb": nrm(ks[0], (vocab, HIDDEN), 1.0),
        "layer_w": nrm(ks[1], (num_hidden_states - 1, HIDDEN, HIDDEN),
                       1.0 / math.sqrt(HIDDEN)),
        # BigBirdAttention (q/k/v/out projections + LayerNorm)
        "wq": nrm(ks[2], (HIDDEN, HIDDEN), 0.02), "bq": zeros((1, HIDDEN)),
        "wk": nrm(ks[3], (HIDDEN, HIDDEN), 0.02), "bk": zeros((1, HIDDEN)),
        "wv": nrm(ks[4], (HIDDEN, HIDDEN), 0.02), "bv": zeros((1, HIDDEN)),
        "wo": nrm(ks[5], (HIDDEN, HIDDEN), 0.02), "bo": zeros((1, HIDDEN)),
        "attn_ln_g": ones((1, HIDDEN)), "attn_ln_b": zeros((1, HIDDEN)),
        # BertSelfOutput
        "out_w": nrm(ks[6], (HIDDEN, HIDDEN), 0.02), "out_b": zeros((1, HIDDEN)),
        "out_ln_g": ones((1, HIDDEN)), "out_ln_b": zeros((1, HIDDEN)),
        # classifier
        "cls_w": nrm(ks[7], (HIDDEN, classes), 0.02), "cls_b": zeros((1, classes)),
    }


if __name__ == "__main__":
    B, S = 2, 8                 # batch, per-example seq length -> N = 16 tokens
    L = 4                       # number of BERT hidden states (stand-in)
    VOCAB = 64
    CLASSES = 9                 # NER tag count

    key = jax.random.PRNGKey(0)
    k_par, k_ids = jax.random.split(key)
    params = init_params(k_par, VOCAB, L, CLASSES)

    input_ids = jax.random.randint(k_ids, (B, S), 0, VOCAB, dtype=jnp.int32)
    attention_mask = jnp.ones((B, S), jnp.int32).at[1, S - 2:].set(0)

    preds = long_attention_bert_forward(input_ids, attention_mask, params, CLASSES)
    preds = jax.block_until_ready(preds)
    assert preds.shape == (B, S, CLASSES)
    assert bool(jnp.all(jnp.isfinite(preds)))
    print("KERNEL_OK")
</pallas_src>

<mosaic_0001>
module attributes {stable_mosaic.version = 11 : i64} {
  func.func @_fused_kernel(%arg0: i32, %arg1: memref<16x768xf32, #tpu.memory_space<vmem>>, %arg2: memref<1x16xf32, #tpu.memory_space<vmem>>, %arg3: memref<768x2304xbf16, #tpu.memory_space<vmem>>, %arg4: memref<1x2304xf32, #tpu.memory_space<vmem>>, %arg5: memref<768x768xbf16, #tpu.memory_space<vmem>>, %arg6: memref<1x768xf32, #tpu.memory_space<vmem>>, %arg7: memref<1x768xf32, #tpu.memory_space<vmem>>, %arg8: memref<1x768xf32, #tpu.memory_space<vmem>>, %arg9: memref<768x768xbf16, #tpu.memory_space<vmem>>, %arg10: memref<1x768xf32, #tpu.memory_space<vmem>>, %arg11: memref<1x768xf32, #tpu.memory_space<vmem>>, %arg12: memref<1x768xf32, #tpu.memory_space<vmem>>, %arg13: memref<768x128xbf16, #tpu.memory_space<vmem>>, %arg14: memref<1x128xf32, #tpu.memory_space<vmem>>, %arg15: memref<16x128xf32, #tpu.memory_space<vmem>>, %arg16: memref<16x768xbf16, #tpu.memory_space<vmem>>) attributes {dimension_semantics = [#tpu.dimension_semantics<arbitrary>], iteration_bounds = array<i64: 1>, scalar_prefetch = 0 : i64, scratch_operands = 1 : i64, tpu.core_type = #tpu.core_type<tc>, window_params = [{pipeline_mode = #tpu.pipeline_mode<synchronous>, transform_indices = @transform_0, window_bounds = array<i64: 16, 768>}, {pipeline_mode = #tpu.pipeline_mode<synchronous>, transform_indices = @transform_1, window_bounds = array<i64: 1, 16>}, {pipeline_mode = #tpu.pipeline_mode<synchronous>, transform_indices = @transform_2, window_bounds = array<i64: 768, 2304>}, {pipeline_mode = #tpu.pipeline_mode<synchronous>, transform_indices = @transform_3, window_bounds = array<i64: 1, 2304>}, {pipeline_mode = #tpu.pipeline_mode<synchronous>, transform_indices = @transform_4, window_bounds = array<i64: 768, 768>}, {pipeline_mode = #tpu.pipeline_mode<synchronous>, transform_indices = @transform_5, window_bounds = array<i64: 1, 768>}, {pipeline_mode = #tpu.pipeline_mode<synchronous>, transform_indices = @transform_6, window_bounds = array<i64: 1, 768>}, {pipeline_mode = #tpu.pipeline_mode<synchronous>, transform_indices = @transform_7, window_bounds = array<i64: 1, 768>}, {pipeline_mode = #tpu.pipeline_mode<synchronous>, transform_indices = @transform_8, window_bounds = array<i64: 768, 768>}, {pipeline_mode = #tpu.pipeline_mode<synchronous>, transform_indices = @transform_9, window_bounds = array<i64: 1, 768>}, {pipeline_mode = #tpu.pipeline_mode<synchronous>, transform_indices = @transform_10, window_bounds = array<i64: 1, 768>}, {pipeline_mode = #tpu.pipeline_mode<synchronous>, transform_indices = @transform_11, window_bounds = array<i64: 1, 768>}, {pipeline_mode = #tpu.pipeline_mode<synchronous>, transform_indices = @transform_12, window_bounds = array<i64: 768, 128>}, {pipeline_mode = #tpu.pipeline_mode<synchronous>, transform_indices = @transform_13, window_bounds = array<i64: 1, 128>}, {pipeline_mode = #tpu.pipeline_mode<synchronous>, transform_indices = @transform_14, window_bounds = array<i64: 16, 128>}]} {
    %c0 = arith.constant 0 : index
    %c0_0 = arith.constant 0 : index
    %0 = vector.load %arg1[%c0, %c0_0] : memref<16x768xf32, #tpu.memory_space<vmem>>, vector<16x768xf32>
    %1 = arith.truncf %0 : vector<16x768xf32> to vector<16x768xbf16>
    %c0_1 = arith.constant 0 : index
    %c0_2 = arith.constant 0 : index
    %2 = vector.load %arg2[%c0_1, %c0_2] : memref<1x16xf32, #tpu.memory_space<vmem>>, vector<1x16xf32>
    %cst = arith.constant 1.000000e+00 : f32
    %3 = vector.broadcast %cst : f32 to vector<1x16xf32>
    %4 = arith.subf %2, %3 : vector<1x16xf32>
    %cst_3 = arith.constant 1.000000e+09 : f32
    %5 = vector.broadcast %cst_3 : f32 to vector<1x16xf32>
    %6 = arith.mulf %4, %5 : vector<1x16xf32>
    %c0_4 = arith.constant 0 : index
    %c0_5 = arith.constant 0 : index
    %7 = vector.load %arg3[%c0_4, %c0_5] : memref<768x2304xbf16, #tpu.memory_space<vmem>>, vector<768x2304xbf16>
    %cst_6 = arith.constant dense<0.000000e+00> : vector<16x2304xf32>
    %8 = tpu.matmul %1, %7, %cst_6 {dimension_numbers = #tpu.dot_dimension_numbers<[1], [0], [0], [1], [0, 0, 1, 1], [], []>} : vector<16x768xbf16>, vector<768x2304xbf16>, vector<16x2304xf32> -> vector<16x2304xf32>
    %c0_7 = arith.constant 0 : index
    %c0_8 = arith.constant 0 : index
    %9 = vector.load %arg4[%c0_7, %c0_8] : memref<1x2304xf32, #tpu.memory_space<vmem>>, vector<1x2304xf32>
    %10 = vector.broadcast %9 : vector<1x2304xf32> to vector<16x2304xf32>
    %11 = arith.addf %8, %10 : vector<16x2304xf32>
    %12 = vector.extract_strided_slice %11 {offsets = [0, 0], sizes = [16, 64], strides = [1, 1]} : vector<16x2304xf32> to vector<16x64xf32>
    %13 = arith.truncf %12 : vector<16x64xf32> to vector<16x64xbf16>
    %14 = vector.extract_strided_slice %11 {offsets = [0, 768], sizes = [16, 64], strides = [1, 1]} : vector<16x2304xf32> to vector<16x64xf32>
    %15 = arith.truncf %14 : vector<16x64xf32> to vector<16x64xbf16>
    %16 = vector.extract_strided_slice %11 {offsets = [0, 1536], sizes = [16, 64], strides = [1, 1]} : vector<16x2304xf32> to vector<16x64xf32>
    %17 = arith.truncf %16 : vector<16x64xf32> to vector<16x64xbf16>
    %cst_9 = arith.constant dense<0.000000e+00> : vector<16x16xf32>
    %18 = tpu.matmul %13, %15, %cst_9 {dimension_numbers = #tpu.dot_dimension_numbers<[1], [1], [0], [0], [0, 0, 1, 0], [], []>} : vector<16x64xbf16>, vector<16x64xbf16>, vector<16x16xf32> -> vector<16x16xf32>
    %19 = vector.broadcast %6 : vector<1x16xf32> to vector<16x16xf32>
    %20 = arith.addf %18, %19 : vector<16x16xf32>
    %cst_10 = arith.constant dense<0xFF800000> : vector<16xf32>
    %21 = vector.multi_reduction <maximumf>, %20, %cst_10 [1] : vector<16x16xf32> to vector<16xf32>
    %22 = vector.shape_cast %21 : vector<16xf32> to vector<16x1xf32>
    %23 = vector.broadcast %22 : vector<16x1xf32> to vector<16x16xf32>
    %24 = arith.subf %20, %23 : vector<16x16xf32>
    %25 = math.exp %24 : vector<16x16xf32>
    %cst_11 = arith.constant dense<0.000000e+00> : vector<16xf32>
    %26 = vector.multi_reduction <add>, %25, %cst_11 [1] : vector<16x16xf32> to vector<16xf32>
    %27 = vector.shape_cast %26 : vector<16xf32> to vector<16x1xf32>
    %28 = arith.truncf %25 : vector<16x16xf32> to vector<16x16xbf16>
    %cst_12 = arith.constant dense<0.000000e+00> : vector<16x64xf32>
    %29 = tpu.matmul %28, %17, %cst_12 {dimension_numbers = #tpu.dot_dimension_numbers<[1], [0], [0], [1], [0, 0, 1, 1], [], []>} : vector<16x16xbf16>, vector<16x64xbf16>, vector<16x64xf32> -> vector<16x64xf32>
    %30 = tpu.reciprocal %27 {approx = true} : vector<16x1xf32> -> vector<16x1xf32>
    %31 = vector.broadcast %30 : vector<16x1xf32> to vector<16x64xf32>
    %32 = arith.mulf %29, %31 : vector<16x64xf32>
    %33 = arith.truncf %32 : vector<16x64xf32> to vector<16x64xbf16>
    %c0_13 = arith.constant 0 : index
    %c0_14 = arith.constant 0 : index
    %34 = vector.load %arg16[%c0_13, %c0_14] : memref<16x768xbf16, #tpu.memory_space<vmem>>, vector<16x64xbf16>
    tpu.vector_store %arg16[%c0_13, %c0_14], %33 {strides = array<i32>} : memref<16x768xbf16, #tpu.memory_space<vmem>>, vector<16x64xbf16>,
    %35 = vector.extract_strided_slice %11 {offsets = [0, 64], sizes = [16, 64], strides = [1, 1]} : vector<16x2304xf32> to vector<16x64xf32>
    %36 = arith.truncf %35 : vector<16x64xf32> to vector<16x64xbf16>
    %37 = vector.extract_strided_slice %11 {offsets = [0, 832], sizes = [16, 64], strides = [1, 1]} : vector<16x2304xf32> to vector<16x64xf32>
    %38 = arith.truncf %37 : vector<16x64xf32> to vector<16x64xbf16>
    %39 = vector.extract_strided_slice %11 {offsets = [0, 1600], sizes = [16, 64], strides = [1, 1]} : vector<16x2304xf32> to vector<16x64xf32>
    %40 = arith.truncf %39 : vector<16x64xf32> to vector<16x64xbf16>
    %cst_15 = arith.constant dense<0.000000e+00> : vector<16x16xf32>
    %41 = tpu.matmul %36, %38, %cst_15 {dimension_numbers = #tpu.dot_dimension_numbers<[1], [1], [0], [0], [0, 0, 1, 0], [], []>} : vector<16x64xbf16>, vector<16x64xbf16>, vector<16x16xf32> -> vector<16x16xf32>
    %42 = vector.broadcast %6 : vector<1x16xf32> to vector<16x16xf32>
    %43 = arith.addf %41, %42 : vector<16x16xf32>
    %cst_16 = arith.constant dense<0xFF800000> : vector<16xf32>
    %44 = vector.multi_reduction <maximumf>, %43, %cst_16 [1] : vector<16x16xf32> to vector<16xf32>
    %45 = vector.shape_cast %44 : vector<16xf32> to vector<16x1xf32>
    %46 = vector.broadcast %45 : vector<16x1xf32> to vector<16x16xf32>
    %47 = arith.subf %43, %46 : vector<16x16xf32>
    %48 = math.exp %47 : vector<16x16xf32>
    %cst_17 = arith.constant dense<0.000000e+00> : vector<16xf32>
    %49 = vector.multi_reduction <add>, %48, %cst_17 [1] : vector<16x16xf32> to vector<16xf32>
    %50 = vector.shape_cast %49 : vector<16xf32> to vector<16x1xf32>
    %51 = arith.truncf %48 : vector<16x16xf32> to vector<16x16xbf16>
    %cst_18 = arith.constant dense<0.000000e+00> : vector<16x64xf32>
    %52 = tpu.matmul %51, %40, %cst_18 {dimension_numbers = #tpu.dot_dimension_numbers<[1], [0], [0], [1], [0, 0, 1, 1], [], []>} : vector<16x16xbf16>, vector<16x64xbf16>, vector<16x64xf32> -> vector<16x64xf32>
    %53 = tpu.reciprocal %50 {approx = true} : vector<16x1xf32> -> vector<16x1xf32>
    %54 = vector.broadcast %53 : vector<16x1xf32> to vector<16x64xf32>
    %55 = arith.mulf %52, %54 : vector<16x64xf32>
    %56 = arith.truncf %55 : vector<16x64xf32> to vector<16x64xbf16>
    %c0_19 = arith.constant 0 : index
    %c64 = arith.constant 64 : index
    %57 = vector.load %arg16[%c0_19, %c64] : memref<16x768xbf16, #tpu.memory_space<vmem>>, vector<16x64xbf16>
    tpu.vector_store %arg16[%c0_19, %c64], %56 {strides = array<i32>} : memref<16x768xbf16, #tpu.memory_space<vmem>>, vector<16x64xbf16>,
    %58 = vector.extract_strided_slice %11 {offsets = [0, 128], sizes = [16, 64], strides = [1, 1]} : vector<16x2304xf32> to vector<16x64xf32>
    %59 = arith.truncf %58 : vector<16x64xf32> to vector<16x64xbf16>
    %60 = vector.extract_strided_slice %11 {offsets = [0, 896], sizes = [16, 64], strides = [1, 1]} : vector<16x2304xf32> to vector<16x64xf32>
    %61 = arith.truncf %60 : vector<16x64xf32> to vector<16x64xbf16>
    %62 = vector.extract_strided_slice %11 {offsets = [0, 1664], sizes = [16, 64], strides = [1, 1]} : vector<16x2304xf32> to vector<16x64xf32>
    %63 = arith.truncf %62 : vector<16x64xf32> to vector<16x64xbf16>
    %cst_20 = arith.constant dense<0.000000e+00> : vector<16x16xf32>
    %64 = tpu.matmul %59, %61, %cst_20 {dimension_numbers = #tpu.dot_dimension_numbers<[1], [1], [0], [0], [0, 0, 1, 0], [], []>} : vector<16x64xbf16>, vector<16x64xbf16>, vector<16x16xf32> -> vector<16x16xf32>
    %65 = vector.broadcast %6 : vector<1x16xf32> to vector<16x16xf32>
    %66 = arith.addf %64, %65 : vector<16x16xf32>
    %cst_21 = arith.constant dense<0xFF800000> : vector<16xf32>
    %67 = vector.multi_reduction <maximumf>, %66, %cst_21 [1] : vector<16x16xf32> to vector<16xf32>
    %68 = vector.shape_cast %67 : vector<16xf32> to vector<16x1xf32>
    %69 = vector.broadcast %68 : vector<16x1xf32> to vector<16x16xf32>
    %70 = arith.subf %66, %69 : vector<16x16xf32>
    %71 = math.exp %70 : vector<16x16xf32>
    %cst_22 = arith.constant dense<0.000000e+00> : vector<16xf32>
    %72 = vector.multi_reduction <add>, %71, %cst_22 [1] : vector<16x16xf32> to vector<16xf32>
    %73 = vector.shape_cast %72 : vector<16xf32> to vector<16x1xf32>
    %74 = arith.truncf %71 : vector<16x16xf32> to vector<16x16xbf16>
    %cst_23 = arith.constant dense<0.000000e+00> : vector<16x64xf32>
    %75 = tpu.matmul %74, %63, %cst_23 {dimension_numbers = #tpu.dot_dimension_numbers<[1], [0], [0], [1], [0, 0, 1, 1], [], []>} : vector<16x16xbf16>, vector<16x64xbf16>, vector<16x64xf32> -> vector<16x64xf32>
    %76 = tpu.reciprocal %73 {approx = true} : vector<16x1xf32> -> vector<16x1xf32>
    %77 = vector.broadcast %76 : vector<16x1xf32> to vector<16x64xf32>
    %78 = arith.mulf %75, %77 : vector<16x64xf32>
    %79 = arith.truncf %78 : vector<16x64xf32> to vector<16x64xbf16>
    %c0_24 = arith.constant 0 : index
    %c128 = arith.constant 128 : index
    %80 = vector.load %arg16[%c0_24, %c128] : memref<16x768xbf16, #tpu.memory_space<vmem>>, vector<16x64xbf16>
    tpu.vector_store %arg16[%c0_24, %c128], %79 {strides = array<i32>} : memref<16x768xbf16, #tpu.memory_space<vmem>>, vector<16x64xbf16>,
    %81 = vector.extract_strided_slice %11 {offsets = [0, 192], sizes = [16, 64], strides = [1, 1]} : vector<16x2304xf32> to vector<16x64xf32>
    %82 = arith.truncf %81 : vector<16x64xf32> to vector<16x64xbf16>
    %83 = vector.extract_strided_slice %11 {offsets = [0, 960], sizes = [16, 64], strides = [1, 1]} : vector<16x2304xf32> to vector<16x64xf32>
    %84 = arith.truncf %83 : vector<16x64xf32> to vector<16x64xbf16>
    %85 = vector.extract_strided_slice %11 {offsets = [0, 1728], sizes = [16, 64], strides = [1, 1]} : vector<16x2304xf32> to vector<16x64xf32>
    %86 = arith.truncf %85 : vector<16x64xf32> to vector<16x64xbf16>
    %cst_25 = arith.constant dense<0.000000e+00> : vector<16x16xf32>
    %87 = tpu.matmul %82, %84, %cst_25 {dimension_numbers = #tpu.dot_dimension_numbers<[1], [1], [0], [0], [0, 0, 1, 0], [], []>} : vector<16x64xbf16>, vector<16x64xbf16>, vector<16x16xf32> -> vector<16x16xf32>
    %88 = vector.broadcast %6 : vector<1x16xf32> to vector<16x16xf32>
    %89 = arith.addf %87, %88 : vector<16x16xf32>
    %cst_26 = arith.constant dense<0xFF800000> : vector<16xf32>
    %90 = vector.multi_reduction <maximumf>, %89, %cst_26 [1] : vector<16x16xf32> to vector<16xf32>
    %91 = vector.shape_cast %90 : vector<16xf32> to vector<16x1xf32>
    %92 = vector.broadcast %91 : vector<16x1xf32> to vector<16x16xf32>
    %93 = arith.subf %89, %92 : vector<16x16xf32>
    %94 = math.exp %93 : vector<16x16xf32>
    %cst_27 = arith.constant dense<0.000000e+00> : vector<16xf32>
    %95 = vector.multi_reduction <add>, %94, %cst_27 [1] : vector<16x16xf32> to vector<16xf32>
    %96 = vector.shape_cast %95 : vector<16xf32> to vector<16x1xf32>
    %97 = arith.truncf %94 : vector<16x16xf32> to vector<16x16xbf16>
    %cst_28 = arith.constant dense<0.000000e+00> : vector<16x64xf32>
    %98 = tpu.matmul %97, %86, %cst_28 {dimension_numbers = #tpu.dot_dimension_numbers<[1], [0], [0], [1], [0, 0, 1, 1], [], []>} : vector<16x16xbf16>, vector<16x64xbf16>, vector<16x64xf32> -> vector<16x64xf32>
    %99 = tpu.reciprocal %96 {approx = true} : vector<16x1xf32> -> vector<16x1xf32>
    %100 = vector.broadcast %99 : vector<16x1xf32> to vector<16x64xf32>
    %101 = arith.mulf %98, %100 : vector<16x64xf32>
    %102 = arith.truncf %101 : vector<16x64xf32> to vector<16x64xbf16>
    %c0_29 = arith.constant 0 : index
    %c192 = arith.constant 192 : index
    %103 = vector.load %arg16[%c0_29, %c192] : memref<16x768xbf16, #tpu.memory_space<vmem>>, vector<16x64xbf16>
    tpu.vector_store %arg16[%c0_29, %c192], %102 {strides = array<i32>} : memref<16x768xbf16, #tpu.memory_space<vmem>>, vector<16x64xbf16>,
    %104 = vector.extract_strided_slice %11 {offsets = [0, 256], sizes = [16, 64], strides = [1, 1]} : vector<16x2304xf32> to vector<16x64xf32>
    %105 = arith.truncf %104 : vector<16x64xf32> to vector<16x64xbf16>
    %106 = vector.extract_strided_slice %11 {offsets = [0, 1024], sizes = [16, 64], strides = [1, 1]} : vector<16x2304xf32> to vector<16x64xf32>
    %107 = arith.truncf %106 : vector<16x64xf32> to vector<16x64xbf16>
    %108 = vector.extract_strided_slice %11 {offsets = [0, 1792], sizes = [16, 64], strides = [1, 1]} : vector<16x2304xf32> to vector<16x64xf32>
    %109 = arith.truncf %108 : vector<16x64xf32> to vector<16x64xbf16>
    %cst_30 = arith.constant dense<0.000000e+00> : vector<16x16xf32>
    %110 = tpu.matmul %105, %107, %cst_30 {dimension_numbers = #tpu.dot_dimension_numbers<[1], [1], [0], [0], [0, 0, 1, 0], [], []>} : vector<16x64xbf16>, vector<16x64xbf16>, vector<16x16xf32> -> vector<16x16xf32>
    %111 = vector.broadcast %6 : vector<1x16xf32> to vector<16x16xf32>
    %112 = arith.addf %110, %111 : vector<16x16xf32>
    %cst_31 = arith.constant dense<0xFF800000> : vector<16xf32>
    %113 = vector.multi_reduction <maximumf>, %112, %cst_31 [1] : vector<16x16xf32> to vector<16xf32>
    %114 = vector.shape_cast %113 : vector<16xf32> to vector<16x1xf32>
    %115 = vector.broadcast %114 : vector<16x1xf32> to vector<16x16xf32>
    %116 = arith.subf %112, %115 : vector<16x16xf32>
    %117 = math.exp %116 : vector<16x16xf32>
    %cst_32 = arith.constant dense<0.000000e+00> : vector<16xf32>
    %118 = vector.multi_reduction <add>, %117, %cst_32 [1] : vector<16x16xf32> to vector<16xf32>
    %119 = vector.shape_cast %118 : vector<16xf32> to vector<16x1xf32>
    %120 = arith.truncf %117 : vector<16x16xf32> to vector<16x16xbf16>
    %cst_33 = arith.constant dense<0.000000e+00> : vector<16x64xf32>
    %121 = tpu.matmul %120, %109, %cst_33 {dimension_numbers = #tpu.dot_dimension_numbers<[1], [0], [0], [1], [0, 0, 1, 1], [], []>} : vector<16x16xbf16>, vector<16x64xbf16>, vector<16x64xf32> -> vector<16x64xf32>
    %122 = tpu.reciprocal %119 {approx = true} : vector<16x1xf32> -> vector<16x1xf32>
    %123 = vector.broadcast %122 : vector<16x1xf32> to vector<16x64xf32>
    %124 = arith.mulf %121, %123 : vector<16x64xf32>
    %125 = arith.truncf %124 : vector<16x64xf32> to vector<16x64xbf16>
    %c0_34 = arith.constant 0 : index
    %c256 = arith.constant 256 : index
    %126 = vector.load %arg16[%c0_34, %c256] : memref<16x768xbf16, #tpu.memory_space<vmem>>, vector<16x64xbf16>
    tpu.vector_store %arg16[%c0_34, %c256], %125 {strides = array<i32>} : memref<16x768xbf16, #tpu.memory_space<vmem>>, vector<16x64xbf16>,
    %127 = vector.extract_strided_slice %11 {offsets = [0, 320], sizes = [16, 64], strides = [1, 1]} : vector<16x2304xf32> to vector<16x64xf32>
    %128 = arith.truncf %127 : vector<16x64xf32> to vector<16x64xbf16>
    %129 = vector.extract_strided_slice %11 {offsets = [0, 1088], sizes = [16, 64], strides = [1, 1]} : vector<16x2304xf32> to vector<16x64xf32>
    %130 = arith.truncf %129 : vector<16x64xf32> to vector<16x64xbf16>
    %131 = vector.extract_strided_slice %11 {offsets = [0, 1856], sizes = [16, 64], strides = [1, 1]} : vector<16x2304xf32> to vector<16x64xf32>
    %132 = arith.truncf %131 : vector<16x64xf32> to vector<16x64xbf16>
    %cst_35 = arith.constant dense<0.000000e+00> : vector<16x16xf32>
    %133 = tpu.matmul %128, %130, %cst_35 {dimension_numbers = #tpu.dot_dimension_numbers<[1], [1], [0], [0], [0, 0, 1, 0], [], []>} : vector<16x64xbf16>, vector<16x64xbf16>, vector<16x16xf32> -> vector<16x16xf32>
    %134 = vector.broadcast %6 : vector<1x16xf32> to vector<16x16xf32>
    %135 = arith.addf %133, %134 : vector<16x16xf32>
    %cst_36 = arith.constant dense<0xFF800000> : vector<16xf32>
    %136 = vector.multi_reduction <maximumf>, %135, %cst_36 [1] : vector<16x16xf32> to vector<16xf32>
    %137 = vector.shape_cast %136 : vector<16xf32> to vector<16x1xf32>
    %138 = vector.broadcast %137 : vector<16x1xf32> to vector<16x16xf32>
    %139 = arith.subf %135, %138 : vector<16x16xf32>
    %140 = math.exp %139 : vector<16x16xf32>
    %cst_37 = arith.constant dense<0.000000e+00> : vector<16xf32>
    %141 = vector.multi_reduction <add>, %140, %cst_37 [1] : vector<16x16xf32> to vector<16xf32>
    %142 = vector.shape_cast %141 : vector<16xf32> to vector<16x1xf32>
    %143 = arith.truncf %140 : vector<16x16xf32> to vector<16x16xbf16>
    %cst_38 = arith.constant dense<0.000000e+00> : vector<16x64xf32>
    %144 = tpu.matmul %143, %132, %cst_38 {dimension_numbers = #tpu.dot_dimension_numbers<[1], [0], [0], [1], [0, 0, 1, 1], [], []>} : vector<16x16xbf16>, vector<16x64xbf16>, vector<16x64xf32> -> vector<16x64xf32>
    %145 = tpu.reciprocal %142 {approx = true} : vector<16x1xf32> -> vector<16x1xf32>
    %146 = vector.broadcast %145 : vector<16x1xf32> to vector<16x64xf32>
    %147 = arith.mulf %144, %146 : vector<16x64xf32>
    %148 = arith.truncf %147 : vector<16x64xf32> to vector<16x64xbf16>
    %c0_39 = arith.constant 0 : index
    %c320 = arith.constant 320 : index
    %149 = vector.load %arg16[%c0_39, %c320] : memref<16x768xbf16, #tpu.memory_space<vmem>>, vector<16x64xbf16>
    tpu.vector_store %arg16[%c0_39, %c320], %148 {strides = array<i32>} : memref<16x768xbf16, #tpu.memory_space<vmem>>, vector<16x64xbf16>,
    %150 = vector.extract_strided_slice %11 {offsets = [0, 384], sizes = [16, 64], strides = [1, 1]} : vector<16x2304xf32> to vector<16x64xf32>
    %151 = arith.truncf %150 : vector<16x64xf32> to vector<16x64xbf16>
    %152 = vector.extract_strided_slice %11 {offsets = [0, 1152], sizes = [16, 64], strides = [1, 1]} : vector<16x2304xf32> to vector<16x64xf32>
    %153 = arith.truncf %152 : vector<16x64xf32> to vector<16x64xbf16>
    %154 = vector.extract_strided_slice %11 {offsets = [0, 1920], sizes = [16, 64], strides = [1, 1]} : vector<16x2304xf32> to vector<16x64xf32>
    %155 = arith.truncf %154 : vector<16x64xf32> to vector<16x64xbf16>
    %cst_40 = arith.constant dense<0.000000e+00> : vector<16x16xf32>
    %156 = tpu.matmul %151, %153, %cst_40 {dimension_numbers = #tpu.dot_dimension_numbers<[1], [1], [0], [0], [0, 0, 1, 0], [], []>} : vector<16x64xbf16>, vector<16x64xbf16>, vector<16x16xf32> -> vector<16x16xf32>
    %157 = vector.broadcast %6 : vector<1x16xf32> to vector<16x16xf32>
    %158 = arith.addf %156, %157 : vector<16x16xf32>
    %cst_41 = arith.constant dense<0xFF800000> : vector<16xf32>
    %159 = vector.multi_reduction <maximumf>, %158, %cst_41 [1] : vector<16x16xf32> to vector<16xf32>
    %160 = vector.shape_cast %159 : vector<16xf32> to vector<16x1xf32>
    %161 = vector.broadcast %160 : vector<16x1xf32> to vector<16x16xf32>
    %162 = arith.subf %158, %161 : vector<16x16xf32>
    %163 = math.exp %162 : vector<16x16xf32>
    %cst_42 = arith.constant dense<0.000000e+00> : vector<16xf32>
    %164 = vector.multi_reduction <add>, %163, %cst_42 [1] : vector<16x16xf32> to vector<16xf32>
    %165 = vector.shape_cast %164 : vector<16xf32> to vector<16x1xf32>
    %166 = arith.truncf %163 : vector<16x16xf32> to vector<16x16xbf16>
    %cst_43 = arith.constant dense<0.000000e+00> : vector<16x64xf32>
    %167 = tpu.matmul %166, %155, %cst_43 {dimension_numbers = #tpu.dot_dimension_numbers<[1], [0], [0], [1], [0, 0, 1, 1], [], []>} : vector<16x16xbf16>, vector<16x64xbf16>, vector<16x64xf32> -> vector<16x64xf32>
    %168 = tpu.reciprocal %165 {approx = true} : vector<16x1xf32> -> vector<16x1xf32>
    %169 = vector.broadcast %168 : vector<16x1xf32> to vector<16x64xf32>
    %170 = arith.mulf %167, %169 : vector<16x64xf32>
    %171 = arith.truncf %170 : vector<16x64xf32> to vector<16x64xbf16>
    %c0_44 = arith.constant 0 : index
    %c384 = arith.constant 384 : index
    %172 = vector.load %arg16[%c0_44, %c384] : memref<16x768xbf16, #tpu.memory_space<vmem>>, vector<16x64xbf16>
    tpu.vector_store %arg16[%c0_44, %c384], %171 {strides = array<i32>} : memref<16x768xbf16, #tpu.memory_space<vmem>>, vector<16x64xbf16>,
    %173 = vector.extract_strided_slice %11 {offsets = [0, 448], sizes = [16, 64], strides = [1, 1]} : vector<16x2304xf32> to vector<16x64xf32>
    %174 = arith.truncf %173 : vector<16x64xf32> to vector<16x64xbf16>
    %175 = vector.extract_strided_slice %11 {offsets = [0, 1216], sizes = [16, 64], strides = [1, 1]} : vector<16x2304xf32> to vector<16x64xf32>
    %176 = arith.truncf %175 : vector<16x64xf32> to vector<16x64xbf16>
    %177 = vector.extract_strided_slice %11 {offsets = [0, 1984], sizes = [16, 64], strides = [1, 1]} : vector<16x2304xf32> to vector<16x64xf32>
    %178 = arith.truncf %177 : vector<16x64xf32> to vector<16x64xbf16>
    %cst_45 = arith.constant dense<0.000000e+00> : vector<16x16xf32>
    %179 = tpu.matmul %174, %176, %cst_45 {dimension_numbers = #tpu.dot_dimension_numbers<[1], [1], [0], [0], [0, 0, 1, 0], [], []>} : vector<16x64xbf16>, vector<16x64xbf16>, vector<16x16xf32> -> vector<16x16xf32>
    %180 = vector.broadcast %6 : vector<1x16xf32> to vector<16x16xf32>
    %181 = arith.addf %179, %180 : vector<16x16xf32>
    %cst_46 = arith.constant dense<0xFF800000> : vector<16xf32>
    %182 = vector.multi_reduction <maximumf>, %181, %cst_46 [1] : vector<16x16xf32> to vector<16xf32>
    %183 = vector.shape_cast %182 : vector<16xf32> to vector<16x1xf32>
    %184 = vector.broadcast %183 : vector<16x1xf32> to vector<16x16xf32>
    %185 = arith.subf %181, %184 : vector<16x16xf32>
    %186 = math.exp %185 : vector<16x16xf32>
    %cst_47 = arith.constant dense<0.000000e+00> : vector<16xf32>
    %187 = vector.multi_reduction <add>, %186, %cst_47 [1] : vector<16x16xf32> to vector<16xf32>
    %188 = vector.shape_cast %187 : vector<16xf32> to vector<16x1xf32>
    %189 = arith.truncf %186 : vector<16x16xf32> to vector<16x16xbf16>
    %cst_48 = arith.constant dense<0.000000e+00> : vector<16x64xf32>
    %190 = tpu.matmul %189, %178, %cst_48 {dimension_numbers = #tpu.dot_dimension_numbers<[1], [0], [0], [1], [0, 0, 1, 1], [], []>} : vector<16x16xbf16>, vector<16x64xbf16>, vector<16x64xf32> -> vector<16x64xf32>
    %191 = tpu.reciprocal %188 {approx = true} : vector<16x1xf32> -> vector<16x1xf32>
    %192 = vector.broadcast %191 : vector<16x1xf32> to vector<16x64xf32>
    %193 = arith.mulf %190, %192 : vector<16x64xf32>
    %194 = arith.truncf %193 : vector<16x64xf32> to vector<16x64xbf16>
    %c0_49 = arith.constant 0 : index
    %c448 = arith.constant 448 : index
    %195 = vector.load %arg16[%c0_49, %c448] : memref<16x768xbf16, #tpu.memory_space<vmem>>, vector<16x64xbf16>
    tpu.vector_store %arg16[%c0_49, %c448], %194 {strides = array<i32>} : memref<16x768xbf16, #tpu.memory_space<vmem>>, vector<16x64xbf16>,
    %196 = vector.extract_strided_slice %11 {offsets = [0, 512], sizes = [16, 64], strides = [1, 1]} : vector<16x2304xf32> to vector<16x64xf32>
    %197 = arith.truncf %196 : vector<16x64xf32> to vector<16x64xbf16>
    %198 = vector.extract_strided_slice %11 {offsets = [0, 1280], sizes = [16, 64], strides = [1, 1]} : vector<16x2304xf32> to vector<16x64xf32>
    %199 = arith.truncf %198 : vector<16x64xf32> to vector<16x64xbf16>
    %200 = vector.extract_strided_slice %11 {offsets = [0, 2048], sizes = [16, 64], strides = [1, 1]} : vector<16x2304xf32> to vector<16x64xf32>
    %201 = arith.truncf %200 : vector<16x64xf32> to vector<16x64xbf16>
    %cst_50 = arith.constant dense<0.000000e+00> : vector<16x16xf32>
    %202 = tpu.matmul %197, %199, %cst_50 {dimension_numbers = #tpu.dot_dimension_numbers<[1], [1], [0], [0], [0, 0, 1, 0], [], []>} : vector<16x64xbf16>, vector<16x64xbf16>, vector<16x16xf32> -> vector<16x16xf32>
    %203 = vector.broadcast %6 : vector<1x16xf32> to vector<16x16xf32>
    %204 = arith.addf %202, %203 : vector<16x16xf32>
    %cst_51 = arith.constant dense<0xFF800000> : vector<16xf32>
    %205 = vector.multi_reduction <maximumf>, %204, %cst_51 [1] : vector<16x16xf32> to vector<16xf32>
    %206 = vector.shape_cast %205 : vector<16xf32> to vector<16x1xf32>
    %207 = vector.broadcast %206 : vector<16x1xf32> to vector<16x16xf32>
    %208 = arith.subf %204, %207 : vector<16x16xf32>
    %209 = math.exp %208 : vector<16x16xf32>
    %cst_52 = arith.constant dense<0.000000e+00> : vector<16xf32>
    %210 = vector.multi_reduction <add>, %209, %cst_52 [1] : vector<16x16xf32> to vector<16xf32>
    %211 = vector.shape_cast %210 : vector<16xf32> to vector<16x1xf32>
    %212 = arith.truncf %209 : vector<16x16xf32> to vector<16x16xbf16>
    %cst_53 = arith.constant dense<0.000000e+00> : vector<16x64xf32>
    %213 = tpu.matmul %212, %201, %cst_53 {dimension_numbers = #tpu.dot_dimension_numbers<[1], [0], [0], [1], [0, 0, 1, 1], [], []>} : vector<16x16xbf16>, vector<16x64xbf16>, vector<16x64xf32> -> vector<16x64xf32>
    %214 = tpu.reciprocal %211 {approx = true} : vector<16x1xf32> -> vector<16x1xf32>
    %215 = vector.broadcast %214 : vector<16x1xf32> to vector<16x64xf32>
    %216 = arith.mulf %213, %215 : vector<16x64xf32>
    %217 = arith.truncf %216 : vector<16x64xf32> to vector<16x64xbf16>
    %c0_54 = arith.constant 0 : index
    %c512 = arith.constant 512 : index
    %218 = vector.load %arg16[%c0_54, %c512] : memref<16x768xbf16, #tpu.memory_space<vmem>>, vector<16x64xbf16>
    tpu.vector_store %arg16[%c0_54, %c512], %217 {strides = array<i32>} : memref<16x768xbf16, #tpu.memory_space<vmem>>, vector<16x64xbf16>,
    %219 = vector.extract_strided_slice %11 {offsets = [0, 576], sizes = [16, 64], strides = [1, 1]} : vector<16x2304xf32> to vector<16x64xf32>
    %220 = arith.truncf %219 : vector<16x64xf32> to vector<16x64xbf16>
    %221 = vector.extract_strided_slice %11 {offsets = [0, 1344], sizes = [16, 64], strides = [1, 1]} : vector<16x2304xf32> to vector<16x64xf32>
    %222 = arith.truncf %221 : vector<16x64xf32> to vector<16x64xbf16>
    %223 = vector.extract_strided_slice %11 {offsets = [0, 2112], sizes = [16, 64], strides = [1, 1]} : vector<16x2304xf32> to vector<16x64xf32>
    %224 = arith.truncf %223 : vector<16x64xf32> to vector<16x64xbf16>
    %cst_55 = arith.constant dense<0.000000e+00> : vector<16x16xf32>
    %225 = tpu.matmul %220, %222, %cst_55 {dimension_numbers = #tpu.dot_dimension_numbers<[1], [1], [0], [0], [0, 0, 1, 0], [], []>} : vector<16x64xbf16>, vector<16x64xbf16>, vector<16x16xf32> -> vector<16x16xf32>
    %226 = vector.broadcast %6 : vector<1x16xf32> to vector<16x16xf32>
    %227 = arith.addf %225, %226 : vector<16x16xf32>
    %cst_56 = arith.constant dense<0xFF800000> : vector<16xf32>
    %228 = vector.multi_reduction <maximumf>, %227, %cst_56 [1] : vector<16x16xf32> to vector<16xf32>
    %229 = vector.shape_cast %228 : vector<16xf32> to vector<16x1xf32>
    %230 = vector.broadcast %229 : vector<16x1xf32> to vector<16x16xf32>
    %231 = arith.subf %227, %230 : vector<16x16xf32>
    %232 = math.exp %231 : vector<16x16xf32>
    %cst_57 = arith.constant dense<0.000000e+00> : vector<16xf32>
    %233 = vector.multi_reduction <add>, %232, %cst_57 [1] : vector<16x16xf32> to vector<16xf32>
    %234 = vector.shape_cast %233 : vector<16xf32> to vector<16x1xf32>
    %235 = arith.truncf %232 : vector<16x16xf32> to vector<16x16xbf16>
    %cst_58 = arith.constant dense<0.000000e+00> : vector<16x64xf32>
    %236 = tpu.matmul %235, %224, %cst_58 {dimension_numbers = #tpu.dot_dimension_numbers<[1], [0], [0], [1], [0, 0, 1, 1], [], []>} : vector<16x16xbf16>, vector<16x64xbf16>, vector<16x64xf32> -> vector<16x64xf32>
    %237 = tpu.reciprocal %234 {approx = true} : vector<16x1xf32> -> vector<16x1xf32>
    %238 = vector.broadcast %237 : vector<16x1xf32> to vector<16x64xf32>
    %239 = arith.mulf %236, %238 : vector<16x64xf32>
    %240 = arith.truncf %239 : vector<16x64xf32> to vector<16x64xbf16>
    %c0_59 = arith.constant 0 : index
    %c576 = arith.constant 576 : index
    %241 = vector.load %arg16[%c0_59, %c576] : memref<16x768xbf16, #tpu.memory_space<vmem>>, vector<16x64xbf16>
    tpu.vector_store %arg16[%c0_59, %c576], %240 {strides = array<i32>} : memref<16x768xbf16, #tpu.memory_space<vmem>>, vector<16x64xbf16>,
    %242 = vector.extract_strided_slice %11 {offsets = [0, 640], sizes = [16, 64], strides = [1, 1]} : vector<16x2304xf32> to vector<16x64xf32>
    %243 = arith.truncf %242 : vector<16x64xf32> to vector<16x64xbf16>
    %244 = vector.extract_strided_slice %11 {offsets = [0, 1408], sizes = [16, 64], strides = [1, 1]} : vector<16x2304xf32> to vector<16x64xf32>
    %245 = arith.truncf %244 : vector<16x64xf32> to vector<16x64xbf16>
    %246 = vector.extract_strided_slice %11 {offsets = [0, 2176], sizes = [16, 64], strides = [1, 1]} : vector<16x2304xf32> to vector<16x64xf32>
    %247 = arith.truncf %246 : vector<16x64xf32> to vector<16x64xbf16>
    %cst_60 = arith.constant dense<0.000000e+00> : vector<16x16xf32>
    %248 = tpu.matmul %243, %245, %cst_60 {dimension_numbers = #tpu.dot_dimension_numbers<[1], [1], [0], [0], [0, 0, 1, 0], [], []>} : vector<16x64xbf16>, vector<16x64xbf16>, vector<16x16xf32> -> vector<16x16xf32>
    %249 = vector.broadcast %6 : vector<1x16xf32> to vector<16x16xf32>
    %250 = arith.addf %248, %249 : vector<16x16xf32>
    %cst_61 = arith.constant dense<0xFF800000> : vector<16xf32>
    %251 = vector.multi_reduction <maximumf>, %250, %cst_61 [1] : vector<16x16xf32> to vector<16xf32>
    %252 = vector.shape_cast %251 : vector<16xf32> to vector<16x1xf32>
    %253 = vector.broadcast %252 : vector<16x1xf32> to vector<16x16xf32>
    %254 = arith.subf %250, %253 : vector<16x16xf32>
    %255 = math.exp %254 : vector<16x16xf32>
    %cst_62 = arith.constant dense<0.000000e+00> : vector<16xf32>
    %256 = vector.multi_reduction <add>, %255, %cst_62 [1] : vector<16x16xf32> to vector<16xf32>
    %257 = vector.shape_cast %256 : vector<16xf32> to vector<16x1xf32>
    %258 = arith.truncf %255 : vector<16x16xf32> to vector<16x16xbf16>
    %cst_63 = arith.constant dense<0.000000e+00> : vector<16x64xf32>
    %259 = tpu.matmul %258, %247, %cst_63 {dimension_numbers = #tpu.dot_dimension_numbers<[1], [0], [0], [1], [0, 0, 1, 1], [], []>} : vector<16x16xbf16>, vector<16x64xbf16>, vector<16x64xf32> -> vector<16x64xf32>
    %260 = tpu.reciprocal %257 {approx = true} : vector<16x1xf32> -> vector<16x1xf32>
    %261 = vector.broadcast %260 : vector<16x1xf32> to vector<16x64xf32>
    %262 = arith.mulf %259, %261 : vector<16x64xf32>
    %263 = arith.truncf %262 : vector<16x64xf32> to vector<16x64xbf16>
    %c0_64 = arith.constant 0 : index
    %c640 = arith.constant 640 : index
    %264 = vector.load %arg16[%c0_64, %c640] : memref<16x768xbf16, #tpu.memory_space<vmem>>, vector<16x64xbf16>
    tpu.vector_store %arg16[%c0_64, %c640], %263 {strides = array<i32>} : memref<16x768xbf16, #tpu.memory_space<vmem>>, vector<16x64xbf16>,
    %265 = vector.extract_strided_slice %11 {offsets = [0, 704], sizes = [16, 64], strides = [1, 1]} : vector<16x2304xf32> to vector<16x64xf32>
    %266 = arith.truncf %265 : vector<16x64xf32> to vector<16x64xbf16>
    %267 = vector.extract_strided_slice %11 {offsets = [0, 1472], sizes = [16, 64], strides = [1, 1]} : vector<16x2304xf32> to vector<16x64xf32>
    %268 = arith.truncf %267 : vector<16x64xf32> to vector<16x64xbf16>
    %269 = vector.extract_strided_slice %11 {offsets = [0, 2240], sizes = [16, 64], strides = [1, 1]} : vector<16x2304xf32> to vector<16x64xf32>
    %270 = arith.truncf %269 : vector<16x64xf32> to vector<16x64xbf16>
    %cst_65 = arith.constant dense<0.000000e+00> : vector<16x16xf32>
    %271 = tpu.matmul %266, %268, %cst_65 {dimension_numbers = #tpu.dot_dimension_numbers<[1], [1], [0], [0], [0, 0, 1, 0], [], []>} : vector<16x64xbf16>, vector<16x64xbf16>, vector<16x16xf32> -> vector<16x16xf32>
    %272 = vector.broadcast %6 : vector<1x16xf32> to vector<16x16xf32>
    %273 = arith.addf %271, %272 : vector<16x16xf32>
    %cst_66 = arith.constant dense<0xFF800000> : vector<16xf32>
    %274 = vector.multi_reduction <maximumf>, %273, %cst_66 [1] : vector<16x16xf32> to vector<16xf32>
    %275 = vector.shape_cast %274 : vector<16xf32> to vector<16x1xf32>
    %276 = vector.broadcast %275 : vector<16x1xf32> to vector<16x16xf32>
    %277 = arith.subf %273, %276 : vector<16x16xf32>
    %278 = math.exp %277 : vector<16x16xf32>
    %cst_67 = arith.constant dense<0.000000e+00> : vector<16xf32>
    %279 = vector.multi_reduction <add>, %278, %cst_67 [1] : vector<16x16xf32> to vector<16xf32>
    %280 = vector.shape_cast %279 : vector<16xf32> to vector<16x1xf32>
    %281 = arith.truncf %278 : vector<16x16xf32> to vector<16x16xbf16>
    %cst_68 = arith.constant dense<0.000000e+00> : vector<16x64xf32>
    %282 = tpu.matmul %281, %270, %cst_68 {dimension_numbers = #tpu.dot_dimension_numbers<[1], [0], [0], [1], [0, 0, 1, 1], [], []>} : vector<16x16xbf16>, vector<16x64xbf16>, vector<16x64xf32> -> vector<16x64xf32>
    %283 = tpu.reciprocal %280 {approx = true} : vector<16x1xf32> -> vector<16x1xf32>
    %284 = vector.broadcast %283 : vector<16x1xf32> to vector<16x64xf32>
    %285 = arith.mulf %282, %284 : vector<16x64xf32>
    %286 = arith.truncf %285 : vector<16x64xf32> to vector<16x64xbf16>
    %c0_69 = arith.constant 0 : index
    %c704 = arith.constant 704 : index
    %287 = vector.load %arg16[%c0_69, %c704] : memref<16x768xbf16, #tpu.memory_space<vmem>>, vector<16x64xbf16>
    tpu.vector_store %arg16[%c0_69, %c704], %286 {strides = array<i32>} : memref<16x768xbf16, #tpu.memory_space<vmem>>, vector<16x64xbf16>,
    %c0_70 = arith.constant 0 : index
    %c0_71 = arith.constant 0 : index
    %288 = vector.load %arg16[%c0_70, %c0_71] : memref<16x768xbf16, #tpu.memory_space<vmem>>, vector<16x768xbf16>
    %c0_72 = arith.constant 0 : index
    %c0_73 = arith.constant 0 : index
    %289 = vector.load %arg5[%c0_72, %c0_73] : memref<768x768xbf16, #tpu.memory_space<vmem>>, vector<768x768xbf16>
    %cst_74 = arith.constant dense<0.000000e+00> : vector<16x768xf32>
    %290 = tpu.matmul %288, %289, %cst_74 {dimension_numbers = #tpu.dot_dimension_numbers<[1], [0], [0], [1], [0, 0, 1, 1], [], []>} : vector<16x768xbf16>, vector<768x768xbf16>, vector<16x768xf32> -> vector<16x768xf32>
    %c0_75 = arith.constant 0 : index
    %c0_76 = arith.constant 0 : index
    %291 = vector.load %arg6[%c0_75, %c0_76] : memref<1x768xf32, #tpu.memory_space<vmem>>, vector<1x768xf32>
    %292 = vector.broadcast %291 : vector<1x768xf32> to vector<16x768xf32>
    %293 = arith.addf %290, %292 : vector<16x768xf32>
    %294 = arith.addf %293, %0 : vector<16x768xf32>
    %c0_77 = arith.constant 0 : index
    %c0_78 = arith.constant 0 : index
    %295 = vector.load %arg7[%c0_77, %c0_78] : memref<1x768xf32, #tpu.memory_space<vmem>>, vector<1x768xf32>
    %c0_79 = arith.constant 0 : index
    %c0_80 = arith.constant 0 : index
    %296 = vector.load %arg8[%c0_79, %c0_80] : memref<1x768xf32, #tpu.memory_space<vmem>>, vector<1x768xf32>
    %cst_81 = arith.constant dense<0.000000e+00> : vector<16xf32>
    %297 = vector.multi_reduction <add>, %294, %cst_81 [1] : vector<16x768xf32> to vector<16xf32>
    %298 = vector.shape_cast %297 : vector<16xf32> to vector<16x1xf32>
    %cst_82 = arith.constant 7.680000e+02 : f32
    %299 = vector.broadcast %cst_82 : f32 to vector<16x1xf32>
    %300 = arith.divf %298, %299 : vector<16x1xf32>
    %301 = vector.broadcast %300 : vector<16x1xf32> to vector<16x768xf32>
    %302 = arith.subf %294, %301 : vector<16x768xf32>
    %303 = arith.mulf %302, %302 : vector<16x768xf32>
    %cst_83 = arith.constant dense<0.000000e+00> : vector<16xf32>
    %304 = vector.multi_reduction <add>, %303, %cst_83 [1] : vector<16x768xf32> to vector<16xf32>
    %305 = vector.shape_cast %304 : vector<16xf32> to vector<16x1xf32>
    %cst_84 = arith.constant 7.680000e+02 : f32
    %306 = vector.broadcast %cst_84 : f32 to vector<16x1xf32>
    %307 = arith.divf %305, %306 : vector<16x1xf32>
    %308 = vector.broadcast %300 : vector<16x1xf32> to vector<16x768xf32>
    %309 = arith.subf %294, %308 : vector<16x768xf32>
    %cst_85 = arith.constant 9.99999996E-13 : f32
    %310 = vector.broadcast %cst_85 : f32 to vector<16x1xf32>
    %311 = arith.addf %307, %310 : vector<16x1xf32>
    %312 = math.rsqrt %311 : vector<16x1xf32>
    %313 = vector.broadcast %312 : vector<16x1xf32> to vector<16x768xf32>
    %314 = arith.mulf %309, %313 : vector<16x768xf32>
    %315 = vector.broadcast %295 : vector<1x768xf32> to vector<16x768xf32>
    %316 = arith.mulf %314, %315 : vector<16x768xf32>
    %317 = vector.broadcast %296 : vector<1x768xf32> to vector<16x768xf32>
    %318 = arith.addf %316, %317 : vector<16x768xf32>
    %319 = arith.truncf %318 : vector<16x768xf32> to vector<16x768xbf16>
    %c0_86 = arith.constant 0 : index
    %c0_87 = arith.constant 0 : index
    %320 = vector.load %arg9[%c0_86, %c0_87] : memref<768x768xbf16, #tpu.memory_space<vmem>>, vector<768x768xbf16>
    %cst_88 = arith.constant dense<0.000000e+00> : vector<16x768xf32>
    %321 = tpu.matmul %319, %320, %cst_88 {dimension_numbers = #tpu.dot_dimension_numbers<[1], [0], [0], [1], [0, 0, 1, 1], [], []>} : vector<16x768xbf16>, vector<768x768xbf16>, vector<16x768xf32> -> vector<16x768xf32>
    %c0_89 = arith.constant 0 : index
    %c0_90 = arith.constant 0 : index
    %322 = vector.load %arg10[%c0_89, %c0_90] : memref<1x768xf32, #tpu.memory_space<vmem>>, vector<1x768xf32>
    %323 = vector.broadcast %322 : vector<1x768xf32> to vector<16x768xf32>
    %324 = arith.addf %321, %323 : vector<16x768xf32>
    %c0_91 = arith.constant 0 : index
    %c0_92 = arith.constant 0 : index
    %325 = vector.load %arg11[%c0_91, %c0_92] : memref<1x768xf32, #tpu.memory_space<vmem>>, vector<1x768xf32>
    %c0_93 = arith.constant 0 : index
    %c0_94 = arith.constant 0 : index
    %326 = vector.load %arg12[%c0_93, %c0_94] : memref<1x768xf32, #tpu.memory_space<vmem>>, vector<1x768xf32>
    %cst_95 = arith.constant dense<0.000000e+00> : vector<16xf32>
    %327 = vector.multi_reduction <add>, %324, %cst_95 [1] : vector<16x768xf32> to vector<16xf32>
    %328 = vector.shape_cast %327 : vector<16xf32> to vector<16x1xf32>
    %cst_96 = arith.constant 7.680000e+02 : f32
    %329 = vector.broadcast %cst_96 : f32 to vector<16x1xf32>
    %330 = arith.divf %328, %329 : vector<16x1xf32>
    %331 = vector.broadcast %330 : vector<16x1xf32> to vector<16x768xf32>
    %332 = arith.subf %324, %331 : vector<16x768xf32>
    %333 = arith.mulf %332, %332 : vector<16x768xf32>
    %cst_97 = arith.constant dense<0.000000e+00> : vector<16xf32>
    %334 = vector.multi_reduction <add>, %333, %cst_97 [1] : vector<16x768xf32> to vector<16xf32>
    %335 = vector.shape_cast %334 : vector<16xf32> to vector<16x1xf32>
    %cst_98 = arith.constant 7.680000e+02 : f32
    %336 = vector.broadcast %cst_98 : f32 to vector<16x1xf32>
    %337 = arith.divf %335, %336 : vector<16x1xf32>
    %338 = vector.broadcast %330 : vector<16x1xf32> to vector<16x768xf32>
    %339 = arith.subf %324, %338 : vector<16x768xf32>
    %cst_99 = arith.constant 9.99999996E-13 : f32
    %340 = vector.broadcast %cst_99 : f32 to vector<16x1xf32>
    %341 = arith.addf %337, %340 : vector<16x1xf32>
    %342 = math.rsqrt %341 : vector<16x1xf32>
    %343 = vector.broadcast %342 : vector<16x1xf32> to vector<16x768xf32>
    %344 = arith.mulf %339, %343 : vector<16x768xf32>
    %345 = vector.broadcast %325 : vector<1x768xf32> to vector<16x768xf32>
    %346 = arith.mulf %344, %345 : vector<16x768xf32>
    %347 = vector.broadcast %326 : vector<1x768xf32> to vector<16x768xf32>
    %348 = arith.addf %346, %347 : vector<16x768xf32>
    %349 = arith.truncf %348 : vector<16x768xf32> to vector<16x768xbf16>
    %c0_100 = arith.constant 0 : index
    %c0_101 = arith.constant 0 : index
    %350 = vector.load %arg13[%c0_100, %c0_101] : memref<768x128xbf16, #tpu.memory_space<vmem>>, vector<768x128xbf16>
    %cst_102 = arith.constant dense<0.000000e+00> : vector<16x128xf32>
    %351 = tpu.matmul %349, %350, %cst_102 {dimension_numbers = #tpu.dot_dimension_numbers<[1], [0], [0], [1], [0, 0, 1, 1], [], []>} : vector<16x768xbf16>, vector<768x128xbf16>, vector<16x128xf32> -> vector<16x128xf32>
    %c0_103 = arith.constant 0 : index
    %c0_104 = arith.constant 0 : index
    %352 = vector.load %arg14[%c0_103, %c0_104] : memref<1x128xf32, #tpu.memory_space<vmem>>, vector<1x128xf32>
    %353 = vector.broadcast %352 : vector<1x128xf32> to vector<16x128xf32>
    %354 = arith.addf %351, %353 : vector<16x128xf32>
    %c0_105 = arith.constant 0 : index
    %c0_106 = arith.constant 0 : index
    %355 = vector.load %arg15[%c0_105, %c0_106] : memref<16x128xf32, #tpu.memory_space<vmem>>, vector<16x128xf32>
    tpu.vector_store %arg15[%c0_105, %c0_106], %354 {strides = array<i32>} : memref<16x128xf32, #tpu.memory_space<vmem>>, vector<16x128xf32>,
    return
  }
  func.func @transform_0(%arg0: i32) -> (i32, i32) {
    %c0_i32 = arith.constant 0 : i32
    %c0_i32_0 = arith.constant 0 : i32
    %c0_i32_1 = arith.constant 0 : i32
    return %c0_i32, %c0_i32_0 : i32, i32
  }
  func.func @transform_1(%arg0: i32) -> (i32, i32) {
    %c0_i32 = arith.constant 0 : i32
    %c0_i32_0 = arith.constant 0 : i32
    %c0_i32_1 = arith.constant 0 : i32
    return %c0_i32, %c0_i32_0 : i32, i32
  }
  func.func @transform_2(%arg0: i32) -> (i32, i32) {
    %c0_i32 = arith.constant 0 : i32
    %c0_i32_0 = arith.constant 0 : i32
    %c0_i32_1 = arith.constant 0 : i32
    return %c0_i32, %c0_i32_0 : i32, i32
  }
  func.func @transform_3(%arg0: i32) -> (i32, i32) {
    %c0_i32 = arith.constant 0 : i32
    %c0_i32_0 = arith.constant 0 : i32
    %c0_i32_1 = arith.constant 0 : i32
    return %c0_i32, %c0_i32_0 : i32, i32
  }
  func.func @transform_4(%arg0: i32) -> (i32, i32) {
    %c0_i32 = arith.constant 0 : i32
    %c0_i32_0 = arith.constant 0 : i32
    %c0_i32_1 = arith.constant 0 : i32
    return %c0_i32, %c0_i32_0 : i32, i32
  }
  func.func @transform_5(%arg0: i32) -> (i32, i32) {
    %c0_i32 = arith.constant 0 : i32
    %c0_i32_0 = arith.constant 0 : i32
    %c0_i32_1 = arith.constant 0 : i32
    return %c0_i32, %c0_i32_0 : i32, i32
  }
  func.func @transform_6(%arg0: i32) -> (i32, i32) {
    %c0_i32 = arith.constant 0 : i32
    %c0_i32_0 = arith.constant 0 : i32
    %c0_i32_1 = arith.constant 0 : i32
    return %c0_i32, %c0_i32_0 : i32, i32
  }
  func.func @transform_7(%arg0: i32) -> (i32, i32) {
    %c0_i32 = arith.constant 0 : i32
    %c0_i32_0 = arith.constant 0 : i32
    %c0_i32_1 = arith.constant 0 : i32
    return %c0_i32, %c0_i32_0 : i32, i32
  }
  func.func @transform_8(%arg0: i32) -> (i32, i32) {
    %c0_i32 = arith.constant 0 : i32
    %c0_i32_0 = arith.constant 0 : i32
    %c0_i32_1 = arith.constant 0 : i32
    return %c0_i32, %c0_i32_0 : i32, i32
  }
  func.func @transform_9(%arg0: i32) -> (i32, i32) {
    %c0_i32 = arith.constant 0 : i32
    %c0_i32_0 = arith.constant 0 : i32
    %c0_i32_1 = arith.constant 0 : i32
    return %c0_i32, %c0_i32_0 : i32, i32
  }
  func.func @transform_10(%arg0: i32) -> (i32, i32) {
    %c0_i32 = arith.constant 0 : i32
    %c0_i32_0 = arith.constant 0 : i32
    %c0_i32_1 = arith.constant 0 : i32
    return %c0_i32, %c0_i32_0 : i32, i32
  }
  func.func @transform_11(%arg0: i32) -> (i32, i32) {
    %c0_i32 = arith.constant 0 : i32
    %c0_i32_0 = arith.constant 0 : i32
    %c0_i32_1 = arith.constant 0 : i32
    return %c0_i32, %c0_i32_0 : i32, i32
  }
  func.func @transform_12(%arg0: i32) -> (i32, i32) {
    %c0_i32 = arith.constant 0 : i32
    %c0_i32_0 = arith.constant 0 : i32
    %c0_i32_1 = arith.constant 0 : i32
    return %c0_i32, %c0_i32_0 : i32, i32
  }
  func.func @transform_13(%arg0: i32) -> (i32, i32) {
    %c0_i32 = arith.constant 0 : i32
    %c0_i32_0 = arith.constant 0 : i32
    %c0_i32_1 = arith.constant 0 : i32
    return %c0_i32, %c0_i32_0 : i32, i32
  }
  func.func @transform_14(%arg0: i32) -> (i32, i32) {
    %c0_i32 = arith.constant 0 : i32
    %c0_i32_0 = arith.constant 0 : i32
    %c0_i32_1 = arith.constant 0 : i32
    return %c0_i32, %c0_i32_0 : i32, i32
  }
}

</mosaic_0001>

<bundles_post_ra>
// kernel: tpu_custom_call.1
= control target key start
LH: loop header
LB: loop body
LE: loop exit
PB: predicated region body
PF: predicated region fallthrough
CT: control target
= control target key end

     0   :  { %19 = vsyncpa [#allocation4], 0  ;;  %s19182_s0 = inlined_call_operand.hbm [shape: f32[16,768], index: 0, kind: input, shape index: {}]   ;;  %s19183_s1 = inlined_call_operand.hbm [shape: f32[1,16], index: 1, kind: input, shape index: {}]   ;;  %s19184_s2 = inlined_call_operand.hbm [shape: bf16[768,2304], index: 2, kind: input, shape index: {}]   ;;  %s19185_s3 = inlined_call_operand.hbm [shape: f32[1,2304], index: 3, kind: input, shape index: {}]   ;;  %s19186_s4 = inlined_call_operand.hbm [shape: bf16[768,768], index: 4, kind: input, shape index: {}]   ;;  %s19187_s5 = inlined_call_operand.hbm [shape: f32[1,768], index: 5, kind: input, shape index: {}]   ;;  %s19188_s6 = inlined_call_operand.hbm [shape: f32[1,768], index: 6, kind: input, shape index: {}]   ;;  %s19189_s7 = inlined_call_operand.hbm [shape: f32[1,768], index: 7, kind: input, shape index: {}]   ;;  %s19190_s8 = inlined_call_operand.hbm [shape: bf16[768,768], index: 8, kind: input, shape index: {}]   ;;  %s19191_s9 = inlined_call_operand.hbm [shape: f32[1,768], index: 9, kind: input, shape index: {}]   ;;  %s19192_s10 = inlined_call_operand.hbm [shape: f32[1,768], index: 10, kind: input, shape index: {}]   ;;  %s19193_s11 = inlined_call_operand.hbm [shape: f32[1,768], index: 11, kind: input, shape index: {}]   ;;  %s19194_s12 = inlined_call_operand.hbm [shape: bf16[768,128], index: 12, kind: input, shape index: {}]   ;;  %s19195_s13 = inlined_call_operand.hbm [shape: f32[1,128], index: 13, kind: input, shape index: {}]   ;;  %s19196_s14 = inlined_call_operand.hbm [shape: f32[16,128], index: 14, kind: output, shape index: {}]  }
   0x1   :  { %20 = vsyncpa [#allocation7], 0 }
   0x2   :  { %21 = vsyncpa [#allocation10], 0 }
   0x3   :  { %22 = vsyncpa [#allocation13], 0 }
   0x4   :  { %23 = vsyncpa [#allocation16], 0 }
   0x5   :  { %24 = vsyncpa [#allocation19], 0 }
   0x6   :  { %25 = vsyncpa [#allocation22], 0 }
   0x7   :  { %26 = vsyncpa [#allocation25], 0 }
   0x8   :  { %27 = vsyncpa [#allocation5], 0  ;;  %s18023_s29 = smov [#allocation6]   ;;  %s18024_s15 = smov [#allocation9]  }
   0x9   :  { %s46_s30 = sshll.u32 %s18023_s29, 4  ;;  %s68_s16 = sshll.u32 %s18024_s15, 4  ;;  %s47_s30 = int_to_ptr.vmem [resolvable:$true] %s46_s30  ;;  %s69_s16 = int_to_ptr.vmem [resolvable:$true] %s68_s16 }
   0xa   :  { %s17675_s19 = scalar_lea.hbm %s19183_s1, 16 }
   0xb   :  { %p17676_p0 = scmp.ne.s32.totalorder %s19183_s1, %s17675_s19  ;;  %p17679_p1 = scmp.lt.u32.totalorder %s17675_s19, %s19183_s1 }
   0xd   :  { %p17681_p2 = pnand %p17679_p1, %p17676_p0 }
   0xf   :  { %17684 = shalt.err (!%p17681_p2)
}
  0x10   :  { %s17685_s24 = scalar_lea.vmem %s47_s30, 16  ;;  %s17689_s25 = scalar_lea.vmem %s47_s30, 32 }
  0x11   :  { %p17686_p3 = scmp.ne.s32.totalorder %s47_s30, %s17685_s24  ;;  %p17690_p4 = scmp.lt.s32.totalorder %s47_s30, %s47_s30 }
  0x12   :  { %p17691_p5 = scmp.lt.s32.totalorder %s17689_s25, %s17685_s24 }
  0x14   :  { %p17692_p6 = por %p17691_p5, %p17690_p4 }
  0x16   :  { %p17693_p7 = pnand %p17692_p6, %p17686_p3 }
  0x18   :  { %17696 = shalt.err (!%p17693_p7)
}
  0x19   :  { %49 = dma.hbm_to_vmem [thread:$0]  %s19183_s1, 16, %s47_s30, [#allocation7]  }
  0x1a   :  { %s17697_s15 = scalar_lea.hbm %s19185_s3, 288 }
  0x1b   :  { %p17698_p8 = scmp.ne.s32.totalorder %s19185_s3, %s17697_s15  ;;  %p17701_p9 = scmp.lt.u32.totalorder %s17697_s15, %s19185_s3 }
  0x1d   :  { %p17703_p10 = pnand %p17701_p9, %p17698_p8 }
  0x1f   :  { %17706 = shalt.err (!%p17703_p10)
}
  0x20   :  { %s17707_s21 = scalar_lea.vmem %s69_s16, 288  ;;  %p17712_p12 = scmp.lt.s32.totalorder %s69_s16, %s69_s16 }
  0x21   :  { %p17708_p11 = scmp.ne.s32.totalorder %s69_s16, %s17707_s21  ;;  %p17713_p13 = scmp.lt.s32.totalorder %s17707_s21, %s17707_s21 }
  0x23   :  { %p17714_p0 = por %p17713_p13, %p17712_p12 }
  0x25   :  { %p17715_p1 = pnand %p17714_p0, %p17708_p11 }
  0x27   :  { %17718 = shalt.err (!%p17715_p1)
}
  0x28   :  { %71 = dma.hbm_to_vmem [thread:$0]  %s19185_s3, 288, %s69_s16, [#allocation10]  }
  0x29   :  { %s18025_s22 = smov [#allocation12]   ;;  %s18026_s24 = smov [#allocation15]  }
  0x2a   :  { %s90_s23 = sshll.u32 %s18025_s22, 4  ;;  %s110_s25 = sshll.u32 %s18026_s24, 4  ;;  %s91_s23 = int_to_ptr.vmem [resolvable:$true] %s90_s23  ;;  %s111_s25 = int_to_ptr.vmem [resolvable:$true] %s110_s25 }
  0x2b   :  { %s17719_s28 = scalar_lea.hbm %s19187_s5, 96 }
  0x2c   :  { %p17720_p2 = scmp.ne.s32.totalorder %s19187_s5, %s17719_s28  ;;  %p17723_p3 = scmp.lt.u32.totalorder %s17719_s28, %s19187_s5 }
  0x2e   :  { %p17725_p4 = pnand %p17723_p3, %p17720_p2 }
  0x30   :  { %17728 = shalt.err (!%p17725_p4)
}
  0x31   :  { %s17729_s3 = scalar_lea.vmem %s91_s23, 96  ;;  %p17734_p6 = scmp.lt.s32.totalorder %s91_s23, %s91_s23 }
  0x32   :  { %p17730_p5 = scmp.ne.s32.totalorder %s91_s23, %s17729_s3  ;;  %p17735_p7 = scmp.lt.s32.totalorder %s17729_s3, %s17729_s3 }
  0x34   :  { %p17736_p8 = por %p17735_p7, %p17734_p6 }
  0x36   :  { %p17737_p9 = pnand %p17736_p8, %p17730_p5 }
  0x38   :  { %17740 = shalt.err (!%p17737_p9)
}
  0x39   :  { %93 = dma.hbm_to_vmem [thread:$0]  %s19187_s5, 96, %s91_s23, [#allocation13]  }
  0x3a   :  { %s17741_s1 = scalar_lea.hbm %s19189_s7, 96 }
  0x3b   :  { %p17742_p10 = scmp.ne.s32.totalorder %s19189_s7, %s17741_s1  ;;  %p17745_p11 = scmp.lt.u32.totalorder %s17741_s1, %s19189_s7 }
  0x3d   :  { %p17747_p12 = pnand %p17745_p11, %p17742_p10 }
  0x3f   :  { %17750 = shalt.err (!%p17747_p12)
}
  0x40   :  { %s17751_s27 = scalar_lea.vmem %s111_s25, 96  ;;  %p17756_p0 = scmp.lt.s32.totalorder %s111_s25, %s111_s25 }
  0x41   :  { %p17752_p13 = scmp.ne.s32.totalorder %s111_s25, %s17751_s27  ;;  %p17757_p1 = scmp.lt.s32.totalorder %s17751_s27, %s17751_s27 }
  0x43   :  { %p17758_p2 = por %p17757_p1, %p17756_p0 }
  0x45   :  { %p17759_p3 = pnand %p17758_p2, %p17752_p13 }
  0x47   :  { %17762 = shalt.err (!%p17759_p3)
}
  0x48   :  { %113 = dma.hbm_to_vmem [thread:$0]  %s19189_s7, 96, %s111_s25, [#allocation16]  }
  0x49   :  { %s18027_s28 = smov [#allocation18]   ;;  %s18028_s15 = smov [#allocation21]  }
  0x4a   :  { %s132_s29 = sshll.u32 %s18027_s28, 4  ;;  %s152_s17 = sshll.u32 %s18028_s15, 4  ;;  %s133_s29 = int_to_ptr.vmem [resolvable:$true] %s132_s29  ;;  %s153_s17 = int_to_ptr.vmem [resolvable:$true] %s152_s17 }
  0x4b   :  { %s17763_s16 = scalar_lea.hbm %s19191_s9, 96 }
  0x4c   :  { %p17764_p4 = scmp.ne.s32.totalorder %s19191_s9, %s17763_s16  ;;  %p17767_p5 = scmp.lt.u32.totalorder %s17763_s16, %s19191_s9 }
  0x4e   :  { %p17769_p6 = pnand %p17767_p5, %p17764_p4 }
  0x50   :  { %17772 = shalt.err (!%p17769_p6)
}
  0x51   :  { %s17773_s7 = scalar_lea.vmem %s133_s29, 96  ;;  %p17778_p8 = scmp.lt.s32.totalorder %s133_s29, %s133_s29 }
  0x52   :  { %p17774_p7 = scmp.ne.s32.totalorder %s133_s29, %s17773_s7  ;;  %p17779_p9 = scmp.lt.s32.totalorder %s17773_s7, %s17773_s7 }
  0x54   :  { %p17780_p10 = por %p17779_p9, %p17778_p8 }
  0x56   :  { %p17781_p11 = pnand %p17780_p10, %p17774_p7 }
  0x58   :  { %17784 = shalt.err (!%p17781_p11)
}
  0x59   :  { %135 = dma.hbm_to_vmem [thread:$0]  %s19191_s9, 96, %s133_s29, [#allocation19]  }
  0x5a   :  { %s17785_s26 = scalar_lea.hbm %s19193_s11, 96 }
  0x5b   :  { %p17786_p12 = scmp.ne.s32.totalorder %s19193_s11, %s17785_s26  ;;  %p17789_p13 = scmp.lt.u32.totalorder %s17785_s26, %s19193_s11 }
  0x5d   :  { %p17791_p0 = pnand %p17789_p13, %p17786_p12 }
  0x5f   :  { %17794 = shalt.err (!%p17791_p0)
}
  0x60   :  { %s17795_s15 = scalar_lea.vmem %s153_s17, 96  ;;  %p17800_p2 = scmp.lt.s32.totalorder %s153_s17, %s153_s17 }
  0x61   :  { %p17796_p1 = scmp.ne.s32.totalorder %s153_s17, %s17795_s15  ;;  %p17801_p3 = scmp.lt.s32.totalorder %s17795_s15, %s17795_s15 }
  0x63   :  { %p17802_p4 = por %p17801_p3, %p17800_p2 }
  0x65   :  { %p17803_p5 = pnand %p17802_p4, %p17796_p1 }
  0x67   :  { %17806 = shalt.err (!%p17803_p5)
}
  0x68   :  { %155 = dma.hbm_to_vmem [thread:$0]  %s19193_s11, 96, %s153_s17, [#allocation22]  }
  0x69   :  { %s18029_s18 = smov [#allocation3]   ;;  %s17807_s20 = scalar_lea.hbm %s19182_s0, 1536 }
  0x6a   :  { %s33_s3 = sshll.u32 %s18029_s18, 4  ;;  %p17808_p6 = scmp.ne.s32.totalorder %s19182_s0, %s17807_s20  ;;  %s34_s3 = int_to_ptr.vmem [resolvable:$true] %s33_s3 }
  0x6b   :  { %p17811_p7 = scmp.lt.u32.totalorder %s17807_s20, %s19182_s0 }
  0x6d   :  { %p17813_p8 = pnand %p17811_p7, %p17808_p6 }
  0x6f   :  { %17816 = shalt.err (!%p17813_p8)
}
  0x70   :  { %s17817_s30 = scalar_lea.vmem %s34_s3, 1536  ;;  %p17822_p10 = scmp.lt.s32.totalorder %s34_s3, %s34_s3 }
  0x71   :  { %p17818_p9 = scmp.ne.s32.totalorder %s34_s3, %s17817_s30  ;;  %p17823_p11 = scmp.lt.s32.totalorder %s17817_s30, %s17817_s30 }
  0x73   :  { %p17824_p12 = por %p17823_p11, %p17822_p10 }
  0x75   :  { %p17825_p13 = pnand %p17824_p12, %p17818_p9 }
  0x77   :  { %17828 = shalt.err (!%p17825_p13)
}
  0x78   :  { %s18030_s11 = smov 768   ;;  %s18031_s17 = smov 48  }
  0x79   :  { %39 = dma.hbm_to_vmem [thread:$0]  %s19182_s0, 1536, %s34_s3, [#allocation4], %s18030_s11, %s18030_s11, %s18031_s17  }
  0x7a   :  { %s18032_s26 = smov [#allocation8]   ;;  %s17829_s28 = scalar_lea.hbm %s19184_s2, 110592 }
  0x7b   :  { %s55_s27 = sshll.u32 %s18032_s26, 4  ;;  %p17830_p0 = scmp.ne.s32.totalorder %s19184_s2, %s17829_s28  ;;  %s56_s27 = int_to_ptr.vmem [resolvable:$true] %s55_s27 }
  0x7c   :  { %p17833_p1 = scmp.lt.u32.totalorder %s17829_s28, %s19184_s2 }
  0x7e   :  { %p17835_p2 = pnand %p17833_p1, %p17830_p0 }
  0x80   :  { %17838 = shalt.err (!%p17835_p2)
}
  0x81   :  { %s17839_s16 = scalar_lea.vmem %s56_s27, 110592  ;;  %p17844_p4 = scmp.lt.s32.totalorder %s56_s27, %s56_s27 }
  0x82   :  { %p17840_p3 = scmp.ne.s32.totalorder %s56_s27, %s17839_s16  ;;  %p17845_p5 = scmp.lt.s32.totalorder %s17839_s16, %s17839_s16 }
  0x84   :  { %p17846_p6 = por %p17845_p5, %p17844_p4 }
  0x86   :  { %p17847_p7 = pnand %p17846_p6, %p17840_p3 }
  0x88   :  { %17850 = shalt.err (!%p17847_p7)
}
  0x89   :  { %s18033_s0 = smov 1152   ;;  %s18034_s3 = smov 72  }
  0x8a   :  { %61 = dma.hbm_to_vmem [thread:$0]  %s19184_s2, 110592, %s56_s27, [#allocation7], %s18033_s0, %s18033_s0, %s18034_s3  }
  0x8b   :  { %s18035_s21 = smov [#allocation11]   ;;  %s17851_s30 = scalar_lea.hbm %s19186_s4, 36864 }
  0x8c   :  { %s77_s1 = sshll.u32 %s18035_s21, 4  ;;  %p17852_p8 = scmp.ne.s32.totalorder %s19186_s4, %s17851_s30  ;;  %s78_s1 = int_to_ptr.vmem [resolvable:$true] %s77_s1 }
  0x8d   :  { %p17855_p9 = scmp.lt.u32.totalorder %s17851_s30, %s19186_s4 }
  0x8f   :  { %p17857_p10 = pnand %p17855_p9, %p17852_p8 }
  0x91   :  { %17860 = shalt.err (!%p17857_p10)
}
  0x92   :  { %s17861_s26 = scalar_lea.vmem %s78_s1, 36864  ;;  %p17866_p12 = scmp.lt.s32.totalorder %s78_s1, %s78_s1 }
  0x93   :  { %p17862_p11 = scmp.ne.s32.totalorder %s78_s1, %s17861_s26  ;;  %p17867_p13 = scmp.lt.s32.totalorder %s17861_s26, %s17861_s26 }
  0x95   :  { %p17868_p0 = por %p17867_p13, %p17866_p12 }
  0x97   :  { %p17869_p1 = pnand %p17868_p0, %p17862_p11 }
  0x99   :  { %17872 = shalt.err (!%p17869_p1)
}
  0x9a   :  { %s18036_s2 = smov 384   ;;  %s18037_s27 = smov 24  }
  0x9b   :  { %83 = dma.hbm_to_vmem [thread:$0]  %s19186_s4, 36864, %s78_s1, [#allocation10], %s18036_s2, %s18036_s2, %s18037_s27  }
  0x9c   :  { %s18038_s28 = smov [#allocation14]   ;;  %s18039_s9 = smov [#allocation17]  }
  0x9d   :  { %s100_s15 = sshll.u32 %s18038_s28, 4  ;;  %s119_s29 = sshll.u32 %s18039_s9, 4  ;;  %s101_s15 = int_to_ptr.vmem [resolvable:$true] %s100_s15  ;;  %s120_s29 = int_to_ptr.vmem [resolvable:$true] %s119_s29 }
  0x9e   :  { %s17873_s0 = scalar_lea.hbm %s19188_s6, 96 }
  0x9f   :  { %p17874_p2 = scmp.ne.s32.totalorder %s19188_s6, %s17873_s0  ;;  %p17877_p3 = scmp.lt.u32.totalorder %s17873_s0, %s19188_s6 }
  0xa1   :  { %p17879_p4 = pnand %p17877_p3, %p17874_p2 }
  0xa3   :  { %17882 = shalt.err (!%p17879_p4)
}
  0xa4   :  { %s17883_s4 = scalar_lea.vmem %s101_s15, 96  ;;  %p17888_p6 = scmp.lt.s32.totalorder %s101_s15, %s101_s15 }
  0xa5   :  { %p17884_p5 = scmp.ne.s32.totalorder %s101_s15, %s17883_s4  ;;  %p17889_p7 = scmp.lt.s32.totalorder %s17883_s4, %s17883_s4 }
  0xa7   :  { %p17890_p8 = por %p17889_p7, %p17888_p6 }
  0xa9   :  { %p17891_p9 = pnand %p17890_p8, %p17884_p5 }
  0xab   :  { %17894 = shalt.err (!%p17891_p9)
}
  0xac   :  { %103 = dma.hbm_to_vmem [thread:$0]  %s19188_s6, 96, %s101_s15, [#allocation13]  }
  0xad   :  { %s17895_s11 = scalar_lea.hbm %s19190_s8, 36864 }
  0xae   :  { %p17896_p10 = scmp.ne.s32.totalorder %s19190_s8, %s17895_s11  ;;  %p17899_p11 = scmp.lt.u32.totalorder %s17895_s11, %s19190_s8 }
  0xb0   :  { %p17901_p12 = pnand %p17899_p11, %p17896_p10 }
  0xb2   :  { %17904 = shalt.err (!%p17901_p12)
}
  0xb3   :  { %s17905_s5 = scalar_lea.vmem %s120_s29, 36864  ;;  %p17910_p0 = scmp.lt.s32.totalorder %s120_s29, %s120_s29 }
  0xb4   :  { %p17906_p13 = scmp.ne.s32.totalorder %s120_s29, %s17905_s5  ;;  %p17911_p1 = scmp.lt.s32.totalorder %s17905_s5, %s17905_s5 }
  0xb6   :  { %p17912_p2 = por %p17911_p1, %p17910_p0 }
  0xb8   :  { %p17913_p3 = pnand %p17912_p2, %p17906_p13 }
  0xba   :  { %17916 = shalt.err (!%p17913_p3)
}
  0xbb   :  { %125 = dma.hbm_to_vmem [thread:$0]  %s19190_s8, 36864, %s120_s29, [#allocation16], %s18036_s2, %s18036_s2, %s18037_s27  }
  0xbc   :  { %s18040_s28 = smov [#allocation20]   ;;  %s18041_s9 = smov [#allocation23]  }
  0xbd   :  { %s142_s15 = sshll.u32 %s18040_s28, 4  ;;  %s161_s18 = sshll.u32 %s18041_s9, 4  ;;  %s143_s15 = int_to_ptr.vmem [resolvable:$true] %s142_s15  ;;  %s162_s18 = int_to_ptr.vmem [resolvable:$true] %s161_s18 }
  0xbe   :  { %s17917_s3 = scalar_lea.hbm %s19192_s10, 96 }
  0xbf   :  { %p17918_p4 = scmp.ne.s32.totalorder %s19192_s10, %s17917_s3  ;;  %p17921_p5 = scmp.lt.u32.totalorder %s17917_s3, %s19192_s10 }
  0xc1   :  { %p17923_p6 = pnand %p17921_p5, %p17918_p4 }
  0xc3   :  { %17926 = shalt.err (!%p17923_p6)
}
  0xc4   :  { %s17927_s8 = scalar_lea.vmem %s143_s15, 96  ;;  %p17932_p8 = scmp.lt.s32.totalorder %s143_s15, %s143_s15 }
  0xc5   :  { %p17928_p7 = scmp.ne.s32.totalorder %s143_s15, %s17927_s8  ;;  %p17933_p9 = scmp.lt.s32.totalorder %s17927_s8, %s17927_s8 }
  0xc7   :  { %p17934_p10 = por %p17933_p9, %p17932_p8 }
  0xc9   :  { %p17935_p11 = pnand %p17934_p10, %p17928_p7 }
  0xcb   :  { %17938 = shalt.err (!%p17935_p11)
}
  0xcc   :  { %145 = dma.hbm_to_vmem [thread:$0]  %s19192_s10, 96, %s143_s15, [#allocation19]  }
  0xcd   :  { %s17939_s7 = scalar_lea.hbm %s19194_s12, 6144 }
  0xce   :  { %p17940_p12 = scmp.ne.s32.totalorder %s19194_s12, %s17939_s7  ;;  %p17943_p13 = scmp.lt.u32.totalorder %s17939_s7, %s19194_s12 }
  0xd0   :  { %p17945_p0 = pnand %p17943_p13, %p17940_p12 }
  0xd2   :  { %17948 = shalt.err (!%p17945_p0)
}
  0xd3   :  { %s17949_s22 = scalar_lea.vmem %s162_s18, 6144  ;;  %p17954_p2 = scmp.lt.s32.totalorder %s162_s18, %s162_s18 }
  0xd4   :  { %p17950_p1 = scmp.ne.s32.totalorder %s162_s18, %s17949_s22  ;;  %p17955_p3 = scmp.lt.s32.totalorder %s17949_s22, %s17949_s22 }
  0xd6   :  { %p17956_p4 = por %p17955_p3, %p17954_p2 }
  0xd8   :  { %p17957_p5 = pnand %p17956_p4, %p17950_p1 }
  0xda   :  { %17960 = shalt.err (!%p17957_p5)
}
  0xdb   :  { %s18042_s10 = smov 64   ;;  %s18043_s24 = smov 4  }
  0xdc   :  { %167 = dma.hbm_to_vmem [thread:$0]  %s19194_s12, 6144, %s162_s18, [#allocation22], %s18042_s10, %s18042_s10, %s18043_s24  }
  0xdd   :  { %s18044_s6 = smov [#allocation24]   ;;  %s17961_s9 = scalar_lea.hbm %s19195_s13, 16 }
  0xde   :  { %s174_s23 = sshll.u32 %s18044_s6, 4  ;;  %p17962_p6 = scmp.ne.s32.totalorder %s19195_s13, %s17961_s9  ;;  %s175_s23 = int_to_ptr.vmem [resolvable:$true] %s174_s23 }
  0xdf   :  { %p17965_p7 = scmp.lt.u32.totalorder %s17961_s9, %s19195_s13 }
  0xe1   :  { %p17967_p8 = pnand %p17965_p7, %p17962_p6 }
  0xe3   :  { %17970 = shalt.err (!%p17967_p8)
}
  0xe4   :  { %s17971_s20 = scalar_lea.vmem %s175_s23, 16  ;;  %s17975_s12 = scalar_lea.vmem %s175_s23, 32 }
  0xe5   :  { %p17972_p9 = scmp.ne.s32.totalorder %s175_s23, %s17971_s20  ;;  %p17976_p10 = scmp.lt.s32.totalorder %s175_s23, %s175_s23 }
  0xe6   :  { %p17977_p11 = scmp.lt.s32.totalorder %s17975_s12, %s17971_s20 }
  0xe8   :  { %p17978_p12 = por %p17977_p11, %p17976_p10 }
  0xea   :  { %p17979_p13 = pnand %p17978_p12, %p17972_p9 }
  0xec   :  { %17982 = shalt.err (!%p17979_p13)
}
  0xed   :  { %177 = dma.hbm_to_vmem [thread:$0]  %s19195_s13, 16, %s175_s23, [#allocation25]  }
  0xee   :  { %18005 = dma.done.wait [#allocation4], 1536  }
  0xef   :  { %18006 = vsyncadd [#allocation4], 4294965760 }
  0xf0   :  { %18007 = dma.done.wait [#allocation7], 110608  }
  0xf1   :  { %18008 = vsyncadd [#allocation7], 4294856688 }
  0xf2   :  { %18009 = dma.done.wait [#allocation10], 37152  }
  0xf3   :  { %18010 = vsyncadd [#allocation10], 4294930144 }
  0xf4   :  { %18011 = dma.done.wait [#allocation13], 192  }
  0xf5   :  { %18012 = vsyncadd [#allocation13], 4294967104 }
  0xf6   :  { %18013 = dma.done.wait [#allocation16], 36960  }
  0xf7   :  { %18014 = vsyncadd [#allocation16], 4294930336 }
  0xf8   :  { %18015 = dma.done.wait [#allocation19], 192  }
  0xf9   :  { %18016 = vsyncadd [#allocation19], 4294967104 }
  0xfa   :  { %18017 = dma.done.wait [#allocation22], 6240  }
  0xfb   :  { %18018 = vsyncadd [#allocation22], 4294961056 }
  0xfc   :  { %18019 = dma.done.wait [#allocation25], 16  }
  0xfd   :  { %18020 = vsyncadd [#allocation25], 4294967280  ;;  %v15350_v0 = vld [vmem:[#allocation8 + $0xc] ss:$72 sps:$4 sm:$0xff]   ;;  %v15352_v1 = vld [vmem:[#allocation8 + $0x8] ss:$72 sps:$4 sm:$0xff]  }
  0xfe   :  { %5651 = vmatprep.subr.bf16.mxu1 %v15350_v0  ;;  %v15353_v2 = vld [vmem:[#allocation8 + $0x9c] ss:$72 sps:$4 sm:$0xff]   ;;  %v15355_v3 = vld [vmem:[#allocation8 + $0x98] ss:$72 sps:$4 sm:$0xff]   ;;  %v15356_v4 = vld [vmem:[#allocation8 + $0x12c] ss:$72 sps:$4 sm:$0xff]  }
  0xff   :  { %5652 = vmatpush1.bf16.msra.mxu1 %v15352_v1  ;;  %v15358_v5 = vld [vmem:[#allocation8 + $0x128] ss:$72 sps:$4 sm:$0xff]   ;;  %v15359_v6 = vld [vmem:[#allocation8 + $0x1bc] ss:$72 sps:$4 sm:$0xff]   ;;  %v15361_v7 = vld [vmem:[#allocation8 + $0x1b8] ss:$72 sps:$4 sm:$0xff]  }
 0x100   :  { %5653 = vmatprep.subr.bf16.mxu1 %v15353_v2  ;;  %v15362_v8 = vld [vmem:[#allocation8 + $0x24c] ss:$72 sps:$4 sm:$0xff]   ;;  %v15379_v10 = vld [vmem:[#allocation8] ss:$72 sps:$4 sm:$0xff]   ;;  %v15385_v13 = vld [vmem:[#allocation8 + $0x90] ss:$72 sps:$4 sm:$0xff]  }
 0x101   :  { %v15377_v9 = vld [vmem:[#allocation8 + $0x4] ss:$72 sps:$4 sm:$0xff]   ;;  %v15364_v11 = vld [vmem:[#allocation8 + $0x248] ss:$72 sps:$4 sm:$0xff]   ;;  %v15383_v12 = vld [vmem:[#allocation8 + $0x94] ss:$72 sps:$4 sm:$0xff]  }
 0x102   :  { %5522 = vmatprep.subr.bf16.mxu0 %v15377_v9  ;;  %v15365_v14 = vld [vmem:[#allocation8 + $0x2dc] ss:$72 sps:$4 sm:$0xff]   ;;  %v15367_v15 = vld [vmem:[#allocation8 + $0x2d8] ss:$72 sps:$4 sm:$0xff]   ;;  %v15368_v17 = vld [vmem:[#allocation8 + $0x36c] ss:$72 sps:$4 sm:$0xff]  }
 0x103   :  { %5654 = vmatpush1.bf16.msra.mxu1 %v15355_v3  ;;  %5523 = vmatpush1.bf16.msra.mxu0 %v15379_v10  ;;  %v15389_v16 = vld [vmem:[#allocation8 + $0x124] ss:$72 sps:$4 sm:$0xff]   ;;  %v15391_v18 = vld [vmem:[#allocation8 + $0x120] ss:$72 sps:$4 sm:$0xff]   ;;  %v15395_v19 = vld [vmem:[#allocation8 + $0x1b4] ss:$72 sps:$4 sm:$0xff]  }
 0x104   :  { %5655 = vmatprep.subr.bf16.mxu1 %v15356_v4  ;;  %5524 = vmatprep.subr.bf16.mxu0 %v15383_v12  ;;  %v15370_v20 = vld [vmem:[#allocation8 + $0x368] ss:$72 sps:$4 sm:$0xff]   ;;  %v15371_v21 = vld [vmem:[#allocation8 + $0x3fc] ss:$72 sps:$4 sm:$0xff]   ;;  %v15373_v24 = vld [vmem:[#allocation8 + $0x3f8] ss:$72 sps:$4 sm:$0xff]  }
 0x105   :  { %v15397_v22 = vld [vmem:[#allocation8 + $0x1b0] ss:$72 sps:$4 sm:$0xff]   ;;  %v15401_v23 = vld [vmem:[#allocation8 + $0x244] ss:$72 sps:$4 sm:$0xff]   ;;  %v15403_v26 = vld [vmem:[#allocation8 + $0x240] ss:$72 sps:$4 sm:$0xff]  }
 0x106   :  { %v15374_v25 = vld [vmem:[#allocation8 + $0x48c] ss:$72 sps:$4 sm:$0xff]   ;;  %v15376_v28 = vld [vmem:[#allocation8 + $0x488] ss:$72 sps:$4 sm:$0xff]   ;;  %v15380_v29 = vld [vmem:[#allocation8 + $0x51c] ss:$72 sps:$4 sm:$0xff]  }
 0x107   :  { %5656 = vmatpush1.bf16.msra.mxu1 %v15358_v5  ;;  %5525 = vmatpush1.bf16.msra.mxu0 %v15385_v13  ;;  %v15407_v27 = vld [vmem:[#allocation8 + $0x2d4] ss:$72 sps:$4 sm:$0xff]   ;;  %v15409_v30 = vld [vmem:[#allocation8 + $0x2d0] ss:$72 sps:$4 sm:$0xff]   ;;  %v15413_v31 = vld [vmem:[#allocation8 + $0x364] ss:$72 sps:$4 sm:$0xff]  }
 0x108   :  { %5657 = vmatprep.subr.bf16.mxu1 %v15359_v6  ;;  %5526 = vmatprep.subr.bf16.mxu0 %v15389_v16  ;;  %v222_v32 = vld [vmem:[#allocation3 + $0x8] sm:$0xff]  ;;  %v228_v33 = vld [vmem:[#allocation3 + $0x38] sm:$0xff]  ;;  %v221_v61 = vld [vmem:[#allocation3] sm:$0xff]  ;;  %vm6692_vm0 = vcmask 523264   ;;  %vm18046_vm1 = vmmov 0   ;;  %vm6740_vm2 = vcmask 130048  }
 0x109   :  { %v18301_v34 = vpack.c.bf16 %v228_v33, %v222_v32  ;;  %v15382_v35 = vld [vmem:[#allocation8 + $0x518] ss:$72 sps:$4 sm:$0xff]   ;;  %v15386_v36 = vld [vmem:[#allocation8 + $0x5ac] ss:$72 sps:$4 sm:$0xff]   ;;  %v15388_v39 = vld [vmem:[#allocation8 + $0x5a8] ss:$72 sps:$4 sm:$0xff]  }
 0x10a   :  { %v15415_v37 = vld [vmem:[#allocation8 + $0x360] ss:$72 sps:$4 sm:$0xff]   ;;  %v15419_v38 = vld [vmem:[#allocation8 + $0x3f4] ss:$72 sps:$4 sm:$0xff]   ;;  %v15421_v41 = vld [vmem:[#allocation8 + $0x3f0] ss:$72 sps:$4 sm:$0xff]  }
 0x10b   :  { %5658 = vmatpush1.bf16.msra.mxu1 %v15361_v7  ;;  %5527 = vmatpush1.bf16.msra.mxu0 %v15391_v18  ;;  %v15392_v40 = vld [vmem:[#allocation8 + $0x63c] ss:$72 sps:$4 sm:$0xff]   ;;  %v15394_v43 = vld [vmem:[#allocation8 + $0x638] ss:$72 sps:$4 sm:$0xff]   ;;  %v15398_v44 = vld [vmem:[#allocation8 + $0x6cc] ss:$72 sps:$4 sm:$0xff]  }
 0x10c   :  { %5659 = vmatprep.subr.bf16.mxu1 %v15362_v8  ;;  %5528 = vmatprep.subr.bf16.mxu0 %v15395_v19  ;;  %v15425_v42 = vld [vmem:[#allocation8 + $0x484] ss:$72 sps:$4 sm:$0xff]   ;;  %v15427_v45 = vld [vmem:[#allocation8 + $0x480] ss:$72 sps:$4 sm:$0xff]   ;;  %v15431_v46 = vld [vmem:[#allocation8 + $0x514] ss:$72 sps:$4 sm:$0xff]  }
 0x10d   :  { %5683 = vmatprep.mubr.bf16.mxu1 %v18301_v34  ;;  %5554 = vmatprep.mubr.bf16.mxu0 %v18301_v34  ;;  %v15400_v47 = vld [vmem:[#allocation8 + $0x6c8] ss:$72 sps:$4 sm:$0xff]   ;;  %v15404_v48 = vld [vmem:[#allocation8 + $0x75c] ss:$72 sps:$4 sm:$0xff]   ;;  %v15406_v51 = vld [vmem:[#allocation8 + $0x758] ss:$72 sps:$4 sm:$0xff]  }
 0x10e   :  { %v15433_v49 = vld [vmem:[#allocation8 + $0x510] ss:$72 sps:$4 sm:$0xff]   ;;  %v15437_v50 = vld [vmem:[#allocation8 + $0x5a4] ss:$72 sps:$4 sm:$0xff]   ;;  %v15439_v53 = vld [vmem:[#allocation8 + $0x5a0] ss:$72 sps:$4 sm:$0xff]  }
 0x10f   :  { %5660 = vmatpush1.bf16.msra.mxu1 %v15364_v11  ;;  %5529 = vmatpush1.bf16.msra.mxu0 %v15397_v22  ;;  %v15410_v52 = vld [vmem:[#allocation8 + $0x7ec] ss:$72 sps:$4 sm:$0xff]   ;;  %v15412_v55 = vld [vmem:[#allocation8 + $0x7e8] ss:$72 sps:$4 sm:$0xff]   ;;  %v15416_v56 = vld [vmem:[#allocation8 + $0x87c] ss:$72 sps:$4 sm:$0xff]  }
 0x110   :  { %5661 = vmatprep.subr.bf16.mxu1 %v15365_v14  ;;  %5530 = vmatprep.subr.bf16.mxu0 %v15401_v23  ;;  %v15443_v54 = vld [vmem:[#allocation8 + $0x634] ss:$72 sps:$4 sm:$0xff]   ;;  %v15445_v57 = vld [vmem:[#allocation8 + $0x630] ss:$72 sps:$4 sm:$0xff]   ;;  %v15449_v58 = vld [vmem:[#allocation8 + $0x6c4] ss:$72 sps:$4 sm:$0xff]  }
 0x111   :  { %v15418_v59 = vld [vmem:[#allocation8 + $0x878] ss:$72 sps:$4 sm:$0xff]   ;;  %v15424_v60 = vld [vmem:[#allocation8 + $0x90c] ss:$72 sps:$4 sm:$0xff]   ;;  %v15422_v1 = vld [vmem:[#allocation8 + $0x908] ss:$72 sps:$4 sm:$0xff]  }
 0x112   :  { %v227_v62 = vld [vmem:[#allocation3 + $0x30] sm:$0xff]  ;;  %v15451_v63 = vld [vmem:[#allocation8 + $0x6c0] ss:$72 sps:$4 sm:$0xff]   ;;  %v15430_v3 = vld [vmem:[#allocation8 + $0x99c] ss:$72 sps:$4 sm:$0xff]   ;;  %vm6939_vm3 = vcmask 1048064  }
 0x113   :  { %5662 = vmatpush1.bf16.msra.mxu1 %v15367_v15  ;;  %5531 = vmatpush1.bf16.msra.mxu0 %v15403_v26  ;;  %v15455_v0 = vld [vmem:[#allocation8 + $0x754] ss:$72 sps:$4 sm:$0xff]   ;;  %v18305_v2 = vpack.c.bf16 %v227_v62, %v221_v61  ;;  %v15457_v4 = vld [vmem:[#allocation8 + $0x750] ss:$72 sps:$4 sm:$0xff]   ;;  %v15461_v5 = vld [vmem:[#allocation8 + $0x7e4] ss:$72 sps:$4 sm:$0xff]  }
 0x114   :  { %5663 = vmatprep.subr.bf16.mxu1 %v15368_v17  ;;  %5532 = vmatprep.subr.bf16.mxu0 %v15407_v27  ;;  %v15428_v6 = vld [vmem:[#allocation8 + $0x998] ss:$72 sps:$4 sm:$0xff]   ;;  %v15436_v7 = vld [vmem:[#allocation8 + $0xa2c] ss:$72 sps:$4 sm:$0xff]   ;;  %v15434_v10 = vld [vmem:[#allocation8 + $0xa28] ss:$72 sps:$4 sm:$0xff]  }
 0x115   :  { %v15463_v8 = vld [vmem:[#allocation8 + $0x7e0] ss:$72 sps:$4 sm:$0xff]   ;;  %v15467_v9 = vld [vmem:[#allocation8 + $0x874] ss:$72 sps:$4 sm:$0xff]   ;;  %v15469_v12 = vld [vmem:[#allocation8 + $0x870] ss:$72 sps:$4 sm:$0xff]  }
 0x116   :  { %v15442_v11 = vld [vmem:[#allocation8 + $0xabc] ss:$72 sps:$4 sm:$0xff]   ;;  %v15440_v14 = vld [vmem:[#allocation8 + $0xab8] ss:$72 sps:$4 sm:$0xff]   ;;  %v15448_v15 = vld [vmem:[#allocation8 + $0xb4c] ss:$72 sps:$4 sm:$0xff]  }
 0x117   :  { %5664 = vmatpush1.bf16.msra.mxu1 %v15370_v20  ;;  %5533 = vmatpush1.bf16.msra.mxu0 %v15409_v30  ;;  %v15475_v13 = vld [vmem:[#allocation8 + $0x904] ss:$72 sps:$4 sm:$0xff]   ;;  %v15473_v16 = vld [vmem:[#allocation8 + $0x900] ss:$72 sps:$4 sm:$0xff]   ;;  %v15481_v17 = vld [vmem:[#allocation8 + $0x994] ss:$72 sps:$4 sm:$0xff]  }
 0x118   :  { %5665 = vmatprep.subr.bf16.mxu1 %v15371_v21  ;;  %5534 = vmatprep.subr.bf16.mxu0 %v15413_v31  ;;  %v224_v18 = vld [vmem:[#allocation3 + $0x18] sm:$0xff]  ;;  %v230_v19 = vld [vmem:[#allocation3 + $0x48] sm:$0xff]  ;;  %s18047_s13 = smov [#allocation26]  }
 0x119   :  { %v18308_v20 = vpack.c.bf16 %v230_v19, %v224_v18  ;;  %v15446_v21 = vld [vmem:[#allocation8 + $0xb48] ss:$72 sps:$4 sm:$0xff]   ;;  %v15454_v22 = vld [vmem:[#allocation8 + $0xbdc] ss:$72 sps:$4 sm:$0xff]   ;;  %v15460_v26 = vld [vmem:[#allocation8 + $0xc6c] ss:$72 sps:$4 sm:$0xff]  }
 0x11a   :  { %v15479_v23 = vld [vmem:[#allocation8 + $0x990] ss:$72 sps:$4 sm:$0xff]   ;;  %v15485_v27 = vld [vmem:[#allocation8 + $0xa20] ss:$72 sps:$4 sm:$0xff]   ;;  %v15466_v30 = vld [vmem:[#allocation8 + $0xcfc] ss:$72 sps:$4 sm:$0xff]  }
 0x11b   :  { %5666 = vmatpush1.bf16.msra.mxu1 %v15373_v24  ;;  %5535 = vmatpush1.bf16.msra.mxu0 %v15415_v37  ;;  %v15487_v24 = vld [vmem:[#allocation8 + $0xa24] ss:$72 sps:$4 sm:$0xff]   ;;  %v15491_v31 = vld [vmem:[#allocation8 + $0xab0] ss:$72 sps:$4 sm:$0xff]   ;;  %v15505_v37 = vld [vmem:[#allocation8 + $0xbd4] ss:$72 sps:$4 sm:$0xff]  }
 0x11c   :  { %5667 = vmatprep.subr.bf16.mxu1 %v15374_v25  ;;  %5536 = vmatprep.subr.bf16.mxu0 %v15419_v38  ;;  %v15452_v25 = vld [vmem:[#allocation8 + $0xbd8] ss:$72 sps:$4 sm:$0xff]   ;;  %v15499_v32 = vld [vmem:[#allocation8 + $0xb44] ss:$72 sps:$4 sm:$0xff]   ;;  %v15470_v38 = vld [vmem:[#allocation8 + $0xd88] ss:$72 sps:$4 sm:$0xff]  }
 0x11d   :  { %v15464_v33 = vld [vmem:[#allocation8 + $0xcf8] ss:$72 sps:$4 sm:$0xff]   ;;  %v15541_v61 = vld [vmem:[#allocation8 + $0xf34] ss:$72 sps:$4 sm:$0xff]   ;;  %v15506_v62 = vld [vmem:[#allocation8 + $0x10e8] ss:$72 sps:$4 sm:$0xff]  }
 0x11e   :  { %v15532_v18 = vld [vmem:[#allocation8 + $0x132c] ss:$72 sps:$4 sm:$0xff]   ;;  %v15557_v19 = vld [vmem:[#allocation8 + $0x10e0] ss:$72 sps:$4 sm:$0xff]   ;;  %s13352_s4 = sshll.u32 %s18047_s13, 4  ;;  %s13353_s4 = int_to_ptr.vmem [resolvable:$true] %s13352_s4 }
 0x11f   :  { %5668 = vmatpush1.bf16.msra.mxu1 %v15376_v28  ;;  %5537 = vmatpush1.bf16.msra.mxu0 %v15421_v41  ;;  %v15493_v28 = vld [vmem:[#allocation8 + $0xab4] ss:$72 sps:$4 sm:$0xff]   ;;  %v15511_v41 = vld [vmem:[#allocation8 + $0xc64] ss:$72 sps:$4 sm:$0xff]   ;;  %s17983_s8 = scalar_lea.vmem %s13353_s4, 256  ;;  %p17988_p1 = scmp.lt.s32.totalorder %s13353_s4, %s13353_s4 }
 0x120   :  { %5669 = vmatprep.subr.bf16.mxu1 %v15380_v29  ;;  %5538 = vmatprep.subr.bf16.mxu0 %v15425_v42  ;;  %v15458_v29 = vld [vmem:[#allocation8 + $0xc68] ss:$72 sps:$4 sm:$0xff]   ;;  %v15476_v42 = vld [vmem:[#allocation8 + $0xe18] ss:$72 sps:$4 sm:$0xff]   ;;  %p17984_p0 = scmp.ne.s32.totalorder %s13353_s4, %s17983_s8  ;;  %p17989_p2 = scmp.lt.s32.totalorder %s17983_s8, %s17983_s8 }
 0x122   :  { %p17990_p3 = por %p17989_p2, %p17988_p1 }
 0x123   :  { %5670 = vmatpush1.bf16.msra.mxu1 %v15382_v35  ;;  %5539 = vmatpush1.bf16.msra.mxu0 %v15427_v45  ;;  %v15472_v35 = vld [vmem:[#allocation8 + $0xd8c] ss:$72 sps:$4 sm:$0xff]  }
 0x124   :  { %5671 = vmatprep.subr.bf16.mxu1 %v15386_v36  ;;  %5540 = vmatprep.subr.bf16.mxu0 %v15431_v46  ;;  %v15497_v36 = vld [vmem:[#allocation8 + $0xb40] ss:$72 sps:$4 sm:$0xff]   ;;  %v15517_v45 = vld [vmem:[#allocation8 + $0xcf4] ss:$72 sps:$4 sm:$0xff]   ;;  %p17991_p4 = pnand %p17990_p3, %p17984_p0 }
 0x125   :  { %v15482_v46 = vld [vmem:[#allocation8 + $0xea8] ss:$72 sps:$4 sm:$0xff]  }
 0x127   :  { %5672 = vmatpush1.bf16.msra.mxu1 %v15388_v39  ;;  %5541 = vmatpush1.bf16.msra.mxu0 %v15433_v49  ;;  %v15478_v39 = vld [vmem:[#allocation8 + $0xe1c] ss:$72 sps:$4 sm:$0xff]  }
 0x128   :  { %5673 = vmatprep.subr.bf16.mxu1 %v15392_v40  ;;  %5542 = vmatprep.subr.bf16.mxu0 %v15437_v50  ;;  %v15503_v40 = vld [vmem:[#allocation8 + $0xbd0] ss:$72 sps:$4 sm:$0xff]   ;;  %v15523_v49 = vld [vmem:[#allocation8 + $0xd84] ss:$72 sps:$4 sm:$0xff]  }
 0x129   :  { %v15488_v50 = vld [vmem:[#allocation8 + $0xf38] ss:$72 sps:$4 sm:$0xff]  }
 0x12b   :  { %5674 = vmatpush1.bf16.msra.mxu1 %v15394_v43  ;;  %5543 = vmatpush1.bf16.msra.mxu0 %v15439_v53  ;;  %v15484_v43 = vld [vmem:[#allocation8 + $0xeac] ss:$72 sps:$4 sm:$0xff]  }
 0x12c   :  { %5675 = vmatprep.subr.bf16.mxu1 %v15398_v44  ;;  %5544 = vmatprep.subr.bf16.mxu0 %v15443_v54  ;;  %v15509_v44 = vld [vmem:[#allocation8 + $0xc60] ss:$72 sps:$4 sm:$0xff]   ;;  %v15529_v53 = vld [vmem:[#allocation8 + $0xe14] ss:$72 sps:$4 sm:$0xff]  }
 0x12d   :  { %v15494_v54 = vld [vmem:[#allocation8 + $0xfc8] ss:$72 sps:$4 sm:$0xff]  }
 0x12f   :  { %5676 = vmatpush1.bf16.msra.mxu1 %v15400_v47  ;;  %5545 = vmatpush1.bf16.msra.mxu0 %v15445_v57  ;;  %v15490_v47 = vld [vmem:[#allocation8 + $0xf3c] ss:$72 sps:$4 sm:$0xff]  }
 0x130   :  { %5677 = vmatprep.subr.bf16.mxu1 %v15404_v48  ;;  %5546 = vmatprep.subr.bf16.mxu0 %v15449_v58  ;;  %v15515_v48 = vld [vmem:[#allocation8 + $0xcf0] ss:$72 sps:$4 sm:$0xff]   ;;  %v15535_v57 = vld [vmem:[#allocation8 + $0xea4] ss:$72 sps:$4 sm:$0xff]  }
 0x131   :  { %v15500_v58 = vld [vmem:[#allocation8 + $0x1058] ss:$72 sps:$4 sm:$0xff]  }
 0x133   :  { %5678 = vmatpush1.bf16.msra.mxu1 %v15406_v51  ;;  %5547 = vmatpush1.bf16.msra.mxu0 %v15451_v63  ;;  %v15496_v51 = vld [vmem:[#allocation8 + $0xfcc] ss:$72 sps:$4 sm:$0xff]   ;;  %v15539_v63 = vld [vmem:[#allocation8 + $0xf30] ss:$72 sps:$4 sm:$0xff]  }
 0x134   :  { %5679 = vmatprep.subr.bf16.mxu1 %v15410_v52  ;;  %5548 = vmatprep.subr.bf16.mxu0 %v15455_v0  ;;  %v15521_v52 = vld [vmem:[#allocation8 + $0xd80] ss:$72 sps:$4 sm:$0xff]   ;;  %v15514_v0 = vld [vmem:[#allocation8 + $0x117c] ss:$72 sps:$4 sm:$0xff]  }
 0x137   :  { %5680 = vmatpush1.bf16.msra.mxu1 %v15412_v55  ;;  %5549 = vmatpush1.bf16.msra.mxu0 %v15457_v4  ;;  %v15502_v55 = vld [vmem:[#allocation8 + $0x105c] ss:$72 sps:$4 sm:$0xff]   ;;  %v15520_v4 = vld [vmem:[#allocation8 + $0x120c] ss:$72 sps:$4 sm:$0xff]  }
 0x138   :  { %5681 = vmatprep.subr.bf16.mxu1 %v15416_v56  ;;  %5550 = vmatprep.subr.bf16.mxu0 %v15461_v5  ;;  %v15527_v56 = vld [vmem:[#allocation8 + $0xe10] ss:$72 sps:$4 sm:$0xff]  }
 0x139   :  { %v223_v5 = vld [vmem:[#allocation3 + $0x10] sm:$0xff] }
 0x13b   :  { %5682 = vmatpush1.bf16.msra.mxu1 %v15418_v59  ;;  %5551 = vmatpush1.bf16.msra.mxu0 %v15463_v8  ;;  %v15508_v59 = vld [vmem:[#allocation8 + $0x10ec] ss:$72 sps:$4 sm:$0xff]  }
 0x13c   :  { %5694 = vmatprep.subr.bf16.mxu1 %v15424_v60  ;;  %5552 = vmatprep.subr.bf16.mxu0 %v15467_v9  ;;  %v15533_v60 = vld [vmem:[#allocation8 + $0xea0] ss:$72 sps:$4 sm:$0xff]   ;;  %v15553_v8 = vld [vmem:[#allocation8 + $0x1054] ss:$72 sps:$4 sm:$0xff]  }
 0x13d   :  { %v15518_v9 = vld [vmem:[#allocation8 + $0x1208] ss:$72 sps:$4 sm:$0xff]  }
 0x13e   :  { %5684 = vmatmul.mubr.bf16.vlgmr.msra.gmra.mrb[0].mxu1 %v18305_v2 }
 0x13f   :  { %5695 = vmatpush1.bf16.msra.mxu1 %v15422_v1  ;;  %5553 = vmatpush1.bf16.msra.mxu0 %v15469_v12  ;;  %v15547_v1 = vld [vmem:[#allocation8 + $0xfc4] ss:$72 sps:$4 sm:$0xff]   ;;  %v232_v12 = vld [vmem:[#allocation3 + $0x58] sm:$0xff] }
 0x140   :  { %5696 = vmatprep.subr.bf16.mxu1 %v15430_v3  ;;  %5565 = vmatprep.subr.bf16.mxu0 %v15475_v13  ;;  %v15512_v3 = vld [vmem:[#allocation8 + $0x1178] ss:$72 sps:$4 sm:$0xff]   ;;  %v15526_v13 = vld [vmem:[#allocation8 + $0x129c] ss:$72 sps:$4 sm:$0xff]  }
 0x141   :  { %5726 = vmatprep.mubr.bf16.mxu1 %v18308_v20 }
 0x142   :  { %5555 = vmatmul.mubr.bf16.vlgmr.msra.gmra.mrb[0].mxu0 %v18305_v2 }
 0x143   :  { %5697 = vmatpush1.bf16.msra.mxu1 %v15428_v6  ;;  %5566 = vmatpush1.bf16.msra.mxu0 %v15473_v16  ;;  %v229_v6 = vld [vmem:[#allocation3 + $0x40] sm:$0xff] }
 0x144   :  { %5698 = vmatprep.subr.bf16.mxu1 %v15436_v7  ;;  %5567 = vmatprep.subr.bf16.mxu0 %v15481_v17  ;;  %v15545_v7 = vld [vmem:[#allocation8 + $0xfc0] ss:$72 sps:$4 sm:$0xff]  }
 0x145   :  { %5597 = vmatprep.mubr.bf16.mxu0 %v18308_v20  ;;  %v15524_v17 = vld [vmem:[#allocation8 + $0x1298] ss:$72 sps:$4 sm:$0xff]  }
 0x147   :  { %5699 = vmatpush1.bf16.msra.mxu1 %v15434_v10  ;;  %5568 = vmatpush1.bf16.msra.mxu0 %v15479_v23  ;;  %v18313_v10 = vpack.c.bf16 %v229_v6, %v223_v5  ;;  %v15538_v23 = vld [vmem:[#allocation8 + $0x13bc] ss:$72 sps:$4 sm:$0xff]   ;;  %v15604_v5 = vld [vmem:[#allocation8 + $0x19ec] ss:$72 sps:$4 sm:$0xff]   ;;  %v15629_v6 = vld [vmem:[#allocation8 + $0x17a0] ss:$72 sps:$4 sm:$0xff]  }
 0x148   :  { %5700 = vmatprep.subr.bf16.mxu1 %v15442_v11  ;;  %5569 = vmatprep.subr.bf16.mxu0 %v15487_v24  ;;  %v226_v11 = vld [vmem:[#allocation3 + $0x28] sm:$0xff]  ;;  %v15563_v24 = vld [vmem:[#allocation8 + $0x1170] ss:$72 sps:$4 sm:$0xff]  }
 0x149   :  { %v18315_v16 = vpack.c.bf16 %v232_v12, %v226_v11  ;;  %v15635_v11 = vld [vmem:[#allocation8 + $0x1830] ss:$72 sps:$4 sm:$0xff]   ;;  %v15643_v12 = vld [vmem:[#allocation8 + $0x18c4] ss:$72 sps:$4 sm:$0xff]  }
 0x14b   :  { %5701 = vmatpush1.bf16.msra.mxu1 %v15440_v14  ;;  %5570 = vmatpush1.bf16.msra.mxu0 %v15485_v27  ;;  %v15551_v14 = vld [vmem:[#allocation8 + $0x1050] ss:$72 sps:$4 sm:$0xff]   ;;  %v15544_v27 = vld [vmem:[#allocation8 + $0x144c] ss:$72 sps:$4 sm:$0xff]  }
 0x14c   :  { %5702 = vmatprep.subr.bf16.mxu1 %v15448_v15  ;;  %5571 = vmatprep.subr.bf16.mxu0 %v15493_v28  ;;  %v15559_v15 = vld [vmem:[#allocation8 + $0x10e4] ss:$72 sps:$4 sm:$0xff]   ;;  %v15569_v28 = vld [vmem:[#allocation8 + $0x1200] ss:$72 sps:$4 sm:$0xff]  }
 0x14f   :  { %5703 = vmatpush1.bf16.msra.mxu1 %v15446_v21  ;;  %5572 = vmatpush1.bf16.msra.mxu0 %v15491_v31  ;;  %v15565_v21 = vld [vmem:[#allocation8 + $0x1174] ss:$72 sps:$4 sm:$0xff]  }
 0x150   :  { %5704 = vmatprep.subr.bf16.mxu1 %v15454_v22  ;;  %5573 = vmatprep.subr.bf16.mxu0 %v15499_v32  ;;  %v15530_v22 = vld [vmem:[#allocation8 + $0x1328] ss:$72 sps:$4 sm:$0xff]   ;;  %v15550_v31 = vld [vmem:[#allocation8 + $0x14dc] ss:$72 sps:$4 sm:$0xff]  }
 0x151   :  { %v15575_v32 = vld [vmem:[#allocation8 + $0x1290] ss:$72 sps:$4 sm:$0xff]  }
 0x153   :  { %5705 = vmatpush1.bf16.msra.mxu1 %v15452_v25  ;;  %5574 = vmatpush1.bf16.msra.mxu0 %v15497_v36  ;;  %v15571_v25 = vld [vmem:[#allocation8 + $0x1204] ss:$72 sps:$4 sm:$0xff]  }
 0x154   :  { %5706 = vmatprep.subr.bf16.mxu1 %v15460_v26  ;;  %5575 = vmatprep.subr.bf16.mxu0 %v15505_v37  ;;  %v15536_v26 = vld [vmem:[#allocation8 + $0x13b8] ss:$72 sps:$4 sm:$0xff]   ;;  %v15556_v36 = vld [vmem:[#allocation8 + $0x156c] ss:$72 sps:$4 sm:$0xff]  }
 0x155   :  { %v15581_v37 = vld [vmem:[#allocation8 + $0x1320] ss:$72 sps:$4 sm:$0xff]  }
 0x157   :  { %5707 = vmatpush1.bf16.msra.mxu1 %v15458_v29  ;;  %5576 = vmatpush1.bf16.msra.mxu0 %v15503_v40  ;;  %v15577_v29 = vld [vmem:[#allocation8 + $0x1294] ss:$72 sps:$4 sm:$0xff]  }
 0x158   :  { %5708 = vmatprep.subr.bf16.mxu1 %v15466_v30  ;;  %5577 = vmatprep.subr.bf16.mxu0 %v15511_v41  ;;  %v15542_v30 = vld [vmem:[#allocation8 + $0x1448] ss:$72 sps:$4 sm:$0xff]   ;;  %v15562_v40 = vld [vmem:[#allocation8 + $0x15fc] ss:$72 sps:$4 sm:$0xff]  }
 0x159   :  { %v15587_v41 = vld [vmem:[#allocation8 + $0x13b0] ss:$72 sps:$4 sm:$0xff]  }
 0x15b   :  { %5709 = vmatpush1.bf16.msra.mxu1 %v15464_v33  ;;  %5578 = vmatpush1.bf16.msra.mxu0 %v15509_v44  ;;  %v15583_v33 = vld [vmem:[#allocation8 + $0x1324] ss:$72 sps:$4 sm:$0xff]  }
 0x15c   :  { %5710 = vmatprep.subr.bf16.mxu1 %v15472_v35  ;;  %5579 = vmatprep.subr.bf16.mxu0 %v15517_v45  ;;  %v15548_v35 = vld [vmem:[#allocation8 + $0x14d8] ss:$72 sps:$4 sm:$0xff]   ;;  %v15568_v44 = vld [vmem:[#allocation8 + $0x168c] ss:$72 sps:$4 sm:$0xff]  }
 0x15d   :  { %v15593_v45 = vld [vmem:[#allocation8 + $0x1440] ss:$72 sps:$4 sm:$0xff]  }
 0x15f   :  { %5711 = vmatpush1.bf16.msra.mxu1 %v15470_v38  ;;  %5580 = vmatpush1.bf16.msra.mxu0 %v15515_v48  ;;  %v15589_v38 = vld [vmem:[#allocation8 + $0x13b4] ss:$72 sps:$4 sm:$0xff]  }
 0x160   :  { %5712 = vmatprep.subr.bf16.mxu1 %v15478_v39  ;;  %5581 = vmatprep.subr.bf16.mxu0 %v15523_v49  ;;  %v15554_v39 = vld [vmem:[#allocation8 + $0x1568] ss:$72 sps:$4 sm:$0xff]   ;;  %v15574_v48 = vld [vmem:[#allocation8 + $0x171c] ss:$72 sps:$4 sm:$0xff]  }
 0x161   :  { %v15599_v49 = vld [vmem:[#allocation8 + $0x14d0] ss:$72 sps:$4 sm:$0xff]  }
 0x163   :  { %5713 = vmatpush1.bf16.msra.mxu1 %v15476_v42  ;;  %5582 = vmatpush1.bf16.msra.mxu0 %v15521_v52  ;;  %v15595_v42 = vld [vmem:[#allocation8 + $0x1444] ss:$72 sps:$4 sm:$0xff]  }
 0x164   :  { %5714 = vmatprep.subr.bf16.mxu1 %v15484_v43  ;;  %5583 = vmatprep.subr.bf16.mxu0 %v15529_v53  ;;  %v15560_v43 = vld [vmem:[#allocation8 + $0x15f8] ss:$72 sps:$4 sm:$0xff]   ;;  %v15580_v52 = vld [vmem:[#allocation8 + $0x17ac] ss:$72 sps:$4 sm:$0xff]  }
 0x165   :  { %v15605_v53 = vld [vmem:[#allocation8 + $0x1560] ss:$72 sps:$4 sm:$0xff]  }
 0x167   :  { %5715 = vmatpush1.bf16.msra.mxu1 %v15482_v46  ;;  %5584 = vmatpush1.bf16.msra.mxu0 %v15527_v56  ;;  %v15601_v46 = vld [vmem:[#allocation8 + $0x14d4] ss:$72 sps:$4 sm:$0xff]  }
 0x168   :  { %5716 = vmatprep.subr.bf16.mxu1 %v15490_v47  ;;  %5585 = vmatprep.subr.bf16.mxu0 %v15535_v57  ;;  %v15566_v47 = vld [vmem:[#allocation8 + $0x1688] ss:$72 sps:$4 sm:$0xff]   ;;  %v15586_v56 = vld [vmem:[#allocation8 + $0x183c] ss:$72 sps:$4 sm:$0xff]  }
 0x169   :  { %v15611_v57 = vld [vmem:[#allocation8 + $0x15f0] ss:$72 sps:$4 sm:$0xff]  }
 0x16b   :  { %5717 = vmatpush1.bf16.msra.mxu1 %v15488_v50  ;;  %5586 = vmatpush1.bf16.msra.mxu0 %v15533_v60  ;;  %v15607_v50 = vld [vmem:[#allocation8 + $0x1564] ss:$72 sps:$4 sm:$0xff]  }
 0x16c   :  { %5718 = vmatprep.subr.bf16.mxu1 %v15496_v51  ;;  %5587 = vmatprep.subr.bf16.mxu0 %v15541_v61  ;;  %v15572_v51 = vld [vmem:[#allocation8 + $0x1718] ss:$72 sps:$4 sm:$0xff]   ;;  %v15592_v60 = vld [vmem:[#allocation8 + $0x18cc] ss:$72 sps:$4 sm:$0xff]  }
 0x16d   :  { %v15617_v61 = vld [vmem:[#allocation8 + $0x1680] ss:$72 sps:$4 sm:$0xff]  }
 0x16f   :  { %5719 = vmatpush1.bf16.msra.mxu1 %v15494_v54  ;;  %5588 = vmatpush1.bf16.msra.mxu0 %v15539_v63  ;;  %v15613_v54 = vld [vmem:[#allocation8 + $0x15f4] ss:$72 sps:$4 sm:$0xff]   ;;  %v15590_v63 = vld [vmem:[#allocation8 + $0x18c8] ss:$72 sps:$4 sm:$0xff]  }
 0x170   :  { %5720 = vmatprep.subr.bf16.mxu1 %v15502_v55  ;;  %5589 = vmatprep.subr.bf16.mxu0 %v15547_v1  ;;  %v15578_v55 = vld [vmem:[#allocation8 + $0x17a8] ss:$72 sps:$4 sm:$0xff]  }
 0x171   :  { %v15623_v1 = vld [vmem:[#allocation8 + $0x1710] ss:$72 sps:$4 sm:$0xff]  }
 0x173   :  { %5721 = vmatpush1.bf16.msra.mxu1 %v15500_v58  ;;  %5590 = vmatpush1.bf16.msra.mxu0 %v15545_v7  ;;  %v15619_v58 = vld [vmem:[#allocation8 + $0x1684] ss:$72 sps:$4 sm:$0xff]   ;;  %v15637_v7 = vld [vmem:[#allocation8 + $0x1834] ss:$72 sps:$4 sm:$0xff]  }
 0x174   :  { %5722 = vmatprep.subr.bf16.mxu1 %v15508_v59  ;;  %5591 = vmatprep.subr.bf16.mxu0 %v15553_v8  ;;  %v15584_v59 = vld [vmem:[#allocation8 + $0x1838] ss:$72 sps:$4 sm:$0xff]   ;;  %v15602_v8 = vld [vmem:[#allocation8 + $0x19e8] ss:$72 sps:$4 sm:$0xff]  }
 0x177   :  { %5723 = vmatpush1.bf16.msra.mxu1 %v15506_v62  ;;  %5592 = vmatpush1.bf16.msra.mxu0 %v15551_v14  ;;  %v15625_v62 = vld [vmem:[#allocation8 + $0x1714] ss:$72 sps:$4 sm:$0xff]  }
 0x178   :  { %5724 = vmatprep.subr.bf16.mxu1 %v15514_v0  ;;  %5593 = vmatprep.subr.bf16.mxu0 %v15559_v15  ;;  %v15598_v0 = vld [vmem:[#allocation8 + $0x195c] ss:$72 sps:$4 sm:$0xff]   ;;  %v231_v15 = vld [vmem:[#allocation3 + $0x50] sm:$0xff] }
 0x179   :  { %v225_v14 = vld [vmem:[#allocation3 + $0x20] sm:$0xff] }
 0x17b   :  { %5725 = vmatpush1.bf16.msra.mxu1 %v15512_v3  ;;  %5594 = vmatpush1.bf16.msra.mxu0 %v15557_v19  ;;  %v15631_v3 = vld [vmem:[#allocation8 + $0x17a4] ss:$72 sps:$4 sm:$0xff]   ;;  %v15649_v19 = vld [vmem:[#allocation8 + $0x1954] ss:$72 sps:$4 sm:$0xff]  }
 0x17c   :  { %5737 = vmatprep.subr.bf16.mxu1 %v15520_v4  ;;  %5595 = vmatprep.subr.bf16.mxu0 %v15565_v21  ;;  %v15596_v4 = vld [vmem:[#allocation8 + $0x1958] ss:$72 sps:$4 sm:$0xff]   ;;  %v18321_v21 = vpack.c.bf16 %v231_v15, %v225_v14  ;;  %v15700_v14 = vld [vmem:[#allocation8 + $0x7fc] ss:$72 sps:$4 sm:$0xff]  }
 0x17d   :  { %v15725_v15 = vld [vmem:[#allocation8 + $0x5b0] ss:$72 sps:$4 sm:$0xff]  }
 0x17e   :  { %5727 = vmatmul.mubr.bf16.vlgmr.msra.gmra.mrb[0].mxu1 %v18313_v10 }
 0x17f   :  { %5738 = vmatpush1.bf16.msra.mxu1 %v15518_v9  ;;  %5769 = vmatprep.mubr.bf16.mxu1 %v18315_v16  ;;  %v15610_v9 = vld [vmem:[#allocation8 + $0x1a7c] ss:$72 sps:$4 sm:$0xff]  }
 0x180   :  { %5739 = vmatprep.subr.bf16.mxu1 %v15526_v13  ;;  %5596 = vmatpush1.bf16.msra.mxu0 %v15563_v24  ;;  %v15608_v13 = vld [vmem:[#allocation8 + $0x1a78] ss:$72 sps:$4 sm:$0xff]  }
 0x181   :  { %5608 = vmatprep.subr.bf16.mxu0 %v15571_v25  ;;  %v15647_v24 = vld [vmem:[#allocation8 + $0x1950] ss:$72 sps:$4 sm:$0xff]   ;;  %v15655_v25 = vld [vmem:[#allocation8 + $0x19e4] ss:$72 sps:$4 sm:$0xff]  }
 0x183   :  { %5740 = vmatpush1.bf16.msra.mxu1 %v15524_v17  ;;  %5598 = vmatmul.mubr.bf16.vlgmr.msra.gmra.mrb[0].mxu0 %v18313_v10  ;;  %v15616_v17 = vld [vmem:[#allocation8 + $0x1c] ss:$72 sps:$4 sm:$0xff]  }
 0x184   :  { %5741 = vmatprep.subr.bf16.mxu1 %v15532_v18  ;;  %5609 = vmatpush1.bf16.msra.mxu0 %v15569_v28  ;;  %v15641_v18 = vld [vmem:[#allocation8 + $0x18c0] ss:$72 sps:$4 sm:$0xff]  }
 0x185   :  { %5610 = vmatprep.subr.bf16.mxu0 %v15577_v29  ;;  %5640 = vmatprep.mubr.bf16.mxu0 %v18315_v16  ;;  %v15653_v28 = vld [vmem:[#allocation8 + $0x19e0] ss:$72 sps:$4 sm:$0xff]   ;;  %v15661_v29 = vld [vmem:[#allocation8 + $0x1a74] ss:$72 sps:$4 sm:$0xff]  }
 0x187   :  { %5742 = vmatpush1.bf16.msra.mxu1 %v15530_v22  ;;  %v15614_v22 = vld [vmem:[#allocation8 + $0x18] ss:$72 sps:$4 sm:$0xff]  }
 0x188   :  { %5743 = vmatprep.subr.bf16.mxu1 %v15538_v23  ;;  %5611 = vmatpush1.bf16.msra.mxu0 %v15575_v32  ;;  %v15622_v23 = vld [vmem:[#allocation8 + $0xac] ss:$72 sps:$4 sm:$0xff]   ;;  %v15659_v32 = vld [vmem:[#allocation8 + $0x1a70] ss:$72 sps:$4 sm:$0xff]  }
 0x189   :  { %5612 = vmatprep.subr.bf16.mxu0 %v15583_v33  ;;  %v15667_v33 = vld [vmem:[#allocation8 + $0x14] ss:$72 sps:$4 sm:$0xff]  }
 0x18b   :  { %5744 = vmatpush1.bf16.msra.mxu1 %v15536_v26  ;;  %v15620_v26 = vld [vmem:[#allocation8 + $0xa8] ss:$72 sps:$4 sm:$0xff]  }
 0x18c   :  { %5745 = vmatprep.subr.bf16.mxu1 %v15544_v27  ;;  %5613 = vmatpush1.bf16.msra.mxu0 %v15581_v37  ;;  %v15628_v27 = vld [vmem:[#allocation8 + $0x13c] ss:$72 sps:$4 sm:$0xff]   ;;  %v15665_v37 = vld [vmem:[#allocation8 + $0x10] ss:$72 sps:$4 sm:$0xff]  }
 0x18d   :  { %5614 = vmatprep.subr.bf16.mxu0 %v15589_v38  ;;  %v15673_v38 = vld [vmem:[#allocation8 + $0xa4] ss:$72 sps:$4 sm:$0xff]  }
 0x18f   :  { %5746 = vmatpush1.bf16.msra.mxu1 %v15542_v30  ;;  %v15626_v30 = vld [vmem:[#allocation8 + $0x138] ss:$72 sps:$4 sm:$0xff]  }
 0x190   :  { %5747 = vmatprep.subr.bf16.mxu1 %v15550_v31  ;;  %5615 = vmatpush1.bf16.msra.mxu0 %v15587_v41  ;;  %v15634_v31 = vld [vmem:[#allocation8 + $0x1cc] ss:$72 sps:$4 sm:$0xff]   ;;  %v15671_v41 = vld [vmem:[#allocation8 + $0xa0] ss:$72 sps:$4 sm:$0xff]  }
 0x191   :  { %5616 = vmatprep.subr.bf16.mxu0 %v15595_v42  ;;  %v15679_v42 = vld [vmem:[#allocation8 + $0x134] ss:$72 sps:$4 sm:$0xff]  }
 0x193   :  { %5748 = vmatpush1.bf16.msra.mxu1 %v15548_v35  ;;  %v15632_v35 = vld [vmem:[#allocation8 + $0x1c8] ss:$72 sps:$4 sm:$0xff]  }
 0x194   :  { %5749 = vmatprep.subr.bf16.mxu1 %v15556_v36  ;;  %5617 = vmatpush1.bf16.msra.mxu0 %v15593_v45  ;;  %v15640_v36 = vld [vmem:[#allocation8 + $0x25c] ss:$72 sps:$4 sm:$0xff]   ;;  %v15677_v45 = vld [vmem:[#allocation8 + $0x130] ss:$72 sps:$4 sm:$0xff]  }
 0x195   :  { %5618 = vmatprep.subr.bf16.mxu0 %v15601_v46  ;;  %v15685_v46 = vld [vmem:[#allocation8 + $0x1c4] ss:$72 sps:$4 sm:$0xff]  }
 0x197   :  { %5750 = vmatpush1.bf16.msra.mxu1 %v15554_v39  ;;  %v15638_v39 = vld [vmem:[#allocation8 + $0x258] ss:$72 sps:$4 sm:$0xff]  }
 0x198   :  { %5751 = vmatprep.subr.bf16.mxu1 %v15562_v40  ;;  %5619 = vmatpush1.bf16.msra.mxu0 %v15599_v49  ;;  %v15646_v40 = vld [vmem:[#allocation8 + $0x2ec] ss:$72 sps:$4 sm:$0xff]   ;;  %v15683_v49 = vld [vmem:[#allocation8 + $0x1c0] ss:$72 sps:$4 sm:$0xff]  }
 0x199   :  { %5620 = vmatprep.subr.bf16.mxu0 %v15607_v50  ;;  %v15691_v50 = vld [vmem:[#allocation8 + $0x254] ss:$72 sps:$4 sm:$0xff]  }
 0x19b   :  { %5752 = vmatpush1.bf16.msra.mxu1 %v15560_v43  ;;  %v15644_v43 = vld [vmem:[#allocation8 + $0x2e8] ss:$72 sps:$4 sm:$0xff]  }
 0x19c   :  { %5753 = vmatprep.subr.bf16.mxu1 %v15568_v44  ;;  %5621 = vmatpush1.bf16.msra.mxu0 %v15605_v53  ;;  %v15652_v44 = vld [vmem:[#allocation8 + $0x37c] ss:$72 sps:$4 sm:$0xff]   ;;  %v15689_v53 = vld [vmem:[#allocation8 + $0x250] ss:$72 sps:$4 sm:$0xff]  }
 0x19d   :  { %5622 = vmatprep.subr.bf16.mxu0 %v15613_v54  ;;  %v15697_v54 = vld [vmem:[#allocation8 + $0x2e4] ss:$72 sps:$4 sm:$0xff]  }
 0x19f   :  { %5754 = vmatpush1.bf16.msra.mxu1 %v15566_v47  ;;  %v15650_v47 = vld [vmem:[#allocation8 + $0x378] ss:$72 sps:$4 sm:$0xff]  }
 0x1a0   :  { %5755 = vmatprep.subr.bf16.mxu1 %v15574_v48  ;;  %5623 = vmatpush1.bf16.msra.mxu0 %v15611_v57  ;;  %v15658_v48 = vld [vmem:[#allocation8 + $0x40c] ss:$72 sps:$4 sm:$0xff]   ;;  %v15695_v57 = vld [vmem:[#allocation8 + $0x2e0] ss:$72 sps:$4 sm:$0xff]  }
 0x1a1   :  { %5624 = vmatprep.subr.bf16.mxu0 %v15619_v58  ;;  %v15703_v58 = vld [vmem:[#allocation8 + $0x374] ss:$72 sps:$4 sm:$0xff]  }
 0x1a3   :  { %5756 = vmatpush1.bf16.msra.mxu1 %v15572_v51  ;;  %v15656_v51 = vld [vmem:[#allocation8 + $0x408] ss:$72 sps:$4 sm:$0xff]  }
 0x1a4   :  { %5757 = vmatprep.subr.bf16.mxu1 %v15580_v52  ;;  %5625 = vmatpush1.bf16.msra.mxu0 %v15617_v61  ;;  %v15664_v52 = vld [vmem:[#allocation8 + $0x49c] ss:$72 sps:$4 sm:$0xff]   ;;  %v15701_v61 = vld [vmem:[#allocation8 + $0x370] ss:$72 sps:$4 sm:$0xff]  }
 0x1a5   :  { %5626 = vmatprep.subr.bf16.mxu0 %v15625_v62  ;;  %v15709_v62 = vld [vmem:[#allocation8 + $0x404] ss:$72 sps:$4 sm:$0xff]  }
 0x1a7   :  { %5758 = vmatpush1.bf16.msra.mxu1 %v15578_v55  ;;  %v15662_v55 = vld [vmem:[#allocation8 + $0x498] ss:$72 sps:$4 sm:$0xff]  }
 0x1a8   :  { %5759 = vmatprep.subr.bf16.mxu1 %v15586_v56  ;;  %5627 = vmatpush1.bf16.msra.mxu0 %v15623_v1  ;;  %v15670_v56 = vld [vmem:[#allocation8 + $0x52c] ss:$72 sps:$4 sm:$0xff]   ;;  %v15707_v1 = vld [vmem:[#allocation8 + $0x400] ss:$72 sps:$4 sm:$0xff]  }
 0x1a9   :  { %5628 = vmatprep.subr.bf16.mxu0 %v15631_v3  ;;  %v15715_v3 = vld [vmem:[#allocation8 + $0x494] ss:$72 sps:$4 sm:$0xff]  }
 0x1ab   :  { %5760 = vmatpush1.bf16.msra.mxu1 %v15584_v59  ;;  %v15668_v59 = vld [vmem:[#allocation8 + $0x528] ss:$72 sps:$4 sm:$0xff]  }
 0x1ac   :  { %5761 = vmatprep.subr.bf16.mxu1 %v15592_v60  ;;  %5629 = vmatpush1.bf16.msra.mxu0 %v15629_v6  ;;  %v15676_v60 = vld [vmem:[#allocation8 + $0x5bc] ss:$72 sps:$4 sm:$0xff]   ;;  %v15713_v6 = vld [vmem:[#allocation8 + $0x490] ss:$72 sps:$4 sm:$0xff]  }
 0x1ad   :  { %5630 = vmatprep.subr.bf16.mxu0 %v15637_v7  ;;  %v15721_v7 = vld [vmem:[#allocation8 + $0x524] ss:$72 sps:$4 sm:$0xff]  }
 0x1af   :  { %5762 = vmatpush1.bf16.msra.mxu1 %v15590_v63  ;;  %v15674_v63 = vld [vmem:[#allocation8 + $0x5b8] ss:$72 sps:$4 sm:$0xff]  }
 0x1b0   :  { %5763 = vmatprep.subr.bf16.mxu1 %v15598_v0  ;;  %5631 = vmatpush1.bf16.msra.mxu0 %v15635_v11  ;;  %v15682_v0 = vld [vmem:[#allocation8 + $0x64c] ss:$72 sps:$4 sm:$0xff]   ;;  %v15719_v11 = vld [vmem:[#allocation8 + $0x520] ss:$72 sps:$4 sm:$0xff]  }
 0x1b1   :  { %5632 = vmatprep.subr.bf16.mxu0 %v15643_v12  ;;  %v15727_v12 = vld [vmem:[#allocation8 + $0x5b4] ss:$72 sps:$4 sm:$0xff]  }
 0x1b3   :  { %5764 = vmatpush1.bf16.msra.mxu1 %v15596_v4  ;;  %v15680_v4 = vld [vmem:[#allocation8 + $0x648] ss:$72 sps:$4 sm:$0xff]  }
 0x1b4   :  { %5765 = vmatprep.subr.bf16.mxu1 %v15604_v5  ;;  %5633 = vmatpush1.bf16.msra.mxu0 %v15641_v18  ;;  %v15688_v5 = vld [vmem:[#allocation8 + $0x6dc] ss:$72 sps:$4 sm:$0xff]   ;;  %v15698_v18 = vld [vmem:[#allocation8 + $0x7f8] ss:$72 sps:$4 sm:$0xff]  }
 0x1b5   :  { %5634 = vmatprep.subr.bf16.mxu0 %v15649_v19  ;;  %v15706_v19 = vld [vmem:[#allocation8 + $0x88c] ss:$72 sps:$4 sm:$0xff]  }
 0x1b7   :  { %5766 = vmatpush1.bf16.msra.mxu1 %v15602_v8  ;;  %v15686_v8 = vld [vmem:[#allocation8 + $0x6d8] ss:$72 sps:$4 sm:$0xff]  }
 0x1b8   :  { %5767 = vmatprep.subr.bf16.mxu1 %v15610_v9  ;;  %5635 = vmatpush1.bf16.msra.mxu0 %v15647_v24  ;;  %v15694_v9 = vld [vmem:[#allocation8 + $0x76c] ss:$72 sps:$4 sm:$0xff]   ;;  %v15704_v24 = vld [vmem:[#allocation8 + $0x888] ss:$72 sps:$4 sm:$0xff]  }
 0x1b9   :  { %5636 = vmatprep.subr.bf16.mxu0 %v15655_v25  ;;  %v15712_v25 = vld [vmem:[#allocation8 + $0x91c] ss:$72 sps:$4 sm:$0xff]  }
 0x1bb   :  { %5768 = vmatpush1.bf16.msra.mxu1 %v15608_v13  ;;  %v15692_v13 = vld [vmem:[#allocation8 + $0x768] ss:$72 sps:$4 sm:$0xff]  }
 0x1bc   :  { %5909 = vmatprep.subr.bf16.mxu1 %v15616_v17  ;;  %5637 = vmatpush1.bf16.msra.mxu0 %v15653_v28  ;;  %v15733_v17 = vld [vmem:[#allocation8 + $0x644] ss:$72 sps:$4 sm:$0xff]   ;;  %v15710_v28 = vld [vmem:[#allocation8 + $0x918] ss:$72 sps:$4 sm:$0xff]  }
 0x1bd   :  { %5638 = vmatprep.subr.bf16.mxu0 %v15661_v29  ;;  %v15718_v29 = vld [vmem:[#allocation8 + $0x9ac] ss:$72 sps:$4 sm:$0xff]  }
 0x1be   :  { %5770 = vmatmul.mubr.bf16.vlgmr.msra.gmra.mrb[0].mxu1 %v18321_v21 }
 0x1bf   :  { %5910 = vmatpush1.bf16.msra.mxu1 %v15614_v22  ;;  %5941 = vmatprep.mubr.bf16.mxu1 %v18301_v34  ;;  %v15731_v22 = vld [vmem:[#allocation8 + $0x640] ss:$72 sps:$4 sm:$0xff]  }
 0x1c0   :  { %5911 = vmatprep.subr.bf16.mxu1 %v15622_v23  ;;  %5639 = vmatpush1.bf16.msra.mxu0 %v15659_v32  ;;  %v15739_v23 = vld [vmem:[#allocation8 + $0x6d4] ss:$72 sps:$4 sm:$0xff]   ;;  %v15716_v32 = vld [vmem:[#allocation8 + $0x9a8] ss:$72 sps:$4 sm:$0xff]  }
 0x1c1   :  { %5780 = vmatprep.subr.bf16.mxu0 %v15667_v33  ;;  %v15724_v33 = vld [vmem:[#allocation8 + $0xa3c] ss:$72 sps:$4 sm:$0xff]  }
 0x1c3   :  { %5912 = vmatpush1.bf16.msra.mxu1 %v15620_v26  ;;  %5641 = vmatmul.mubr.bf16.vlgmr.msra.gmra.mrb[0].mxu0 %v18321_v21  ;;  %v15737_v26 = vld [vmem:[#allocation8 + $0x6d0] ss:$72 sps:$4 sm:$0xff]  }
 0x1c4   :  { %5913 = vmatprep.subr.bf16.mxu1 %v15628_v27  ;;  %5781 = vmatpush1.bf16.msra.mxu0 %v15665_v37  ;;  %v15745_v27 = vld [vmem:[#allocation8 + $0x764] ss:$72 sps:$4 sm:$0xff]   ;;  %v15722_v37 = vld [vmem:[#allocation8 + $0xa38] ss:$72 sps:$4 sm:$0xff]  }
 0x1c5   :  { %5782 = vmatprep.subr.bf16.mxu0 %v15673_v38  ;;  %5812 = vmatprep.mubr.bf16.mxu0 %v18301_v34  ;;  %v15730_v38 = vld [vmem:[#allocation8 + $0xacc] ss:$72 sps:$4 sm:$0xff]  }
 0x1c7   :  { %5914 = vmatpush1.bf16.msra.mxu1 %v15626_v30  ;;  %v15743_v30 = vld [vmem:[#allocation8 + $0x760] ss:$72 sps:$4 sm:$0xff]  }
 0x1c8   :  { %5915 = vmatprep.subr.bf16.mxu1 %v15634_v31  ;;  %5783 = vmatpush1.bf16.msra.mxu0 %v15671_v41  ;;  %v15751_v31 = vld [vmem:[#allocation8 + $0x7f4] ss:$72 sps:$4 sm:$0xff]   ;;  %v15728_v41 = vld [vmem:[#allocation8 + $0xac8] ss:$72 sps:$4 sm:$0xff]  }
 0x1c9   :  { %5784 = vmatprep.subr.bf16.mxu0 %v15679_v42  ;;  %v15736_v42 = vld [vmem:[#allocation8 + $0xb5c] ss:$72 sps:$4 sm:$0xff]  }
 0x1cb   :  { %5916 = vmatpush1.bf16.msra.mxu1 %v15632_v35  ;;  %v15749_v35 = vld [vmem:[#allocation8 + $0x7f0] ss:$72 sps:$4 sm:$0xff]  }
 0x1cc   :  { %5917 = vmatprep.subr.bf16.mxu1 %v15640_v36  ;;  %5785 = vmatpush1.bf16.msra.mxu0 %v15677_v45  ;;  %v15757_v36 = vld [vmem:[#allocation8 + $0x884] ss:$72 sps:$4 sm:$0xff]   ;;  %v15734_v45 = vld [vmem:[#allocation8 + $0xb58] ss:$72 sps:$4 sm:$0xff]  }
 0x1cd   :  { %5786 = vmatprep.subr.bf16.mxu0 %v15685_v46  ;;  %v15742_v46 = vld [vmem:[#allocation8 + $0xbec] ss:$72 sps:$4 sm:$0xff]  }
 0x1cf   :  { %5918 = vmatpush1.bf16.msra.mxu1 %v15638_v39  ;;  %v15755_v39 = vld [vmem:[#allocation8 + $0x880] ss:$72 sps:$4 sm:$0xff]  }
 0x1d0   :  { %5919 = vmatprep.subr.bf16.mxu1 %v15646_v40  ;;  %5787 = vmatpush1.bf16.msra.mxu0 %v15683_v49  ;;  %v15763_v40 = vld [vmem:[#allocation8 + $0x914] ss:$72 sps:$4 sm:$0xff]   ;;  %v15740_v49 = vld [vmem:[#allocation8 + $0xbe8] ss:$72 sps:$4 sm:$0xff]  }
 0x1d1   :  { %5788 = vmatprep.subr.bf16.mxu0 %v15691_v50  ;;  %v15773_v50 = vld [vmem:[#allocation8 + $0xa30] ss:$72 sps:$4 sm:$0xff]  }
 0x1d3   :  { %5920 = vmatpush1.bf16.msra.mxu1 %v15644_v43  ;;  %v15761_v43 = vld [vmem:[#allocation8 + $0x910] ss:$72 sps:$4 sm:$0xff]  }
 0x1d4   :  { %5921 = vmatprep.subr.bf16.mxu1 %v15652_v44  ;;  %5789 = vmatpush1.bf16.msra.mxu0 %v15689_v53  ;;  %v15769_v44 = vld [vmem:[#allocation8 + $0x9a4] ss:$72 sps:$4 sm:$0xff]   ;;  %v15746_v53 = vld [vmem:[#allocation8 + $0xc78] ss:$72 sps:$4 sm:$0xff]  }
 0x1d5   :  { %5790 = vmatprep.subr.bf16.mxu0 %v15697_v54  ;;  %v15779_v54 = vld [vmem:[#allocation8 + $0xac0] ss:$72 sps:$4 sm:$0xff]  }
 0x1d7   :  { %5922 = vmatpush1.bf16.msra.mxu1 %v15650_v47  ;;  %v15767_v47 = vld [vmem:[#allocation8 + $0x9a0] ss:$72 sps:$4 sm:$0xff]  }
 0x1d8   :  { %5923 = vmatprep.subr.bf16.mxu1 %v15658_v48  ;;  %5791 = vmatpush1.bf16.msra.mxu0 %v15695_v57  ;;  %v15775_v48 = vld [vmem:[#allocation8 + $0xa34] ss:$72 sps:$4 sm:$0xff]   ;;  %v15752_v57 = vld [vmem:[#allocation8 + $0xd08] ss:$72 sps:$4 sm:$0xff]  }
 0x1d9   :  { %5792 = vmatprep.subr.bf16.mxu0 %v15703_v58  ;;  %v15760_v58 = vld [vmem:[#allocation8 + $0xd9c] ss:$72 sps:$4 sm:$0xff]  }
 0x1db   :  { %5924 = vmatpush1.bf16.msra.mxu1 %v15656_v51  ;;  %v15748_v51 = vld [vmem:[#allocation8 + $0xc7c] ss:$72 sps:$4 sm:$0xff]  }
 0x1dc   :  { %5925 = vmatprep.subr.bf16.mxu1 %v15664_v52  ;;  %5793 = vmatpush1.bf16.msra.mxu0 %v15701_v61  ;;  %v15781_v52 = vld [vmem:[#allocation8 + $0xac4] ss:$72 sps:$4 sm:$0xff]   ;;  %v15758_v61 = vld [vmem:[#allocation8 + $0xd98] ss:$72 sps:$4 sm:$0xff]  }
 0x1dd   :  { %5794 = vmatprep.subr.bf16.mxu0 %v15709_v62  ;;  %v15766_v62 = vld [vmem:[#allocation8 + $0xe2c] ss:$72 sps:$4 sm:$0xff]  }
 0x1df   :  { %5926 = vmatpush1.bf16.msra.mxu1 %v15662_v55  ;;  %v15754_v55 = vld [vmem:[#allocation8 + $0xd0c] ss:$72 sps:$4 sm:$0xff]  }
 0x1e0   :  { %5927 = vmatprep.subr.bf16.mxu1 %v15670_v56  ;;  %5795 = vmatpush1.bf16.msra.mxu0 %v15707_v1  ;;  %v15787_v56 = vld [vmem:[#allocation8 + $0xb54] ss:$72 sps:$4 sm:$0xff]   ;;  %v15764_v1 = vld [vmem:[#allocation8 + $0xe28] ss:$72 sps:$4 sm:$0xff]  }
 0x1e1   :  { %5796 = vmatprep.subr.bf16.mxu0 %v15715_v3  ;;  %v15772_v3 = vld [vmem:[#allocation8 + $0xebc] ss:$72 sps:$4 sm:$0xff]  }
 0x1e3   :  { %5928 = vmatpush1.bf16.msra.mxu1 %v15668_v59  ;;  %v15785_v59 = vld [vmem:[#allocation8 + $0xb50] ss:$72 sps:$4 sm:$0xff]  }
 0x1e4   :  { %5929 = vmatprep.subr.bf16.mxu1 %v15676_v60  ;;  %5797 = vmatpush1.bf16.msra.mxu0 %v15713_v6  ;;  %v15793_v60 = vld [vmem:[#allocation8 + $0xbe4] ss:$72 sps:$4 sm:$0xff]   ;;  %v15770_v6 = vld [vmem:[#allocation8 + $0xeb8] ss:$72 sps:$4 sm:$0xff]  }
 0x1e5   :  { %5798 = vmatprep.subr.bf16.mxu0 %v15721_v7  ;;  %v15778_v7 = vld [vmem:[#allocation8 + $0xf4c] ss:$72 sps:$4 sm:$0xff]  }
 0x1e7   :  { %5930 = vmatpush1.bf16.msra.mxu1 %v15674_v63  ;;  %v15791_v63 = vld [vmem:[#allocation8 + $0xbe0] ss:$72 sps:$4 sm:$0xff]  }
 0x1e8   :  { %5931 = vmatprep.subr.bf16.mxu1 %v15682_v0  ;;  %5799 = vmatpush1.bf16.msra.mxu0 %v15719_v11  ;;  %v15799_v0 = vld [vmem:[#allocation8 + $0xc74] ss:$72 sps:$4 sm:$0xff]   ;;  %v15776_v11 = vld [vmem:[#allocation8 + $0xf48] ss:$72 sps:$4 sm:$0xff]  }
 0x1e9   :  { %5800 = vmatprep.subr.bf16.mxu0 %v15727_v12  ;;  %v15784_v12 = vld [vmem:[#allocation8 + $0xfdc] ss:$72 sps:$4 sm:$0xff]  }
 0x1eb   :  { %5932 = vmatpush1.bf16.msra.mxu1 %v15680_v4  ;;  %v15797_v4 = vld [vmem:[#allocation8 + $0xc70] ss:$72 sps:$4 sm:$0xff]  }
 0x1ec   :  { %5933 = vmatprep.subr.bf16.mxu1 %v15688_v5  ;;  %5801 = vmatpush1.bf16.msra.mxu0 %v15725_v15  ;;  %v15805_v5 = vld [vmem:[#allocation8 + $0xd04] ss:$72 sps:$4 sm:$0xff]   ;;  %v15782_v15 = vld [vmem:[#allocation8 + $0xfd8] ss:$72 sps:$4 sm:$0xff]  }
 0x1ed   :  { %5802 = vmatprep.subr.bf16.mxu0 %v15733_v17  ;;  %v15790_v17 = vld [vmem:[#allocation8 + $0x106c] ss:$72 sps:$4 sm:$0xff]  }
 0x1ef   :  { %5934 = vmatpush1.bf16.msra.mxu1 %v15686_v8  ;;  %v15803_v8 = vld [vmem:[#allocation8 + $0xd00] ss:$72 sps:$4 sm:$0xff]  }
 0x1f0   :  { %5935 = vmatprep.subr.bf16.mxu1 %v15694_v9  ;;  %5803 = vmatpush1.bf16.msra.mxu0 %v15731_v22  ;;  %v15811_v9 = vld [vmem:[#allocation8 + $0xd94] ss:$72 sps:$4 sm:$0xff]   ;;  %v15788_v22 = vld [vmem:[#allocation8 + $0x1068] ss:$72 sps:$4 sm:$0xff]  }
 0x1f1   :  { %5804 = vmatprep.subr.bf16.mxu0 %v15739_v23  ;;  %v15796_v23 = vld [vmem:[#allocation8 + $0x10fc] ss:$72 sps:$4 sm:$0xff]  }
 0x1f3   :  { %5936 = vmatpush1.bf16.msra.mxu1 %v15692_v13  ;;  %v15809_v13 = vld [vmem:[#allocation8 + $0xd90] ss:$72 sps:$4 sm:$0xff]  }
 0x1f4   :  { %5937 = vmatprep.subr.bf16.mxu1 %v15700_v14  ;;  %5805 = vmatpush1.bf16.msra.mxu0 %v15737_v26  ;;  %v15817_v14 = vld [vmem:[#allocation8 + $0xe24] ss:$72 sps:$4 sm:$0xff]   ;;  %v15794_v26 = vld [vmem:[#allocation8 + $0x10f8] ss:$72 sps:$4 sm:$0xff]  }
 0x1f5   :  { %5806 = vmatprep.subr.bf16.mxu0 %v15745_v27  ;;  %v15827_v27 = vld [vmem:[#allocation8 + $0xf40] ss:$72 sps:$4 sm:$0xff]  }
 0x1f7   :  { %5938 = vmatpush1.bf16.msra.mxu1 %v15698_v18  ;;  %v15815_v18 = vld [vmem:[#allocation8 + $0xe20] ss:$72 sps:$4 sm:$0xff]  }
 0x1f8   :  { %5939 = vmatprep.subr.bf16.mxu1 %v15706_v19  ;;  %5807 = vmatpush1.bf16.msra.mxu0 %v15743_v30  ;;  %v15823_v19 = vld [vmem:[#allocation8 + $0xeb4] ss:$72 sps:$4 sm:$0xff]   ;;  %v15800_v30 = vld [vmem:[#allocation8 + $0x1188] ss:$72 sps:$4 sm:$0xff]  }
 0x1f9   :  { %5808 = vmatprep.subr.bf16.mxu0 %v15751_v31  ;;  %v15808_v31 = vld [vmem:[#allocation8 + $0x121c] ss:$72 sps:$4 sm:$0xff]  }
 0x1fb   :  { %5940 = vmatpush1.bf16.msra.mxu1 %v15704_v24  ;;  %v15821_v24 = vld [vmem:[#allocation8 + $0xeb0] ss:$72 sps:$4 sm:$0xff]  }
 0x1fc   :  { %5952 = vmatprep.subr.bf16.mxu1 %v15712_v25  ;;  %5809 = vmatpush1.bf16.msra.mxu0 %v15749_v35  ;;  %v15829_v25 = vld [vmem:[#allocation8 + $0xf44] ss:$72 sps:$4 sm:$0xff]   ;;  %v15806_v35 = vld [vmem:[#allocation8 + $0x1218] ss:$72 sps:$4 sm:$0xff]  }
 0x1fd   :  { %5810 = vmatprep.subr.bf16.mxu0 %v15757_v36  ;;  %v15814_v36 = vld [vmem:[#allocation8 + $0x12ac] ss:$72 sps:$4 sm:$0xff]  }
 0x1fe   :  { %5942 = vmatmul.mubr.bf16.vlgmr.msra.gmra.mrb[4].mxu1 %v18305_v2 }
 0x1ff   :  { %5953 = vmatpush1.bf16.msra.mxu1 %v15710_v28  ;;  %5984 = vmatprep.mubr.bf16.mxu1 %v18308_v20  ;;  %v15802_v28 = vld [vmem:[#allocation8 + $0x118c] ss:$72 sps:$4 sm:$0xff]  }
 0x200   :  { %5954 = vmatprep.subr.bf16.mxu1 %v15718_v29  ;;  %5811 = vmatpush1.bf16.msra.mxu0 %v15755_v39  ;;  %v15835_v29 = vld [vmem:[#allocation8 + $0xfd4] ss:$72 sps:$4 sm:$0xff]   ;;  %v15812_v39 = vld [vmem:[#allocation8 + $0x12a8] ss:$72 sps:$4 sm:$0xff]  }
 0x201   :  { %5823 = vmatprep.subr.bf16.mxu0 %v15763_v40  ;;  %v15820_v40 = vld [vmem:[#allocation8 + $0x133c] ss:$72 sps:$4 sm:$0xff]  }
 0x203   :  { %5955 = vmatpush1.bf16.msra.mxu1 %v15716_v32  ;;  %5813 = vmatmul.mubr.bf16.vlgmr.msra.gmra.mrb[4].mxu0 %v18305_v2  ;;  %v15833_v32 = vld [vmem:[#allocation8 + $0xfd0] ss:$72 sps:$4 sm:$0xff]  }
 0x204   :  { %5956 = vmatprep.subr.bf16.mxu1 %v15724_v33  ;;  %5824 = vmatpush1.bf16.msra.mxu0 %v15761_v43  ;;  %v15841_v33 = vld [vmem:[#allocation8 + $0x1064] ss:$72 sps:$4 sm:$0xff]   ;;  %v15818_v43 = vld [vmem:[#allocation8 + $0x1338] ss:$72 sps:$4 sm:$0xff]  }
 0x205   :  { %5825 = vmatprep.subr.bf16.mxu0 %v15769_v44  ;;  %5855 = vmatprep.mubr.bf16.mxu0 %v18308_v20  ;;  %v15826_v44 = vld [vmem:[#allocation8 + $0x13cc] ss:$72 sps:$4 sm:$0xff]  }
 0x207   :  { %5957 = vmatpush1.bf16.msra.mxu1 %v15722_v37  ;;  %v15839_v37 = vld [vmem:[#allocation8 + $0x1060] ss:$72 sps:$4 sm:$0xff]  }
 0x208   :  { %5958 = vmatprep.subr.bf16.mxu1 %v15730_v38  ;;  %5826 = vmatpush1.bf16.msra.mxu0 %v15767_v47  ;;  %v15847_v38 = vld [vmem:[#allocation8 + $0x10f4] ss:$72 sps:$4 sm:$0xff]   ;;  %v15824_v47 = vld [vmem:[#allocation8 + $0x13c8] ss:$72 sps:$4 sm:$0xff]  }
 0x209   :  { %5827 = vmatprep.subr.bf16.mxu0 %v15775_v48  ;;  %v15832_v48 = vld [vmem:[#allocation8 + $0x145c] ss:$72 sps:$4 sm:$0xff]  }
 0x20b   :  { %5959 = vmatpush1.bf16.msra.mxu1 %v15728_v41  ;;  %v15845_v41 = vld [vmem:[#allocation8 + $0x10f0] ss:$72 sps:$4 sm:$0xff]  }
 0x20c   :  { %5960 = vmatprep.subr.bf16.mxu1 %v15736_v42  ;;  %5828 = vmatpush1.bf16.msra.mxu0 %v15773_v50  ;;  %v15853_v42 = vld [vmem:[#allocation8 + $0x1184] ss:$72 sps:$4 sm:$0xff]  }
 0x20d   :  { %5829 = vmatprep.subr.bf16.mxu0 %v15781_v52  ;;  %v15865_v50 = vld [vmem:[#allocation8 + $0x12a4] ss:$72 sps:$4 sm:$0xff]  }
 0x20e   :  { %v15838_v52 = vld [vmem:[#allocation8 + $0x14ec] ss:$72 sps:$4 sm:$0xff]  }
 0x20f   :  { %5961 = vmatpush1.bf16.msra.mxu1 %v15734_v45  ;;  %v15851_v45 = vld [vmem:[#allocation8 + $0x1180] ss:$72 sps:$4 sm:$0xff]  }
 0x210   :  { %5962 = vmatprep.subr.bf16.mxu1 %v15742_v46  ;;  %5830 = vmatpush1.bf16.msra.mxu0 %v15779_v54  ;;  %v15859_v46 = vld [vmem:[#allocation8 + $0x1214] ss:$72 sps:$4 sm:$0xff]  }
 0x211   :  { %5831 = vmatprep.subr.bf16.mxu0 %v15787_v56  ;;  %v15871_v54 = vld [vmem:[#allocation8 + $0x1334] ss:$72 sps:$4 sm:$0xff]  }
 0x212   :  { %v15844_v56 = vld [vmem:[#allocation8 + $0x157c] ss:$72 sps:$4 sm:$0xff]  }
 0x213   :  { %5963 = vmatpush1.bf16.msra.mxu1 %v15740_v49  ;;  %v15857_v49 = vld [vmem:[#allocation8 + $0x1210] ss:$72 sps:$4 sm:$0xff]  }
 0x214   :  { %5964 = vmatprep.subr.bf16.mxu1 %v15748_v51  ;;  %5832 = vmatpush1.bf16.msra.mxu0 %v15785_v59  ;;  %v15830_v51 = vld [vmem:[#allocation8 + $0x1458] ss:$72 sps:$4 sm:$0xff]  }
 0x215   :  { %5833 = vmatprep.subr.bf16.mxu0 %v15793_v60  ;;  %v15842_v59 = vld [vmem:[#allocation8 + $0x1578] ss:$72 sps:$4 sm:$0xff]   ;;  %v15850_v60 = vld [vmem:[#allocation8 + $0x160c] ss:$72 sps:$4 sm:$0xff]  }
 0x217   :  { %5965 = vmatpush1.bf16.msra.mxu1 %v15746_v53  ;;  %v15863_v53 = vld [vmem:[#allocation8 + $0x12a0] ss:$72 sps:$4 sm:$0xff]  }
 0x218   :  { %5966 = vmatprep.subr.bf16.mxu1 %v15754_v55  ;;  %5834 = vmatpush1.bf16.msra.mxu0 %v15791_v63  ;;  %v15836_v55 = vld [vmem:[#allocation8 + $0x14e8] ss:$72 sps:$4 sm:$0xff]  }
 0x219   :  { %5835 = vmatprep.subr.bf16.mxu0 %v15799_v0  ;;  %v15848_v63 = vld [vmem:[#allocation8 + $0x1608] ss:$72 sps:$4 sm:$0xff]   ;;  %v15856_v0 = vld [vmem:[#allocation8 + $0x169c] ss:$72 sps:$4 sm:$0xff]  }
 0x21b   :  { %5967 = vmatpush1.bf16.msra.mxu1 %v15752_v57  ;;  %v15869_v57 = vld [vmem:[#allocation8 + $0x1330] ss:$72 sps:$4 sm:$0xff]  }
 0x21c   :  { %5968 = vmatprep.subr.bf16.mxu1 %v15760_v58  ;;  %5836 = vmatpush1.bf16.msra.mxu0 %v15797_v4  ;;  %v15877_v58 = vld [vmem:[#allocation8 + $0x13c4] ss:$72 sps:$4 sm:$0xff]   ;;  %v15854_v4 = vld [vmem:[#allocation8 + $0x1698] ss:$72 sps:$4 sm:$0xff]  }
 0x21d   :  { %5837 = vmatprep.subr.bf16.mxu0 %v15805_v5  ;;  %v15862_v5 = vld [vmem:[#allocation8 + $0x172c] ss:$72 sps:$4 sm:$0xff]  }
 0x21f   :  { %5969 = vmatpush1.bf16.msra.mxu1 %v15758_v61  ;;  %v15875_v61 = vld [vmem:[#allocation8 + $0x13c0] ss:$72 sps:$4 sm:$0xff]  }
 0x220   :  { %5970 = vmatprep.subr.bf16.mxu1 %v15766_v62  ;;  %5838 = vmatpush1.bf16.msra.mxu0 %v15803_v8  ;;  %v15883_v62 = vld [vmem:[#allocation8 + $0x1454] ss:$72 sps:$4 sm:$0xff]   ;;  %v15860_v8 = vld [vmem:[#allocation8 + $0x1728] ss:$72 sps:$4 sm:$0xff]  }
 0x221   :  { %5839 = vmatprep.subr.bf16.mxu0 %v15811_v9  ;;  %v15868_v9 = vld [vmem:[#allocation8 + $0x17bc] ss:$72 sps:$4 sm:$0xff]  }
 0x223   :  { %5971 = vmatpush1.bf16.msra.mxu1 %v15764_v1  ;;  %v15881_v1 = vld [vmem:[#allocation8 + $0x1450] ss:$72 sps:$4 sm:$0xff]  }
 0x224   :  { %5972 = vmatprep.subr.bf16.mxu1 %v15772_v3  ;;  %5840 = vmatpush1.bf16.msra.mxu0 %v15809_v13  ;;  %v15889_v3 = vld [vmem:[#allocation8 + $0x14e4] ss:$72 sps:$4 sm:$0xff]   ;;  %v15866_v13 = vld [vmem:[#allocation8 + $0x17b8] ss:$72 sps:$4 sm:$0xff]  }
 0x225   :  { %5841 = vmatprep.subr.bf16.mxu0 %v15817_v14  ;;  %v15874_v14 = vld [vmem:[#allocation8 + $0x184c] ss:$72 sps:$4 sm:$0xff]  }
 0x227   :  { %5973 = vmatpush1.bf16.msra.mxu1 %v15770_v6  ;;  %v15887_v6 = vld [vmem:[#allocation8 + $0x14e0] ss:$72 sps:$4 sm:$0xff]  }
 0x228   :  { %5974 = vmatprep.subr.bf16.mxu1 %v15778_v7  ;;  %5842 = vmatpush1.bf16.msra.mxu0 %v15815_v18  ;;  %v15895_v7 = vld [vmem:[#allocation8 + $0x1574] ss:$72 sps:$4 sm:$0xff]   ;;  %v15872_v18 = vld [vmem:[#allocation8 + $0x1848] ss:$72 sps:$4 sm:$0xff]  }
 0x229   :  { %5843 = vmatprep.subr.bf16.mxu0 %v15823_v19  ;;  %v15880_v19 = vld [vmem:[#allocation8 + $0x18dc] ss:$72 sps:$4 sm:$0xff]  }
 0x22b   :  { %5975 = vmatpush1.bf16.msra.mxu1 %v15776_v11  ;;  %v15893_v11 = vld [vmem:[#allocation8 + $0x1570] ss:$72 sps:$4 sm:$0xff]  }
 0x22c   :  { %5976 = vmatprep.subr.bf16.mxu1 %v15784_v12  ;;  %5844 = vmatpush1.bf16.msra.mxu0 %v15821_v24  ;;  %v15901_v12 = vld [vmem:[#allocation8 + $0x1604] ss:$72 sps:$4 sm:$0xff]   ;;  %v15878_v24 = vld [vmem:[#allocation8 + $0x18d8] ss:$72 sps:$4 sm:$0xff]  }
 0x22d   :  { %5845 = vmatprep.subr.bf16.mxu0 %v15829_v25  ;;  %v15886_v25 = vld [vmem:[#allocation8 + $0x196c] ss:$72 sps:$4 sm:$0xff]  }
 0x22f   :  { %5977 = vmatpush1.bf16.msra.mxu1 %v15782_v15  ;;  %v15899_v15 = vld [vmem:[#allocation8 + $0x1600] ss:$72 sps:$4 sm:$0xff]  }
 0x230   :  { %5978 = vmatprep.subr.bf16.mxu1 %v15790_v17  ;;  %5846 = vmatpush1.bf16.msra.mxu0 %v15827_v27  ;;  %v15907_v17 = vld [vmem:[#allocation8 + $0x1694] ss:$72 sps:$4 sm:$0xff]  }
 0x231   :  { %5847 = vmatprep.subr.bf16.mxu0 %v15835_v29  ;;  %v15919_v27 = vld [vmem:[#allocation8 + $0x17b4] ss:$72 sps:$4 sm:$0xff]  }
 0x232   :  { %v15892_v29 = vld [vmem:[#allocation8 + $0x19fc] ss:$72 sps:$4 sm:$0xff]  }
 0x233   :  { %5979 = vmatpush1.bf16.msra.mxu1 %v15788_v22  ;;  %v15905_v22 = vld [vmem:[#allocation8 + $0x1690] ss:$72 sps:$4 sm:$0xff]  }
 0x234   :  { %5980 = vmatprep.subr.bf16.mxu1 %v15796_v23  ;;  %5848 = vmatpush1.bf16.msra.mxu0 %v15833_v32  ;;  %v15913_v23 = vld [vmem:[#allocation8 + $0x1724] ss:$72 sps:$4 sm:$0xff]   ;;  %v15890_v32 = vld [vmem:[#allocation8 + $0x19f8] ss:$72 sps:$4 sm:$0xff]  }
 0x235   :  { %5849 = vmatprep.subr.bf16.mxu0 %v15841_v33  ;;  %v15898_v33 = vld [vmem:[#allocation8 + $0x1a8c] ss:$72 sps:$4 sm:$0xff]  }
 0x237   :  { %5981 = vmatpush1.bf16.msra.mxu1 %v15794_v26  ;;  %v15911_v26 = vld [vmem:[#allocation8 + $0x1720] ss:$72 sps:$4 sm:$0xff]  }
 0x238   :  { %5982 = vmatprep.subr.bf16.mxu1 %v15802_v28  ;;  %5850 = vmatpush1.bf16.msra.mxu0 %v15839_v37  ;;  %v15884_v28 = vld [vmem:[#allocation8 + $0x1968] ss:$72 sps:$4 sm:$0xff]  }
 0x239   :  { %5851 = vmatprep.subr.bf16.mxu0 %v15847_v38  ;;  %v15896_v37 = vld [vmem:[#allocation8 + $0x1a88] ss:$72 sps:$4 sm:$0xff]   ;;  %v15904_v38 = vld [vmem:[#allocation8 + $0x2c] ss:$72 sps:$4 sm:$0xff]  }
 0x23b   :  { %5983 = vmatpush1.bf16.msra.mxu1 %v15800_v30  ;;  %v15917_v30 = vld [vmem:[#allocation8 + $0x17b0] ss:$72 sps:$4 sm:$0xff]  }
 0x23c   :  { %5995 = vmatprep.subr.bf16.mxu1 %v15808_v31  ;;  %5852 = vmatpush1.bf16.msra.mxu0 %v15845_v41  ;;  %v15925_v31 = vld [vmem:[#allocation8 + $0x1844] ss:$72 sps:$4 sm:$0xff]   ;;  %v15902_v41 = vld [vmem:[#allocation8 + $0x28] ss:$72 sps:$4 sm:$0xff]  }
 0x23d   :  { %5853 = vmatprep.subr.bf16.mxu0 %v15853_v42  ;;  %v15910_v42 = vld [vmem:[#allocation8 + $0xbc] ss:$72 sps:$4 sm:$0xff]  }
 0x23e   :  { %5985 = vmatmul.mubr.bf16.vlgmr.msra.gmra.mrb[4].mxu1 %v18313_v10 }
 0x23f   :  { %5996 = vmatpush1.bf16.msra.mxu1 %v15806_v35  ;;  %6027 = vmatprep.mubr.bf16.mxu1 %v18315_v16  ;;  %v15923_v35 = vld [vmem:[#allocation8 + $0x1840] ss:$72 sps:$4 sm:$0xff]  }
 0x240   :  { %5997 = vmatprep.subr.bf16.mxu1 %v15814_v36  ;;  %5854 = vmatpush1.bf16.msra.mxu0 %v15851_v45  ;;  %v15931_v36 = vld [vmem:[#allocation8 + $0x18d4] ss:$72 sps:$4 sm:$0xff]   ;;  %v15908_v45 = vld [vmem:[#allocation8 + $0xb8] ss:$72 sps:$4 sm:$0xff]  }
 0x241   :  { %5866 = vmatprep.subr.bf16.mxu0 %v15859_v46  ;;  %v15916_v46 = vld [vmem:[#allocation8 + $0x14c] ss:$72 sps:$4 sm:$0xff]  }
 0x243   :  { %5998 = vmatpush1.bf16.msra.mxu1 %v15812_v39  ;;  %5856 = vmatmul.mubr.bf16.vlgmr.msra.gmra.mrb[4].mxu0 %v18313_v10  ;;  %v15929_v39 = vld [vmem:[#allocation8 + $0x18d0] ss:$72 sps:$4 sm:$0xff]  }
 0x244   :  { %5999 = vmatprep.subr.bf16.mxu1 %v15820_v40  ;;  %5867 = vmatpush1.bf16.msra.mxu0 %v15857_v49  ;;  %v15937_v40 = vld [vmem:[#allocation8 + $0x1964] ss:$72 sps:$4 sm:$0xff]   ;;  %v15914_v49 = vld [vmem:[#allocation8 + $0x148] ss:$72 sps:$4 sm:$0xff]  }
 0x245   :  { %5868 = vmatprep.subr.bf16.mxu0 %v15865_v50  ;;  %5898 = vmatprep.mubr.bf16.mxu0 %v18315_v16  ;;  %v15922_v50 = vld [vmem:[#allocation8 + $0x1dc] ss:$72 sps:$4 sm:$0xff]  }
 0x247   :  { %6000 = vmatpush1.bf16.msra.mxu1 %v15818_v43  ;;  %v15935_v43 = vld [vmem:[#allocation8 + $0x1960] ss:$72 sps:$4 sm:$0xff]  }
 0x248   :  { %6001 = vmatprep.subr.bf16.mxu1 %v15826_v44  ;;  %5869 = vmatpush1.bf16.msra.mxu0 %v15863_v53  ;;  %v15943_v44 = vld [vmem:[#allocation8 + $0x19f4] ss:$72 sps:$4 sm:$0xff]   ;;  %v15955_v53 = vld [vmem:[#allocation8 + $0x24] ss:$72 sps:$4 sm:$0xff]  }
 0x249   :  { %5870 = vmatprep.subr.bf16.mxu0 %v15871_v54  ;;  %v15920_v54 = vld [vmem:[#allocation8 + $0x1d8] ss:$72 sps:$4 sm:$0xff]  }
 0x24b   :  { %6002 = vmatpush1.bf16.msra.mxu1 %v15824_v47  ;;  %v15941_v47 = vld [vmem:[#allocation8 + $0x19f0] ss:$72 sps:$4 sm:$0xff]  }
 0x24c   :  { %6003 = vmatprep.subr.bf16.mxu1 %v15832_v48  ;;  %5871 = vmatpush1.bf16.msra.mxu0 %v15869_v57  ;;  %v15949_v48 = vld [vmem:[#allocation8 + $0x1a84] ss:$72 sps:$4 sm:$0xff]  }
 0x24d   :  { %5872 = vmatprep.subr.bf16.mxu0 %v15877_v58  ;;  %v15961_v58 = vld [vmem:[#allocation8 + $0xb4] ss:$72 sps:$4 sm:$0xff]  }
 0x24f   :  { %6004 = vmatpush1.bf16.msra.mxu1 %v15830_v51  ;;  %v15947_v51 = vld [vmem:[#allocation8 + $0x1a80] ss:$72 sps:$4 sm:$0xff]  }
 0x250   :  { %6005 = vmatprep.subr.bf16.mxu1 %v15838_v52  ;;  %5873 = vmatpush1.bf16.msra.mxu0 %v15875_v61  ;;  %v1112_v52 = vlaneseq  ;;  %v15934_v61 = vld [vmem:[#allocation8 + $0x2fc] ss:$72 sps:$4 sm:$0xff]  }
 0x251   :  { %5874 = vmatprep.subr.bf16.mxu0 %v15883_v62  ;;  %v15959_v62 = vld [vmem:[#allocation8 + $0xb0] ss:$72 sps:$4 sm:$0xff]  }
 0x252   :  { %v18337_v57 = vshrl.u32 %v1112_v52, 7 }
 0x253   :  { %6006 = vmatpush1.bf16.msra.mxu1 %v15836_v55  ;;  %v15928_v55 = vld [vmem:[#allocation8 + $0x26c] ss:$72 sps:$4 sm:$0xff]  }
 0x254   :  { %6007 = vmatprep.subr.bf16.mxu1 %v15844_v56  ;;  %5875 = vmatpush1.bf16.msra.mxu0 %v15881_v1  ;;  %v15953_v56 = vld [vmem:[#allocation8 + $0x20] ss:$72 sps:$4 sm:$0xff]   ;;  %v18344_v1 = vsub.s32 3, %v18337_v57 }
 0x255   :  { %5876 = vmatprep.subr.bf16.mxu0 %v15889_v3  ;;  %v15932_v3 = vld [vmem:[#allocation8 + $0x2f8] ss:$72 sps:$4 sm:$0xff]  }
 0x257   :  { %6008 = vmatpush1.bf16.msra.mxu1 %v15842_v59  ;;  %v15926_v59 = vld [vmem:[#allocation8 + $0x268] ss:$72 sps:$4 sm:$0xff]  }
 0x258   :  { %6009 = vmatprep.subr.bf16.mxu1 %v15850_v60  ;;  %5877 = vmatpush1.bf16.msra.mxu0 %v15887_v6  ;;  %v1106_v60 = vld [vmem:[#allocation9] sm:$0xff] }
 0x259   :  { %5878 = vmatprep.subr.bf16.mxu0 %v15895_v7  ;;  %v15973_v7 = vld [vmem:[#allocation8 + $0x1d4] ss:$72 sps:$4 sm:$0xff]  }
 0x25b   :  { %6010 = vmatpush1.bf16.msra.mxu1 %v15848_v63  ;;  %v18341_v63 = vsub.s32 2, %v18337_v57 }
 0x25c   :  { %6011 = vmatprep.subr.bf16.mxu1 %v15856_v0  ;;  %5879 = vmatpush1.bf16.msra.mxu0 %v15893_v11  ;;  %v15967_v0 = vld [vmem:[#allocation8 + $0x144] ss:$72 sps:$4 sm:$0xff]  }
 0x25d   :  { %5880 = vmatprep.subr.bf16.mxu0 %v15901_v12  ;;  %v1123_v6 = vrot.slane %v1106_v60, %v18341_v63 }
 0x25f   :  { %6012 = vmatpush1.bf16.msra.mxu1 %v15854_v4  ;;  %v15940_v4 = vld [vmem:[#allocation8 + $0x38c] ss:$72 sps:$4 sm:$0xff]  }
 0x260   :  { %6013 = vmatprep.subr.bf16.mxu1 %v15862_v5  ;;  %5881 = vmatpush1.bf16.msra.mxu0 %v15899_v15  ;;  %v15965_v5 = vld [vmem:[#allocation8 + $0x140] ss:$72 sps:$4 sm:$0xff]  }
 0x261   :  { %5882 = vmatprep.subr.bf16.mxu0 %v15907_v17 }
 0x263   :  { %6014 = vmatpush1.bf16.msra.mxu1 %v15860_v8 }
 0x264   :  { %6015 = vmatprep.subr.bf16.mxu1 %v15868_v9  ;;  %5883 = vmatpush1.bf16.msra.mxu0 %v15905_v22  ;;  %v1127_v9 = vrot.slane %v1106_v60, %v18344_v1  ;;  %v15979_v22 = vld [vmem:[#allocation8 + $0x264] ss:$72 sps:$4 sm:$0xff]  }
 0x265   :  { %5884 = vmatprep.subr.bf16.mxu0 %v15913_v23 }
 0x267   :  { %6016 = vmatpush1.bf16.msra.mxu1 %v15866_v13  ;;  %v15938_v13 = vld [vmem:[#allocation8 + $0x388] ss:$72 sps:$4 sm:$0xff]  }
 0x268   :  { %6017 = vmatprep.subr.bf16.mxu1 %v15874_v14  ;;  %5885 = vmatpush1.bf16.msra.mxu0 %v15911_v26  ;;  %v15971_v14 = vld [vmem:[#allocation8 + $0x1d0] ss:$72 sps:$4 sm:$0xff]  }
 0x269   :  { %5886 = vmatprep.subr.bf16.mxu0 %v15919_v27  ;;  %v18352_v27 = vsub.s32 0, %v18337_v57 }
 0x26b   :  { %6018 = vmatpush1.bf16.msra.mxu1 %v15872_v18 }
 0x26c   :  { %6019 = vmatprep.subr.bf16.mxu1 %v15880_v19  ;;  %5887 = vmatpush1.bf16.msra.mxu0 %v15917_v30  ;;  %v15946_v19 = vld [vmem:[#allocation8 + $0x41c] ss:$72 sps:$4 sm:$0xff]   ;;  %v15977_v30 = vld [vmem:[#allocation8 + $0x260] ss:$72 sps:$4 sm:$0xff]  }
 0x26d   :  { %5888 = vmatprep.subr.bf16.mxu0 %v15925_v31  ;;  %v18357_v31 = vsub.s32 1, %v18337_v57 }
 0x26f   :  { %6020 = vmatpush1.bf16.msra.mxu1 %v15878_v24 }
 0x270   :  { %6021 = vmatprep.subr.bf16.mxu1 %v15886_v25  ;;  %5889 = vmatpush1.bf16.msra.mxu0 %v15923_v35  ;;  %v15944_v25 = vld [vmem:[#allocation8 + $0x418] ss:$72 sps:$4 sm:$0xff]   ;;  %v15950_v35 = vld [vmem:[#allocation8 + $0x4a8] ss:$72 sps:$4 sm:$0xff]  }
 0x271   :  { %5890 = vmatprep.subr.bf16.mxu0 %v15931_v36  ;;  %v15958_v36 = vld [vmem:[#allocation8 + $0x53c] ss:$72 sps:$4 sm:$0xff]  }
 0x273   :  { %6022 = vmatpush1.bf16.msra.mxu1 %v15884_v28 }
 0x274   :  { %6023 = vmatprep.subr.bf16.mxu1 %v15892_v29  ;;  %5891 = vmatpush1.bf16.msra.mxu0 %v15929_v39  ;;  %v15952_v29 = vld [vmem:[#allocation8 + $0x4ac] ss:$72 sps:$4 sm:$0xff]  }
 0x275   :  { %5892 = vmatprep.subr.bf16.mxu0 %v15937_v40  ;;  %v15991_v39 = vld [vmem:[#allocation8 + $0x384] ss:$72 sps:$4 sm:$0xff]  }
 0x277   :  { %6024 = vmatpush1.bf16.msra.mxu1 %v15890_v32  ;;  %v15985_v32 = vld [vmem:[#allocation8 + $0x2f4] ss:$72 sps:$4 sm:$0xff]  }
 0x278   :  { %6025 = vmatprep.subr.bf16.mxu1 %v15898_v33  ;;  %5893 = vmatpush1.bf16.msra.mxu0 %v15935_v43  ;;  %v1115_v33 = vrot.slane %v1106_v60, %v18352_v27  ;;  %v15956_v43 = vld [vmem:[#allocation8 + $0x538] ss:$72 sps:$4 sm:$0xff]  }
 0x279   :  { %5894 = vmatprep.subr.bf16.mxu0 %v15943_v44 }
 0x27b   :  { %6026 = vmatpush1.bf16.msra.mxu1 %v15896_v37  ;;  %v1119_v37 = vrot.slane %v1106_v60, %v18357_v31  ;;  %v15976_v60 = vld [vmem:[#allocation8 + $0x6ec] ss:$72 sps:$4 sm:$0xff]  }
 0x27c   :  { %6167 = vmatprep.subr.bf16.mxu1 %v15904_v38  ;;  %5895 = vmatpush1.bf16.msra.mxu0 %v15941_v47  ;;  %v15983_v38 = vld [vmem:[#allocation8 + $0x2f0] ss:$72 sps:$4 sm:$0xff]   ;;  %v15964_v47 = vld [vmem:[#allocation8 + $0x5cc] ss:$72 sps:$4 sm:$0xff]  }
 0x27d   :  { %5896 = vmatprep.subr.bf16.mxu0 %v15949_v48 }
 0x27e   :  { %6028 = vmatmul.mubr.bf16.vlgmr.msra.gmra.mrb[4].mxu1 %v18321_v21 }
 0x27f   :  { %6168 = vmatpush1.bf16.msra.mxu1 %v15902_v41  ;;  %6199 = vmatprep.mubr.bf16.mxu1 %v18301_v34 }
 0x280   :  { %6169 = vmatprep.subr.bf16.mxu1 %v15910_v42  ;;  %5897 = vmatpush1.bf16.msra.mxu0 %v15947_v51 }
 0x281   :  { %6038 = vmatprep.subr.bf16.mxu0 %v15955_v53  ;;  %v15962_v53 = vld [vmem:[#allocation8 + $0x5c8] ss:$72 sps:$4 sm:$0xff]  }
 0x283   :  { %6170 = vmatpush1.bf16.msra.mxu1 %v15908_v45  ;;  %5899 = vmatmul.mubr.bf16.vlgmr.msra.gmra.mrb[4].mxu0 %v18321_v21 }
 0x284   :  { %6171 = vmatprep.subr.bf16.mxu1 %v15916_v46  ;;  %6039 = vmatpush1.bf16.msra.mxu0 %v15953_v56  ;;  %v15989_v46 = vld [vmem:[#allocation8 + $0x380] ss:$72 sps:$4 sm:$0xff]   ;;  %v15995_v56 = vld [vmem:[#allocation8 + $0x410] ss:$72 sps:$4 sm:$0xff]  }
 0x285   :  { %6040 = vmatprep.subr.bf16.mxu0 %v15961_v58  ;;  %6070 = vmatprep.mubr.bf16.mxu0 %v18301_v34  ;;  %v16003_v58 = vld [vmem:[#allocation8 + $0x4a4] ss:$72 sps:$4 sm:$0xff]  }
 0x287   :  { %6172 = vmatpush1.bf16.msra.mxu1 %v15914_v49 }
 0x288   :  { %6173 = vmatprep.subr.bf16.mxu1 %v15922_v50  ;;  %6041 = vmatpush1.bf16.msra.mxu0 %v15959_v62  ;;  %v15997_v50 = vld [vmem:[#allocation8 + $0x414] ss:$72 sps:$4 sm:$0xff]  }
 0x289   :  { %6042 = vmatprep.subr.bf16.mxu0 %v15967_v0  ;;  %v16009_v62 = vld [vmem:[#allocation8 + $0x534] ss:$72 sps:$4 sm:$0xff]   ;;  %v15974_v0 = vld [vmem:[#allocation8 + $0x6e8] ss:$72 sps:$4 sm:$0xff]  }
 0x28b   :  { %6174 = vmatpush1.bf16.msra.mxu1 %v15920_v54  ;;  %v15970_v54 = vld [vmem:[#allocation8 + $0x65c] ss:$72 sps:$4 sm:$0xff]  }
 0x28c   :  { %6175 = vmatprep.subr.bf16.mxu1 %v15928_v55  ;;  %6043 = vmatpush1.bf16.msra.mxu0 %v15965_v5  ;;  %v16015_v5 = vld [vmem:[#allocation8 + $0x5c4] ss:$72 sps:$4 sm:$0xff]  }
 0x28d   :  { %6044 = vmatprep.subr.bf16.mxu0 %v15973_v7  ;;  %v15988_v7 = vld [vmem:[#allocation8 + $0x80c] ss:$72 sps:$4 sm:$0xff]  }
 0x28f   :  { %6176 = vmatpush1.bf16.msra.mxu1 %v15926_v59  ;;  %v15968_v59 = vld [vmem:[#allocation8 + $0x658] ss:$72 sps:$4 sm:$0xff]  }
 0x290   :  { %6177 = vmatprep.subr.bf16.mxu1 %v15934_v61  ;;  %6045 = vmatpush1.bf16.msra.mxu0 %v15971_v14  ;;  %v16001_v61 = vld [vmem:[#allocation8 + $0x4a0] ss:$72 sps:$4 sm:$0xff]   ;;  %v16027_v14 = vld [vmem:[#allocation8 + $0x6e4] ss:$72 sps:$4 sm:$0xff]  }
 0x291   :  { %v5771_v8 = vpop.f32.mrb[0].mxu1  ;;  %6046 = vmatprep.subr.bf16.mxu0 %v15979_v22  ;;  %v15998_v22 = vld [vmem:[#allocation8 + $0x928] ss:$72 sps:$4 sm:$0xff]  }
 0x292   :  { %v5773_v11 = vpop.f32.mrb[1].mxu1  ;;  %v15147_v15 = vadd.f32 %v5771_v8, %v1123_v6  ;;  %v16013_v8 = vld [vmem:[#allocation8 + $0x5c0] ss:$72 sps:$4 sm:$0xff]  }
 0x293   :  { %v5775_v12 = vpop.f32.mrb[2].mxu1  ;;  %6178 = vmatpush1.bf16.msra.mxu1 %v15932_v3  ;;  %v15148_v23 = vadd.f32 %v5773_v11, %v1127_v9  ;;  %v15982_v3 = vld [vmem:[#allocation8 + $0x77c] ss:$72 sps:$4 sm:$0xff]   ;;  %v15986_v11 = vld [vmem:[#allocation8 + $0x808] ss:$72 sps:$4 sm:$0xff]  }
 0x294   :  { %v15149_v17 = vadd.f32 %v5775_v12, %v1123_v6  ;;  %v5777_v18 = vpop.f32.mrb[3].mxu1  ;;  %6179 = vmatprep.subr.bf16.mxu1 %v15940_v4  ;;  %6047 = vmatpush1.bf16.msra.mxu0 %v15977_v30  ;;  %v16007_v4 = vld [vmem:[#allocation8 + $0x530] ss:$72 sps:$4 sm:$0xff]   ;;  %v15994_v12 = vld [vmem:[#allocation8 + $0x89c] ss:$72 sps:$4 sm:$0xff]  }
 0x295   :  { %v15150_v24 = vadd.f32 %v5777_v18, %v1127_v9  ;;  %6048 = vmatprep.subr.bf16.mxu0 %v15985_v32  ;;  %v15980_v6 = vld [vmem:[#allocation8 + $0x778] ss:$72 sps:$4 sm:$0xff]   ;;  %v16021_v9 = vld [vmem:[#allocation8 + $0x654] ss:$72 sps:$4 sm:$0xff]  }
 0x296   :  { %v18349_v26 = vpack.c.bf16 %v15149_v17, %v15147_v15  ;;  %v5642_v40 = vpop.f32.mrb[0].mxu0  ;;  %v15992_v15 = vld [vmem:[#allocation8 + $0x898] ss:$72 sps:$4 sm:$0xff]   ;;  %v16000_v17 = vld [vmem:[#allocation8 + $0x92c] ss:$72 sps:$4 sm:$0xff]  }
 0x297   :  { %v18354_v28 = vpack.c.bf16 %v15150_v24, %v15148_v23  ;;  %6180 = vmatpush1.bf16.msra.mxu1 %v15938_v13  ;;  %v15143_v41 = vadd.f32 %v5642_v40, %v1115_v33  ;;  %v5644_v42 = vpop.f32.mrb[1].mxu0  ;;  %v16019_v13 = vld [vmem:[#allocation8 + $0x650] ss:$72 sps:$4 sm:$0xff]   ;;  %v16025_v18 = vld [vmem:[#allocation8 + $0x6e0] ss:$72 sps:$4 sm:$0xff]  }
 0x298   :  { %6181 = vmatprep.subr.bf16.mxu1 %v15946_v19  ;;  %v15144_v44 = vadd.f32 %v5644_v42, %v1119_v37  ;;  %v5646_v45 = vpop.f32.mrb[2].mxu0  ;;  %6049 = vmatpush1.bf16.msra.mxu0 %v15983_v38  ;;  %v16033_v19 = vld [vmem:[#allocation8 + $0x774] ss:$72 sps:$4 sm:$0xff]   ;;  %v16031_v24 = vld [vmem:[#allocation8 + $0x770] ss:$72 sps:$4 sm:$0xff]  }
 0x299   :  { %v15145_v48 = vadd.f32 %v5646_v45, %v1115_v33  ;;  %v5648_v49 = vpop.f32.mrb[3].mxu0  ;;  %6050 = vmatprep.subr.bf16.mxu0 %v15991_v39  ;;  %v16006_v23 = vld [vmem:[#allocation8 + $0x9bc] ss:$72 sps:$4 sm:$0xff]   ;;  %v16012_v30 = vld [vmem:[#allocation8 + $0xa4c] ss:$72 sps:$4 sm:$0xff]  }
 0x29a   :  { %v15146_v51 = vadd.f32 %v5648_v49, %v1119_v37  ;;  %v16037_v32 = vld [vmem:[#allocation8 + $0x800] ss:$72 sps:$4 sm:$0xff]   ;;  %v16045_v33 = vld [vmem:[#allocation8 + $0x894] ss:$72 sps:$4 sm:$0xff]   ;;  %v16043_v37 = vld [vmem:[#allocation8 + $0x890] ss:$72 sps:$4 sm:$0xff]  }
 0x29b   :  { %6182 = vmatpush1.bf16.msra.mxu1 %v15944_v25  ;;  %v18361_v52 = vpack.c.bf16 %v15145_v48, %v15143_v41  ;;  %v16039_v25 = vld [vmem:[#allocation8 + $0x804] ss:$72 sps:$4 sm:$0xff]   ;;  %v16016_v39 = vld [vmem:[#allocation8 + $0xad8] ss:$72 sps:$4 sm:$0xff]   ;;  %v16057_v42 = vld [vmem:[#allocation8 + $0x9b4] ss:$72 sps:$4 sm:$0xff]  }
 0x29c   :  { %6183 = vmatprep.subr.bf16.mxu1 %v15952_v29  ;;  %v18363_v55 = vpack.c.bf16 %v15146_v51, %v15144_v44  ;;  %6051 = vmatpush1.bf16.msra.mxu0 %v15989_v46  ;;  %v16004_v29 = vld [vmem:[#allocation8 + $0x9b8] ss:$72 sps:$4 sm:$0xff]   ;;  %v16051_v38 = vld [vmem:[#allocation8 + $0x924] ss:$72 sps:$4 sm:$0xff]   ;;  %v16034_v51 = vld [vmem:[#allocation8 + $0xc88] ss:$72 sps:$4 sm:$0xff]  }
 0x29d   :  { %6052 = vmatprep.subr.bf16.mxu0 %v15997_v50  ;;  %v16024_v40 = vld [vmem:[#allocation8 + $0xb6c] ss:$72 sps:$4 sm:$0xff]   ;;  %v16049_v41 = vld [vmem:[#allocation8 + $0x920] ss:$72 sps:$4 sm:$0xff]   ;;  %v16030_v44 = vld [vmem:[#allocation8 + $0xbfc] ss:$72 sps:$4 sm:$0xff]  }
 0x29e   :  { %v16055_v45 = vld [vmem:[#allocation8 + $0x9b0] ss:$72 sps:$4 sm:$0xff]   ;;  %v16063_v46 = vld [vmem:[#allocation8 + $0xa44] ss:$72 sps:$4 sm:$0xff]   ;;  %v16061_v48 = vld [vmem:[#allocation8 + $0xa40] ss:$72 sps:$4 sm:$0xff]  }
 0x29f   :  { %6184 = vmatpush1.bf16.msra.mxu1 %v15950_v35  ;;  %v16010_v35 = vld [vmem:[#allocation8 + $0xa48] ss:$72 sps:$4 sm:$0xff]   ;;  %v16036_v49 = vld [vmem:[#allocation8 + $0xc8c] ss:$72 sps:$4 sm:$0xff]  }
 0x2a0   :  { %6185 = vmatprep.subr.bf16.mxu1 %v15958_v36  ;;  %6053 = vmatpush1.bf16.msra.mxu0 %v15995_v56  ;;  %v16018_v36 = vld [vmem:[#allocation8 + $0xadc] ss:$72 sps:$4 sm:$0xff]  }
 0x2a1   :  { %6054 = vmatprep.subr.bf16.mxu0 %v16003_v58  ;;  %v16069_v50 = vld [vmem:[#allocation8 + $0xad4] ss:$72 sps:$4 sm:$0xff]   ;;  %v16075_v56 = vld [vmem:[#allocation8 + $0xb64] ss:$72 sps:$4 sm:$0xff]   ;;  %v16040_v58 = vld [vmem:[#allocation8 + $0xd18] ss:$72 sps:$4 sm:$0xff]  }
 0x2a3   :  { %6186 = vmatpush1.bf16.msra.mxu1 %v15956_v43  ;;  %v16022_v43 = vld [vmem:[#allocation8 + $0xb68] ss:$72 sps:$4 sm:$0xff]  }
 0x2a4   :  { %6187 = vmatprep.subr.bf16.mxu1 %v15964_v47  ;;  %6055 = vmatpush1.bf16.msra.mxu0 %v16001_v61  ;;  %v16028_v47 = vld [vmem:[#allocation8 + $0xbf8] ss:$72 sps:$4 sm:$0xff]   ;;  %v16081_v61 = vld [vmem:[#allocation8 + $0xbf4] ss:$72 sps:$4 sm:$0xff]  }
 0x2a5   :  { %6056 = vmatprep.subr.bf16.mxu0 %v16009_v62  ;;  %v16046_v62 = vld [vmem:[#allocation8 + $0xda8] ss:$72 sps:$4 sm:$0xff]  }
 0x2a7   :  { %6188 = vmatpush1.bf16.msra.mxu1 %v15962_v53  ;;  %v16067_v53 = vld [vmem:[#allocation8 + $0xad0] ss:$72 sps:$4 sm:$0xff]  }
 0x2a8   :  { %6189 = vmatprep.subr.bf16.mxu1 %v15970_v54  ;;  %6057 = vmatpush1.bf16.msra.mxu0 %v16007_v4  ;;  %v16042_v54 = vld [vmem:[#allocation8 + $0xd1c] ss:$72 sps:$4 sm:$0xff]  }
 0x2a9   :  { %6058 = vmatprep.subr.bf16.mxu0 %v16015_v5  ;;  %v16087_v4 = vld [vmem:[#allocation8 + $0xc84] ss:$72 sps:$4 sm:$0xff]   ;;  %v16052_v5 = vld [vmem:[#allocation8 + $0xe38] ss:$72 sps:$4 sm:$0xff]  }
 0x2ab   :  { %6190 = vmatpush1.bf16.msra.mxu1 %v15968_v59  ;;  %v16073_v59 = vld [vmem:[#allocation8 + $0xb60] ss:$72 sps:$4 sm:$0xff]  }
 0x2ac   :  { %6191 = vmatprep.subr.bf16.mxu1 %v15976_v60  ;;  %6059 = vmatpush1.bf16.msra.mxu0 %v16013_v8  ;;  %v16048_v60 = vld [vmem:[#allocation8 + $0xdac] ss:$72 sps:$4 sm:$0xff]  }
 0x2ad   :  { %6060 = vmatprep.subr.bf16.mxu0 %v16021_v9  ;;  %v16093_v8 = vld [vmem:[#allocation8 + $0xd14] ss:$72 sps:$4 sm:$0xff]   ;;  %v16058_v9 = vld [vmem:[#allocation8 + $0xec8] ss:$72 sps:$4 sm:$0xff]  }
 0x2af   :  { %6192 = vmatpush1.bf16.msra.mxu1 %v15974_v0  ;;  %v16079_v0 = vld [vmem:[#allocation8 + $0xbf0] ss:$72 sps:$4 sm:$0xff]  }
 0x2b0   :  { %6193 = vmatprep.subr.bf16.mxu1 %v15982_v3  ;;  %6061 = vmatpush1.bf16.msra.mxu0 %v16019_v13  ;;  %v16054_v3 = vld [vmem:[#allocation8 + $0xe3c] ss:$72 sps:$4 sm:$0xff]  }
 0x2b1   :  { %6062 = vmatprep.subr.bf16.mxu0 %v16027_v14  ;;  %v16099_v13 = vld [vmem:[#allocation8 + $0xda4] ss:$72 sps:$4 sm:$0xff]   ;;  %v16064_v14 = vld [vmem:[#allocation8 + $0xf58] ss:$72 sps:$4 sm:$0xff]  }
 0x2b3   :  { %6194 = vmatpush1.bf16.msra.mxu1 %v15980_v6  ;;  %v16060_v6 = vld [vmem:[#allocation8 + $0xecc] ss:$72 sps:$4 sm:$0xff]  }
 0x2b4   :  { %6195 = vmatprep.subr.bf16.mxu1 %v15988_v7  ;;  %6063 = vmatpush1.bf16.msra.mxu0 %v16025_v18  ;;  %v16085_v7 = vld [vmem:[#allocation8 + $0xc80] ss:$72 sps:$4 sm:$0xff]   ;;  %v16105_v18 = vld [vmem:[#allocation8 + $0xe34] ss:$72 sps:$4 sm:$0xff]  }
 0x2b5   :  { %6064 = vmatprep.subr.bf16.mxu0 %v16033_v19  ;;  %v16070_v19 = vld [vmem:[#allocation8 + $0xfe8] ss:$72 sps:$4 sm:$0xff]  }
 0x2b7   :  { %6196 = vmatpush1.bf16.msra.mxu1 %v15986_v11  ;;  %v16066_v11 = vld [vmem:[#allocation8 + $0xf5c] ss:$72 sps:$4 sm:$0xff]  }
 0x2b8   :  { %6197 = vmatprep.subr.bf16.mxu1 %v15994_v12  ;;  %6065 = vmatpush1.bf16.msra.mxu0 %v16031_v24  ;;  %v16091_v12 = vld [vmem:[#allocation8 + $0xd10] ss:$72 sps:$4 sm:$0xff]   ;;  %v16111_v24 = vld [vmem:[#allocation8 + $0xec4] ss:$72 sps:$4 sm:$0xff]  }
 0x2b9   :  { %6066 = vmatprep.subr.bf16.mxu0 %v16039_v25  ;;  %v16076_v25 = vld [vmem:[#allocation8 + $0x1078] ss:$72 sps:$4 sm:$0xff]  }
 0x2bb   :  { %6198 = vmatpush1.bf16.msra.mxu1 %v15992_v15  ;;  %v16072_v15 = vld [vmem:[#allocation8 + $0xfec] ss:$72 sps:$4 sm:$0xff]  }
 0x2bc   :  { %6210 = vmatprep.subr.bf16.mxu1 %v16000_v17  ;;  %6067 = vmatpush1.bf16.msra.mxu0 %v16037_v32  ;;  %v16097_v17 = vld [vmem:[#allocation8 + $0xda0] ss:$72 sps:$4 sm:$0xff]   ;;  %v16117_v32 = vld [vmem:[#allocation8 + $0xf54] ss:$72 sps:$4 sm:$0xff]  }
 0x2bd   :  { %6068 = vmatprep.subr.bf16.mxu0 %v16045_v33  ;;  %v16082_v33 = vld [vmem:[#allocation8 + $0x1108] ss:$72 sps:$4 sm:$0xff]  }
 0x2be   :  { %6200 = vmatmul.mubr.bf16.vlgmr.msra.gmra.mrb[8].mxu1 %v18305_v2 }
 0x2bf   :  { %6211 = vmatpush1.bf16.msra.mxu1 %v15998_v22  ;;  %6242 = vmatprep.mubr.bf16.mxu1 %v18308_v20  ;;  %v16078_v22 = vld [vmem:[#allocation8 + $0x107c] ss:$72 sps:$4 sm:$0xff]  }
 0x2c0   :  { %6212 = vmatprep.subr.bf16.mxu1 %v16006_v23  ;;  %6069 = vmatpush1.bf16.msra.mxu0 %v16043_v37  ;;  %v16103_v23 = vld [vmem:[#allocation8 + $0xe30] ss:$72 sps:$4 sm:$0xff]   ;;  %v16123_v37 = vld [vmem:[#allocation8 + $0xfe4] ss:$72 sps:$4 sm:$0xff]  }
 0x2c1   :  { %6081 = vmatprep.subr.bf16.mxu0 %v16051_v38  ;;  %v16088_v38 = vld [vmem:[#allocation8 + $0x1198] ss:$72 sps:$4 sm:$0xff]  }
 0x2c3   :  { %6213 = vmatpush1.bf16.msra.mxu1 %v16004_v29  ;;  %6071 = vmatmul.mubr.bf16.vlgmr.msra.gmra.mrb[8].mxu0 %v18305_v2  ;;  %v16084_v29 = vld [vmem:[#allocation8 + $0x110c] ss:$72 sps:$4 sm:$0xff]  }
 0x2c4   :  { %6214 = vmatprep.subr.bf16.mxu1 %v16012_v30  ;;  %6082 = vmatpush1.bf16.msra.mxu0 %v16049_v41  ;;  %v16109_v30 = vld [vmem:[#allocation8 + $0xec0] ss:$72 sps:$4 sm:$0xff]   ;;  %v16129_v41 = vld [vmem:[#allocation8 + $0x1074] ss:$72 sps:$4 sm:$0xff]  }
 0x2c5   :  { %6083 = vmatprep.subr.bf16.mxu0 %v16057_v42  ;;  %6113 = vmatprep.mubr.bf16.mxu0 %v18308_v20  ;;  %v16094_v42 = vld [vmem:[#allocation8 + $0x1228] ss:$72 sps:$4 sm:$0xff]  }
 0x2c7   :  { %6215 = vmatpush1.bf16.msra.mxu1 %v16010_v35  ;;  %v16115_v35 = vld [vmem:[#allocation8 + $0xf50] ss:$72 sps:$4 sm:$0xff]  }
 0x2c8   :  { %6216 = vmatprep.subr.bf16.mxu1 %v16018_v36  ;;  %6084 = vmatpush1.bf16.msra.mxu0 %v16055_v45  ;;  %v16090_v36 = vld [vmem:[#allocation8 + $0x119c] ss:$72 sps:$4 sm:$0xff]  }
 0x2c9   :  { %6085 = vmatprep.subr.bf16.mxu0 %v16063_v46  ;;  %v16135_v45 = vld [vmem:[#allocation8 + $0x1104] ss:$72 sps:$4 sm:$0xff]   ;;  %v16100_v46 = vld [vmem:[#allocation8 + $0x12b8] ss:$72 sps:$4 sm:$0xff]  }
 0x2cb   :  { %6217 = vmatpush1.bf16.msra.mxu1 %v16016_v39  ;;  %v16096_v39 = vld [vmem:[#allocation8 + $0x122c] ss:$72 sps:$4 sm:$0xff]  }
 0x2cc   :  { %6218 = vmatprep.subr.bf16.mxu1 %v16024_v40  ;;  %6086 = vmatpush1.bf16.msra.mxu0 %v16061_v48  ;;  %v16121_v40 = vld [vmem:[#allocation8 + $0xfe0] ss:$72 sps:$4 sm:$0xff]  }
 0x2cd   :  { %6087 = vmatprep.subr.bf16.mxu0 %v16069_v50  ;;  %v16133_v48 = vld [vmem:[#allocation8 + $0x1100] ss:$72 sps:$4 sm:$0xff]  }
 0x2ce   :  { %v16106_v50 = vld [vmem:[#allocation8 + $0x1348] ss:$72 sps:$4 sm:$0xff]  }
 0x2cf   :  { %6219 = vmatpush1.bf16.msra.mxu1 %v16022_v43  ;;  %v16102_v43 = vld [vmem:[#allocation8 + $0x12bc] ss:$72 sps:$4 sm:$0xff]  }
 0x2d0   :  { %6220 = vmatprep.subr.bf16.mxu1 %v16030_v44  ;;  %6088 = vmatpush1.bf16.msra.mxu0 %v16067_v53  ;;  %v16127_v44 = vld [vmem:[#allocation8 + $0x1070] ss:$72 sps:$4 sm:$0xff]  }
 0x2d1   :  { %6089 = vmatprep.subr.bf16.mxu0 %v16075_v56  ;;  %v16139_v53 = vld [vmem:[#allocation8 + $0x1190] ss:$72 sps:$4 sm:$0xff]  }
 0x2d2   :  { %v16112_v56 = vld [vmem:[#allocation8 + $0x13d8] ss:$72 sps:$4 sm:$0xff]  }
 0x2d3   :  { %6221 = vmatpush1.bf16.msra.mxu1 %v16028_v47  ;;  %v16108_v47 = vld [vmem:[#allocation8 + $0x134c] ss:$72 sps:$4 sm:$0xff]  }
 0x2d4   :  { %6222 = vmatprep.subr.bf16.mxu1 %v16036_v49  ;;  %6090 = vmatpush1.bf16.msra.mxu0 %v16073_v59  ;;  %v16141_v49 = vld [vmem:[#allocation8 + $0x1194] ss:$72 sps:$4 sm:$0xff]   ;;  %v16145_v59 = vld [vmem:[#allocation8 + $0x1220] ss:$72 sps:$4 sm:$0xff]  }
 0x2d5   :  { %6091 = vmatprep.subr.bf16.mxu0 %v16081_v61  ;;  %v16118_v61 = vld [vmem:[#allocation8 + $0x1468] ss:$72 sps:$4 sm:$0xff]  }
 0x2d7   :  { %6223 = vmatpush1.bf16.msra.mxu1 %v16034_v51  ;;  %v16114_v51 = vld [vmem:[#allocation8 + $0x13dc] ss:$72 sps:$4 sm:$0xff]  }
 0x2d8   :  { %6224 = vmatprep.subr.bf16.mxu1 %v16042_v54  ;;  %6092 = vmatpush1.bf16.msra.mxu0 %v16079_v0  ;;  %v16147_v54 = vld [vmem:[#allocation8 + $0x1224] ss:$72 sps:$4 sm:$0xff]   ;;  %v16151_v0 = vld [vmem:[#allocation8 + $0x12b0] ss:$72 sps:$4 sm:$0xff]  }
 0x2d9   :  { %6093 = vmatprep.subr.bf16.mxu0 %v16087_v4  ;;  %v16124_v4 = vld [vmem:[#allocation8 + $0x14f8] ss:$72 sps:$4 sm:$0xff]  }
 0x2db   :  { %6225 = vmatpush1.bf16.msra.mxu1 %v16040_v58  ;;  %v16120_v58 = vld [vmem:[#allocation8 + $0x146c] ss:$72 sps:$4 sm:$0xff]  }
 0x2dc   :  { %6226 = vmatprep.subr.bf16.mxu1 %v16048_v60  ;;  %6094 = vmatpush1.bf16.msra.mxu0 %v16085_v7  ;;  %v16153_v60 = vld [vmem:[#allocation8 + $0x12b4] ss:$72 sps:$4 sm:$0xff]  }
 0x2dd   :  { %6095 = vmatprep.subr.bf16.mxu0 %v16093_v8  ;;  %v16165_v7 = vld [vmem:[#allocation8 + $0x13d4] ss:$72 sps:$4 sm:$0xff]   ;;  %v16130_v8 = vld [vmem:[#allocation8 + $0x1588] ss:$72 sps:$4 sm:$0xff]  }
 0x2df   :  { %6227 = vmatpush1.bf16.msra.mxu1 %v16046_v62  ;;  %v16126_v62 = vld [vmem:[#allocation8 + $0x14fc] ss:$72 sps:$4 sm:$0xff]  }
 0x2e0   :  { %6228 = vmatprep.subr.bf16.mxu1 %v16054_v3  ;;  %6096 = vmatpush1.bf16.msra.mxu0 %v16091_v12  ;;  %v16159_v3 = vld [vmem:[#allocation8 + $0x1344] ss:$72 sps:$4 sm:$0xff]  }
 0x2e1   :  { %6097 = vmatprep.subr.bf16.mxu0 %v16099_v13  ;;  %v16171_v12 = vld [vmem:[#allocation8 + $0x1464] ss:$72 sps:$4 sm:$0xff]   ;;  %v16136_v13 = vld [vmem:[#allocation8 + $0x1618] ss:$72 sps:$4 sm:$0xff]  }
 0x2e3   :  { %6229 = vmatpush1.bf16.msra.mxu1 %v16052_v5  ;;  %v16132_v5 = vld [vmem:[#allocation8 + $0x158c] ss:$72 sps:$4 sm:$0xff]  }
 0x2e4   :  { %6230 = vmatprep.subr.bf16.mxu1 %v16060_v6  ;;  %6098 = vmatpush1.bf16.msra.mxu0 %v16097_v17  ;;  %v16157_v6 = vld [vmem:[#allocation8 + $0x1340] ss:$72 sps:$4 sm:$0xff]   ;;  %v16177_v17 = vld [vmem:[#allocation8 + $0x14f4] ss:$72 sps:$4 sm:$0xff]  }
 0x2e5   :  { %6099 = vmatprep.subr.bf16.mxu0 %v16105_v18  ;;  %v16142_v18 = vld [vmem:[#allocation8 + $0x16a8] ss:$72 sps:$4 sm:$0xff]  }
 0x2e7   :  { %6231 = vmatpush1.bf16.msra.mxu1 %v16058_v9  ;;  %v16138_v9 = vld [vmem:[#allocation8 + $0x161c] ss:$72 sps:$4 sm:$0xff]  }
 0x2e8   :  { %6232 = vmatprep.subr.bf16.mxu1 %v16066_v11  ;;  %6100 = vmatpush1.bf16.msra.mxu0 %v16103_v23  ;;  %v16163_v11 = vld [vmem:[#allocation8 + $0x13d0] ss:$72 sps:$4 sm:$0xff]   ;;  %v16183_v23 = vld [vmem:[#allocation8 + $0x1584] ss:$72 sps:$4 sm:$0xff]  }
 0x2e9   :  { %6101 = vmatprep.subr.bf16.mxu0 %v16111_v24  ;;  %v16148_v24 = vld [vmem:[#allocation8 + $0x1738] ss:$72 sps:$4 sm:$0xff]  }
 0x2eb   :  { %6233 = vmatpush1.bf16.msra.mxu1 %v16064_v14  ;;  %v16144_v14 = vld [vmem:[#allocation8 + $0x16ac] ss:$72 sps:$4 sm:$0xff]  }
 0x2ec   :  { %6234 = vmatprep.subr.bf16.mxu1 %v16072_v15  ;;  %6102 = vmatpush1.bf16.msra.mxu0 %v16109_v30  ;;  %v16169_v15 = vld [vmem:[#allocation8 + $0x1460] ss:$72 sps:$4 sm:$0xff]   ;;  %v16189_v30 = vld [vmem:[#allocation8 + $0x1614] ss:$72 sps:$4 sm:$0xff]  }
 0x2ed   :  { %6103 = vmatprep.subr.bf16.mxu0 %v16117_v32  ;;  %v16154_v32 = vld [vmem:[#allocation8 + $0x17c8] ss:$72 sps:$4 sm:$0xff]  }
 0x2ef   :  { %6235 = vmatpush1.bf16.msra.mxu1 %v16070_v19  ;;  %v16150_v19 = vld [vmem:[#allocation8 + $0x173c] ss:$72 sps:$4 sm:$0xff]  }
 0x2f0   :  { %6236 = vmatprep.subr.bf16.mxu1 %v16078_v22  ;;  %6104 = vmatpush1.bf16.msra.mxu0 %v16115_v35  ;;  %v16175_v22 = vld [vmem:[#allocation8 + $0x14f0] ss:$72 sps:$4 sm:$0xff]  }
 0x2f1   :  { %6105 = vmatprep.subr.bf16.mxu0 %v16123_v37  ;;  %v16187_v35 = vld [vmem:[#allocation8 + $0x1610] ss:$72 sps:$4 sm:$0xff]  }
 0x2f2   :  { %v16160_v37 = vld [vmem:[#allocation8 + $0x1858] ss:$72 sps:$4 sm:$0xff]  }
 0x2f3   :  { %6237 = vmatpush1.bf16.msra.mxu1 %v16076_v25  ;;  %v16156_v25 = vld [vmem:[#allocation8 + $0x17cc] ss:$72 sps:$4 sm:$0xff]  }
 0x2f4   :  { %6238 = vmatprep.subr.bf16.mxu1 %v16084_v29  ;;  %6106 = vmatpush1.bf16.msra.mxu0 %v16121_v40  ;;  %v16181_v29 = vld [vmem:[#allocation8 + $0x1580] ss:$72 sps:$4 sm:$0xff]   ;;  %v16201_v40 = vld [vmem:[#allocation8 + $0x1734] ss:$72 sps:$4 sm:$0xff]  }
 0x2f5   :  { %6107 = vmatprep.subr.bf16.mxu0 %v16129_v41  ;;  %v16166_v41 = vld [vmem:[#allocation8 + $0x18e8] ss:$72 sps:$4 sm:$0xff]  }
 0x2f7   :  { %6239 = vmatpush1.bf16.msra.mxu1 %v16082_v33  ;;  %v16162_v33 = vld [vmem:[#allocation8 + $0x185c] ss:$72 sps:$4 sm:$0xff]  }
 0x2f8   :  { %6240 = vmatprep.subr.bf16.mxu1 %v16090_v36  ;;  %6108 = vmatpush1.bf16.msra.mxu0 %v16127_v44  ;;  %v16195_v36 = vld [vmem:[#allocation8 + $0x16a4] ss:$72 sps:$4 sm:$0xff]  }
 0x2f9   :  { %6109 = vmatprep.subr.bf16.mxu0 %v16135_v45  ;;  %v16207_v44 = vld [vmem:[#allocation8 + $0x17c4] ss:$72 sps:$4 sm:$0xff]   ;;  %v16172_v45 = vld [vmem:[#allocation8 + $0x1978] ss:$72 sps:$4 sm:$0xff]  }
 0x2fb   :  { %6241 = vmatpush1.bf16.msra.mxu1 %v16088_v38  ;;  %v16168_v38 = vld [vmem:[#allocation8 + $0x18ec] ss:$72 sps:$4 sm:$0xff]  }
 0x2fc   :  { %6253 = vmatprep.subr.bf16.mxu1 %v16096_v39  ;;  %6110 = vmatpush1.bf16.msra.mxu0 %v16133_v48  ;;  %v16193_v39 = vld [vmem:[#allocation8 + $0x16a0] ss:$72 sps:$4 sm:$0xff]   ;;  %v16213_v48 = vld [vmem:[#allocation8 + $0x1854] ss:$72 sps:$4 sm:$0xff]  }
 0x2fd   :  { %6111 = vmatprep.subr.bf16.mxu0 %v16141_v49  ;;  %v16178_v49 = vld [vmem:[#allocation8 + $0x1a08] ss:$72 sps:$4 sm:$0xff]  }
 0x2fe   :  { %6243 = vmatmul.mubr.bf16.vlgmr.msra.gmra.mrb[8].mxu1 %v18313_v10 }
 0x2ff   :  { %6254 = vmatpush1.bf16.msra.mxu1 %v16094_v42  ;;  %6285 = vmatprep.mubr.bf16.mxu1 %v18315_v16  ;;  %v16174_v42 = vld [vmem:[#allocation8 + $0x197c] ss:$72 sps:$4 sm:$0xff]  }
 0x300   :  { %6255 = vmatprep.subr.bf16.mxu1 %v16102_v43  ;;  %6112 = vmatpush1.bf16.msra.mxu0 %v16139_v53  ;;  %v16199_v43 = vld [vmem:[#allocation8 + $0x1730] ss:$72 sps:$4 sm:$0xff]   ;;  %v16219_v53 = vld [vmem:[#allocation8 + $0x18e4] ss:$72 sps:$4 sm:$0xff]  }
 0x301   :  { %6124 = vmatprep.subr.bf16.mxu0 %v16147_v54  ;;  %v16184_v54 = vld [vmem:[#allocation8 + $0x1a98] ss:$72 sps:$4 sm:$0xff]  }
 0x303   :  { %6256 = vmatpush1.bf16.msra.mxu1 %v16100_v46  ;;  %6114 = vmatmul.mubr.bf16.vlgmr.msra.gmra.mrb[8].mxu0 %v18313_v10  ;;  %v16180_v46 = vld [vmem:[#allocation8 + $0x1a0c] ss:$72 sps:$4 sm:$0xff]  }
 0x304   :  { %6257 = vmatprep.subr.bf16.mxu1 %v16108_v47  ;;  %6125 = vmatpush1.bf16.msra.mxu0 %v16145_v59  ;;  %v16205_v47 = vld [vmem:[#allocation8 + $0x17c0] ss:$72 sps:$4 sm:$0xff]   ;;  %v16225_v59 = vld [vmem:[#allocation8 + $0x1974] ss:$72 sps:$4 sm:$0xff]  }
 0x305   :  { %6126 = vmatprep.subr.bf16.mxu0 %v16153_v60  ;;  %6156 = vmatprep.mubr.bf16.mxu0 %v18315_v16  ;;  %v16190_v60 = vld [vmem:[#allocation8 + $0x38] ss:$72 sps:$4 sm:$0xff]  }
 0x307   :  { %6258 = vmatpush1.bf16.msra.mxu1 %v16106_v50  ;;  %v16186_v50 = vld [vmem:[#allocation8 + $0x1a9c] ss:$72 sps:$4 sm:$0xff]  }
 0x308   :  { %6259 = vmatprep.subr.bf16.mxu1 %v16114_v51  ;;  %6127 = vmatpush1.bf16.msra.mxu0 %v16151_v0  ;;  %v16211_v51 = vld [vmem:[#allocation8 + $0x1850] ss:$72 sps:$4 sm:$0xff]   ;;  %v16231_v0 = vld [vmem:[#allocation8 + $0x1a04] ss:$72 sps:$4 sm:$0xff]  }
 0x309   :  { %6128 = vmatprep.subr.bf16.mxu0 %v16159_v3  ;;  %v16196_v3 = vld [vmem:[#allocation8 + $0xc8] ss:$72 sps:$4 sm:$0xff]  }
 0x30b   :  { %6260 = vmatpush1.bf16.msra.mxu1 %v16112_v56  ;;  %v16192_v56 = vld [vmem:[#allocation8 + $0x3c] ss:$72 sps:$4 sm:$0xff]  }
 0x30c   :  { %6261 = vmatprep.subr.bf16.mxu1 %v16120_v58  ;;  %6129 = vmatpush1.bf16.msra.mxu0 %v16157_v6  ;;  %v16217_v58 = vld [vmem:[#allocation8 + $0x18e0] ss:$72 sps:$4 sm:$0xff]   ;;  %v16237_v6 = vld [vmem:[#allocation8 + $0x1a94] ss:$72 sps:$4 sm:$0xff]  }
 0x30d   :  { %6130 = vmatprep.subr.bf16.mxu0 %v16165_v7  ;;  %v16202_v7 = vld [vmem:[#allocation8 + $0x158] ss:$72 sps:$4 sm:$0xff]  }
 0x30f   :  { %6262 = vmatpush1.bf16.msra.mxu1 %v16118_v61  ;;  %v16198_v61 = vld [vmem:[#allocation8 + $0xcc] ss:$72 sps:$4 sm:$0xff]  }
 0x310   :  { %6263 = vmatprep.subr.bf16.mxu1 %v16126_v62  ;;  %6131 = vmatpush1.bf16.msra.mxu0 %v16163_v11  ;;  %v16223_v62 = vld [vmem:[#allocation8 + $0x1970] ss:$72 sps:$4 sm:$0xff]   ;;  %v16243_v11 = vld [vmem:[#allocation8 + $0x34] ss:$72 sps:$4 sm:$0xff]  }
 0x311   :  { %6132 = vmatprep.subr.bf16.mxu0 %v16171_v12  ;;  %v16208_v12 = vld [vmem:[#allocation8 + $0x1e8] ss:$72 sps:$4 sm:$0xff]  }
 0x313   :  { %6264 = vmatpush1.bf16.msra.mxu1 %v16124_v4  ;;  %v16204_v4 = vld [vmem:[#allocation8 + $0x15c] ss:$72 sps:$4 sm:$0xff]  }
 0x314   :  { %6265 = vmatprep.subr.bf16.mxu1 %v16132_v5  ;;  %6133 = vmatpush1.bf16.msra.mxu0 %v16169_v15  ;;  %v16229_v5 = vld [vmem:[#allocation8 + $0x1a00] ss:$72 sps:$4 sm:$0xff]   ;;  %v16249_v15 = vld [vmem:[#allocation8 + $0xc4] ss:$72 sps:$4 sm:$0xff]  }
 0x315   :  { %6134 = vmatprep.subr.bf16.mxu0 %v16177_v17  ;;  %v16214_v17 = vld [vmem:[#allocation8 + $0x278] ss:$72 sps:$4 sm:$0xff]  }
 0x317   :  { %6266 = vmatpush1.bf16.msra.mxu1 %v16130_v8  ;;  %v16210_v8 = vld [vmem:[#allocation8 + $0x1ec] ss:$72 sps:$4 sm:$0xff]  }
 0x318   :  { %6267 = vmatprep.subr.bf16.mxu1 %v16138_v9  ;;  %6135 = vmatpush1.bf16.msra.mxu0 %v16175_v22  ;;  %v16235_v9 = vld [vmem:[#allocation8 + $0x1a90] ss:$72 sps:$4 sm:$0xff]   ;;  %v1138_v22 = vsub.s32 6, %v18337_v57 }
 0x319   :  { %6136 = vmatprep.subr.bf16.mxu0 %v16183_v23  ;;  %v16255_v23 = vld [vmem:[#allocation8 + $0x154] ss:$72 sps:$4 sm:$0xff]  }
 0x31b   :  { %6268 = vmatpush1.bf16.msra.mxu1 %v16136_v13  ;;  %v16216_v13 = vld [vmem:[#allocation8 + $0x27c] ss:$72 sps:$4 sm:$0xff]  }
 0x31c   :  { %6269 = vmatprep.subr.bf16.mxu1 %v16144_v14  ;;  %6137 = vmatpush1.bf16.msra.mxu0 %v16181_v29  ;;  %v16241_v14 = vld [vmem:[#allocation8 + $0x30] ss:$72 sps:$4 sm:$0xff]   ;;  %v16228_v29 = vld [vmem:[#allocation8 + $0x39c] ss:$72 sps:$4 sm:$0xff]  }
 0x31d   :  { %6138 = vmatprep.subr.bf16.mxu0 %v16189_v30  ;;  %v16253_v30 = vld [vmem:[#allocation8 + $0x150] ss:$72 sps:$4 sm:$0xff]  }
 0x31f   :  { %6270 = vmatpush1.bf16.msra.mxu1 %v16142_v18  ;;  %v16222_v18 = vld [vmem:[#allocation8 + $0x30c] ss:$72 sps:$4 sm:$0xff]  }
 0x320   :  { %6271 = vmatprep.subr.bf16.mxu1 %v16150_v19  ;;  %6139 = vmatpush1.bf16.msra.mxu0 %v16187_v35  ;;  %v16247_v19 = vld [vmem:[#allocation8 + $0xc0] ss:$72 sps:$4 sm:$0xff]   ;;  %v16261_v35 = vld [vmem:[#allocation8 + $0x1e4] ss:$72 sps:$4 sm:$0xff]  }
 0x321   :  { %6140 = vmatprep.subr.bf16.mxu0 %v16195_v36 }
 0x323   :  { %6272 = vmatpush1.bf16.msra.mxu1 %v16148_v24  ;;  %v1142_v24 = vsub.s32 7, %v18337_v57 }
 0x324   :  { %6273 = vmatprep.subr.bf16.mxu1 %v16156_v25  ;;  %6141 = vmatpush1.bf16.msra.mxu0 %v16193_v39  ;;  %v16220_v25 = vld [vmem:[#allocation8 + $0x308] ss:$72 sps:$4 sm:$0xff]  }
 0x325   :  { %6142 = vmatprep.subr.bf16.mxu0 %v16201_v40  ;;  %v16226_v40 = vld [vmem:[#allocation8 + $0x398] ss:$72 sps:$4 sm:$0xff]  }
 0x327   :  { %6274 = vmatpush1.bf16.msra.mxu1 %v16154_v32  ;;  %v17662_v32 = vld [vmem:[#allocation9] sm:$0xff] }
 0x328   :  { %6275 = vmatprep.subr.bf16.mxu1 %v16162_v33  ;;  %6143 = vmatpush1.bf16.msra.mxu0 %v16199_v43  ;;  %v1139_v33 = vrot.slane %v17662_v32, %v1138_v22 }
 0x329   :  { %6144 = vmatprep.subr.bf16.mxu0 %v16207_v44 }
 0x32b   :  { %6276 = vmatpush1.bf16.msra.mxu1 %v16160_v37  ;;  %v1143_v37 = vrot.slane %v17662_v32, %v1142_v24 }
 0x32c   :  { %6277 = vmatprep.subr.bf16.mxu1 %v16168_v38  ;;  %6145 = vmatpush1.bf16.msra.mxu0 %v16205_v47 }
 0x32d   :  { %6146 = vmatprep.subr.bf16.mxu0 %v16213_v48 }
 0x32f   :  { %6278 = vmatpush1.bf16.msra.mxu1 %v16166_v41  ;;  %v16259_v41 = vld [vmem:[#allocation8 + $0x1e0] ss:$72 sps:$4 sm:$0xff]  }
 0x330   :  { %6279 = vmatprep.subr.bf16.mxu1 %v16174_v42  ;;  %6147 = vmatpush1.bf16.msra.mxu0 %v16211_v51  ;;  %v18386_v51 = vsub.s32 4, %v18337_v57 }
 0x331   :  { %6148 = vmatprep.subr.bf16.mxu0 %v16219_v53 }
 0x333   :  { %6280 = vmatpush1.bf16.msra.mxu1 %v16172_v45  ;;  %v16234_v45 = vld [vmem:[#allocation8 + $0x42c] ss:$72 sps:$4 sm:$0xff]  }
 0x334   :  { %6281 = vmatprep.subr.bf16.mxu1 %v16180_v46  ;;  %6149 = vmatpush1.bf16.msra.mxu0 %v16217_v58  ;;  %v16267_v46 = vld [vmem:[#allocation8 + $0x274] ss:$72 sps:$4 sm:$0xff]   ;;  %v18391_v58 = vsub.s32 5, %v18337_v57 }
 0x335   :  { %6150 = vmatprep.subr.bf16.mxu0 %v16225_v59  ;;  %v16273_v59 = vld [vmem:[#allocation8 + $0x304] ss:$72 sps:$4 sm:$0xff]  }
 0x337   :  { %6282 = vmatpush1.bf16.msra.mxu1 %v16178_v49  ;;  %v16232_v49 = vld [vmem:[#allocation8 + $0x428] ss:$72 sps:$4 sm:$0xff]  }
 0x338   :  { %6283 = vmatprep.subr.bf16.mxu1 %v16186_v50  ;;  %6151 = vmatpush1.bf16.msra.mxu0 %v16223_v62  ;;  %v16246_v62 = vld [vmem:[#allocation8 + $0x54c] ss:$72 sps:$4 sm:$0xff]  }
 0x339   :  { %6152 = vmatprep.subr.bf16.mxu0 %v16231_v0  ;;  %v1135_v0 = vrot.slane %v17662_v32, %v18391_v58 }
 0x33b   :  { %6284 = vmatpush1.bf16.msra.mxu1 %v16184_v54  ;;  %v16240_v54 = vld [vmem:[#allocation8 + $0x4bc] ss:$72 sps:$4 sm:$0xff]  }
 0x33c   :  { %6425 = vmatprep.subr.bf16.mxu1 %v16192_v56  ;;  %6153 = vmatpush1.bf16.msra.mxu0 %v16229_v5  ;;  %v16265_v56 = vld [vmem:[#allocation8 + $0x270] ss:$72 sps:$4 sm:$0xff]  }
 0x33d   :  { %6154 = vmatprep.subr.bf16.mxu0 %v16237_v6 }
 0x33e   :  { %6286 = vmatmul.mubr.bf16.vlgmr.msra.gmra.mrb[8].mxu1 %v18321_v21 }
 0x33f   :  { %6426 = vmatpush1.bf16.msra.mxu1 %v16190_v60  ;;  %6457 = vmatprep.mubr.bf16.mxu1 %v18301_v34  ;;  %v1131_v60 = vrot.slane %v17662_v32, %v18386_v51  ;;  %v16291_v32 = vld [vmem:[#allocation8 + $0x4b4] ss:$72 sps:$4 sm:$0xff]  }
 0x340   :  { %6427 = vmatprep.subr.bf16.mxu1 %v16198_v61  ;;  %6155 = vmatpush1.bf16.msra.mxu0 %v16235_v9  ;;  %v16238_v61 = vld [vmem:[#allocation8 + $0x4b8] ss:$72 sps:$4 sm:$0xff]  }
 0x341   :  { %6296 = vmatprep.subr.bf16.mxu0 %v16243_v11 }
 0x343   :  { %6428 = vmatpush1.bf16.msra.mxu1 %v16196_v3  ;;  %6157 = vmatmul.mubr.bf16.vlgmr.msra.gmra.mrb[8].mxu0 %v18321_v21  ;;  %v16271_v3 = vld [vmem:[#allocation8 + $0x300] ss:$72 sps:$4 sm:$0xff]  }
 0x344   :  { %6429 = vmatprep.subr.bf16.mxu1 %v16204_v4  ;;  %6297 = vmatpush1.bf16.msra.mxu0 %v16241_v14  ;;  %v16279_v4 = vld [vmem:[#allocation8 + $0x394] ss:$72 sps:$4 sm:$0xff]  }
 0x345   :  { %6298 = vmatprep.subr.bf16.mxu0 %v16249_v15  ;;  %6328 = vmatprep.mubr.bf16.mxu0 %v18301_v34 }
 0x347   :  { %6430 = vmatpush1.bf16.msra.mxu1 %v16202_v7 }
 0x348   :  { %6431 = vmatprep.subr.bf16.mxu1 %v16210_v8  ;;  %6299 = vmatpush1.bf16.msra.mxu0 %v16247_v19  ;;  %v16244_v8 = vld [vmem:[#allocation8 + $0x548] ss:$72 sps:$4 sm:$0xff]  }
 0x349   :  { %6300 = vmatprep.subr.bf16.mxu0 %v16255_v23  ;;  %v16250_v23 = vld [vmem:[#allocation8 + $0x5d8] ss:$72 sps:$4 sm:$0xff]  }
 0x34b   :  { %6432 = vmatpush1.bf16.msra.mxu1 %v16208_v12  ;;  %v16277_v12 = vld [vmem:[#allocation8 + $0x390] ss:$72 sps:$4 sm:$0xff]  }
 0x34c   :  { %6433 = vmatprep.subr.bf16.mxu1 %v16216_v13  ;;  %6301 = vmatpush1.bf16.msra.mxu0 %v16253_v30  ;;  %v16252_v13 = vld [vmem:[#allocation8 + $0x5dc] ss:$72 sps:$4 sm:$0xff]   ;;  %v16283_v30 = vld [vmem:[#allocation8 + $0x420] ss:$72 sps:$4 sm:$0xff]  }
 0x34d   :  { %6302 = vmatprep.subr.bf16.mxu0 %v16261_v35  ;;  %v16264_v35 = vld [vmem:[#allocation8 + $0x6fc] ss:$72 sps:$4 sm:$0xff]  }
 0x34f   :  { %6434 = vmatpush1.bf16.msra.mxu1 %v16214_v17  ;;  %v16285_v17 = vld [vmem:[#allocation8 + $0x424] ss:$72 sps:$4 sm:$0xff]  }
 0x350   :  { %6435 = vmatprep.subr.bf16.mxu1 %v16222_v18  ;;  %6303 = vmatpush1.bf16.msra.mxu0 %v16259_v41  ;;  %v16303_v41 = vld [vmem:[#allocation8 + $0x5d4] ss:$72 sps:$4 sm:$0xff]  }
 0x351   :  { %v6029_v36 = vpop.f32.mrb[4].mxu1  ;;  %6304 = vmatprep.subr.bf16.mxu0 %v16267_v46  ;;  %v16274_v46 = vld [vmem:[#allocation8 + $0x818] ss:$72 sps:$4 sm:$0xff]  }
 0x352   :  { %v6031_v38 = vpop.f32.mrb[5].mxu1  ;;  %v15155_v42 = vadd.f32 %v6029_v36, %v1139_v33  ;;  %v16289_v36 = vld [vmem:[#allocation8 + $0x4b0] ss:$72 sps:$4 sm:$0xff]  }
 0x353   :  { %v6033_v39 = vpop.f32.mrb[6].mxu1  ;;  %6436 = vmatpush1.bf16.msra.mxu1 %v16220_v25  ;;  %v15156_v47 = vadd.f32 %v6031_v38, %v1143_v37  ;;  %v16258_v25 = vld [vmem:[#allocation8 + $0x66c] ss:$72 sps:$4 sm:$0xff]   ;;  %v16262_v38 = vld [vmem:[#allocation8 + $0x6f8] ss:$72 sps:$4 sm:$0xff]  }
 0x354   :  { %v15157_v43 = vadd.f32 %v6033_v39, %v1139_v33  ;;  %v6035_v44 = vpop.f32.mrb[7].mxu1  ;;  %6437 = vmatprep.subr.bf16.mxu1 %v16228_v29  ;;  %6305 = vmatpush1.bf16.msra.mxu0 %v16265_v56  ;;  %v16256_v33 = vld [vmem:[#allocation8 + $0x668] ss:$72 sps:$4 sm:$0xff]   ;;  %v16270_v39 = vld [vmem:[#allocation8 + $0x78c] ss:$72 sps:$4 sm:$0xff]  }
 0x355   :  { %v15158_v48 = vadd.f32 %v6035_v44, %v1143_v37  ;;  %6306 = vmatprep.subr.bf16.mxu0 %v16273_v59  ;;  %v16297_v37 = vld [vmem:[#allocation8 + $0x544] ss:$72 sps:$4 sm:$0xff]   ;;  %v16301_v44 = vld [vmem:[#allocation8 + $0x5d0] ss:$72 sps:$4 sm:$0xff]  }
 0x356   :  { %v18383_v50 = vpack.c.bf16 %v15157_v43, %v15155_v42  ;;  %v5900_v5 = vpop.f32.mrb[4].mxu0  ;;  %v16268_v42 = vld [vmem:[#allocation8 + $0x788] ss:$72 sps:$4 sm:$0xff]   ;;  %v16276_v43 = vld [vmem:[#allocation8 + $0x81c] ss:$72 sps:$4 sm:$0xff]  }
 0x357   :  { %v18388_v53 = vpack.c.bf16 %v15158_v48, %v15156_v47  ;;  %6438 = vmatpush1.bf16.msra.mxu1 %v16226_v40  ;;  %v15151_v6 = vadd.f32 %v5900_v5, %v1131_v60  ;;  %v5902_v7 = vpop.f32.mrb[5].mxu0  ;;  %v16295_v40 = vld [vmem:[#allocation8 + $0x540] ss:$72 sps:$4 sm:$0xff]   ;;  %v16282_v47 = vld [vmem:[#allocation8 + $0x8ac] ss:$72 sps:$4 sm:$0xff]  }
 0x358   :  { %6814 = vrot.lane.b32.xlu1 %v18383_v50, %s18042_s10  ;;  %6439 = vmatprep.subr.bf16.mxu1 %v16234_v45  ;;  %v15152_v9 = vadd.f32 %v5902_v7, %v1135_v0  ;;  %v5904_v11 = vpop.f32.mrb[6].mxu0  ;;  %v16309_v45 = vld [vmem:[#allocation8 + $0x664] ss:$72 sps:$4 sm:$0xff]   ;;  %v16307_v48 = vld [vmem:[#allocation8 + $0x660] ss:$72 sps:$4 sm:$0xff]  }
 0x359   :  { %6307 = vmatpush1.bf16.msra.mxu0 %v16271_v3  ;;  %v15153_v14 = vadd.f32 %v5904_v11, %v1131_v60  ;;  %v5906_v15 = vpop.f32.mrb[7].mxu0  ;;  %v16288_v56 = vld [vmem:[#allocation8 + $0x93c] ss:$72 sps:$4 sm:$0xff]   ;;  %v16313_v59 = vld [vmem:[#allocation8 + $0x6f0] ss:$72 sps:$4 sm:$0xff]  }
 0x35a   :  { %6308 = vmatprep.subr.bf16.mxu0 %v16279_v4  ;;  %v15154_v18 = vadd.f32 %v5906_v15, %v1135_v0  ;;  %v16321_v60 = vld [vmem:[#allocation8 + $0x784] ss:$72 sps:$4 sm:$0xff]   ;;  %v16319_v0 = vld [vmem:[#allocation8 + $0x780] ss:$72 sps:$4 sm:$0xff]   ;;  %v16327_v3 = vld [vmem:[#allocation8 + $0x814] ss:$72 sps:$4 sm:$0xff]  }
 0x35b   :  { %6440 = vmatpush1.bf16.msra.mxu1 %v16232_v49  ;;  %v18399_v19 = vpack.c.bf16 %v15153_v14, %v15151_v6  ;;  %v16315_v49 = vld [vmem:[#allocation8 + $0x6f4] ss:$72 sps:$4 sm:$0xff]   ;;  %v16292_v4 = vld [vmem:[#allocation8 + $0x9c8] ss:$72 sps:$4 sm:$0xff]   ;;  %v16333_v7 = vld [vmem:[#allocation8 + $0x8a4] ss:$72 sps:$4 sm:$0xff]  }
 0x35c   :  { %6811 = vrot.lane.b32.xlu1 %v18361_v52, %s18042_s10  ;;  %6441 = vmatprep.subr.bf16.mxu1 %v16240_v54  ;;  %v18401_v29 = vpack.c.bf16 %v15154_v18, %v15152_v9  ;;  %v16280_v54 = vld [vmem:[#allocation8 + $0x8a8] ss:$72 sps:$4 sm:$0xff]   ;;  %v16300_v5 = vld [vmem:[#allocation8 + $0xa5c] ss:$72 sps:$4 sm:$0xff]   ;;  %v16306_v11 = vld [vmem:[#allocation8 + $0xaec] ss:$72 sps:$4 sm:$0xff]  }
 0x35d   :  { %6309 = vmatpush1.bf16.msra.mxu0 %v16277_v12  ;;  %v16325_v6 = vld [vmem:[#allocation8 + $0x810] ss:$72 sps:$4 sm:$0xff]   ;;  %v16331_v9 = vld [vmem:[#allocation8 + $0x8a0] ss:$72 sps:$4 sm:$0xff]   ;;  %v16339_v12 = vld [vmem:[#allocation8 + $0x934] ss:$72 sps:$4 sm:$0xff]  }
 0x35e   :  { %6310 = vmatprep.subr.bf16.mxu0 %v16285_v17  ;;  %v16337_v14 = vld [vmem:[#allocation8 + $0x930] ss:$72 sps:$4 sm:$0xff]   ;;  %v16312_v15 = vld [vmem:[#allocation8 + $0xb7c] ss:$72 sps:$4 sm:$0xff]  }
 0x35f   :  { %6442 = vmatpush1.bf16.msra.mxu1 %v16238_v61  ;;  %v16286_v61 = vld [vmem:[#allocation8 + $0x938] ss:$72 sps:$4 sm:$0xff]   ;;  %v16345_v17 = vld [vmem:[#allocation8 + $0x9c4] ss:$72 sps:$4 sm:$0xff]  }
 0x360   :  { %6443 = vmatprep.subr.bf16.mxu1 %v16246_v62  ;;  %v16294_v62 = vld [vmem:[#allocation8 + $0x9cc] ss:$72 sps:$4 sm:$0xff]   ;;  %v16310_v18 = vld [vmem:[#allocation8 + $0xb78] ss:$72 sps:$4 sm:$0xff]  }
 0x361   :  { %6311 = vmatpush1.bf16.msra.mxu0 %v16283_v30  ;;  %v16351_v30 = vld [vmem:[#allocation8 + $0xa54] ss:$72 sps:$4 sm:$0xff]  }
 0x362   :  { %6312 = vmatprep.subr.bf16.mxu0 %v16291_v32  ;;  %v16316_v32 = vld [vmem:[#allocation8 + $0xc08] ss:$72 sps:$4 sm:$0xff]  }
 0x363   :  { %6444 = vmatpush1.bf16.msra.mxu1 %v16244_v8  ;;  %v16298_v8 = vld [vmem:[#allocation8 + $0xa58] ss:$72 sps:$4 sm:$0xff]  }
 0x364   :  { %6445 = vmatprep.subr.bf16.mxu1 %v16252_v13  ;;  %v16304_v13 = vld [vmem:[#allocation8 + $0xae8] ss:$72 sps:$4 sm:$0xff]  }
 0x365   :  { %6313 = vmatpush1.bf16.msra.mxu0 %v16289_v36  ;;  %v16357_v36 = vld [vmem:[#allocation8 + $0xae4] ss:$72 sps:$4 sm:$0xff]  }
 0x366   :  { %6314 = vmatprep.subr.bf16.mxu0 %v16297_v37  ;;  %v16322_v37 = vld [vmem:[#allocation8 + $0xc98] ss:$72 sps:$4 sm:$0xff]  }
 0x367   :  { %6446 = vmatpush1.bf16.msra.mxu1 %v16250_v23  ;;  %v16318_v23 = vld [vmem:[#allocation8 + $0xc0c] ss:$72 sps:$4 sm:$0xff]  }
 0x368   :  { %6447 = vmatprep.subr.bf16.mxu1 %v16258_v25  ;;  %v16343_v25 = vld [vmem:[#allocation8 + $0x9c0] ss:$72 sps:$4 sm:$0xff]  }
 0x369   :  { %6315 = vmatpush1.bf16.msra.mxu0 %v16295_v40  ;;  %v16363_v40 = vld [vmem:[#allocation8 + $0xb74] ss:$72 sps:$4 sm:$0xff]  }
 0x36a   :  { %6316 = vmatprep.subr.bf16.mxu0 %v16303_v41  ;;  %v16328_v41 = vld [vmem:[#allocation8 + $0xd28] ss:$72 sps:$4 sm:$0xff]  }
 0x36b   :  { %6448 = vmatpush1.bf16.msra.mxu1 %v16256_v33  ;;  %v16324_v33 = vld [vmem:[#allocation8 + $0xc9c] ss:$72 sps:$4 sm:$0xff]  }
 0x36c   :  { %6449 = vmatprep.subr.bf16.mxu1 %v16264_v35  ;;  %v16349_v35 = vld [vmem:[#allocation8 + $0xa50] ss:$72 sps:$4 sm:$0xff]  }
 0x36d   :  { %6317 = vmatpush1.bf16.msra.mxu0 %v16301_v44  ;;  %v16369_v44 = vld [vmem:[#allocation8 + $0xc04] ss:$72 sps:$4 sm:$0xff]  }
 0x36e   :  { %6318 = vmatprep.subr.bf16.mxu0 %v16309_v45  ;;  %v16334_v45 = vld [vmem:[#allocation8 + $0xdb8] ss:$72 sps:$4 sm:$0xff]  }
 0x36f   :  { %6450 = vmatpush1.bf16.msra.mxu1 %v16262_v38  ;;  %v16330_v38 = vld [vmem:[#allocation8 + $0xd2c] ss:$72 sps:$4 sm:$0xff]  }
 0x370   :  { %6451 = vmatprep.subr.bf16.mxu1 %v16270_v39  ;;  %v16355_v39 = vld [vmem:[#allocation8 + $0xae0] ss:$72 sps:$4 sm:$0xff]  }
 0x371   :  { %6319 = vmatpush1.bf16.msra.mxu0 %v16307_v48  ;;  %v16375_v48 = vld [vmem:[#allocation8 + $0xc94] ss:$72 sps:$4 sm:$0xff]  }
 0x372   :  { %6320 = vmatprep.subr.bf16.mxu0 %v16315_v49  ;;  %v16340_v49 = vld [vmem:[#allocation8 + $0xe48] ss:$72 sps:$4 sm:$0xff]  }
 0x373   :  { %6452 = vmatpush1.bf16.msra.mxu1 %v16268_v42  ;;  %v16336_v42 = vld [vmem:[#allocation8 + $0xdbc] ss:$72 sps:$4 sm:$0xff]  }
 0x374   :  { %6453 = vmatprep.subr.bf16.mxu1 %v16276_v43  ;;  %v16361_v43 = vld [vmem:[#allocation8 + $0xb70] ss:$72 sps:$4 sm:$0xff]  }
 0x375   :  { %6321 = vmatpush1.bf16.msra.mxu0 %v16313_v59  ;;  %v16381_v59 = vld [vmem:[#allocation8 + $0xd24] ss:$72 sps:$4 sm:$0xff]  }
 0x376   :  { %6322 = vmatprep.subr.bf16.mxu0 %v16321_v60  ;;  %v16346_v60 = vld [vmem:[#allocation8 + $0xed8] ss:$72 sps:$4 sm:$0xff]  }
 0x377   :  { %6454 = vmatpush1.bf16.msra.mxu1 %v16274_v46  ;;  %v16367_v46 = vld [vmem:[#allocation8 + $0xc00] ss:$72 sps:$4 sm:$0xff]  }
 0x378   :  { %6455 = vmatprep.subr.bf16.mxu1 %v16282_v47  ;;  %v16342_v47 = vld [vmem:[#allocation8 + $0xe4c] ss:$72 sps:$4 sm:$0xff]  }
 0x379   :  { %6323 = vmatpush1.bf16.msra.mxu0 %v16319_v0  ;;  %v16387_v0 = vld [vmem:[#allocation8 + $0xdb4] ss:$72 sps:$4 sm:$0xff]  }
 0x37a   :  { %6324 = vmatprep.subr.bf16.mxu0 %v16327_v3  ;;  %v16352_v3 = vld [vmem:[#allocation8 + $0xf68] ss:$72 sps:$4 sm:$0xff]  }
 0x37b   :  { %6456 = vmatpush1.bf16.msra.mxu1 %v16280_v54  ;;  %v16373_v54 = vld [vmem:[#allocation8 + $0xc90] ss:$72 sps:$4 sm:$0xff]  }
 0x37c   :  { %6468 = vmatprep.subr.bf16.mxu1 %v16288_v56  ;;  %v16348_v56 = vld [vmem:[#allocation8 + $0xedc] ss:$72 sps:$4 sm:$0xff]  }
 0x37d   :  { %6325 = vmatpush1.bf16.msra.mxu0 %v16325_v6  ;;  %v16393_v6 = vld [vmem:[#allocation8 + $0xe44] ss:$72 sps:$4 sm:$0xff]  }
 0x37e   :  { %6458 = vmatmul.mubr.bf16.vlgmr.msra.gmra.mrb[12].mxu1 %v18305_v2  ;;  %6326 = vmatprep.subr.bf16.mxu0 %v16333_v7  ;;  %v16358_v7 = vld [vmem:[#allocation8 + $0xff8] ss:$72 sps:$4 sm:$0xff]  }
 0x37f   :  { %6469 = vmatpush1.bf16.msra.mxu1 %v16286_v61  ;;  %6500 = vmatprep.mubr.bf16.mxu1 %v18308_v20  ;;  %v16379_v61 = vld [vmem:[#allocation8 + $0xd20] ss:$72 sps:$4 sm:$0xff]  }
 0x380   :  { %6470 = vmatprep.subr.bf16.mxu1 %v16294_v62  ;;  %v16354_v62 = vld [vmem:[#allocation8 + $0xf6c] ss:$72 sps:$4 sm:$0xff]  }
 0x381   :  { %6327 = vmatpush1.bf16.msra.mxu0 %v16331_v9  ;;  %v16366_v9 = vld [vmem:[#allocation8 + $0x108c] ss:$72 sps:$4 sm:$0xff]  }
 0x382   :  { %6339 = vmatprep.subr.bf16.mxu0 %v16339_v12  ;;  %v16364_v12 = vld [vmem:[#allocation8 + $0x1088] ss:$72 sps:$4 sm:$0xff]  }
 0x383   :  { %6471 = vmatpush1.bf16.msra.mxu1 %v16292_v4  ;;  %v16385_v4 = vld [vmem:[#allocation8 + $0xdb0] ss:$72 sps:$4 sm:$0xff]  }
 0x384   :  { %6472 = vmatprep.subr.bf16.mxu1 %v16300_v5  ;;  %6329 = vmatmul.mubr.bf16.vlgmr.msra.gmra.mrb[12].mxu0 %v18305_v2  ;;  %v16360_v5 = vld [vmem:[#allocation8 + $0xffc] ss:$72 sps:$4 sm:$0xff]  }
 0x385   :  { %6340 = vmatpush1.bf16.msra.mxu0 %v16337_v14  ;;  %6371 = vmatprep.mubr.bf16.mxu0 %v18308_v20  ;;  %v16372_v14 = vld [vmem:[#allocation8 + $0x111c] ss:$72 sps:$4 sm:$0xff]  }
 0x386   :  { %6341 = vmatprep.subr.bf16.mxu0 %v16345_v17  ;;  %v16370_v17 = vld [vmem:[#allocation8 + $0x1118] ss:$72 sps:$4 sm:$0xff]  }
 0x387   :  { %6473 = vmatpush1.bf16.msra.mxu1 %v16298_v8  ;;  %v16391_v8 = vld [vmem:[#allocation8 + $0xe40] ss:$72 sps:$4 sm:$0xff]  }
 0x388   :  { %6474 = vmatprep.subr.bf16.mxu1 %v16306_v11  ;;  %v16399_v11 = vld [vmem:[#allocation8 + $0xed4] ss:$72 sps:$4 sm:$0xff]  }
 0x389   :  { %6342 = vmatpush1.bf16.msra.mxu0 %v16343_v25  ;;  %v16411_v25 = vld [vmem:[#allocation8 + $0xff4] ss:$72 sps:$4 sm:$0xff]  }
 0x38a   :  { %6343 = vmatprep.subr.bf16.mxu0 %v16351_v30  ;;  %v16376_v30 = vld [vmem:[#allocation8 + $0x11a8] ss:$72 sps:$4 sm:$0xff]  }
 0x38b   :  { %6475 = vmatpush1.bf16.msra.mxu1 %v16304_v13  ;;  %v16397_v13 = vld [vmem:[#allocation8 + $0xed0] ss:$72 sps:$4 sm:$0xff]  }
 0x38c   :  { %6476 = vmatprep.subr.bf16.mxu1 %v16312_v15  ;;  %v16405_v15 = vld [vmem:[#allocation8 + $0xf64] ss:$72 sps:$4 sm:$0xff]  }
 0x38d   :  { %6344 = vmatpush1.bf16.msra.mxu0 %v16349_v35  ;;  %v16417_v35 = vld [vmem:[#allocation8 + $0x1084] ss:$72 sps:$4 sm:$0xff]  }
 0x38e   :  { %6345 = vmatprep.subr.bf16.mxu0 %v16357_v36  ;;  %v16382_v36 = vld [vmem:[#allocation8 + $0x1238] ss:$72 sps:$4 sm:$0xff]  }
 0x38f   :  { %6477 = vmatpush1.bf16.msra.mxu1 %v16310_v18  ;;  %v16403_v18 = vld [vmem:[#allocation8 + $0xf60] ss:$72 sps:$4 sm:$0xff]  }
 0x390   :  { %6478 = vmatprep.subr.bf16.mxu1 %v16318_v23  ;;  %v16378_v23 = vld [vmem:[#allocation8 + $0x11ac] ss:$72 sps:$4 sm:$0xff]  }
 0x391   :  { %6346 = vmatpush1.bf16.msra.mxu0 %v16355_v39  ;;  %v16423_v39 = vld [vmem:[#allocation8 + $0x1114] ss:$72 sps:$4 sm:$0xff]  }
 0x392   :  { %6347 = vmatprep.subr.bf16.mxu0 %v16363_v40  ;;  %v16388_v40 = vld [vmem:[#allocation8 + $0x12c8] ss:$72 sps:$4 sm:$0xff]  }
 0x393   :  { %6479 = vmatpush1.bf16.msra.mxu1 %v16316_v32  ;;  %v16409_v32 = vld [vmem:[#allocation8 + $0xff0] ss:$72 sps:$4 sm:$0xff]  }
 0x394   :  { %6480 = vmatprep.subr.bf16.mxu1 %v16324_v33  ;;  %v16384_v33 = vld [vmem:[#allocation8 + $0x123c] ss:$72 sps:$4 sm:$0xff]  }
 0x395   :  { %6348 = vmatpush1.bf16.msra.mxu0 %v16361_v43  ;;  %v16429_v43 = vld [vmem:[#allocation8 + $0x11a4] ss:$72 sps:$4 sm:$0xff]  }
 0x396   :  { %6349 = vmatprep.subr.bf16.mxu0 %v16369_v44  ;;  %v16394_v44 = vld [vmem:[#allocation8 + $0x1358] ss:$72 sps:$4 sm:$0xff]  }
 0x397   :  { %6481 = vmatpush1.bf16.msra.mxu1 %v16322_v37  ;;  %v16415_v37 = vld [vmem:[#allocation8 + $0x1080] ss:$72 sps:$4 sm:$0xff]  }
 0x398   :  { %6482 = vmatprep.subr.bf16.mxu1 %v16330_v38  ;;  %v16390_v38 = vld [vmem:[#allocation8 + $0x12cc] ss:$72 sps:$4 sm:$0xff]  }
 0x399   :  { %6350 = vmatpush1.bf16.msra.mxu0 %v16367_v46  ;;  %v16402_v46 = vld [vmem:[#allocation8 + $0x13ec] ss:$72 sps:$4 sm:$0xff]  }
 0x39a   :  { %6351 = vmatprep.subr.bf16.mxu0 %v16375_v48  ;;  %v16400_v48 = vld [vmem:[#allocation8 + $0x13e8] ss:$72 sps:$4 sm:$0xff]  }
 0x39b   :  { %6483 = vmatpush1.bf16.msra.mxu1 %v16328_v41  ;;  %v16421_v41 = vld [vmem:[#allocation8 + $0x1110] ss:$72 sps:$4 sm:$0xff]  }
 0x39c   :  { %6484 = vmatprep.subr.bf16.mxu1 %v16336_v42  ;;  %v16396_v42 = vld [vmem:[#allocation8 + $0x135c] ss:$72 sps:$4 sm:$0xff]  }
 0x39d   :  { %6352 = vmatpush1.bf16.msra.mxu0 %v16373_v54  ;;  %v16408_v54 = vld [vmem:[#allocation8 + $0x147c] ss:$72 sps:$4 sm:$0xff]  }
 0x39e   :  { %6353 = vmatprep.subr.bf16.mxu0 %v16381_v59  ;;  %v16406_v59 = vld [vmem:[#allocation8 + $0x1478] ss:$72 sps:$4 sm:$0xff]  }
 0x39f   :  { %6485 = vmatpush1.bf16.msra.mxu1 %v16334_v45  ;;  %v16427_v45 = vld [vmem:[#allocation8 + $0x11a0] ss:$72 sps:$4 sm:$0xff]  }
 0x3a0   :  { %6486 = vmatprep.subr.bf16.mxu1 %v16342_v47  ;;  %v16435_v47 = vld [vmem:[#allocation8 + $0x1234] ss:$72 sps:$4 sm:$0xff]  }
 0x3a1   :  { %6354 = vmatpush1.bf16.msra.mxu0 %v16379_v61  ;;  %v16414_v61 = vld [vmem:[#allocation8 + $0x150c] ss:$72 sps:$4 sm:$0xff]  }
 0x3a2   :  { %6355 = vmatprep.subr.bf16.mxu0 %v16387_v0  ;;  %v16412_v0 = vld [vmem:[#allocation8 + $0x1508] ss:$72 sps:$4 sm:$0xff]  }
 0x3a3   :  { %6487 = vmatpush1.bf16.msra.mxu1 %v16340_v49  ;;  %v16433_v49 = vld [vmem:[#allocation8 + $0x1230] ss:$72 sps:$4 sm:$0xff]  }
 0x3a4   :  { %6488 = vmatprep.subr.bf16.mxu1 %v16348_v56  ;;  %v16441_v56 = vld [vmem:[#allocation8 + $0x12c4] ss:$72 sps:$4 sm:$0xff]  }
 0x3a5   :  { %6356 = vmatpush1.bf16.msra.mxu0 %v16385_v4  ;;  %v16420_v4 = vld [vmem:[#allocation8 + $0x159c] ss:$72 sps:$4 sm:$0xff]  }
 0x3a6   :  { %6357 = vmatprep.subr.bf16.mxu0 %v16393_v6  ;;  %v16418_v6 = vld [vmem:[#allocation8 + $0x1598] ss:$72 sps:$4 sm:$0xff]  }
 0x3a7   :  { %6489 = vmatpush1.bf16.msra.mxu1 %v16346_v60  ;;  %v16439_v60 = vld [vmem:[#allocation8 + $0x12c0] ss:$72 sps:$4 sm:$0xff]  }
 0x3a8   :  { %6490 = vmatprep.subr.bf16.mxu1 %v16354_v62  ;;  %v16447_v62 = vld [vmem:[#allocation8 + $0x1354] ss:$72 sps:$4 sm:$0xff]  }
 0x3a9   :  { %6358 = vmatpush1.bf16.msra.mxu0 %v16391_v8  ;;  %v16426_v8 = vld [vmem:[#allocation8 + $0x162c] ss:$72 sps:$4 sm:$0xff]  }
 0x3aa   :  { %6359 = vmatprep.subr.bf16.mxu0 %v16399_v11  ;;  %v16424_v11 = vld [vmem:[#allocation8 + $0x1628] ss:$72 sps:$4 sm:$0xff]  }
 0x3ab   :  { %6491 = vmatpush1.bf16.msra.mxu1 %v16352_v3  ;;  %v16445_v3 = vld [vmem:[#allocation8 + $0x1350] ss:$72 sps:$4 sm:$0xff]  }
 0x3ac   :  { %6492 = vmatprep.subr.bf16.mxu1 %v16360_v5  ;;  %v16453_v5 = vld [vmem:[#allocation8 + $0x13e4] ss:$72 sps:$4 sm:$0xff]  }
 0x3ad   :  { %6360 = vmatpush1.bf16.msra.mxu0 %v16397_v13  ;;  %v16432_v13 = vld [vmem:[#allocation8 + $0x16bc] ss:$72 sps:$4 sm:$0xff]  }
 0x3ae   :  { %6361 = vmatprep.subr.bf16.mxu0 %v16405_v15  ;;  %v16430_v15 = vld [vmem:[#allocation8 + $0x16b8] ss:$72 sps:$4 sm:$0xff]  }
 0x3af   :  { %6493 = vmatpush1.bf16.msra.mxu1 %v16358_v7  ;;  %v16451_v7 = vld [vmem:[#allocation8 + $0x13e0] ss:$72 sps:$4 sm:$0xff]  }
 0x3b0   :  { %6494 = vmatprep.subr.bf16.mxu1 %v16366_v9  ;;  %v16459_v9 = vld [vmem:[#allocation8 + $0x1474] ss:$72 sps:$4 sm:$0xff]  }
 0x3b1   :  { %6362 = vmatpush1.bf16.msra.mxu0 %v16403_v18  ;;  %v16438_v18 = vld [vmem:[#allocation8 + $0x174c] ss:$72 sps:$4 sm:$0xff]  }
 0x3b2   :  { %6363 = vmatprep.subr.bf16.mxu0 %v16411_v25  ;;  %v16436_v25 = vld [vmem:[#allocation8 + $0x1748] ss:$72 sps:$4 sm:$0xff]  }
 0x3b3   :  { %6495 = vmatpush1.bf16.msra.mxu1 %v16364_v12  ;;  %v16457_v12 = vld [vmem:[#allocation8 + $0x1470] ss:$72 sps:$4 sm:$0xff]  }
 0x3b4   :  { %6496 = vmatprep.subr.bf16.mxu1 %v16372_v14  ;;  %v16465_v14 = vld [vmem:[#allocation8 + $0x1504] ss:$72 sps:$4 sm:$0xff]  }
 0x3b5   :  { %6364 = vmatpush1.bf16.msra.mxu0 %v16409_v32  ;;  %v16444_v32 = vld [vmem:[#allocation8 + $0x17dc] ss:$72 sps:$4 sm:$0xff]  }
 0x3b6   :  { %6365 = vmatprep.subr.bf16.mxu0 %v16417_v35  ;;  %v16442_v35 = vld [vmem:[#allocation8 + $0x17d8] ss:$72 sps:$4 sm:$0xff]  }
 0x3b7   :  { %6497 = vmatpush1.bf16.msra.mxu1 %v16370_v17  ;;  %v16463_v17 = vld [vmem:[#allocation8 + $0x1500] ss:$72 sps:$4 sm:$0xff]  }
 0x3b8   :  { %6498 = vmatprep.subr.bf16.mxu1 %v16378_v23  ;;  %v16471_v23 = vld [vmem:[#allocation8 + $0x1594] ss:$72 sps:$4 sm:$0xff]  }
 0x3b9   :  { %6366 = vmatpush1.bf16.msra.mxu0 %v16415_v37  ;;  %v16450_v37 = vld [vmem:[#allocation8 + $0x186c] ss:$72 sps:$4 sm:$0xff]  }
 0x3ba   :  { %6367 = vmatprep.subr.bf16.mxu0 %v16423_v39  ;;  %v16448_v39 = vld [vmem:[#allocation8 + $0x1868] ss:$72 sps:$4 sm:$0xff]  }
 0x3bb   :  { %6499 = vmatpush1.bf16.msra.mxu1 %v16376_v30  ;;  %v16469_v30 = vld [vmem:[#allocation8 + $0x1590] ss:$72 sps:$4 sm:$0xff]  }
 0x3bc   :  { %6511 = vmatprep.subr.bf16.mxu1 %v16384_v33  ;;  %v16477_v33 = vld [vmem:[#allocation8 + $0x1624] ss:$72 sps:$4 sm:$0xff]  }
 0x3bd   :  { %6368 = vmatpush1.bf16.msra.mxu0 %v16421_v41  ;;  %v16456_v41 = vld [vmem:[#allocation8 + $0x18fc] ss:$72 sps:$4 sm:$0xff]  }
 0x3be   :  { %6501 = vmatmul.mubr.bf16.vlgmr.msra.gmra.mrb[12].mxu1 %v18313_v10  ;;  %6369 = vmatprep.subr.bf16.mxu0 %v16429_v43  ;;  %v16454_v43 = vld [vmem:[#allocation8 + $0x18f8] ss:$72 sps:$4 sm:$0xff]  }
 0x3bf   :  { %6512 = vmatpush1.bf16.msra.mxu1 %v16382_v36  ;;  %6543 = vmatprep.mubr.bf16.mxu1 %v18315_v16  ;;  %v16475_v36 = vld [vmem:[#allocation8 + $0x1620] ss:$72 sps:$4 sm:$0xff]  }
 0x3c0   :  { %6513 = vmatprep.subr.bf16.mxu1 %v16390_v38  ;;  %v16480_v38 = vld [vmem:[#allocation8 + $0x16b4] ss:$72 sps:$4 sm:$0xff]  }
 0x3c1   :  { %6370 = vmatpush1.bf16.msra.mxu0 %v16427_v45  ;;  %v16462_v45 = vld [vmem:[#allocation8 + $0x198c] ss:$72 sps:$4 sm:$0xff]  }
 0x3c2   :  { %6382 = vmatprep.subr.bf16.mxu0 %v16435_v47  ;;  %v16460_v47 = vld [vmem:[#allocation8 + $0x1988] ss:$72 sps:$4 sm:$0xff]  }
 0x3c3   :  { %6514 = vmatpush1.bf16.msra.mxu1 %v16388_v40  ;;  %v16478_v40 = vld [vmem:[#allocation8 + $0x16b0] ss:$72 sps:$4 sm:$0xff]  }
 0x3c4   :  { %6515 = vmatprep.subr.bf16.mxu1 %v16396_v42  ;;  %6372 = vmatmul.mubr.bf16.vlgmr.msra.gmra.mrb[12].mxu0 %v18313_v10  ;;  %v16483_v42 = vld [vmem:[#allocation8 + $0x1744] ss:$72 sps:$4 sm:$0xff]  }
 0x3c5   :  { %6383 = vmatpush1.bf16.msra.mxu0 %v16433_v49  ;;  %6414 = vmatprep.mubr.bf16.mxu0 %v18315_v16  ;;  %v16468_v49 = vld [vmem:[#allocation8 + $0x1a1c] ss:$72 sps:$4 sm:$0xff]  }
 0x3c6   :  { %6384 = vmatprep.subr.bf16.mxu0 %v16441_v56  ;;  %v16466_v56 = vld [vmem:[#allocation8 + $0x1a18] ss:$72 sps:$4 sm:$0xff]  }
 0x3c7   :  { %6516 = vmatpush1.bf16.msra.mxu1 %v16394_v44  ;;  %v16481_v44 = vld [vmem:[#allocation8 + $0x1740] ss:$72 sps:$4 sm:$0xff]  }
 0x3c8   :  { %6517 = vmatprep.subr.bf16.mxu1 %v16402_v46  ;;  %v16486_v46 = vld [vmem:[#allocation8 + $0x17d4] ss:$72 sps:$4 sm:$0xff]  }
 0x3c9   :  { %6385 = vmatpush1.bf16.msra.mxu0 %v16439_v60  ;;  %v16474_v60 = vld [vmem:[#allocation8 + $0x1aac] ss:$72 sps:$4 sm:$0xff]  }
 0x3ca   :  { %6386 = vmatprep.subr.bf16.mxu0 %v16447_v62  ;;  %v16472_v62 = vld [vmem:[#allocation8 + $0x1aa8] ss:$72 sps:$4 sm:$0xff]  }
 0x3cb   :  { %6518 = vmatpush1.bf16.msra.mxu1 %v16400_v48  ;;  %v16484_v48 = vld [vmem:[#allocation8 + $0x17d0] ss:$72 sps:$4 sm:$0xff]  }
 0x3cc   :  { %6519 = vmatprep.subr.bf16.mxu1 %v16408_v54  ;;  %v16489_v54 = vld [vmem:[#allocation8 + $0x1864] ss:$72 sps:$4 sm:$0xff]  }
 0x3cd   :  { %6387 = vmatpush1.bf16.msra.mxu0 %v16445_v3  ;;  %v16495_v3 = vld [vmem:[#allocation8 + $0x1984] ss:$72 sps:$4 sm:$0xff]  }
 0x3ce   :  { %6388 = vmatprep.subr.bf16.mxu0 %v16453_v5  ;;  %v16498_v5 = vld [vmem:[#allocation8 + $0x1a14] ss:$72 sps:$4 sm:$0xff]  }
 0x3cf   :  { %6520 = vmatpush1.bf16.msra.mxu1 %v16406_v59  ;;  %v16487_v59 = vld [vmem:[#allocation8 + $0x1860] ss:$72 sps:$4 sm:$0xff]  }
 0x3d0   :  { %6521 = vmatprep.subr.bf16.mxu1 %v16414_v61  ;;  %v16492_v61 = vld [vmem:[#allocation8 + $0x18f4] ss:$72 sps:$4 sm:$0xff]  }
 0x3d1   :  { %6389 = vmatpush1.bf16.msra.mxu0 %v16451_v7  ;;  %v16496_v7 = vld [vmem:[#allocation8 + $0x1a10] ss:$72 sps:$4 sm:$0xff]  }
 0x3d2   :  { %6390 = vmatprep.subr.bf16.mxu0 %v16459_v9  ;;  %v6697_v9 = vsel %vm6692_vm0, %v18383_v50, 0 }
 0x3d3   :  { %6522 = vmatpush1.bf16.msra.mxu1 %v16412_v0  ;;  %v16490_v0 = vld [vmem:[#allocation8 + $0x18f0] ss:$72 sps:$4 sm:$0xff]  }
 0x3d4   :  { %6523 = vmatprep.subr.bf16.mxu1 %v16420_v4  ;;  %v16493_v4 = vld [vmem:[#allocation8 + $0x1980] ss:$72 sps:$4 sm:$0xff]  }
 0x3d5   :  { %6391 = vmatpush1.bf16.msra.mxu0 %v16457_v12  ;;  %v1107_v12 = vld [vmem:[#allocation9 + $0x8] sm:$0xff] }
 0x3d6   :  { %6392 = vmatprep.subr.bf16.mxu0 %v16465_v14  ;;  %v1155_v50 = vrot.slane %v1107_v12, %v18341_v63  ;;  %v1159_v14 = vrot.slane %v1107_v12, %v18344_v1  ;;  %v1167_v57 = vrot.slane %v1107_v12, %v18391_v58 }
 0x3d7   :  { %6524 = vmatpush1.bf16.msra.mxu1 %v16418_v6  ;;  %v18045_v6 = vmov 0.0  }
 0x3d8   :  { %6525 = vmatprep.subr.bf16.mxu1 %v16426_v8  ;;  %v16501_v8 = vld [vmem:[#allocation8 + $0x1aa4] ss:$72 sps:$4 sm:$0xff]  }
 0x3d9   :  { %6393 = vmatpush1.bf16.msra.mxu0 %v16463_v17 }
 0x3da   :  { %6394 = vmatprep.subr.bf16.mxu0 %v16471_v23 }
 0x3db   :  { %6526 = vmatpush1.bf16.msra.mxu1 %v16424_v11  ;;  %v16499_v11 = vld [vmem:[#allocation8 + $0x1aa0] ss:$72 sps:$4 sm:$0xff]  }
 0x3dc   :  { %6527 = vmatprep.subr.bf16.mxu1 %v16432_v13 }
 0x3dd   :  { %6395 = vmatpush1.bf16.msra.mxu0 %v16469_v30 }
 0x3de   :  { %6396 = vmatprep.subr.bf16.mxu0 %v16477_v33 }
 0x3df   :  { %6528 = vmatpush1.bf16.msra.mxu1 %v16430_v15 }
 0x3e0   :  { %6529 = vmatprep.subr.bf16.mxu1 %v16438_v18 }
 0x3e1   :  { %6397 = vmatpush1.bf16.msra.mxu0 %v16475_v36 }
 0x3e2   :  { %6398 = vmatprep.subr.bf16.mxu0 %v16480_v38 }
 0x3e3   :  { %6530 = vmatpush1.bf16.msra.mxu1 %v16436_v25 }
 0x3e4   :  { %6531 = vmatprep.subr.bf16.mxu1 %v16444_v32 }
 0x3e5   :  { %6399 = vmatpush1.bf16.msra.mxu0 %v16478_v40 }
 0x3e6   :  { %6400 = vmatprep.subr.bf16.mxu0 %v16483_v42 }
 0x3e7   :  { %6532 = vmatpush1.bf16.msra.mxu1 %v16442_v35  ;;  %v1151_v35 = vrot.slane %v1107_v12, %v18357_v31 }
 0x3e8   :  { %6533 = vmatprep.subr.bf16.mxu1 %v16450_v37 }
 0x3e9   :  { %6401 = vmatpush1.bf16.msra.mxu0 %v16481_v44 }
 0x3ea   :  { %6402 = vmatprep.subr.bf16.mxu0 %v16486_v46  ;;  %v239_v46 = vld [vmem:[#allocation6] sm:$0x1] }
 0x3eb   :  { %6534 = vmatpush1.bf16.msra.mxu1 %v16448_v39 }
 0x3ec   :  { %6535 = vmatprep.subr.bf16.mxu1 %v16456_v41 }
 0x3ed   :  { %6403 = vmatpush1.bf16.msra.mxu0 %v16484_v48 }
 0x3ee   :  { %6404 = vmatprep.subr.bf16.mxu0 %v16489_v54 }
 0x3ef   :  { %6536 = vmatpush1.bf16.msra.mxu1 %v16454_v43 }
 0x3f0   :  { %6537 = vmatprep.subr.bf16.mxu1 %v16462_v45 }
 0x3f1   :  { %6405 = vmatpush1.bf16.msra.mxu0 %v16487_v59 }
 0x3f2   :  { %6406 = vmatprep.subr.bf16.mxu0 %v16492_v61 }
 0x3f3   :  { %6538 = vmatpush1.bf16.msra.mxu1 %v16460_v47  ;;  %v1171_v47 = vrot.slane %v1107_v12, %v1138_v22 }
 0x3f4   :  { %6539 = vmatprep.subr.bf16.mxu1 %v16468_v49  ;;  %v1175_v49 = vrot.slane %v1107_v12, %v1142_v24 }
 0x3f5   :  { %6407 = vmatpush1.bf16.msra.mxu0 %v16490_v0 }
 0x3f6   :  { %6408 = vmatprep.subr.bf16.mxu0 %v16495_v3 }
 0x3f7   :  { %6540 = vmatpush1.bf16.msra.mxu1 %v16466_v56  ;;  %v13371_v56 = vadd.f32 -1.0, %v239_v46 }
 0x3f8   :  { %6541 = vmatprep.subr.bf16.mxu1 %v16474_v60 }
 0x3f9   :  { %6409 = vmatpush1.bf16.msra.mxu0 %v16493_v4 }
 0x3fa   :  { %6410 = vmatprep.subr.bf16.mxu0 %v16498_v5  ;;  %v241_v5 = vmul.f32 1e+09, %v13371_v56 }
 0x3fb   :  { %6542 = vmatpush1.bf16.msra.mxu1 %v16472_v62 }
 0x3fc   :  { %14999 = vmatprep.subr.bf16.mxu1 %v18045_v6  ;;  %v18446_v22 = vrot.slane %v241_v5, %v18352_v27 }
 0x3fd   :  { %6411 = vmatpush1.bf16.msra.mxu0 %v16496_v7 }
 0x3fe   :  { %6544 = vmatmul.mubr.bf16.vlgmr.msra.gmra.mrb[12].mxu1 %v18321_v21  ;;  %6412 = vmatprep.subr.bf16.mxu0 %v16501_v8  ;;  %v1163_v8 = vrot.slane %v1107_v12, %v18386_v51 }
 0x3ff   :  { %15001 = vmatprep.mubr.msk.bf16.mxu1 %vm18046_vm1, %v18045_v6 }
 0x401   :  { %6413 = vmatpush1.bf16.msra.mxu0 %v16499_v11 }
 0x404   :  { %15000 = vmatpush3.bf16.xpose.msra.mxu1 %v6697_v9  ;;  %6415 = vmatmul.mubr.bf16.vlgmr.msra.gmra.mrb[12].mxu0 %v18321_v21 }
 0x405   :  { %15005 = vmatprep.subr.bf16.mxu1 %v18045_v6  ;;  %6586 = vmatprep.mubr.bf16.mxu0 %v18301_v34  ;;  %v1147_v34 = vrot.slane %v1107_v12, %v18352_v27 }
 0x40b   :  { %15002 = vmatmul.mubr.msk.bf16.vlgmr.msra.gmra.mrb[16].mxu1 %vm6692_vm0, %v18361_v52 }
 0x40c   :  { %15007 = vmatprep.mubr.msk.bf16.mxu1 %vm18046_vm1, %v18045_v6 }
 0x411   :  { %v6287_v13 = vpop.f32.mrb[8].mxu1 }
 0x412   :  { %v6289_v15 = vpop.f32.mrb[9].mxu1  ;;  %v15163_v18 = vadd.f32 %v6287_v13, %v1155_v50 }
 0x413   :  { %v6291_v17 = vpop.f32.mrb[10].mxu1  ;;  %v15164_v30 = vadd.f32 %v6289_v15, %v1159_v14 }
 0x414   :  { %v15165_v23 = vadd.f32 %v6291_v17, %v1155_v50  ;;  %v6293_v25 = vpop.f32.mrb[11].mxu1 }
 0x415   :  { %v15166_v32 = vadd.f32 %v6293_v25, %v1159_v14 }
 0x416   :  { %v18426_v33 = vpack.c.bf16 %v15165_v23, %v15163_v18  ;;  %v6158_v36 = vpop.f32.mrb[8].mxu0 }
 0x417   :  { %v18428_v52 = vpack.c.bf16 %v15166_v32, %v15164_v30  ;;  %v15159_v37 = vadd.f32 %v6158_v36, %v1147_v34  ;;  %v6160_v38 = vpop.f32.mrb[9].mxu0 }
 0x418   :  { %v15160_v39 = vadd.f32 %v6160_v38, %v1151_v35  ;;  %v6162_v40 = vpop.f32.mrb[10].mxu0 }
 0x419   :  { %v15161_v41 = vadd.f32 %v6162_v40, %v1147_v34  ;;  %v6164_v42 = vpop.f32.mrb[11].mxu0 }
 0x41a   :  { %v15162_v43 = vadd.f32 %v6164_v42, %v1151_v35 }
 0x41b   :  { %v18432_v44 = vpack.c.bf16 %v15161_v41, %v15159_v37 }
 0x41c   :  { %v18434_v45 = vpack.c.bf16 %v15162_v43, %v15160_v39 }
 0x4d1   :  { %v6545_v48 = vpop.f32.mrb[12].mxu1 }
 0x4d2   :  { %v6547_v54 = vpop.f32.mrb[13].mxu1  ;;  %v15171_v60 = vadd.f32 %v6545_v48, %v1171_v47  ;;  %v6815_v48 = vpop.permute.xlu1 %6814 }
 0x4d3   :  { %v6549_v59 = vpop.f32.mrb[14].mxu1  ;;  %v15172_v0 = vadd.f32 %v6547_v54, %v1175_v49  ;;  %v6820_v54 = vsel %vm6692_vm0, %v6815_v48, 0 }
 0x4d4   :  { %v15173_v61 = vadd.f32 %v6549_v59, %v1171_v47  ;;  %v6551_v62 = vpop.f32.mrb[15].mxu1 }
 0x4d5   :  { %v15174_v3 = vadd.f32 %v6551_v62, %v1175_v49 }
 0x4d6   :  { %v18440_v4 = vpack.c.bf16 %v15173_v61, %v15171_v60  ;;  %v6812_v56 = vpop.permute.xlu1 %6811 }
 0x4d7   :  { %v18442_v7 = vpack.c.bf16 %v15174_v3, %v15172_v0  ;;  %v6416_v24 = vpop.f32.mrb[12].mxu0 }
 0x4d8   :  { %v15167_v11 = vadd.f32 %v6416_v24, %v1163_v8  ;;  %v6418_v50 = vpop.f32.mrb[13].mxu0 }
 0x4d9   :  { %v15168_v15 = vadd.f32 %v6418_v50, %v1167_v57  ;;  %v6420_v17 = vpop.f32.mrb[14].mxu0 }
 0x4da   :  { %v15169_v23 = vadd.f32 %v6420_v17, %v1163_v8  ;;  %v6422_v25 = vpop.f32.mrb[15].mxu0 }
 0x4db   :  { %v15170_v35 = vadd.f32 %v6422_v25, %v1167_v57 }
 0x4dc   :  { %v6685_v12 = vpack.c.bf16 %v15169_v23, %v15167_v11 }
 0x4dd   :  { %v18452_v36 = vpack.c.bf16 %v15170_v35, %v15168_v15 }
 0x4de   :  { %v6733_v9 = vpop.f32.mrb[16].mxu1  ;;  %15006 = vmatpush3.bf16.msra.mxu1 %v6685_v12 }
 0x4df   :  { %v6734_v13 = vadd.f32 %v6733_v9, %v18446_v22  ;;  %v15003_v14 = vpop.f32.mrb[17].mxu1  ;;  %15011 = vmatprep.subr.bf16.mxu1 %v18045_v6 }
 0x4e0   :  { %v6736_v18 = vpop.f32.mrb[18].mxu1 }
 0x4e1   :  { %v6737_v30 = vadd.f32 %v6736_v18, %v18446_v22  ;;  %v15004_v32 = vpop.f32.mrb[19].mxu1  ;;  %v6741_v34 = vsel %vm6740_vm2, %v6734_v13, -inf }
 0x4e2   :  { %6742 = vmax.xlane.f32.xlu0 %v6741_v34  ;;  %v6948_v34 = vsel %vm6692_vm0, %v18388_v53, 0 }
 0x4e3   :  { %v6744_v37 = vsel %vm6740_vm2, %v6737_v30, -inf }
 0x4e6   :  { %6745 = vmax.xlane.f32.xlu0 %v6744_v37 }
 0x56f   :  { %v6743_v38 = vpop.xlane.xlu0 %6742 }
 0x570   :  { %v6747_v39 = vsub.f32 %v6734_v13, %v6743_v38 }
 0x572   :  { %v6749_v40 = vmul.f32 1.442695, %v6747_v39 }
 0x573   :  { %v6746_v41 = vpop.xlane.xlu0 %6745 }
 0x574   :  { %v6748_v42 = vsub.f32 %v6737_v30, %v6746_v41  ;;  %17558 = vpow2.f32 %v6749_v40 }
 0x576   :  { %v6751_v43 = vmul.f32 1.442695, %v6748_v42 }
 0x578   :  { %17560 = vpow2.f32 %v6751_v43 }
 0x57e   :  { %v18456_v46 = vpop.eup %17558 }
 0x582   :  { %v18458_v47 = vpop.eup %17560 }
 0x583   :  { %v6759_v49 = vpack.c.bf16 %v18458_v47, %v18456_v46 }
 0x585   :  { %15008 = vmatmul.mubr.msk.bf16.vlgmr.msra.gmra.mrb[20].mxu1 %vm6740_vm2, %v6759_v49 }
 0x586   :  { %15012 = vmatpush3.bf16.xpose.msra.mxu1 %v6820_v54  ;;  %15013 = vmatprep.mubr.msk.bf16.mxu1 %vm18046_vm1, %v18045_v6 }
 0x587   :  { %15017 = vmatprep.subr.bf16.mxu1 %v18045_v6 }
 0x58d   :  { %15014 = vmatmul.mubr.msk.bf16.vlgmr.msra.gmra.mrb[24].mxu1 %vm6692_vm0, %v6812_v56 }
 0x58e   :  { %15019 = vmatprep.mubr.msk.bf16.mxu1 %vm18046_vm1, %v18045_v6 }
 0x658   :  { %v18470_v59 = vpop.f32.mrb[20].mxu1 }
 0x659   :  { %v15009_v60 = vpop.f32.mrb[21].mxu1 }
 0x65a   :  { %v18472_v61 = vpop.f32.mrb[22].mxu1 }
 0x65b   :  { %v15010_v62 = vpop.f32.mrb[23].mxu1 }
 0x660   :  { %v6856_v0 = vpop.f32.mrb[24].mxu1 }
 0x661   :  { %v6857_v3 = vadd.f32 %v6856_v0, %v18446_v22  ;;  %v15015_v5 = vpop.f32.mrb[25].mxu1 }
 0x662   :  { %v6859_v8 = vpop.f32.mrb[26].mxu1 }
 0x663   :  { %v6860_v57 = vadd.f32 %v6859_v8, %v18446_v22  ;;  %v15016_v24 = vpop.f32.mrb[27].mxu1  ;;  %v6863_v9 = vsel %vm6740_vm2, %v6857_v3, -inf }
 0x664   :  { %6864 = vmax.xlane.f32.xlu0 %v6863_v9 }
 0x665   :  { %v6866_v11 = vsel %vm6740_vm2, %v6860_v57, -inf }
 0x666   :  { %6867 = vmax.xlane.f32.xlu1 %v6866_v11 }
 0x67a   :  { %6883 = vrot.lane.b32.xlu0 %v6685_v12, %s18042_s10 }
 0x6f1   :  { %v6865_v50 = vpop.xlane.xlu0 %6864 }
 0x6f2   :  { %v6869_v13 = vsub.f32 %v6857_v3, %v6865_v50 }
 0x6f3   :  { %v6868_v14 = vpop.xlane.xlu1 %6867 }
 0x6f4   :  { %v6871_v15 = vmul.f32 1.442695, %v6869_v13  ;;  %v6870_v17 = vsub.f32 %v6860_v57, %v6868_v14 }
 0x6f5   :  { %v6884_v18 = vpop.permute.xlu0 %6883 }
 0x6f6   :  { %v6873_v23 = vmul.f32 1.442695, %v6870_v17  ;;  %15018 = vmatpush3.bf16.msra.mxu1 %v6884_v18  ;;  %17562 = vpow2.f32 %v6871_v15 }
 0x6f7   :  { %15023 = vmatprep.subr.bf16.mxu1 %v18045_v6 }
 0x6f8   :  { %17564 = vpow2.f32 %v6873_v23 }
 0x700   :  { %v18480_v25 = vpop.eup %17562 }
 0x702   :  { %v18482_v30 = vpop.eup %17564 }
 0x703   :  { %v6881_v32 = vpack.c.bf16 %v18482_v30, %v18480_v25 }
 0x705   :  { %15020 = vmatmul.mubr.msk.bf16.vlgmr.msra.gmra.mrb[28].mxu1 %vm6740_vm2, %v6881_v32 }
 0x706   :  { %15024 = vmatpush3.bf16.xpose.msra.mxu1 %v6948_v34  ;;  %15025 = vmatprep.mubr.msk.bf16.mxu1 %vm18046_vm1, %v18045_v6 }
 0x707   :  { %15029 = vmatprep.subr.bf16.mxu1 %v18045_v6 }
 0x70d   :  { %15026 = vmatmul.mubr.msk.bf16.vlgmr.msra.gmra.mrb[32].mxu1 %vm6692_vm0, %v18363_v55 }
 0x70e   :  { %15030 = vmatpush3.bf16.msra.mxu1 %v18452_v36  ;;  %15031 = vmatprep.mubr.msk.bf16.mxu1 %vm18046_vm1, %v18045_v6 }
 0x70f   :  { %15035 = vmatprep.subr.bf16.mxu1 %v18045_v6 }
 0x7d8   :  { %v18498_v35 = vpop.f32.mrb[28].mxu1 }
 0x7d9   :  { %v15021_v12 = vpop.f32.mrb[29].mxu1 }
 0x7da   :  { %v18500_v37 = vpop.f32.mrb[30].mxu1 }
 0x7db   :  { %v15022_v38 = vpop.f32.mrb[31].mxu1 }
 0x7e0   :  { %v6984_v39 = vpop.f32.mrb[32].mxu1 }
 0x7e1   :  { %v6985_v40 = vadd.f32 %v6984_v39, %v18446_v22  ;;  %v15027_v41 = vpop.f32.mrb[33].mxu1 }
 0x7e2   :  { %v6987_v42 = vpop.f32.mrb[34].mxu1 }
 0x7e3   :  { %v6988_v43 = vadd.f32 %v6987_v42, %v18446_v22  ;;  %v15028_v48 = vpop.f32.mrb[35].mxu1  ;;  %v6991_v49 = vsel %vm6740_vm2, %v6985_v40, -inf }
 0x7e4   :  { %6992 = vmax.xlane.f32.xlu0 %v6991_v49 }
 0x7e5   :  { %v6994_v54 = vsel %vm6740_vm2, %v6988_v43, -inf }
 0x7e6   :  { %6995 = vmax.xlane.f32.xlu1 %v6994_v54 }
 0x7f7   :  { %7064 = vrot.lane.b32.xlu1 %v18388_v53, %s18042_s10 }
 0x7fa   :  { %7061 = vrot.lane.b32.xlu0 %v18363_v55, %s18042_s10 }
 0x871   :  { %v6993_v56 = vpop.xlane.xlu0 %6992 }
 0x872   :  { %v6997_v60 = vsub.f32 %v6985_v40, %v6993_v56 }
 0x873   :  { %v6996_v62 = vpop.xlane.xlu1 %6995 }
 0x874   :  { %v6999_v0 = vmul.f32 1.442695, %v6997_v60  ;;  %v6998_v3 = vsub.f32 %v6988_v43, %v6996_v62 }
 0x875   :  { %v7062_v55 = vpop.permute.xlu0 %7061 }
 0x876   :  { %v7001_v5 = vmul.f32 1.442695, %v6998_v3  ;;  %17566 = vpow2.f32 %v6999_v0 }
 0x877   :  { %v7065_v24 = vpop.permute.xlu1 %7064 }
 0x878   :  { %17568 = vpow2.f32 %v7001_v5  ;;  %v7070_v53 = vsel %vm6692_vm0, %v7065_v24, 0 }
 0x880   :  { %v18510_v8 = vpop.eup %17566 }
 0x882   :  { %v18512_v57 = vpop.eup %17568 }
 0x883   :  { %v7009_v9 = vpack.c.bf16 %v18512_v57, %v18510_v8 }
 0x885   :  { %15032 = vmatmul.mubr.msk.bf16.vlgmr.msra.gmra.mrb[36].mxu1 %vm6740_vm2, %v7009_v9 }
 0x886   :  { %15036 = vmatpush3.bf16.xpose.msra.mxu1 %v7070_v53  ;;  %15037 = vmatprep.mubr.msk.bf16.mxu1 %vm18046_vm1, %v18045_v6 }
 0x887   :  { %15041 = vmatprep.subr.bf16.mxu1 %v18045_v6 }
 0x88d   :  { %15038 = vmatmul.mubr.msk.bf16.vlgmr.msra.gmra.mrb[40].mxu1 %vm6692_vm0, %v7062_v55 }
 0x88e   :  { %15043 = vmatprep.mubr.msk.bf16.mxu1 %vm18046_vm1, %v18045_v6 }
 0x958   :  { %v18524_v11 = vpop.f32.mrb[36].mxu1 }
 0x959   :  { %v15033_v50 = vpop.f32.mrb[37].mxu1 }
 0x95a   :  { %v18526_v13 = vpop.f32.mrb[38].mxu1 }
 0x95b   :  { %v15034_v14 = vpop.f32.mrb[39].mxu1 }
 0x960   :  { %v7106_v15 = vpop.f32.mrb[40].mxu1 }
 0x961   :  { %v7107_v17 = vadd.f32 %v7106_v15, %v18446_v22  ;;  %v15039_v18 = vpop.f32.mrb[41].mxu1 }
 0x962   :  { %v7109_v23 = vpop.f32.mrb[42].mxu1 }
 0x963   :  { %v7110_v32 = vadd.f32 %v7109_v23, %v18446_v22  ;;  %v15040_v34 = vpop.f32.mrb[43].mxu1  ;;  %v7113_v12 = vsel %vm6740_vm2, %v7107_v17, -inf }
 0x964   :  { %7114 = vmax.xlane.f32.xlu1 %v7113_v12 }
 0x965   :  { %v7116_v38 = vsel %vm6740_vm2, %v7110_v32, -inf }
 0x966   :  { %7117 = vmax.xlane.f32.xlu0 %v7116_v38 }
 0x975   :  { %7133 = vrot.lane.b32.xlu1 %v18452_v36, %s18042_s10  ;;  %v7197_v36 = vsel %vm6692_vm0, %v18432_v44, 0 }
 0x9f1   :  { %v7115_v39 = vpop.xlane.xlu1 %7114 }
 0x9f2   :  { %v7119_v40 = vsub.f32 %v7107_v17, %v7115_v39 }
 0x9f3   :  { %v7118_v41 = vpop.xlane.xlu0 %7117 }
 0x9f4   :  { %v7121_v42 = vmul.f32 1.442695, %v7119_v40  ;;  %v7120_v43 = vsub.f32 %v7110_v32, %v7118_v41 }
 0x9f5   :  { %v7134_v48 = vpop.permute.xlu1 %7133 }
 0x9f6   :  { %v7123_v49 = vmul.f32 1.442695, %v7120_v43  ;;  %15042 = vmatpush3.bf16.msra.mxu1 %v7134_v48  ;;  %17570 = vpow2.f32 %v7121_v42 }
 0x9f7   :  { %15047 = vmatprep.subr.bf16.mxu1 %v18045_v6 }
 0x9f8   :  { %17572 = vpow2.f32 %v7123_v49 }
 0xa00   :  { %v18535_v54 = vpop.eup %17570 }
 0xa02   :  { %v18537_v56 = vpop.eup %17572 }
 0xa03   :  { %v7131_v60 = vpack.c.bf16 %v18537_v56, %v18535_v54 }
 0xa05   :  { %15044 = vmatmul.mubr.msk.bf16.vlgmr.msra.gmra.mrb[44].mxu1 %vm6740_vm2, %v7131_v60 }
 0xa06   :  { %15048 = vmatpush3.bf16.xpose.msra.mxu1 %v7197_v36  ;;  %15049 = vmatprep.mubr.msk.bf16.mxu1 %vm18046_vm1, %v18045_v6 }
 0xa07   :  { %15053 = vmatprep.subr.bf16.mxu1 %v18045_v6 }
 0xa0d   :  { %15050 = vmatmul.mubr.msk.bf16.vlgmr.msra.gmra.mrb[48].mxu1 %vm6692_vm0, %v18349_v26 }
 0xa0e   :  { %15054 = vmatpush3.bf16.msra.mxu1 %v18440_v4  ;;  %15055 = vmatprep.mubr.msk.bf16.mxu1 %vm18046_vm1, %v18045_v6 }
 0xa0f   :  { %15059 = vmatprep.subr.bf16.mxu1 %v18045_v6 }
 0xad8   :  { %v18553_v62 = vpop.f32.mrb[44].mxu1 }
 0xad9   :  { %v15045_v0 = vpop.f32.mrb[45].mxu1 }
 0xada   :  { %v18555_v3 = vpop.f32.mrb[46].mxu1 }
 0xadb   :  { %v15046_v5 = vpop.f32.mrb[47].mxu1 }
 0xae0   :  { %v7233_v24 = vpop.f32.mrb[48].mxu1 }
 0xae1   :  { %v7234_v9 = vadd.f32 %v7233_v24, %v18446_v22  ;;  %v15051_v53 = vpop.f32.mrb[49].mxu1 }
 0xae2   :  { %v7236_v55 = vpop.f32.mrb[50].mxu1 }
 0xae3   :  { %v7237_v50 = vadd.f32 %v7236_v55, %v18446_v22  ;;  %v15052_v14 = vpop.f32.mrb[51].mxu1  ;;  %v7240_v15 = vsel %vm6740_vm2, %v7234_v9, -inf }
 0xae4   :  { %7241 = vmax.xlane.f32.xlu0 %v7240_v15 }
 0xae5   :  { %v7243_v17 = vsel %vm6740_vm2, %v7237_v50, -inf }
 0xae6   :  { %7244 = vmax.xlane.f32.xlu1 %v7243_v17 }
 0xafa   :  { %7313 = vrot.lane.b32.xlu0 %v18432_v44, %s18042_s10 }
 0xafe   :  { %7310 = vrot.lane.b32.xlu0 %v18349_v26, %s18042_s10 }
 0xb71   :  { %v7242_v18 = vpop.xlane.xlu0 %7241 }
 0xb72   :  { %v7246_v23 = vsub.f32 %v7234_v9, %v7242_v18 }
 0xb73   :  { %v7245_v32 = vpop.xlane.xlu1 %7244 }
 0xb74   :  { %v7248_v34 = vmul.f32 1.442695, %v7246_v23  ;;  %v7247_v12 = vsub.f32 %v7237_v50, %v7245_v32 }
 0xb75   :  { %v7314_v41 = vpop.permute.xlu0 %7313 }
 0xb76   :  { %v7250_v38 = vmul.f32 1.442695, %v7247_v12  ;;  %17574 = vpow2.f32 %v7248_v34  ;;  %v7319_v44 = vsel %vm6692_vm0, %v7314_v41, 0 }
 0xb78   :  { %17576 = vpow2.f32 %v7250_v38 }
 0xb79   :  { %v7311_v26 = vpop.permute.xlu0 %7310 }
 0xb80   :  { %v18565_v39 = vpop.eup %17574 }
 0xb82   :  { %v18567_v40 = vpop.eup %17576 }
 0xb83   :  { %v7258_v42 = vpack.c.bf16 %v18567_v40, %v18565_v39 }
 0xb85   :  { %15056 = vmatmul.mubr.msk.bf16.vlgmr.msra.gmra.mrb[52].mxu1 %vm6740_vm2, %v7258_v42 }
 0xb86   :  { %15060 = vmatpush3.bf16.xpose.msra.mxu1 %v7319_v44  ;;  %15061 = vmatprep.mubr.msk.bf16.mxu1 %vm18046_vm1, %v18045_v6 }
 0xb87   :  { %15065 = vmatprep.subr.bf16.mxu1 %v18045_v6 }
 0xb8d   :  { %15062 = vmatmul.mubr.msk.bf16.vlgmr.msra.gmra.mrb[56].mxu1 %vm6692_vm0, %v7311_v26 }
 0xb8e   :  { %15067 = vmatprep.mubr.msk.bf16.mxu1 %vm18046_vm1, %v18045_v6 }
 0xc58   :  { %v18579_v43 = vpop.f32.mrb[52].mxu1 }
 0xc59   :  { %v15057_v48 = vpop.f32.mrb[53].mxu1 }
 0xc5a   :  { %v18581_v49 = vpop.f32.mrb[54].mxu1 }
 0xc5b   :  { %v15058_v60 = vpop.f32.mrb[55].mxu1 }
 0xc60   :  { %v7355_v36 = vpop.f32.mrb[56].mxu1 }
 0xc61   :  { %v7356_v0 = vadd.f32 %v7355_v36, %v18446_v22  ;;  %v15063_v5 = vpop.f32.mrb[57].mxu1 }
 0xc62   :  { %v7358_v24 = vpop.f32.mrb[58].mxu1 }
 0xc63   :  { %v7359_v9 = vadd.f32 %v7358_v24, %v18446_v22  ;;  %v15064_v53 = vpop.f32.mrb[59].mxu1  ;;  %v7362_v55 = vsel %vm6740_vm2, %v7356_v0, -inf }
 0xc64   :  { %7363 = vmax.xlane.f32.xlu0 %v7362_v55 }
 0xc65   :  { %v7365_v50 = vsel %vm6740_vm2, %v7359_v9, -inf }
 0xc66   :  { %7366 = vmax.xlane.f32.xlu1 %v7365_v50 }
 0xc77   :  { %7382 = vrot.lane.b32.xlu1 %v18440_v4, %s18042_s10  ;;  %v7446_v4 = vsel %vm6692_vm0, %v18434_v45, 0 }
 0xcf1   :  { %v7364_v14 = vpop.xlane.xlu0 %7363 }
 0xcf2   :  { %v7368_v15 = vsub.f32 %v7356_v0, %v7364_v14 }
 0xcf3   :  { %v7367_v17 = vpop.xlane.xlu1 %7366 }
 0xcf4   :  { %v7370_v18 = vmul.f32 1.442695, %v7368_v15  ;;  %v7369_v23 = vsub.f32 %v7359_v9, %v7367_v17 }
 0xcf6   :  { %v7372_v32 = vmul.f32 1.442695, %v7369_v23  ;;  %17578 = vpow2.f32 %v7370_v18 }
 0xcf7   :  { %v7383_v34 = vpop.permute.xlu1 %7382 }
 0xcf8   :  { %17580 = vpow2.f32 %v7372_v32  ;;  %15066 = vmatpush3.bf16.msra.mxu1 %v7383_v34 }
 0xcf9   :  { %15071 = vmatprep.subr.bf16.mxu1 %v18045_v6 }
 0xd00   :  { %v18590_v12 = vpop.eup %17578 }
 0xd02   :  { %v18592_v38 = vpop.eup %17580 }
 0xd03   :  { %v7380_v41 = vpack.c.bf16 %v18592_v38, %v18590_v12 }
 0xd05   :  { %15068 = vmatmul.mubr.msk.bf16.vlgmr.msra.gmra.mrb[60].mxu1 %vm6740_vm2, %v7380_v41 }
 0xd06   :  { %15072 = vmatpush3.bf16.xpose.msra.mxu1 %v7446_v4  ;;  %15073 = vmatprep.mubr.msk.bf16.mxu1 %vm18046_vm1, %v18045_v6 }
 0xd07   :  { %15077 = vmatprep.subr.bf16.mxu1 %v18045_v6 }
 0xd0d   :  { %15074 = vmatmul.mubr.msk.bf16.vlgmr.msra.gmra.mrb[64].mxu1 %vm6692_vm0, %v18354_v28 }
 0xd0e   :  { %15078 = vmatpush3.bf16.msra.mxu1 %v18442_v7  ;;  %15079 = vmatprep.mubr.msk.bf16.mxu1 %vm18046_vm1, %v18045_v6 }
 0xd0f   :  { %15083 = vmatprep.subr.bf16.mxu1 %v18045_v6 }
 0xdd8   :  { %v18608_v42 = vpop.f32.mrb[60].mxu1 }
 0xdd9   :  { %v15069_v44 = vpop.f32.mrb[61].mxu1 }
 0xdda   :  { %v18610_v26 = vpop.f32.mrb[62].mxu1  ;;  %v16504_v44 = vld [vmem:[#allocation8 + $0x44] ss:$72 sps:$4 sm:$0xff]  }
 0xddb   :  { %v15070_v48 = vpop.f32.mrb[63].mxu1  ;;  %6554 = vmatprep.subr.bf16.mxu0 %v16504_v44  ;;  %v16534_v44 = vld [vmem:[#allocation8 + $0x5e4] ss:$72 sps:$4 sm:$0xff]  }
 0xddc   :  { %v16502_v48 = vld [vmem:[#allocation8 + $0x40] ss:$72 sps:$4 sm:$0xff]  }
 0xddd   :  { %6555 = vmatpush1.bf16.msra.mxu0 %v16502_v48  ;;  %v16532_v48 = vld [vmem:[#allocation8 + $0x5e0] ss:$72 sps:$4 sm:$0xff]  }
 0xde0   :  { %v7482_v60 = vpop.f32.mrb[64].mxu1 }
 0xde1   :  { %v7483_v36 = vadd.f32 %v7482_v60, %v18446_v22  ;;  %v15075_v0 = vpop.f32.mrb[65].mxu1  ;;  %v16505_v60 = vld [vmem:[#allocation8 + $0xd0] ss:$72 sps:$4 sm:$0xff]  }
 0xde2   :  { %v7485_v5 = vpop.f32.mrb[66].mxu1  ;;  %v16510_v0 = vld [vmem:[#allocation8 + $0x164] ss:$72 sps:$4 sm:$0xff]  }
 0xde3   :  { %v7486_v24 = vadd.f32 %v7485_v5, %v18446_v22  ;;  %v15076_v9 = vpop.f32.mrb[67].mxu1  ;;  %v7489_v53 = vsel %vm6740_vm2, %v7483_v36, -inf  ;;  %v16508_v5 = vld [vmem:[#allocation8 + $0x160] ss:$72 sps:$4 sm:$0xff]  }
 0xde4   :  { %7490 = vmax.xlane.f32.xlu1 %v7489_v53  ;;  %v16511_v9 = vld [vmem:[#allocation8 + $0x1f0] ss:$72 sps:$4 sm:$0xff]   ;;  %v16516_v53 = vld [vmem:[#allocation8 + $0x284] ss:$72 sps:$4 sm:$0xff]  }
 0xde5   :  { %v7492_v55 = vsel %vm6740_vm2, %v7486_v24, -inf }
 0xde6   :  { %7493 = vmax.xlane.f32.xlu0 %v7492_v55  ;;  %v16514_v55 = vld [vmem:[#allocation8 + $0x280] ss:$72 sps:$4 sm:$0xff]  }
 0xdfc   :  { %7562 = vrot.lane.b32.xlu0 %v18434_v45, %s18042_s10 }
 0xe00   :  { %7559 = vrot.lane.b32.xlu0 %v18354_v28, %s18042_s10 }
 0xe71   :  { %v7491_v50 = vpop.xlane.xlu1 %7490 }
 0xe72   :  { %v7495_v14 = vsub.f32 %v7483_v36, %v7491_v50  ;;  %v16507_v36 = vld [vmem:[#allocation8 + $0xd4] ss:$72 sps:$4 sm:$0xff]  }
 0xe73   :  { %v7494_v15 = vpop.xlane.xlu0 %7493  ;;  %6556 = vmatprep.subr.bf16.mxu0 %v16507_v36  ;;  %v16519_v50 = vld [vmem:[#allocation8 + $0x314] ss:$72 sps:$4 sm:$0xff]   ;;  %v16535_v36 = vld [vmem:[#allocation8 + $0x670] ss:$72 sps:$4 sm:$0xff]  }
 0xe74   :  { %v7497_v17 = vmul.f32 1.442695, %v7495_v14  ;;  %v7496_v18 = vsub.f32 %v7486_v24, %v7494_v15  ;;  %6557 = vmatpush1.bf16.msra.mxu0 %v16505_v60  ;;  %v16513_v24 = vld [vmem:[#allocation8 + $0x1f4] ss:$72 sps:$4 sm:$0xff]   ;;  %v16517_v14 = vld [vmem:[#allocation8 + $0x310] ss:$72 sps:$4 sm:$0xff]  }
 0xe75   :  { %6558 = vmatprep.subr.bf16.mxu0 %v16510_v0  ;;  %v16520_v15 = vld [vmem:[#allocation8 + $0x3a0] ss:$72 sps:$4 sm:$0xff]   ;;  %v16537_v60 = vld [vmem:[#allocation8 + $0x674] ss:$72 sps:$4 sm:$0xff]   ;;  %v16540_v0 = vld [vmem:[#allocation8 + $0x704] ss:$72 sps:$4 sm:$0xff]  }
 0xe76   :  { %v7499_v23 = vmul.f32 1.442695, %v7496_v18  ;;  %17582 = vpow2.f32 %v7497_v17  ;;  %v16522_v17 = vld [vmem:[#allocation8 + $0x3a4] ss:$72 sps:$4 sm:$0xff]   ;;  %v16525_v18 = vld [vmem:[#allocation8 + $0x434] ss:$72 sps:$4 sm:$0xff]  }
 0xe77   :  { %v7563_v41 = vpop.permute.xlu0 %7562 }
 0xe78   :  { %17584 = vpow2.f32 %v7499_v23  ;;  %v7568_v45 = vsel %vm6692_vm0, %v7563_v41, 0  ;;  %6559 = vmatpush1.bf16.msra.mxu0 %v16508_v5  ;;  %v16523_v23 = vld [vmem:[#allocation8 + $0x430] ss:$72 sps:$4 sm:$0xff]   ;;  %v16528_v41 = vld [vmem:[#allocation8 + $0x4c4] ss:$72 sps:$4 sm:$0xff]  }
 0xe79   :  { %6560 = vmatprep.subr.bf16.mxu0 %v16513_v24  ;;  %v16538_v5 = vld [vmem:[#allocation8 + $0x700] ss:$72 sps:$4 sm:$0xff]   ;;  %v16543_v24 = vld [vmem:[#allocation8 + $0x794] ss:$72 sps:$4 sm:$0xff]  }
 0xe7b   :  { %v7560_v28 = vpop.permute.xlu0 %7559 }
 0xe7c   :  { %6561 = vmatpush1.bf16.msra.mxu0 %v16511_v9  ;;  %v16541_v9 = vld [vmem:[#allocation8 + $0x790] ss:$72 sps:$4 sm:$0xff]  }
 0xe7d   :  { %6562 = vmatprep.subr.bf16.mxu0 %v16516_v53  ;;  %v16546_v53 = vld [vmem:[#allocation8 + $0x824] ss:$72 sps:$4 sm:$0xff]  }
 0xe80   :  { %v18620_v32 = vpop.eup %17582  ;;  %6563 = vmatpush1.bf16.msra.mxu0 %v16514_v55  ;;  %v16544_v55 = vld [vmem:[#allocation8 + $0x820] ss:$72 sps:$4 sm:$0xff]  }
 0xe81   :  { %6564 = vmatprep.subr.bf16.mxu0 %v16519_v50  ;;  %v16549_v50 = vld [vmem:[#allocation8 + $0x8b4] ss:$72 sps:$4 sm:$0xff]  }
 0xe82   :  { %v18622_v34 = vpop.eup %17584 }
 0xe83   :  { %v7507_v4 = vpack.c.bf16 %v18622_v34, %v18620_v32 }
 0xe84   :  { %6565 = vmatpush1.bf16.msra.mxu0 %v16517_v14  ;;  %v16547_v14 = vld [vmem:[#allocation8 + $0x8b0] ss:$72 sps:$4 sm:$0xff]  }
 0xe85   :  { %15080 = vmatmul.mubr.msk.bf16.vlgmr.msra.gmra.mrb[68].mxu1 %vm6740_vm2, %v7507_v4  ;;  %6566 = vmatprep.subr.bf16.mxu0 %v16522_v17  ;;  %v16526_v4 = vld [vmem:[#allocation8 + $0x4c0] ss:$72 sps:$4 sm:$0xff]  }
 0xe86   :  { %15084 = vmatpush3.bf16.xpose.msra.mxu1 %v7568_v45  ;;  %15085 = vmatprep.mubr.msk.bf16.mxu1 %vm18046_vm1, %v18045_v6  ;;  %v16531_v45 = vld [vmem:[#allocation8 + $0x554] ss:$72 sps:$4 sm:$0xff]   ;;  %v16550_v17 = vld [vmem:[#allocation8 + $0x940] ss:$72 sps:$4 sm:$0xff]  }
 0xe87   :  { %15089 = vmatprep.subr.bf16.mxu1 %v18045_v6 }
 0xe88   :  { %6567 = vmatpush1.bf16.msra.mxu0 %v16520_v15  ;;  %v16552_v15 = vld [vmem:[#allocation8 + $0x944] ss:$72 sps:$4 sm:$0xff]  }
 0xe89   :  { %6568 = vmatprep.subr.bf16.mxu0 %v16525_v18  ;;  %v16555_v18 = vld [vmem:[#allocation8 + $0x9d4] ss:$72 sps:$4 sm:$0xff]  }
 0xe8c   :  { %6569 = vmatpush1.bf16.msra.mxu0 %v16523_v23  ;;  %v16553_v23 = vld [vmem:[#allocation8 + $0x9d0] ss:$72 sps:$4 sm:$0xff]  }
 0xe8d   :  { %15086 = vmatmul.mubr.msk.bf16.vlgmr.msra.gmra.mrb[72].mxu1 %vm6692_vm0, %v7560_v28  ;;  %6570 = vmatprep.subr.bf16.mxu0 %v16528_v41  ;;  %v16529_v28 = vld [vmem:[#allocation8 + $0x550] ss:$72 sps:$4 sm:$0xff]   ;;  %v16558_v41 = vld [vmem:[#allocation8 + $0xa64] ss:$72 sps:$4 sm:$0xff]  }
 0xe8e   :  { %15091 = vmatprep.mubr.msk.bf16.mxu1 %vm18046_vm1, %v18045_v6 }
 0xe90   :  { %6571 = vmatpush1.bf16.msra.mxu0 %v16526_v4  ;;  %v16556_v4 = vld [vmem:[#allocation8 + $0xa60] ss:$72 sps:$4 sm:$0xff]  }
 0xe91   :  { %6572 = vmatprep.subr.bf16.mxu0 %v16531_v45  ;;  %v16561_v45 = vld [vmem:[#allocation8 + $0xaf4] ss:$72 sps:$4 sm:$0xff]  }
 0xe94   :  { %6573 = vmatpush1.bf16.msra.mxu0 %v16529_v28  ;;  %v16559_v28 = vld [vmem:[#allocation8 + $0xaf0] ss:$72 sps:$4 sm:$0xff]  }
 0xe95   :  { %6574 = vmatprep.subr.bf16.mxu0 %v16534_v44  ;;  %v16564_v44 = vld [vmem:[#allocation8 + $0xb84] ss:$72 sps:$4 sm:$0xff]  }
 0xe98   :  { %6575 = vmatpush1.bf16.msra.mxu0 %v16532_v48  ;;  %v16562_v48 = vld [vmem:[#allocation8 + $0xb80] ss:$72 sps:$4 sm:$0xff]  }
 0xe99   :  { %6576 = vmatprep.subr.bf16.mxu0 %v16537_v60  ;;  %v16567_v60 = vld [vmem:[#allocation8 + $0xc14] ss:$72 sps:$4 sm:$0xff]  }
 0xe9c   :  { %6577 = vmatpush1.bf16.msra.mxu0 %v16535_v36  ;;  %v16570_v36 = vld [vmem:[#allocation8 + $0xca4] ss:$72 sps:$4 sm:$0xff]  }
 0xe9d   :  { %6578 = vmatprep.subr.bf16.mxu0 %v16540_v0  ;;  %v16573_v0 = vld [vmem:[#allocation8 + $0xd34] ss:$72 sps:$4 sm:$0xff]  }
 0xea0   :  { %6579 = vmatpush1.bf16.msra.mxu0 %v16538_v5  ;;  %v16571_v5 = vld [vmem:[#allocation8 + $0xd30] ss:$72 sps:$4 sm:$0xff]  }
 0xea1   :  { %6580 = vmatprep.subr.bf16.mxu0 %v16543_v24  ;;  %v16576_v24 = vld [vmem:[#allocation8 + $0xdc4] ss:$72 sps:$4 sm:$0xff]  }
 0xea4   :  { %6581 = vmatpush1.bf16.msra.mxu0 %v16541_v9  ;;  %v16574_v9 = vld [vmem:[#allocation8 + $0xdc0] ss:$72 sps:$4 sm:$0xff]  }
 0xea5   :  { %6582 = vmatprep.subr.bf16.mxu0 %v16546_v53  ;;  %v16579_v53 = vld [vmem:[#allocation8 + $0xe54] ss:$72 sps:$4 sm:$0xff]  }
 0xea8   :  { %6583 = vmatpush1.bf16.msra.mxu0 %v16544_v55  ;;  %v16577_v55 = vld [vmem:[#allocation8 + $0xe50] ss:$72 sps:$4 sm:$0xff]  }
 0xea9   :  { %6584 = vmatprep.subr.bf16.mxu0 %v16549_v50  ;;  %v16582_v50 = vld [vmem:[#allocation8 + $0xee4] ss:$72 sps:$4 sm:$0xff]  }
 0xeac   :  { %6585 = vmatpush1.bf16.msra.mxu0 %v16547_v14  ;;  %v16580_v14 = vld [vmem:[#allocation8 + $0xee0] ss:$72 sps:$4 sm:$0xff]  }
 0xead   :  { %6597 = vmatprep.subr.bf16.mxu0 %v16552_v15  ;;  %v16585_v15 = vld [vmem:[#allocation8 + $0xf74] ss:$72 sps:$4 sm:$0xff]  }
 0xeaf   :  { %6587 = vmatmul.mubr.bf16.vlgmr.msra.gmra.mrb[16].mxu0 %v18305_v2  ;;  %v16565_v2 = vld [vmem:[#allocation8 + $0xc10] ss:$72 sps:$4 sm:$0xff]  }
 0xeb0   :  { %6598 = vmatpush1.bf16.msra.mxu0 %v16550_v17  ;;  %6629 = vmatprep.mubr.bf16.mxu0 %v18308_v20  ;;  %v16568_v20 = vld [vmem:[#allocation8 + $0xca0] ss:$72 sps:$4 sm:$0xff]   ;;  %v16583_v17 = vld [vmem:[#allocation8 + $0xf70] ss:$72 sps:$4 sm:$0xff]  }
 0xeb1   :  { %6599 = vmatprep.subr.bf16.mxu0 %v16555_v18  ;;  %v16588_v18 = vld [vmem:[#allocation8 + $0x1004] ss:$72 sps:$4 sm:$0xff]  }
 0xeb4   :  { %6600 = vmatpush1.bf16.msra.mxu0 %v16553_v23  ;;  %v16586_v23 = vld [vmem:[#allocation8 + $0x1000] ss:$72 sps:$4 sm:$0xff]  }
 0xeb5   :  { %6601 = vmatprep.subr.bf16.mxu0 %v16558_v41  ;;  %v16591_v41 = vld [vmem:[#allocation8 + $0x1094] ss:$72 sps:$4 sm:$0xff]  }
 0xeb8   :  { %6602 = vmatpush1.bf16.msra.mxu0 %v16556_v4  ;;  %v16589_v4 = vld [vmem:[#allocation8 + $0x1090] ss:$72 sps:$4 sm:$0xff]  }
 0xeb9   :  { %6603 = vmatprep.subr.bf16.mxu0 %v16561_v45  ;;  %v16594_v45 = vld [vmem:[#allocation8 + $0x1124] ss:$72 sps:$4 sm:$0xff]  }
 0xebc   :  { %6604 = vmatpush1.bf16.msra.mxu0 %v16559_v28  ;;  %v16592_v28 = vld [vmem:[#allocation8 + $0x1120] ss:$72 sps:$4 sm:$0xff]  }
 0xebd   :  { %6605 = vmatprep.subr.bf16.mxu0 %v16564_v44 }
 0xec0   :  { %6606 = vmatpush1.bf16.msra.mxu0 %v16562_v48  ;;  %v16597_v48 = vld [vmem:[#allocation8 + $0x11b4] ss:$72 sps:$4 sm:$0xff]  }
 0xec1   :  { %6607 = vmatprep.subr.bf16.mxu0 %v16567_v60 }
 0xec4   :  { %6608 = vmatpush1.bf16.msra.mxu0 %v16565_v2 }
 0xec5   :  { %6609 = vmatprep.subr.bf16.mxu0 %v16570_v36 }
 0xec8   :  { %6610 = vmatpush1.bf16.msra.mxu0 %v16568_v20  ;;  %v16595_v20 = vld [vmem:[#allocation8 + $0x11b0] ss:$72 sps:$4 sm:$0xff]  }
 0xec9   :  { %6611 = vmatprep.subr.bf16.mxu0 %v16573_v0  ;;  %v16600_v0 = vld [vmem:[#allocation8 + $0x1244] ss:$72 sps:$4 sm:$0xff]  }
 0xecc   :  { %6612 = vmatpush1.bf16.msra.mxu0 %v16571_v5  ;;  %v16598_v5 = vld [vmem:[#allocation8 + $0x1240] ss:$72 sps:$4 sm:$0xff]  }
 0xecd   :  { %6613 = vmatprep.subr.bf16.mxu0 %v16576_v24 }
 0xed0   :  { %6614 = vmatpush1.bf16.msra.mxu0 %v16574_v9  ;;  %v16603_v9 = vld [vmem:[#allocation8 + $0x12d4] ss:$72 sps:$4 sm:$0xff]  }
 0xed1   :  { %6615 = vmatprep.subr.bf16.mxu0 %v16579_v53 }
 0xed4   :  { %6616 = vmatpush1.bf16.msra.mxu0 %v16577_v55 }
 0xed5   :  { %6617 = vmatprep.subr.bf16.mxu0 %v16582_v50 }
 0xed8   :  { %6618 = vmatpush1.bf16.msra.mxu0 %v16580_v14 }
 0xed9   :  { %6619 = vmatprep.subr.bf16.mxu0 %v16585_v15 }
 0xedc   :  { %6620 = vmatpush1.bf16.msra.mxu0 %v16583_v17 }
 0xedd   :  { %6621 = vmatprep.subr.bf16.mxu0 %v16588_v18  ;;  %v16601_v18 = vld [vmem:[#allocation8 + $0x12d0] ss:$72 sps:$4 sm:$0xff]  }
 0xee0   :  { %6622 = vmatpush1.bf16.msra.mxu0 %v16586_v23  ;;  %v16606_v23 = vld [vmem:[#allocation8 + $0x1364] ss:$72 sps:$4 sm:$0xff]  }
 0xee1   :  { %6623 = vmatprep.subr.bf16.mxu0 %v16591_v41 }
 0xee4   :  { %6624 = vmatpush1.bf16.msra.mxu0 %v16589_v4  ;;  %v16609_v4 = vld [vmem:[#allocation8 + $0x13f4] ss:$72 sps:$4 sm:$0xff]  }
 0xee5   :  { %6625 = vmatprep.subr.bf16.mxu0 %v16594_v45  ;;  %v16607_v45 = vld [vmem:[#allocation8 + $0x13f0] ss:$72 sps:$4 sm:$0xff]  }
 0xee8   :  { %6626 = vmatpush1.bf16.msra.mxu0 %v16592_v28  ;;  %v16612_v28 = vld [vmem:[#allocation8 + $0x1484] ss:$72 sps:$4 sm:$0xff]  }
 0xee9   :  { %6627 = vmatprep.subr.bf16.mxu0 %v16597_v48  ;;  %v16610_v48 = vld [vmem:[#allocation8 + $0x1480] ss:$72 sps:$4 sm:$0xff]  }
 0xeec   :  { %6628 = vmatpush1.bf16.msra.mxu0 %v16595_v20  ;;  %v16618_v20 = vld [vmem:[#allocation8 + $0x15a4] ss:$72 sps:$4 sm:$0xff]  }
 0xeed   :  { %6640 = vmatprep.subr.bf16.mxu0 %v16600_v0  ;;  %v16621_v0 = vld [vmem:[#allocation8 + $0x1634] ss:$72 sps:$4 sm:$0xff]  }
 0xeef   :  { %6630 = vmatmul.mubr.bf16.vlgmr.msra.gmra.mrb[16].mxu0 %v18313_v10  ;;  %v16604_v10 = vld [vmem:[#allocation8 + $0x1360] ss:$72 sps:$4 sm:$0xff]  }
 0xef0   :  { %6641 = vmatpush1.bf16.msra.mxu0 %v16598_v5  ;;  %6672 = vmatprep.mubr.bf16.mxu0 %v18315_v16  ;;  %v16615_v16 = vld [vmem:[#allocation8 + $0x1514] ss:$72 sps:$4 sm:$0xff]   ;;  %v16619_v5 = vld [vmem:[#allocation8 + $0x1630] ss:$72 sps:$4 sm:$0xff]  }
 0xef1   :  { %6642 = vmatprep.subr.bf16.mxu0 %v16603_v9  ;;  %v16622_v9 = vld [vmem:[#allocation8 + $0x16c0] ss:$72 sps:$4 sm:$0xff]  }
 0xef4   :  { %6643 = vmatpush1.bf16.msra.mxu0 %v16601_v18  ;;  %v16631_v18 = vld [vmem:[#allocation8 + $0x1870] ss:$72 sps:$4 sm:$0xff]  }
 0xef5   :  { %6644 = vmatprep.subr.bf16.mxu0 %v16606_v23  ;;  %v16636_v23 = vld [vmem:[#allocation8 + $0x1904] ss:$72 sps:$4 sm:$0xff]  }
 0xef8   :  { %6645 = vmatpush1.bf16.msra.mxu0 %v16604_v10  ;;  %v16639_v10 = vld [vmem:[#allocation8 + $0x1994] ss:$72 sps:$4 sm:$0xff]  }
 0xef9   :  { %6646 = vmatprep.subr.bf16.mxu0 %v16609_v4  ;;  %v16637_v4 = vld [vmem:[#allocation8 + $0x1990] ss:$72 sps:$4 sm:$0xff]  }
 0xefc   :  { %6647 = vmatpush1.bf16.msra.mxu0 %v16607_v45  ;;  %v16642_v45 = vld [vmem:[#allocation8 + $0x1a24] ss:$72 sps:$4 sm:$0xff]  }
 0xefd   :  { %6648 = vmatprep.subr.bf16.mxu0 %v16612_v28  ;;  %v16640_v28 = vld [vmem:[#allocation8 + $0x1a20] ss:$72 sps:$4 sm:$0xff]  }
 0xf00   :  { %6649 = vmatpush1.bf16.msra.mxu0 %v16610_v48  ;;  %v16645_v48 = vld [vmem:[#allocation8 + $0x1ab4] ss:$72 sps:$4 sm:$0xff]  }
 0xf01   :  { %6650 = vmatprep.subr.bf16.mxu0 %v16615_v16  ;;  %v16643_v16 = vld [vmem:[#allocation8 + $0x1ab0] ss:$72 sps:$4 sm:$0xff]  }
 0xf58   :  { %v18636_v44 = vpop.f32.mrb[68].mxu1 }
 0xf59   :  { %v15081_v60 = vpop.f32.mrb[69].mxu1 }
 0xf5a   :  { %v18638_v2 = vpop.f32.mrb[70].mxu1  ;;  %v16613_v60 = vld [vmem:[#allocation8 + $0x1510] ss:$72 sps:$4 sm:$0xff]  }
 0xf5b   :  { %v15082_v36 = vpop.f32.mrb[71].mxu1  ;;  %6651 = vmatpush1.bf16.msra.mxu0 %v16613_v60 }
 0xf5c   :  { %v16616_v36 = vld [vmem:[#allocation8 + $0x15a0] ss:$72 sps:$4 sm:$0xff]   ;;  %6652 = vmatprep.subr.bf16.mxu0 %v16618_v20 }
 0xf5f   :  { %6653 = vmatpush1.bf16.msra.mxu0 %v16616_v36 }
 0xf60   :  { %v7604_v24 = vpop.f32.mrb[72].mxu1  ;;  %6654 = vmatprep.subr.bf16.mxu0 %v16621_v0 }
 0xf61   :  { %v18641_v53 = vadd.f32 %v7604_v24, %v18446_v22  ;;  %v15087_v55 = vpop.f32.mrb[73].mxu1  ;;  %v16624_v24 = vld [vmem:[#allocation8 + $0x16c4] ss:$72 sps:$4 sm:$0xff]  }
 0xf62   :  { %v7607_v50 = vpop.f32.mrb[74].mxu1  ;;  %v16627_v55 = vld [vmem:[#allocation8 + $0x1754] ss:$72 sps:$4 sm:$0xff]  }
 0xf63   :  { %v18645_v14 = vadd.f32 %v7607_v50, %v18446_v22  ;;  %v15088_v15 = vpop.f32.mrb[75].mxu1  ;;  %v7611_v17 = vsel %vm6740_vm2, %v18641_v53, -inf  ;;  %6655 = vmatpush1.bf16.msra.mxu0 %v16619_v5  ;;  %v16625_v50 = vld [vmem:[#allocation8 + $0x1750] ss:$72 sps:$4 sm:$0xff]  }
 0xf64   :  { %7612 = vmax.xlane.f32.xlu0 %v7611_v17  ;;  %6656 = vmatprep.subr.bf16.mxu0 %v16624_v24  ;;  %v16630_v15 = vld [vmem:[#allocation8 + $0x17e4] ss:$72 sps:$4 sm:$0xff]   ;;  %v16628_v17 = vld [vmem:[#allocation8 + $0x17e0] ss:$72 sps:$4 sm:$0xff]  }
 0xf65   :  { %v7614_v41 = vsel %vm6740_vm2, %v18645_v14, -inf }
 0xf66   :  { %7615 = vmax.xlane.f32.xlu1 %v7614_v41  ;;  %v16634_v41 = vld [vmem:[#allocation8 + $0x1900] ss:$72 sps:$4 sm:$0xff]  }
 0xf67   :  { %6657 = vmatpush1.bf16.msra.mxu0 %v16622_v9 }
 0xf68   :  { %6658 = vmatprep.subr.bf16.mxu0 %v16627_v55 }
 0xf6b   :  { %6659 = vmatpush1.bf16.msra.mxu0 %v16625_v50 }
 0xf6c   :  { %6660 = vmatprep.subr.bf16.mxu0 %v16630_v15 }
 0xf6f   :  { %6661 = vmatpush1.bf16.msra.mxu0 %v16628_v17 }
 0xf77   :  { %7631 = vrot.lane.b32.xlu1 %v18442_v7, %s18042_s10  ;;  %v16633_v7 = vld [vmem:[#allocation8 + $0x1874] ss:$72 sps:$4 sm:$0xff]  }
 0xf78   :  { %6662 = vmatprep.subr.bf16.mxu0 %v16633_v7 }
 0xf79   :  { %6663 = vmatpush1.bf16.msra.mxu0 %v16631_v18 }
 0xf7a   :  { %6664 = vmatprep.subr.bf16.mxu0 %v16636_v23 }
 0xf7d   :  { %6665 = vmatpush1.bf16.msra.mxu0 %v16634_v41 }
 0xf7e   :  { %6666 = vmatprep.subr.bf16.mxu0 %v16639_v10 }
 0xf81   :  { %6667 = vmatpush1.bf16.msra.mxu0 %v16637_v4 }
 0xf82   :  { %6668 = vmatprep.subr.bf16.mxu0 %v16642_v45 }
 0xf85   :  { %6669 = vmatpush1.bf16.msra.mxu0 %v16640_v28 }
 0xf86   :  { %6670 = vmatprep.subr.bf16.mxu0 %v16645_v48 }
 0xf89   :  { %6671 = vmatpush1.bf16.msra.mxu0 %v16643_v16 }
 0xf8c   :  { %6673 = vmatmul.mubr.bf16.vlgmr.msra.gmra.mrb[16].mxu0 %v18321_v21 }
 0xff1   :  { %v7613_v60 = vpop.xlane.xlu0 %7612 }
 0xff2   :  { %v7617_v36 = vsub.f32 %v18641_v53, %v7613_v60  ;;  %v7695_v53 = vsel %vm6692_vm0, %v18426_v33, 0 }
 0xff3   :  { %v7616_v20 = vpop.xlane.xlu1 %7615 }
 0xff4   :  { %v7619_v0 = vmul.f32 1.442695, %v7617_v36  ;;  %v7618_v5 = vsub.f32 %v18645_v14, %v7616_v20  ;;  %v1108_v14 = vld [vmem:[#allocation9 + $0x10] sm:$0x3] }
 0xff5   :  { %v1179_v15 = vrot.slane %v1108_v14, %v18352_v27  ;;  %v1183_v17 = vrot.slane %v1108_v14, %v18357_v31 }
 0xff6   :  { %v7621_v24 = vmul.f32 1.442695, %v7618_v5  ;;  %17586 = vpow2.f32 %v7619_v0 }
 0xff7   :  { %v7632_v9 = vpop.permute.xlu1 %7631 }
 0xff8   :  { %17588 = vpow2.f32 %v7621_v24  ;;  %15090 = vmatpush3.bf16.msra.mxu1 %v7632_v9 }
 0xff9   :  { %15095 = vmatprep.subr.bf16.mxu1 %v18045_v6 }
0x1000   :  { %v18658_v55 = vpop.eup %17586 }
0x1002   :  { %v18660_v50 = vpop.eup %17588 }
0x1003   :  { %v7629_v21 = vpack.c.bf16 %v18660_v50, %v18658_v55 }
0x1005   :  { %15092 = vmatmul.mubr.msk.bf16.vlgmr.msra.gmra.mrb[76].mxu1 %vm6740_vm2, %v7629_v21 }
0x1006   :  { %15096 = vmatpush3.bf16.xpose.msra.mxu1 %v7695_v53  ;;  %15097 = vmatprep.mubr.msk.bf16.mxu1 %vm18046_vm1, %v18045_v6 }
0x1007   :  { %15101 = vmatprep.subr.bf16.mxu1 %v18045_v6 }
0x100d   :  { %15098 = vmatmul.mubr.msk.bf16.vlgmr.msra.gmra.mrb[80].mxu1 %vm6692_vm0, %v18399_v19 }
0x100e   :  { %15103 = vmatprep.mubr.msk.bf16.mxu1 %vm18046_vm1, %v18045_v6 }
0x105f   :  { %v6674_v7 = vpop.f32.mrb[16].mxu0 }
0x1060   :  { %v15175_v18 = vadd.f32 %v6674_v7, %v1179_v15  ;;  %v6676_v23 = vpop.f32.mrb[17].mxu0 }
0x1061   :  { %v15176_v41 = vadd.f32 %v6676_v23, %v1183_v17  ;;  %v6678_v10 = vpop.f32.mrb[18].mxu0 }
0x1062   :  { %v15177_v4 = vadd.f32 %v6678_v10, %v1179_v15  ;;  %v6680_v45 = vpop.f32.mrb[19].mxu0 }
0x1063   :  { %v15178_v28 = vadd.f32 %v6680_v45, %v1183_v17 }
0x1064   :  { %v7690_v48 = vpack.c.bf16 %v15177_v4, %v15175_v18 }
0x1065   :  { %v18676_v16 = vpack.c.bf16 %v15178_v28, %v15176_v41 }
0x1066   :  { %15102 = vmatpush3.bf16.msra.mxu1 %v7690_v48 }
0x1067   :  { %15107 = vmatprep.subr.bf16.mxu1 %v18045_v6 }
0x10d8   :  { %v18679_v60 = vpop.f32.mrb[76].mxu1 }
0x10d9   :  { %v15093_v36 = vpop.f32.mrb[77].mxu1 }
0x10da   :  { %v18681_v20 = vpop.f32.mrb[78].mxu1 }
0x10db   :  { %v15094_v0 = vpop.f32.mrb[79].mxu1 }
0x10e0   :  { %v7731_v5 = vpop.f32.mrb[80].mxu1 }
0x10e1   :  { %v7732_v24 = vadd.f32 %v7731_v5, %v18446_v22  ;;  %v15099_v9 = vpop.f32.mrb[81].mxu1 }
0x10e2   :  { %v7734_v21 = vpop.f32.mrb[82].mxu1 }
0x10e3   :  { %v7735_v53 = vadd.f32 %v7734_v21, %v18446_v22  ;;  %v15100_v14 = vpop.f32.mrb[83].mxu1  ;;  %v7738_v15 = vsel %vm6740_vm2, %v7732_v24, -inf }
0x10e4   :  { %7739 = vmax.xlane.f32.xlu1 %v7738_v15 }
0x10e5   :  { %v7741_v17 = vsel %vm6740_vm2, %v7735_v53, -inf }
0x10e6   :  { %7742 = vmax.xlane.f32.xlu0 %v7741_v17 }
0x10fc   :  { %7811 = vrot.lane.b32.xlu0 %v18426_v33, %s18042_s10 }
0x1100   :  { %7808 = vrot.lane.b32.xlu0 %v18399_v19, %s18042_s10 }
0x1171   :  { %v7740_v7 = vpop.xlane.xlu1 %7739 }
0x1172   :  { %v7744_v18 = vsub.f32 %v7732_v24, %v7740_v7 }
0x1173   :  { %v7743_v23 = vpop.xlane.xlu0 %7742 }
0x1174   :  { %v7746_v41 = vmul.f32 1.442695, %v7744_v18  ;;  %v7745_v10 = vsub.f32 %v7735_v53, %v7743_v23 }
0x1176   :  { %v7748_v4 = vmul.f32 1.442695, %v7745_v10  ;;  %17590 = vpow2.f32 %v7746_v41 }
0x1177   :  { %v7812_v36 = vpop.permute.xlu0 %7811 }
0x1178   :  { %17592 = vpow2.f32 %v7748_v4  ;;  %v7817_v33 = vsel %vm6692_vm0, %v7812_v36, 0 }
0x117b   :  { %v7809_v19 = vpop.permute.xlu0 %7808 }
0x1180   :  { %v18691_v45 = vpop.eup %17590 }
0x1182   :  { %v18693_v28 = vpop.eup %17592 }
0x1183   :  { %v7756_v0 = vpack.c.bf16 %v18693_v28, %v18691_v45 }
0x1185   :  { %15104 = vmatmul.mubr.msk.bf16.vlgmr.msra.gmra.mrb[84].mxu1 %vm6740_vm2, %v7756_v0 }
0x1186   :  { %15108 = vmatpush3.bf16.xpose.msra.mxu1 %v7817_v33  ;;  %15109 = vmatprep.mubr.msk.bf16.mxu1 %vm18046_vm1, %v18045_v6 }
0x1187   :  { %15113 = vmatprep.subr.bf16.mxu1 %v18045_v6 }
0x118d   :  { %15110 = vmatmul.mubr.msk.bf16.vlgmr.msra.gmra.mrb[88].mxu1 %vm6692_vm0, %v7809_v19 }
0x118e   :  { %15115 = vmatprep.mubr.msk.bf16.mxu1 %vm18046_vm1, %v18045_v6 }
0x1258   :  { %v18705_v5 = vpop.f32.mrb[84].mxu1 }
0x1259   :  { %v15105_v24 = vpop.f32.mrb[85].mxu1 }
0x125a   :  { %v18707_v9 = vpop.f32.mrb[86].mxu1 }
0x125b   :  { %v15106_v21 = vpop.f32.mrb[87].mxu1 }
0x1260   :  { %v7853_v53 = vpop.f32.mrb[88].mxu1 }
0x1261   :  { %v7854_v14 = vadd.f32 %v7853_v53, %v18446_v22  ;;  %v15111_v15 = vpop.f32.mrb[89].mxu1 }
0x1262   :  { %v7856_v17 = vpop.f32.mrb[90].mxu1 }
0x1263   :  { %v7857_v7 = vadd.f32 %v7856_v17, %v18446_v22  ;;  %v15112_v18 = vpop.f32.mrb[91].mxu1  ;;  %v7860_v23 = vsel %vm6740_vm2, %v7854_v14, -inf }
0x1264   :  { %7861 = vmax.xlane.f32.xlu1 %v7860_v23 }
0x1265   :  { %v7863_v41 = vsel %vm6740_vm2, %v7857_v7, -inf }
0x1266   :  { %7864 = vmax.xlane.f32.xlu0 %v7863_v41 }
0x1275   :  { %7880 = vrot.lane.b32.xlu1 %v7690_v48, %s18042_s10  ;;  %v7944_v48 = vsel %vm6692_vm0, %v18428_v52, 0 }
0x12f1   :  { %v7862_v10 = vpop.xlane.xlu1 %7861 }
0x12f2   :  { %v7866_v4 = vsub.f32 %v7854_v14, %v7862_v10 }
0x12f3   :  { %v7865_v36 = vpop.xlane.xlu0 %7864 }
0x12f4   :  { %v7868_v0 = vmul.f32 1.442695, %v7866_v4  ;;  %v7867_v33 = vsub.f32 %v7857_v7, %v7865_v36 }
0x12f5   :  { %v7881_v19 = vpop.permute.xlu1 %7880 }
0x12f6   :  { %v7870_v24 = vmul.f32 1.442695, %v7867_v33  ;;  %15114 = vmatpush3.bf16.msra.mxu1 %v7881_v19  ;;  %17594 = vpow2.f32 %v7868_v0 }
0x12f7   :  { %15119 = vmatprep.subr.bf16.mxu1 %v18045_v6 }
0x12f8   :  { %17596 = vpow2.f32 %v7870_v24 }
0x1300   :  { %v18715_v21 = vpop.eup %17594 }
0x1302   :  { %v18717_v53 = vpop.eup %17596 }
0x1303   :  { %v7878_v15 = vpack.c.bf16 %v18717_v53, %v18715_v21 }
0x1305   :  { %15116 = vmatmul.mubr.msk.bf16.vlgmr.msra.gmra.mrb[92].mxu1 %vm6740_vm2, %v7878_v15 }
0x1306   :  { %15120 = vmatpush3.bf16.xpose.msra.mxu1 %v7944_v48  ;;  %15121 = vmatprep.mubr.msk.bf16.mxu1 %vm18046_vm1, %v18045_v6 }
0x1307   :  { %15125 = vmatprep.subr.bf16.mxu1 %v18045_v6 }
0x130d   :  { %15122 = vmatmul.mubr.msk.bf16.vlgmr.msra.gmra.mrb[96].mxu1 %vm6692_vm0, %v18401_v29 }
0x130e   :  { %15126 = vmatpush3.bf16.msra.mxu1 %v18676_v16  ;;  %15127 = vmatprep.mubr.msk.bf16.mxu1 %vm18046_vm1, %v18045_v6 }
0x130f   :  { %15131 = vmatprep.subr.bf16.mxu1 %v18045_v6 }
0x13d8   :  { %v18733_v14 = vpop.f32.mrb[92].mxu1 }
0x13d9   :  { %v15117_v17 = vpop.f32.mrb[93].mxu1 }
0x13da   :  { %v18735_v7 = vpop.f32.mrb[94].mxu1 }
0x13db   :  { %v15118_v18 = vpop.f32.mrb[95].mxu1 }
0x13e0   :  { %v7980_v23 = vpop.f32.mrb[96].mxu1 }
0x13e1   :  { %v7981_v41 = vadd.f32 %v7980_v23, %v18446_v22  ;;  %v15123_v10 = vpop.f32.mrb[97].mxu1 }
0x13e2   :  { %v7983_v4 = vpop.f32.mrb[98].mxu1 }
0x13e3   :  { %v7984_v36 = vadd.f32 %v7983_v4, %v18446_v22  ;;  %v15124_v0 = vpop.f32.mrb[99].mxu1  ;;  %v7987_v33 = vsel %vm6740_vm2, %v7981_v41, -inf }
0x13e4   :  { %7988 = vmax.xlane.f32.xlu1 %v7987_v33 }
0x13e5   :  { %v7990_v19 = vsel %vm6740_vm2, %v7984_v36, -inf }
0x13e6   :  { %7991 = vmax.xlane.f32.xlu0 %v7990_v19 }
0x13f5   :  { %8057 = vrot.lane.b32.xlu1 %v18401_v29, %s18042_s10 }
0x13fc   :  { %8060 = vrot.lane.b32.xlu0 %v18428_v52, %s18042_s10 }
0x1471   :  { %v7989_v24 = vpop.xlane.xlu1 %7988 }
0x1472   :  { %v7993_v15 = vsub.f32 %v7981_v41, %v7989_v24 }
0x1473   :  { %v7992_v48 = vpop.xlane.xlu0 %7991 }
0x1474   :  { %v7995_v17 = vmul.f32 1.442695, %v7993_v15  ;;  %v7994_v18 = vsub.f32 %v7984_v36, %v7992_v48 }
0x1475   :  { %v8058_v52 = vpop.permute.xlu1 %8057 }
0x1476   :  { %v7997_v23 = vmul.f32 1.442695, %v7994_v18  ;;  %17598 = vpow2.f32 %v7995_v17 }
0x1477   :  { %v8061_v0 = vpop.permute.xlu0 %8060 }
0x1478   :  { %17600 = vpow2.f32 %v7997_v23  ;;  %v8066_v29 = vsel %vm6692_vm0, %v8061_v0, 0 }
0x1480   :  { %v18745_v10 = vpop.eup %17598 }
0x1482   :  { %v18747_v4 = vpop.eup %17600 }
0x1483   :  { %v8005_v33 = vpack.c.bf16 %v18747_v4, %v18745_v10 }
0x1485   :  { %15128 = vmatmul.mubr.msk.bf16.vlgmr.msra.gmra.mrb[100].mxu1 %vm6740_vm2, %v8005_v33 }
0x1486   :  { %15132 = vmatpush3.bf16.xpose.msra.mxu1 %v8066_v29  ;;  %15133 = vmatprep.mubr.msk.bf16.mxu1 %vm18046_vm1, %v18045_v6 }
0x1487   :  { %15137 = vmatprep.subr.bf16.mxu1 %v18045_v6 }
0x148d   :  { %15134 = vmatmul.mubr.msk.bf16.vlgmr.msra.gmra.mrb[104].mxu1 %vm6692_vm0, %v8058_v52  ;;  %v6875_v52 = vsel %vm6740_vm2, %v18480_v25, 0.0  ;;  %v6756_v25 = vsel %vm6740_vm2, %v18458_v47, 0.0  ;;  %v7374_v47 = vsel %vm6740_vm2, %v18590_v12, 0.0  ;;  %v16658_v12 = vld [vmem:[#allocation11 + $0x60] ss:$24 sps:$4 sm:$0xff]  }
0x148e   :  { %15139 = vmatprep.mubr.msk.bf16.mxu1 %vm18046_vm1, %v18045_v6  ;;  %v7125_v6 = vsel %vm6740_vm2, %v18535_v54, 0.0  ;;  %v6753_v54 = vsel %vm6740_vm2, %v18456_v46, 0.0  ;;  %v7128_v46 = vsel %vm6740_vm2, %v18537_v56, 0.0 }
0x1558   :  { %v18759_v41 = vpop.f32.mrb[100].mxu1 }
0x1559   :  { %v15129_v36 = vpop.f32.mrb[101].mxu1 }
0x155a   :  { %v18761_v19 = vpop.f32.mrb[102].mxu1  ;;  %v6878_v36 = vsel %vm6740_vm2, %v18482_v30, 0.0  ;;  %v7623_v30 = vsel %vm6740_vm2, %v18658_v55, 0.0 }
0x155b   :  { %v15130_v24 = vpop.f32.mrb[103].mxu1 }
0x155c   :  { %v7006_v24 = vsel %vm6740_vm2, %v18512_v57, 0.0  ;;  %v7377_v57 = vsel %vm6740_vm2, %v18592_v38, 0.0  ;;  %v16652_v38 = vld [vmem:[#allocation11 + $0x30] ss:$24 sps:$4 sm:$0xff]  }
0x1560   :  { %v8102_v15 = vpop.f32.mrb[104].mxu1 }
0x1561   :  { %v8103_v48 = vadd.f32 %v8102_v15, %v18446_v22  ;;  %v15135_v17 = vpop.f32.mrb[105].mxu1  ;;  %v16648_v15 = vld [vmem:[#allocation11 + $0x4] ss:$24 sps:$4 sm:$0xff]  }
0x1562   :  { %v8105_v18 = vpop.f32.mrb[106].mxu1  ;;  %9952 = vmatprep.subr.bf16.mxu0 %v16648_v15  ;;  %v16678_v15 = vld [vmem:[#allocation11 + $0xf4] ss:$24 sps:$4 sm:$0xff]  }
0x1563   :  { %v8106_v23 = vadd.f32 %v8105_v18, %v18446_v22  ;;  %v15136_v0 = vpop.f32.mrb[107].mxu1  ;;  %v8109_v33 = vsel %vm6740_vm2, %v8103_v48, -inf  ;;  %v7003_v22 = vsel %vm6740_vm2, %v18510_v8, 0.0  ;;  %v7626_v8 = vsel %vm6740_vm2, %v18660_v50, 0.0  ;;  %v16651_v18 = vld [vmem:[#allocation11 + $0xc] ss:$24 sps:$4 sm:$0xff]  }
0x1564   :  { %8110 = vmax.xlane.f32.xlu0 %v8109_v33 }
0x1565   :  { %v8112_v29 = vsel %vm6740_vm2, %v8106_v23, -inf }
0x1566   :  { %8113 = vmax.xlane.f32.xlu1 %v8112_v29  ;;  %v16654_v29 = vld [vmem:[#allocation11 + $0x34] ss:$24 sps:$4 sm:$0xff]  }
0x156a   :  { %7126 = vadd.xlane.f32.xlu1 %v7125_v6 }
0x156e   :  { %6876 = vadd.xlane.f32.xlu1 %v6875_v52 }
0x1572   :  { %6879 = vadd.xlane.f32.xlu1 %v6878_v36  ;;  %v16660_v36 = vld [vmem:[#allocation11 + $0x64] ss:$24 sps:$4 sm:$0xff]  }
0x1576   :  { %7004 = vadd.xlane.f32.xlu1 %v7003_v22  ;;  %v16666_v22 = vld [vmem:[#allocation11 + $0x94] ss:$24 sps:$4 sm:$0xff]  }
0x157a   :  { %8129 = vrot.lane.b32.xlu0 %v18676_v16, %s18042_s10  ;;  %7007 = vadd.xlane.f32.xlu1 %v7006_v24  ;;  %v16646_v16 = vld [vmem:[#allocation11] ss:$24 sps:$4 sm:$0xff]   ;;  %v16664_v24 = vld [vmem:[#allocation11 + $0x90] ss:$24 sps:$4 sm:$0xff]  }
0x157b   :  { %9953 = vmatpush1.bf16.msra.mxu0 %v16646_v16  ;;  %v16657_v16 = vld [vmem:[#allocation11 + $0x3c] ss:$24 sps:$4 sm:$0xff]  }
0x157c   :  { %9954 = vmatprep.subr.bf16.mxu0 %v16654_v29  ;;  %v16690_v29 = vld [vmem:[#allocation11 + $0x154] ss:$24 sps:$4 sm:$0xff]  }
0x157e   :  { %6754 = vadd.xlane.f32.xlu1 %v6753_v54 }
0x157f   :  { %9955 = vmatpush1.bf16.msra.mxu0 %v16652_v38  ;;  %v16682_v38 = vld [vmem:[#allocation11 + $0x120] ss:$24 sps:$4 sm:$0xff]  }
0x1580   :  { %9956 = vmatprep.subr.bf16.mxu0 %v16660_v36 }
0x1582   :  { %6757 = vadd.xlane.f32.xlu1 %v6756_v25  ;;  %v16672_v25 = vld [vmem:[#allocation11 + $0xc4] ss:$24 sps:$4 sm:$0xff]  }
0x1583   :  { %9957 = vmatpush1.bf16.msra.mxu0 %v16658_v12 }
0x1584   :  { %9958 = vmatprep.subr.bf16.mxu0 %v16666_v22 }
0x1586   :  { %7624 = vadd.xlane.f32.xlu1 %v7623_v30 }
0x1587   :  { %9959 = vmatpush1.bf16.msra.mxu0 %v16664_v24  ;;  %v16688_v24 = vld [vmem:[#allocation11 + $0x150] ss:$24 sps:$4 sm:$0xff]  }
0x1588   :  { %9960 = vmatprep.subr.bf16.mxu0 %v16672_v25  ;;  %v16696_v25 = vld [vmem:[#allocation11 + $0x184] ss:$24 sps:$4 sm:$0xff]  }
0x158a   :  { %7627 = vadd.xlane.f32.xlu1 %v7626_v8  ;;  %v16649_v8 = vld [vmem:[#allocation11 + $0x8] ss:$24 sps:$4 sm:$0xff]  }
0x158e   :  { %7378 = vadd.xlane.f32.xlu1 %v7377_v57  ;;  %v16670_v57 = vld [vmem:[#allocation11 + $0xc0] ss:$24 sps:$4 sm:$0xff]  }
0x158f   :  { %9961 = vmatpush1.bf16.msra.mxu0 %v16670_v57 }
0x1590   :  { %9962 = vmatprep.subr.bf16.mxu0 %v16678_v15  ;;  %v16673_v15 = vld [vmem:[#allocation11 + $0xc8] ss:$24 sps:$4 sm:$0xff]  }
0x1599   :  { %7129 = vadd.xlane.f32.xlu0 %v7128_v46 }
0x159d   :  { %7375 = vadd.xlane.f32.xlu0 %v7374_v47 }
0x15f1   :  { %v8111_v55 = vpop.xlane.xlu0 %8110 }
0x15f2   :  { %v8115_v17 = vsub.f32 %v8103_v48, %v8111_v55  ;;  %v16676_v55 = vld [vmem:[#allocation11 + $0xf0] ss:$24 sps:$4 sm:$0xff]  }
0x15f3   :  { %v8114_v50 = vpop.xlane.xlu1 %8113  ;;  %9963 = vmatpush1.bf16.msra.mxu0 %v16676_v55 }
0x15f4   :  { %v8117_v0 = vmul.f32 1.442695, %v8115_v17  ;;  %v8116_v33 = vsub.f32 %v8106_v23, %v8114_v50  ;;  %v16684_v17 = vld [vmem:[#allocation11 + $0x124] ss:$24 sps:$4 sm:$0xff]   ;;  %v16655_v50 = vld [vmem:[#allocation11 + $0x38] ss:$24 sps:$4 sm:$0xff]  }
0x15f5   :  { %v8130_v6 = vpop.permute.xlu0 %8129  ;;  %9964 = vmatprep.subr.bf16.mxu0 %v16684_v17 }
0x15f6   :  { %v8119_v52 = vmul.f32 1.442695, %v8116_v33  ;;  %15138 = vmatpush3.bf16.msra.mxu1 %v8130_v6  ;;  %17602 = vpow2.f32 %v8117_v0  ;;  %v16663_v0 = vld [vmem:[#allocation11 + $0x6c] ss:$24 sps:$4 sm:$0xff]  }
0x15f7   :  { %v18793_v56 = vpop.xlane.xlu1 %7126  ;;  %10081 = vmatprep.subr.bf16.mxu1 %v16651_v18  ;;  %9965 = vmatpush1.bf16.msra.mxu0 %v16682_v38  ;;  %v16679_v38 = vld [vmem:[#allocation11 + $0xf8] ss:$24 sps:$4 sm:$0xff]  }
0x15f8   :  { %17604 = vpow2.f32 %v8119_v52  ;;  %v16661_v52 = vld [vmem:[#allocation11 + $0x68] ss:$24 sps:$4 sm:$0xff]   ;;  %9966 = vmatprep.subr.bf16.mxu0 %v16690_v29  ;;  %v16708_v29 = vld [vmem:[#allocation11 + $0x1e4] ss:$24 sps:$4 sm:$0xff]  }
0x15fb   :  { %v6877_v48 = vpop.xlane.xlu1 %6876  ;;  %9967 = vmatpush1.bf16.msra.mxu0 %v16688_v24 }
0x15fc   :  { %17606 = vrcp.f32 %v6877_v48  ;;  %v16669_v48 = vld [vmem:[#allocation11 + $0x9c] ss:$24 sps:$4 sm:$0xff]   ;;  %9968 = vmatprep.subr.bf16.mxu0 %v16696_v25  ;;  %v16712_v25 = vld [vmem:[#allocation11 + $0x210] ss:$24 sps:$4 sm:$0xff]  }
0x15ff   :  { %v6880_v23 = vpop.xlane.xlu1 %6879 }
0x1600   :  { %17608 = vrcp.f32 %v6880_v23  ;;  %v18795_v54 = vpop.eup %17602 }
0x1602   :  { %v18797_v30 = vpop.eup %17604 }
0x1603   :  { %v7005_v46 = vpop.xlane.xlu1 %7004  ;;  %v8127_v47 = vpack.c.bf16 %v18797_v30, %v18795_v54 }
0x1604   :  { %17610 = vrcp.f32 %v7005_v46  ;;  %v16675_v46 = vld [vmem:[#allocation11 + $0xcc] ss:$24 sps:$4 sm:$0xff]  }
0x1605   :  { %15140 = vmatmul.mubr.msk.bf16.vlgmr.msra.gmra.mrb[108].mxu1 %vm6740_vm2, %v8127_v47 }
0x1606   :  { %10082 = vmatpush1.bf16.msra.mxu1 %v16649_v8  ;;  %v17607_v33 = vpop.eup %17606  ;;  %v16667_v8 = vld [vmem:[#allocation11 + $0x98] ss:$24 sps:$4 sm:$0xff]  }
0x1607   :  { %v7008_v18 = vpop.xlane.xlu1 %7007  ;;  %10083 = vmatprep.subr.bf16.mxu1 %v16657_v16  ;;  %v6932_v36 = vmul.f32 %v17607_v33, %v18498_v35  ;;  %v16694_v35 = vld [vmem:[#allocation11 + $0x180] ss:$24 sps:$4 sm:$0xff]  }
0x1608   :  { %17612 = vrcp.f32 %v7008_v18  ;;  %v16681_v18 = vld [vmem:[#allocation11 + $0xfc] ss:$24 sps:$4 sm:$0xff]   ;;  %9969 = vmatpush1.bf16.msra.mxu0 %v16694_v35 }
0x160a   :  { %v17609_v6 = vpop.eup %17608  ;;  %10084 = vmatpush1.bf16.msra.mxu1 %v16655_v50 }
0x160b   :  { %v6755_v12 = vpop.xlane.xlu1 %6754  ;;  %v6933_v22 = vmul.f32 %v17609_v6, %v18500_v37  ;;  %10085 = vmatprep.subr.bf16.mxu1 %v16663_v0  ;;  %v16702_v37 = vld [vmem:[#allocation11 + $0x1b4] ss:$24 sps:$4 sm:$0xff]   ;;  %v16700_v0 = vld [vmem:[#allocation11 + $0x1b0] ss:$24 sps:$4 sm:$0xff]  }
0x160c   :  { %17614 = vrcp.f32 %v6755_v12  ;;  %9970 = vmatprep.subr.bf16.mxu0 %v16702_v37  ;;  %v16718_v37 = vld [vmem:[#allocation11 + $0x240] ss:$24 sps:$4 sm:$0xff]  }
0x160d   :  { %v6934_v23 = vpack.c.bf16 %v6933_v22, %v6932_v36  ;;  %9971 = vmatpush1.bf16.msra.mxu0 %v16700_v0  ;;  %v16685_v36 = vld [vmem:[#allocation11 + $0x128] ss:$24 sps:$4 sm:$0xff]   ;;  %v16714_v22 = vld [vmem:[#allocation11 + $0x214] ss:$24 sps:$4 sm:$0xff]  }
0x160e   :  { %10086 = vmatpush1.bf16.msra.mxu1 %v16661_v52  ;;  %v17611_v47 = vpop.eup %17610  ;;  %v16687_v52 = vld [vmem:[#allocation11 + $0x12c] ss:$24 sps:$4 sm:$0xff]   ;;  %9972 = vmatprep.subr.bf16.mxu0 %v16708_v29 }
0x160f   :  { %6936 = vrot.lane.b32.xlu1 %v6934_v23, %s18042_s10  ;;  %v6758_v57 = vpop.xlane.xlu1 %6757  ;;  %10087 = vmatprep.subr.bf16.mxu1 %v16669_v48  ;;  %v7056_v55 = vmul.f32 %v17611_v47, %v18524_v11  ;;  %v16706_v11 = vld [vmem:[#allocation11 + $0x1e0] ss:$24 sps:$4 sm:$0xff]   ;;  %v16693_v23 = vld [vmem:[#allocation11 + $0x15c] ss:$24 sps:$4 sm:$0xff]   ;;  %v16699_v47 = vld [vmem:[#allocation11 + $0x18c] ss:$24 sps:$4 sm:$0xff]  }
0x1610   :  { %17616 = vrcp.f32 %v6758_v57  ;;  %v16720_v57 = vld [vmem:[#allocation11 + $0x244] ss:$24 sps:$4 sm:$0xff]  }
0x1611   :  { %9973 = vmatpush1.bf16.msra.mxu0 %v16706_v11  ;;  %v16732_v29 = vld [vmem:[#allocation11 + $0x2a4] ss:$24 sps:$4 sm:$0xff]   ;;  %v16736_v11 = vld [vmem:[#allocation11 + $0x2d0] ss:$24 sps:$4 sm:$0xff]  }
0x1612   :  { %v17613_v16 = vpop.eup %17612  ;;  %10088 = vmatpush1.bf16.msra.mxu1 %v16667_v8  ;;  %9974 = vmatprep.subr.bf16.mxu0 %v16714_v22  ;;  %v16723_v22 = vld [vmem:[#allocation11 + $0x24c] ss:$24 sps:$4 sm:$0xff]  }
0x1613   :  { %v7057_v17 = vmul.f32 %v17613_v16, %v18526_v13  ;;  %v7625_v50 = vpop.xlane.xlu1 %7624  ;;  %10089 = vmatprep.subr.bf16.mxu1 %v16675_v46  ;;  %v16691_v46 = vld [vmem:[#allocation11 + $0x158] ss:$24 sps:$4 sm:$0xff]  }
0x1614   :  { %17618 = vrcp.f32 %v7625_v50  ;;  %v16724_v50 = vld [vmem:[#allocation11 + $0x270] ss:$24 sps:$4 sm:$0xff]  }
0x1615   :  { %v7058_v33 = vpack.c.bf16 %v7057_v17, %v7056_v55  ;;  %9975 = vmatpush1.bf16.msra.mxu0 %v16712_v25  ;;  %v16705_v17 = vld [vmem:[#allocation11 + $0x1bc] ss:$24 sps:$4 sm:$0xff]  }
0x1616   :  { %10090 = vmatpush1.bf16.msra.mxu1 %v16673_v15  ;;  %v17615_v12 = vpop.eup %17614  ;;  %9976 = vmatprep.subr.bf16.mxu0 %v16720_v57  ;;  %v16744_v57 = vld [vmem:[#allocation11 + $0x304] ss:$24 sps:$4 sm:$0xff]  }
0x1617   :  { %v7628_v6 = vpop.xlane.xlu1 %7627  ;;  %10091 = vmatprep.subr.bf16.mxu1 %v16681_v18  ;;  %7059 = vst.msk [vmem:[#allocation2 + $0x8] sm:$0xff] %vm6692_vm0, %v7058_v33  ;;  %v6806_v48 = vmul.f32 %v17615_v12, %v18470_v59  ;;  %v16726_v59 = vld [vmem:[#allocation11 + $0x274] ss:$24 sps:$4 sm:$0xff]  }
0x1618   :  { %17620 = vrcp.f32 %v7628_v6  ;;  %v16738_v12 = vld [vmem:[#allocation11 + $0x2d4] ss:$24 sps:$4 sm:$0xff]  }
0x1619   :  { %9977 = vmatpush1.bf16.msra.mxu0 %v16718_v37  ;;  %17622 = vrcp.f32 %v18793_v56  ;;  %v16717_v56 = vld [vmem:[#allocation11 + $0x21c] ss:$24 sps:$4 sm:$0xff]  }
0x161a   :  { %v17617_v13 = vpop.eup %17616  ;;  %10092 = vmatpush1.bf16.msra.mxu1 %v16679_v38  ;;  %9978 = vmatprep.subr.bf16.mxu0 %v16726_v59  ;;  %v16703_v38 = vld [vmem:[#allocation11 + $0x1b8] ss:$24 sps:$4 sm:$0xff]   ;;  %v7255_v59 = vsel %vm6740_vm2, %v18567_v40, 0.0  ;;  %v8124_v40 = vsel %vm6740_vm2, %v18797_v30, 0.0  ;;  %v7872_v30 = vsel %vm6740_vm2, %v18715_v21, 0.0  ;;  %v8002_v21 = vsel %vm6740_vm2, %v18747_v4, 0.0 }
0x161b   :  { %v6807_v24 = vmul.f32 %v17617_v13, %v18472_v61  ;;  %10093 = vmatprep.subr.bf16.mxu1 %v16687_v52  ;;  %v16697_v61 = vld [vmem:[#allocation11 + $0x188] ss:$24 sps:$4 sm:$0xff]   ;;  %v7379_v0 = vpop.xlane.xlu1 %7378  ;;  %v16715_v13 = vld [vmem:[#allocation11 + $0x218] ss:$24 sps:$4 sm:$0xff]  }
0x161c   :  { %v16709_v52 = vld [vmem:[#allocation11 + $0x1e8] ss:$24 sps:$4 sm:$0xff]   ;;  %v16751_v4 = vld [vmem:[#allocation11 + $0x338] ss:$24 sps:$4 sm:$0xff]  }
0x161d   :  { %v6808_v8 = vpack.c.bf16 %v6807_v24, %v6806_v48  ;;  %9979 = vmatpush1.bf16.msra.mxu0 %v16724_v50  ;;  %v7501_v24 = vsel %vm6740_vm2, %v18620_v32, 0.0  ;;  %v16733_v50 = vld [vmem:[#allocation11 + $0x2a8] ss:$24 sps:$4 sm:$0xff]  }
0x161e   :  { %10094 = vmatpush1.bf16.msra.mxu1 %v16685_v36  ;;  %v17619_v35 = vpop.eup %17618  ;;  %9980 = vmatprep.subr.bf16.mxu0 %v16732_v29 }
0x161f   :  { %6809 = vst.msk [vmem:[#allocation2] sm:$0xff] %vm6692_vm0, %v6808_v8  ;;  %10095 = vmatprep.subr.bf16.mxu1 %v16693_v23  ;;  %v18812_v15 = vmul.f32 %v17619_v35, %v18679_v60  ;;  %v16711_v60 = vld [vmem:[#allocation11 + $0x1ec] ss:$24 sps:$4 sm:$0xff]   ;;  %v16721_v8 = vld [vmem:[#allocation11 + $0x248] ss:$24 sps:$4 sm:$0xff]  }
0x1622   :  { %v17621_v16 = vpop.eup %17620  ;;  %10096 = vmatpush1.bf16.msra.mxu1 %v16691_v46 }
0x1623   :  { %v18815_v55 = vmul.f32 %v17621_v16, %v18681_v20  ;;  %10097 = vmatprep.subr.bf16.mxu1 %v16699_v47  ;;  %v16730_v20 = vld [vmem:[#allocation11 + $0x2a0] ss:$24 sps:$4 sm:$0xff]   ;;  %v17623_v36 = vpop.eup %17622  ;;  %v16729_v47 = vld [vmem:[#allocation11 + $0x27c] ss:$24 sps:$4 sm:$0xff]   ;;  %v16735_v16 = vld [vmem:[#allocation11 + $0x2ac] ss:$24 sps:$4 sm:$0xff]  }
0x1624   :  { %9981 = vmatpush1.bf16.msra.mxu0 %v16730_v20  ;;  %v7182_v23 = vmul.f32 %v17623_v36, %v18553_v62  ;;  %v16753_v20 = vld [vmem:[#allocation11 + $0x33c] ss:$24 sps:$4 sm:$0xff]   ;;  %v16760_v36 = vld [vmem:[#allocation11 + $0x390] ss:$24 sps:$4 sm:$0xff]  }
0x1625   :  { %v7682_v18 = vpack.c.bf16 %v18815_v55, %v18812_v15  ;;  %9982 = vmatprep.subr.bf16.mxu0 %v16738_v12  ;;  %v16742_v15 = vld [vmem:[#allocation11 + $0x300] ss:$24 sps:$4 sm:$0xff]  }
0x1626   :  { %v7130_v33 = vpop.xlane.xlu0 %7129  ;;  %10098 = vmatpush1.bf16.msra.mxu1 %v16697_v61  ;;  %v16745_v55 = vld [vmem:[#allocation11 + $0x308] ss:$24 sps:$4 sm:$0xff]  }
0x1627   :  { %17624 = vrcp.f32 %v7130_v33  ;;  %10099 = vmatprep.subr.bf16.mxu1 %v16705_v17  ;;  %v7875_v17 = vsel %vm6740_vm2, %v18717_v53, 0.0  ;;  %v7504_v53 = vsel %vm6740_vm2, %v18622_v34, 0.0  ;;  %v7252_v33 = vsel %vm6740_vm2, %v18565_v39, 0.0  ;;  %v16754_v12 = vld [vmem:[#allocation11 + $0x360] ss:$24 sps:$4 sm:$0xff]  }
0x1628   :  { %17626 = vrcp.f32 %v7379_v0  ;;  %9983 = vmatpush1.bf16.msra.mxu0 %v16736_v11  ;;  %v16741_v0 = vld [vmem:[#allocation11 + $0x2dc] ss:$24 sps:$4 sm:$0xff]   ;;  %v7753_v39 = vsel %vm6740_vm2, %v18693_v28, 0.0 }
0x1629   :  { %9995 = vmatprep.subr.bf16.mxu0 %v16744_v57  ;;  %v16750_v28 = vld [vmem:[#allocation11 + $0x334] ss:$24 sps:$4 sm:$0xff]  }
0x162a   :  { %v7376_v6 = vpop.xlane.xlu0 %7375  ;;  %10100 = vmatpush1.bf16.msra.mxu1 %v16703_v38  ;;  %v8121_v38 = vsel %vm6740_vm2, %v18795_v54, 0.0  ;;  %v16762_v11 = vld [vmem:[#allocation11 + $0x394] ss:$24 sps:$4 sm:$0xff]  }
0x162b   :  { %17628 = vrcp.f32 %v7376_v6  ;;  %10101 = vmatprep.subr.bf16.mxu1 %v16711_v60  ;;  %v7999_v60 = vsel %vm6740_vm2, %v18745_v10, 0.0  ;;  %v7750_v10 = vsel %vm6740_vm2, %v18691_v45, 0.0  ;;  %v16748_v45 = vld [vmem:[#allocation11 + $0x330] ss:$24 sps:$4 sm:$0xff]   ;;  %v16756_v6 = vld [vmem:[#allocation11 + $0x364] ss:$24 sps:$4 sm:$0xff]  }
0x162c   :  { %v16777_v57 = vld [vmem:[#allocation11 + $0x3fc] ss:$24 sps:$4 sm:$0xff]  }
0x162e   :  { %10102 = vmatpush1.bf16.msra.mxu1 %v16709_v52  ;;  %v16759_v52 = vld [vmem:[#allocation11 + $0x36c] ss:$24 sps:$4 sm:$0xff]  }
0x162f   :  { %10103 = vmatprep.subr.bf16.mxu1 %v16717_v56  ;;  %v16757_v56 = vld [vmem:[#allocation11 + $0x368] ss:$24 sps:$4 sm:$0xff]  }
0x1631   :  { %v17625_v48 = vpop.eup %17624 }
0x1632   :  { %v7183_v25 = vmul.f32 %v17625_v48, %v18555_v3  ;;  %10104 = vmatpush1.bf16.msra.mxu1 %v16715_v13  ;;  %v17627_v46 = vpop.eup %17626  ;;  %v16727_v3 = vld [vmem:[#allocation11 + $0x278] ss:$24 sps:$4 sm:$0xff]   ;;  %v16765_v13 = vld [vmem:[#allocation11 + $0x39c] ss:$24 sps:$4 sm:$0xff]  }
0x1633   :  { %7502 = vadd.xlane.f32.xlu1 %v7501_v24  ;;  %10105 = vmatprep.subr.bf16.mxu1 %v16723_v22  ;;  %v7432_v62 = vmul.f32 %v17627_v46, %v18610_v26  ;;  %v16747_v26 = vld [vmem:[#allocation11 + $0x30c] ss:$24 sps:$4 sm:$0xff]   ;;  %v16763_v22 = vld [vmem:[#allocation11 + $0x398] ss:$24 sps:$4 sm:$0xff]  }
0x1634   :  { %v7184_v35 = vpack.c.bf16 %v7183_v25, %v7182_v23  ;;  %v16768_v48 = vld [vmem:[#allocation11 + $0x3c4] ss:$24 sps:$4 sm:$0xff]   ;;  %v16766_v23 = vld [vmem:[#allocation11 + $0x3c0] ss:$24 sps:$4 sm:$0xff]   ;;  %v16772_v46 = vld [vmem:[#allocation11 + $0x3f0] ss:$24 sps:$4 sm:$0xff]  }
0x1635   :  { %v17629_v37 = vpop.eup %17628  ;;  %v16771_v24 = vld [vmem:[#allocation11 + $0x3cc] ss:$24 sps:$4 sm:$0xff]   ;;  %v16769_v25 = vld [vmem:[#allocation11 + $0x3c8] ss:$24 sps:$4 sm:$0xff]  }
0x1636   :  { %7186 = vrot.lane.b32.xlu0 %v7184_v35, %s18042_s10  ;;  %v7431_v32 = vmul.f32 %v17629_v37, %v18608_v42  ;;  %10106 = vmatpush1.bf16.msra.mxu1 %v16721_v8  ;;  %v16739_v42 = vld [vmem:[#allocation11 + $0x2d8] ss:$24 sps:$4 sm:$0xff]   ;;  %v16774_v8 = vld [vmem:[#allocation11 + $0x3f4] ss:$24 sps:$4 sm:$0xff]   ;;  %v16780_v35 = vld [vmem:[#allocation11 + $0x424] ss:$24 sps:$4 sm:$0xff]  }
0x1637   :  { %7256 = vadd.xlane.f32.xlu1 %v7255_v59  ;;  %10107 = vmatprep.subr.bf16.mxu1 %v16729_v47  ;;  %v16775_v47 = vld [vmem:[#allocation11 + $0x3f8] ss:$24 sps:$4 sm:$0xff]   ;;  %v16783_v37 = vld [vmem:[#allocation11 + $0x42c] ss:$24 sps:$4 sm:$0xff]  }
0x1638   :  { %v7433_v61 = vpack.c.bf16 %v7432_v62, %v7431_v32  ;;  %v16778_v59 = vld [vmem:[#allocation11 + $0x420] ss:$24 sps:$4 sm:$0xff]   ;;  %v16786_v62 = vld [vmem:[#allocation11 + $0x454] ss:$24 sps:$4 sm:$0xff]  }
0x1639   :  { %v16781_v32 = vld [vmem:[#allocation11 + $0x428] ss:$24 sps:$4 sm:$0xff]  }
0x163a   :  { %10108 = vmatpush1.bf16.msra.mxu1 %v16727_v3  ;;  %v16789_v3 = vld [vmem:[#allocation11 + $0x45c] ss:$24 sps:$4 sm:$0xff]  }
0x163b   :  { %7876 = vadd.xlane.f32.xlu1 %v7875_v17  ;;  %10109 = vmatprep.subr.bf16.mxu1 %v16735_v16  ;;  %v16784_v16 = vld [vmem:[#allocation11 + $0x450] ss:$24 sps:$4 sm:$0xff]   ;;  %v16792_v17 = vld [vmem:[#allocation11 + $0x484] ss:$24 sps:$4 sm:$0xff]  }
0x163e   :  { %10110 = vmatpush1.bf16.msra.mxu1 %v16733_v50  ;;  %v16795_v50 = vld [vmem:[#allocation11 + $0x48c] ss:$24 sps:$4 sm:$0xff]  }
0x163f   :  { %8125 = vadd.xlane.f32.xlu1 %v8124_v40  ;;  %10111 = vmatprep.subr.bf16.mxu1 %v16741_v0  ;;  %v16790_v0 = vld [vmem:[#allocation11 + $0x480] ss:$24 sps:$4 sm:$0xff]  }
0x1640   :  { %v16793_v40 = vld [vmem:[#allocation11 + $0x488] ss:$24 sps:$4 sm:$0xff]  }
0x1642   :  { %10112 = vmatpush1.bf16.msra.mxu1 %v16739_v42  ;;  %v16798_v42 = vld [vmem:[#allocation11 + $0x4b4] ss:$24 sps:$4 sm:$0xff]  }
0x1643   :  { %10124 = vmatprep.subr.bf16.mxu1 %v16747_v26  ;;  %v16801_v26 = vld [vmem:[#allocation11 + $0x4bc] ss:$24 sps:$4 sm:$0xff]  }
0x1650   :  { %7435 = vrot.lane.b32.xlu1 %v7433_v61, %s18042_s10  ;;  %v16787_v61 = vld [vmem:[#allocation11 + $0x458] ss:$24 sps:$4 sm:$0xff]  }
0x1655   :  { %7505 = vadd.xlane.f32.xlu0 %v7504_v53  ;;  %v16796_v53 = vld [vmem:[#allocation11 + $0x4b0] ss:$24 sps:$4 sm:$0xff]  }
0x1659   :  { %7253 = vadd.xlane.f32.xlu0 %v7252_v33  ;;  %v16799_v33 = vld [vmem:[#allocation11 + $0x4b8] ss:$24 sps:$4 sm:$0xff]  }
0x165d   :  { %7873 = vadd.xlane.f32.xlu0 %v7872_v30  ;;  %v16804_v30 = vld [vmem:[#allocation11 + $0x4e4] ss:$24 sps:$4 sm:$0xff]  }
0x1661   :  { %8122 = vadd.xlane.f32.xlu0 %v8121_v38  ;;  %v16807_v38 = vld [vmem:[#allocation11 + $0x4ec] ss:$24 sps:$4 sm:$0xff]  }
0x1674   :  { %8000 = vadd.xlane.f32.xlu1 %v7999_v60  ;;  %v16802_v60 = vld [vmem:[#allocation11 + $0x4e0] ss:$24 sps:$4 sm:$0xff]  }
0x1677   :  { %7684 = vrot.lane.b32.xlu0 %v7682_v18, %s18042_s10 }
0x1678   :  { %7754 = vadd.xlane.f32.xlu1 %v7753_v39  ;;  %v16805_v39 = vld [vmem:[#allocation11 + $0x4e8] ss:$24 sps:$4 sm:$0xff]  }
0x1681   :  { %v6937_v34 = vpop.permute.xlu1 %6936 }
0x1682   :  { %6940 = vst.msk [vmem:[#allocation2] sm:$0xff] %vm6939_vm3, %v6937_v34 }
0x1689   :  { %v18860_v29 = vld [vmem:[#allocation2] sm:$0xff] }
0x1696   :  { %8003 = vadd.xlane.f32.xlu0 %v8002_v21  ;;  %v16810_v21 = vld [vmem:[#allocation11 + $0x514] ss:$24 sps:$4 sm:$0xff]  }
0x169a   :  { %7751 = vadd.xlane.f32.xlu0 %v7750_v10  ;;  %v16813_v10 = vld [vmem:[#allocation11 + $0x51c] ss:$24 sps:$4 sm:$0xff]  }
0x16a8   :  { %v7187_v54 = vpop.permute.xlu0 %7186 }
0x16a9   :  { %7189 = vst.msk [vmem:[#allocation2 + $0x8] sm:$0xff] %vm6939_vm3, %v7187_v54 }
0x16b0   :  { %v18856_v18 = vld [vmem:[#allocation2 + $0x8] sm:$0xff] }
0x16b1   :  { %9984 = vmatprep.mubr.bf16.mxu0 %v18856_v18  ;;  %10113 = vmatprep.mubr.bf16.mxu1 %v18856_v18 }
0x16b2   :  { %9985 = vmatmul.mubr.bf16.vlgmr.msra.gmra.mrb[20].mxu0 %v18860_v29  ;;  %10114 = vmatmul.mubr.bf16.vlgmr.msra.gmra.mrb[112].mxu1 %v18860_v29 }
0x16b3   :  { %9996 = vmatpush1.bf16.msra.mxu0 %v16742_v15  ;;  %10125 = vmatpush1.bf16.msra.mxu1 %v16745_v55 }
0x16b4   :  { %9997 = vmatprep.subr.bf16.mxu0 %v16750_v28  ;;  %10126 = vmatprep.subr.bf16.mxu1 %v16753_v20  ;;  %v16808_v20 = vld [vmem:[#allocation11 + $0x510] ss:$24 sps:$4 sm:$0xff]  }
0x16b7   :  { %9998 = vmatpush1.bf16.msra.mxu0 %v16748_v45  ;;  %10127 = vmatpush1.bf16.msra.mxu1 %v16751_v4  ;;  %v16811_v45 = vld [vmem:[#allocation11 + $0x518] ss:$24 sps:$4 sm:$0xff]   ;;  %v16816_v4 = vld [vmem:[#allocation11 + $0x544] ss:$24 sps:$4 sm:$0xff]  }
0x16b8   :  { %9999 = vmatprep.subr.bf16.mxu0 %v16756_v6  ;;  %10128 = vmatprep.subr.bf16.mxu1 %v16759_v52  ;;  %v16819_v6 = vld [vmem:[#allocation11 + $0x54c] ss:$24 sps:$4 sm:$0xff]  }
0x16bb   :  { %10000 = vmatpush1.bf16.msra.mxu0 %v16754_v12  ;;  %10129 = vmatpush1.bf16.msra.mxu1 %v16757_v56  ;;  %v16814_v12 = vld [vmem:[#allocation11 + $0x540] ss:$24 sps:$4 sm:$0xff]  }
0x16bc   :  { %10001 = vmatprep.subr.bf16.mxu0 %v16762_v11  ;;  %10130 = vmatprep.subr.bf16.mxu1 %v16765_v13  ;;  %v16817_v56 = vld [vmem:[#allocation11 + $0x548] ss:$24 sps:$4 sm:$0xff]   ;;  %v16822_v11 = vld [vmem:[#allocation11 + $0x574] ss:$24 sps:$4 sm:$0xff]  }
0x16bd   :  { %v16825_v13 = vld [vmem:[#allocation11 + $0x57c] ss:$24 sps:$4 sm:$0xff]  }
0x16bf   :  { %10002 = vmatpush1.bf16.msra.mxu0 %v16760_v36  ;;  %10131 = vmatpush1.bf16.msra.mxu1 %v16763_v22  ;;  %v16820_v22 = vld [vmem:[#allocation11 + $0x570] ss:$24 sps:$4 sm:$0xff]  }
0x16c0   :  { %10003 = vmatprep.subr.bf16.mxu0 %v16768_v48  ;;  %10132 = vmatprep.subr.bf16.mxu1 %v16771_v24  ;;  %v7503_v54 = vpop.xlane.xlu1 %7502  ;;  %v16823_v48 = vld [vmem:[#allocation11 + $0x578] ss:$24 sps:$4 sm:$0xff]   ;;  %v16828_v24 = vld [vmem:[#allocation11 + $0x5a4] ss:$24 sps:$4 sm:$0xff]  }
0x16c1   :  { %17630 = vrcp.f32 %v7503_v54 }
0x16c3   :  { %10004 = vmatpush1.bf16.msra.mxu0 %v16766_v23  ;;  %10133 = vmatpush1.bf16.msra.mxu1 %v16769_v25  ;;  %v16831_v23 = vld [vmem:[#allocation11 + $0x5ac] ss:$24 sps:$4 sm:$0xff]  }
0x16c4   :  { %10005 = vmatprep.subr.bf16.mxu0 %v16774_v8  ;;  %10134 = vmatprep.subr.bf16.mxu1 %v16777_v57  ;;  %v7257_v52 = vpop.xlane.xlu1 %7256  ;;  %v16826_v57 = vld [vmem:[#allocation11 + $0x5a0] ss:$24 sps:$4 sm:$0xff]  }
0x16c7   :  { %10006 = vmatpush1.bf16.msra.mxu0 %v16772_v46  ;;  %10135 = vmatpush1.bf16.msra.mxu1 %v16775_v47  ;;  %v16829_v46 = vld [vmem:[#allocation11 + $0x5a8] ss:$24 sps:$4 sm:$0xff]   ;;  %v16834_v47 = vld [vmem:[#allocation11 + $0x5d4] ss:$24 sps:$4 sm:$0xff]  }
0x16c8   :  { %10007 = vmatprep.subr.bf16.mxu0 %v16780_v35  ;;  %10136 = vmatprep.subr.bf16.mxu1 %v16783_v37  ;;  %v7877_v25 = vpop.xlane.xlu1 %7876  ;;  %v16837_v35 = vld [vmem:[#allocation11 + $0x5dc] ss:$24 sps:$4 sm:$0xff]  }
0x16cb   :  { %10008 = vmatpush1.bf16.msra.mxu0 %v16778_v59  ;;  %10137 = vmatpush1.bf16.msra.mxu1 %v16781_v32  ;;  %v17631_v59 = vpop.eup %17630 }
0x16cc   :  { %10009 = vmatprep.subr.bf16.mxu0 %v16786_v62  ;;  %10138 = vmatprep.subr.bf16.mxu1 %v16789_v3  ;;  %v8126_v32 = vpop.xlane.xlu1 %8125  ;;  %v16832_v62 = vld [vmem:[#allocation11 + $0x5d0] ss:$24 sps:$4 sm:$0xff]  }
0x16cd   :  { %v16835_v3 = vld [vmem:[#allocation11 + $0x5d8] ss:$24 sps:$4 sm:$0xff]  }
0x16cf   :  { %10010 = vmatpush1.bf16.msra.mxu0 %v16784_v16  ;;  %10139 = vmatpush1.bf16.msra.mxu1 %v16787_v61  ;;  %v16840_v16 = vld [vmem:[#allocation11 + $0x604] ss:$24 sps:$4 sm:$0xff]  }
0x16d0   :  { %10011 = vmatprep.subr.bf16.mxu0 %v16792_v17  ;;  %10140 = vmatprep.subr.bf16.mxu1 %v16795_v50  ;;  %v16843_v61 = vld [vmem:[#allocation11 + $0x60c] ss:$24 sps:$4 sm:$0xff]   ;;  %v7554_v50 = vmul.f32 %v17631_v59, %v18636_v44 }
0x16d1   :  { %v16876_v59 = vld [vmem:[#allocation11 + $0x724] ss:$24 sps:$4 sm:$0xff]  }
0x16d3   :  { %10012 = vmatpush1.bf16.msra.mxu0 %v16790_v0  ;;  %10141 = vmatpush1.bf16.msra.mxu1 %v16793_v40 }
0x16d4   :  { %10013 = vmatprep.subr.bf16.mxu0 %v16798_v42  ;;  %10142 = vmatprep.subr.bf16.mxu1 %v16801_v26 }
0x16d7   :  { %10014 = vmatpush1.bf16.msra.mxu0 %v16796_v53  ;;  %10143 = vmatpush1.bf16.msra.mxu1 %v16799_v33 }
0x16d8   :  { %v18864_v34 = vpop.f32.mrb[108].mxu1  ;;  %10015 = vmatprep.subr.bf16.mxu0 %v16804_v30  ;;  %10144 = vmatprep.subr.bf16.mxu1 %v16807_v38 }
0x16d9   :  { %v15141_v15 = vpop.f32.mrb[109].mxu1 }
0x16da   :  { %v18866_v55 = vpop.f32.mrb[110].mxu1 }
0x16db   :  { %v15142_v28 = vpop.f32.mrb[111].mxu1  ;;  %10016 = vmatpush1.bf16.msra.mxu0 %v16802_v60  ;;  %10145 = vmatpush1.bf16.msra.mxu1 %v16805_v39  ;;  %v7436_v39 = vpop.permute.xlu1 %7435 }
0x16dc   :  { %10017 = vmatprep.subr.bf16.mxu0 %v16810_v21  ;;  %10146 = vmatprep.subr.bf16.mxu1 %v16813_v10 }
0x16df   :  { %10018 = vmatpush1.bf16.msra.mxu0 %v16808_v20  ;;  %10147 = vmatpush1.bf16.msra.mxu1 %v16811_v45  ;;  %v16838_v45 = vld [vmem:[#allocation11 + $0x600] ss:$24 sps:$4 sm:$0xff]  }
0x16e0   :  { %10019 = vmatprep.subr.bf16.mxu0 %v16816_v4  ;;  %10148 = vmatprep.subr.bf16.mxu1 %v16819_v6  ;;  %v16846_v4 = vld [vmem:[#allocation11 + $0x634] ss:$24 sps:$4 sm:$0xff]  }
0x16e1   :  { %v16849_v6 = vld [vmem:[#allocation11 + $0x63c] ss:$24 sps:$4 sm:$0xff]  }
0x16e2   :  { %v7506_v36 = vpop.xlane.xlu0 %7505 }
0x16e3   :  { %17632 = vrcp.f32 %v7506_v36  ;;  %10020 = vmatpush1.bf16.msra.mxu0 %v16814_v12  ;;  %10149 = vmatpush1.bf16.msra.mxu1 %v16817_v56  ;;  %v16852_v12 = vld [vmem:[#allocation11 + $0x664] ss:$24 sps:$4 sm:$0xff]   ;;  %v16858_v36 = vld [vmem:[#allocation11 + $0x694] ss:$24 sps:$4 sm:$0xff]  }
0x16e4   :  { %10021 = vmatprep.subr.bf16.mxu0 %v16822_v11  ;;  %10150 = vmatprep.subr.bf16.mxu1 %v16825_v13  ;;  %17634 = vrcp.f32 %v7257_v52  ;;  %v16855_v56 = vld [vmem:[#allocation11 + $0x66c] ss:$24 sps:$4 sm:$0xff]   ;;  %v16850_v11 = vld [vmem:[#allocation11 + $0x660] ss:$24 sps:$4 sm:$0xff]  }
0x16e5   :  { %v16853_v13 = vld [vmem:[#allocation11 + $0x668] ss:$24 sps:$4 sm:$0xff]  }
0x16e6   :  { %v7254_v8 = vpop.xlane.xlu0 %7253 }
0x16e7   :  { %17636 = vrcp.f32 %v7254_v8  ;;  %10022 = vmatpush1.bf16.msra.mxu0 %v16820_v22  ;;  %10151 = vmatpush1.bf16.msra.mxu1 %v16823_v48  ;;  %v16861_v22 = vld [vmem:[#allocation11 + $0x69c] ss:$24 sps:$4 sm:$0xff]   ;;  %v16856_v48 = vld [vmem:[#allocation11 + $0x690] ss:$24 sps:$4 sm:$0xff]   ;;  %v16862_v8 = vld [vmem:[#allocation11 + $0x6c0] ss:$24 sps:$4 sm:$0xff]  }
0x16e8   :  { %10023 = vmatprep.subr.bf16.mxu0 %v16828_v24  ;;  %10152 = vmatprep.subr.bf16.mxu1 %v16831_v23  ;;  %17638 = vrcp.f32 %v7877_v25  ;;  %v16859_v24 = vld [vmem:[#allocation11 + $0x698] ss:$24 sps:$4 sm:$0xff]   ;;  %v16864_v23 = vld [vmem:[#allocation11 + $0x6c4] ss:$24 sps:$4 sm:$0xff]  }
0x16e9   :  { %v16867_v25 = vld [vmem:[#allocation11 + $0x6cc] ss:$24 sps:$4 sm:$0xff]  }
0x16ea   :  { %v7874_v37 = vpop.xlane.xlu0 %7873 }
0x16eb   :  { %17640 = vrcp.f32 %v7874_v37  ;;  %10024 = vmatpush1.bf16.msra.mxu0 %v16826_v57  ;;  %10153 = vmatpush1.bf16.msra.mxu1 %v16829_v46  ;;  %v16865_v57 = vld [vmem:[#allocation11 + $0x6c8] ss:$24 sps:$4 sm:$0xff]   ;;  %v16870_v46 = vld [vmem:[#allocation11 + $0x6f4] ss:$24 sps:$4 sm:$0xff]   ;;  %v16871_v37 = vld [vmem:[#allocation11 + $0x6f8] ss:$24 sps:$4 sm:$0xff]  }
0x16ec   :  { %10025 = vmatprep.subr.bf16.mxu0 %v16834_v47  ;;  %10154 = vmatprep.subr.bf16.mxu1 %v16837_v35  ;;  %17642 = vrcp.f32 %v8126_v32  ;;  %v16873_v47 = vld [vmem:[#allocation11 + $0x6fc] ss:$24 sps:$4 sm:$0xff]   ;;  %v16868_v35 = vld [vmem:[#allocation11 + $0x6f0] ss:$24 sps:$4 sm:$0xff]   ;;  %v16879_v32 = vld [vmem:[#allocation11 + $0x72c] ss:$24 sps:$4 sm:$0xff]  }
0x16ed   :  { %v17633_v17 = vpop.eup %17632 }
0x16ee   :  { %v7555_v0 = vmul.f32 %v17633_v17, %v18638_v2  ;;  %v8123_v40 = vpop.xlane.xlu0 %8122  ;;  %v17635_v42 = vpop.eup %17634  ;;  %v16880_v17 = vld [vmem:[#allocation11 + $0x750] ss:$24 sps:$4 sm:$0xff]  }
0x16ef   :  { %17644 = vrcp.f32 %v8123_v40  ;;  %10026 = vmatpush1.bf16.msra.mxu0 %v16832_v62  ;;  %10155 = vmatpush1.bf16.msra.mxu1 %v16835_v3  ;;  %v7306_v33 = vmul.f32 %v17635_v42, %v18581_v49  ;;  %v16874_v62 = vld [vmem:[#allocation11 + $0x720] ss:$24 sps:$4 sm:$0xff]   ;;  %v16891_v40 = vld [vmem:[#allocation11 + $0x78c] ss:$24 sps:$4 sm:$0xff]  }
0x16f0   :  { %v7556_v26 = vpack.c.bf16 %v7555_v0, %v7554_v50  ;;  %10038 = vmatprep.subr.bf16.mxu0 %v16840_v16  ;;  %10167 = vmatprep.subr.bf16.mxu1 %v16843_v61  ;;  %v16877_v3 = vld [vmem:[#allocation11 + $0x728] ss:$24 sps:$4 sm:$0xff]   ;;  %v16882_v16 = vld [vmem:[#allocation11 + $0x754] ss:$24 sps:$4 sm:$0xff]   ;;  %v16883_v50 = vld [vmem:[#allocation11 + $0x758] ss:$24 sps:$4 sm:$0xff]  }
0x16f1   :  { %v17637_v53 = vpop.eup %17636  ;;  %v16885_v61 = vld [vmem:[#allocation11 + $0x75c] ss:$24 sps:$4 sm:$0xff]   ;;  %v16886_v42 = vld [vmem:[#allocation11 + $0x780] ss:$24 sps:$4 sm:$0xff]  }
0x16f2   :  { %v7305_v30 = vmul.f32 %v17637_v53, %v18579_v43  ;;  %v7685_v38 = vpop.permute.xlu0 %7684  ;;  %7557 = vst.msk [vmem:[#allocation2 + $0x18] sm:$0xff] %vm6692_vm0, %v7556_v26  ;;  %v17639_v44 = vpop.eup %17638  ;;  %v16888_v0 = vld [vmem:[#allocation11 + $0x784] ss:$24 sps:$4 sm:$0xff]   ;;  %v16889_v26 = vld [vmem:[#allocation11 + $0x788] ss:$24 sps:$4 sm:$0xff]  }
0x16f3   :  { %7687 = vst.msk [vmem:[#allocation2 + $0x18] sm:$0xff] %vm6939_vm3, %v7685_v38  ;;  %v7930_v10 = vmul.f32 %v17639_v44, %v18735_v7  ;;  %v16841_v7 = vld [vmem:[#allocation11 + $0x608] ss:$24 sps:$4 sm:$0xff]   ;;  %v16895_v44 = vld [vmem:[#allocation11 + $0x7b8] ss:$24 sps:$4 sm:$0xff]  }
0x16f4   :  { %v7307_v2 = vpack.c.bf16 %v7306_v33, %v7305_v30  ;;  %v16894_v33 = vld [vmem:[#allocation11 + $0x7b4] ss:$24 sps:$4 sm:$0xff]   ;;  %v16892_v38 = vld [vmem:[#allocation11 + $0x7b0] ss:$24 sps:$4 sm:$0xff]  }
0x16f5   :  { %v17641_v60 = vpop.eup %17640  ;;  %v16897_v30 = vld [vmem:[#allocation11 + $0x7bc] ss:$24 sps:$4 sm:$0xff]  }
0x16f6   :  { %7308 = vst.msk [vmem:[#allocation2 + $0x10] sm:$0xff] %vm6692_vm0, %v7307_v2  ;;  %v7929_v21 = vmul.f32 %v17641_v60, %v18733_v14  ;;  %v17643_v49 = vpop.eup %17642  ;;  %v16900_v2 = vld [vmem:[#allocation11 + $0x7e4] ss:$24 sps:$4 sm:$0xff]  }
0x16f7   :  { %7438 = vst.msk [vmem:[#allocation2 + $0x10] sm:$0xff] %vm6939_vm3, %v7436_v39  ;;  %v8179_v15 = vmul.f32 %v17643_v49, %v18866_v55  ;;  %v16847_v55 = vld [vmem:[#allocation11 + $0x638] ss:$24 sps:$4 sm:$0xff]   ;;  %v16903_v60 = vld [vmem:[#allocation11 + $0x7ec] ss:$24 sps:$4 sm:$0xff]  }
0x16f8   :  { %v7931_v54 = vpack.c.bf16 %v7930_v10, %v7929_v21  ;;  %v16898_v10 = vld [vmem:[#allocation11 + $0x7e0] ss:$24 sps:$4 sm:$0xff]  }
0x16f9   :  { %v17645_v43 = vpop.eup %17644  ;;  %v16901_v49 = vld [vmem:[#allocation11 + $0x7e8] ss:$24 sps:$4 sm:$0xff]  }
0x16fa   :  { %7933 = vrot.lane.b32.xlu1 %v7931_v54, %s18042_s10  ;;  %v18880_v28 = vld [vmem:[#allocation2 + $0x18] sm:$0xff]  ;;  %v8178_v20 = vmul.f32 %v17645_v43, %v18864_v34  ;;  %v16844_v34 = vld [vmem:[#allocation11 + $0x630] ss:$24 sps:$4 sm:$0xff]  }
0x16fb   :  { %10027 = vmatprep.mubr.bf16.mxu0 %v18880_v28  ;;  %10156 = vmatprep.mubr.bf16.mxu1 %v18880_v28  ;;  %v16906_v54 = vld [vmem:[#allocation11 + $0x814] ss:$24 sps:$4 sm:$0xff]  }
0x16fc   :  { %v8180_v14 = vpack.c.bf16 %v8179_v15, %v8178_v20  ;;  %v16909_v43 = vld [vmem:[#allocation11 + $0x81c] ss:$24 sps:$4 sm:$0xff]   ;;  %v16904_v20 = vld [vmem:[#allocation11 + $0x810] ss:$24 sps:$4 sm:$0xff]  }
0x16fe   :  { %8182 = vrot.lane.b32.xlu0 %v8180_v14, %s18042_s10  ;;  %v18886_v52 = vld [vmem:[#allocation2 + $0x10] sm:$0xff] }
0x16ff   :  { %10028 = vmatmul.mubr.bf16.vlgmr.msra.gmra.mrb[20].mxu0 %v18886_v52  ;;  %10157 = vmatmul.mubr.bf16.vlgmr.msra.gmra.mrb[112].mxu1 %v18886_v52  ;;  %v16907_v14 = vld [vmem:[#allocation11 + $0x818] ss:$24 sps:$4 sm:$0xff]  }
0x1700   :  { %10039 = vmatpush1.bf16.msra.mxu0 %v16838_v45  ;;  %10168 = vmatpush1.bf16.msra.mxu1 %v16841_v7  ;;  %v16912_v45 = vld [vmem:[#allocation11 + $0x844] ss:$24 sps:$4 sm:$0xff]  }
0x1701   :  { %10040 = vmatprep.subr.bf16.mxu0 %v16846_v4  ;;  %10169 = vmatprep.subr.bf16.mxu1 %v16849_v6  ;;  %v8001_v53 = vpop.xlane.xlu1 %8000  ;;  %v16915_v7 = vld [vmem:[#allocation11 + $0x84c] ss:$24 sps:$4 sm:$0xff]   ;;  %v16910_v6 = vld [vmem:[#allocation11 + $0x840] ss:$24 sps:$4 sm:$0xff]  }
0x1702   :  { %17646 = vrcp.f32 %v8001_v53  ;;  %v16948_v53 = vld [vmem:[#allocation11 + $0xd4] ss:$24 sps:$4 sm:$0xff]  }
0x1704   :  { %10041 = vmatpush1.bf16.msra.mxu0 %v16844_v34  ;;  %10170 = vmatpush1.bf16.msra.mxu1 %v16847_v55  ;;  %v16913_v34 = vld [vmem:[#allocation11 + $0x848] ss:$24 sps:$4 sm:$0xff]   ;;  %v16918_v55 = vld [vmem:[#allocation11 + $0x874] ss:$24 sps:$4 sm:$0xff]  }
0x1705   :  { %10042 = vmatprep.subr.bf16.mxu0 %v16852_v12  ;;  %10171 = vmatprep.subr.bf16.mxu1 %v16855_v56  ;;  %v7755_v39 = vpop.xlane.xlu1 %7754  ;;  %v16921_v12 = vld [vmem:[#allocation11 + $0x87c] ss:$24 sps:$4 sm:$0xff]  }
0x1708   :  { %10043 = vmatpush1.bf16.msra.mxu0 %v16850_v11  ;;  %10172 = vmatpush1.bf16.msra.mxu1 %v16853_v13 }
0x1709   :  { %10044 = vmatprep.subr.bf16.mxu0 %v16858_v36  ;;  %10173 = vmatprep.subr.bf16.mxu1 %v16861_v22  ;;  %v16916_v22 = vld [vmem:[#allocation11 + $0x870] ss:$24 sps:$4 sm:$0xff]  }
0x170c   :  { %10045 = vmatpush1.bf16.msra.mxu0 %v16856_v48  ;;  %10174 = vmatpush1.bf16.msra.mxu1 %v16859_v24  ;;  %v17647_v4 = vpop.eup %17646  ;;  %v16919_v48 = vld [vmem:[#allocation11 + $0x878] ss:$24 sps:$4 sm:$0xff]  }
0x170d   :  { %10046 = vmatprep.subr.bf16.mxu0 %v16864_v23  ;;  %10175 = vmatprep.subr.bf16.mxu1 %v16867_v25  ;;  %v8052_v11 = vmul.f32 %v17647_v4, %v18759_v41  ;;  %v16924_v23 = vld [vmem:[#allocation11 + $0x8a4] ss:$24 sps:$4 sm:$0xff]   ;;  %v16922_v41 = vld [vmem:[#allocation11 + $0x8a0] ss:$24 sps:$4 sm:$0xff]  }
0x170e   :  { %v16927_v25 = vld [vmem:[#allocation11 + $0x8ac] ss:$24 sps:$4 sm:$0xff]   ;;  %v16973_v4 = vld [vmem:[#allocation11 + $0x280] ss:$24 sps:$4 sm:$0xff]  }
0x1710   :  { %10047 = vmatpush1.bf16.msra.mxu0 %v16862_v8  ;;  %10176 = vmatpush1.bf16.msra.mxu1 %v16865_v57 }
0x1711   :  { %10048 = vmatprep.subr.bf16.mxu0 %v16870_v46  ;;  %10177 = vmatprep.subr.bf16.mxu1 %v16873_v47 }
0x1714   :  { %10049 = vmatpush1.bf16.msra.mxu0 %v16868_v35  ;;  %10178 = vmatpush1.bf16.msra.mxu1 %v16871_v37  ;;  %v16930_v35 = vld [vmem:[#allocation11 + $0x8d4] ss:$24 sps:$4 sm:$0xff]  }
0x1715   :  { %10050 = vmatprep.subr.bf16.mxu0 %v16876_v59  ;;  %10179 = vmatprep.subr.bf16.mxu1 %v16879_v32  ;;  %v16933_v37 = vld [vmem:[#allocation11 + $0x8dc] ss:$24 sps:$4 sm:$0xff]   ;;  %v16928_v59 = vld [vmem:[#allocation11 + $0x8d0] ss:$24 sps:$4 sm:$0xff]  }
0x1716   :  { %v16931_v32 = vld [vmem:[#allocation11 + $0x8d8] ss:$24 sps:$4 sm:$0xff]  }
0x1718   :  { %10051 = vmatpush1.bf16.msra.mxu0 %v16874_v62  ;;  %10180 = vmatpush1.bf16.msra.mxu1 %v16877_v3  ;;  %v16934_v3 = vld [vmem:[#allocation11 + $0x10] ss:$24 sps:$4 sm:$0xff]  }
0x1719   :  { %10052 = vmatprep.subr.bf16.mxu0 %v16882_v16  ;;  %10181 = vmatprep.subr.bf16.mxu1 %v16885_v61  ;;  %v16939_v61 = vld [vmem:[#allocation11 + $0x44] ss:$24 sps:$4 sm:$0xff]  }
0x171c   :  { %10053 = vmatpush1.bf16.msra.mxu0 %v16880_v17  ;;  %10182 = vmatpush1.bf16.msra.mxu1 %v16883_v50  ;;  %v16937_v50 = vld [vmem:[#allocation11 + $0x40] ss:$24 sps:$4 sm:$0xff]  }
0x171d   :  { %10054 = vmatprep.subr.bf16.mxu0 %v16888_v0  ;;  %10183 = vmatprep.subr.bf16.mxu1 %v16891_v40  ;;  %v16942_v0 = vld [vmem:[#allocation11 + $0x74] ss:$24 sps:$4 sm:$0xff]   ;;  %v16940_v40 = vld [vmem:[#allocation11 + $0x70] ss:$24 sps:$4 sm:$0xff]  }
0x1720   :  { %10055 = vmatpush1.bf16.msra.mxu0 %v16886_v42  ;;  %10184 = vmatpush1.bf16.msra.mxu1 %v16889_v26  ;;  %v16945_v42 = vld [vmem:[#allocation11 + $0xa4] ss:$24 sps:$4 sm:$0xff]   ;;  %v16943_v26 = vld [vmem:[#allocation11 + $0xa0] ss:$24 sps:$4 sm:$0xff]  }
0x1721   :  { %10056 = vmatprep.subr.bf16.mxu0 %v16894_v33  ;;  %10185 = vmatprep.subr.bf16.mxu1 %v16897_v30  ;;  %v16946_v33 = vld [vmem:[#allocation11 + $0xd0] ss:$24 sps:$4 sm:$0xff]   ;;  %v16951_v30 = vld [vmem:[#allocation11 + $0x104] ss:$24 sps:$4 sm:$0xff]  }
0x1723   :  { %v8004_v21 = vpop.xlane.xlu0 %8003 }
0x1724   :  { %17648 = vrcp.f32 %v8004_v21  ;;  %10057 = vmatpush1.bf16.msra.mxu0 %v16892_v38  ;;  %10186 = vmatpush1.bf16.msra.mxu1 %v16895_v44  ;;  %v16949_v38 = vld [vmem:[#allocation11 + $0x100] ss:$24 sps:$4 sm:$0xff]   ;;  %v16954_v44 = vld [vmem:[#allocation11 + $0x134] ss:$24 sps:$4 sm:$0xff]   ;;  %v16958_v21 = vld [vmem:[#allocation11 + $0x190] ss:$24 sps:$4 sm:$0xff]  }
0x1725   :  { %10058 = vmatprep.subr.bf16.mxu0 %v16900_v2  ;;  %10187 = vmatprep.subr.bf16.mxu1 %v16903_v60  ;;  %17650 = vrcp.f32 %v7755_v39  ;;  %v16957_v2 = vld [vmem:[#allocation11 + $0x164] ss:$24 sps:$4 sm:$0xff]   ;;  %v16955_v60 = vld [vmem:[#allocation11 + $0x160] ss:$24 sps:$4 sm:$0xff]   ;;  %v16960_v39 = vld [vmem:[#allocation11 + $0x194] ss:$24 sps:$4 sm:$0xff]  }
0x1727   :  { %v7752_v15 = vpop.xlane.xlu0 %7751 }
0x1728   :  { %17652 = vrcp.f32 %v7752_v15  ;;  %10059 = vmatpush1.bf16.msra.mxu0 %v16898_v10  ;;  %10188 = vmatpush1.bf16.msra.mxu1 %v16901_v49  ;;  %v16963_v10 = vld [vmem:[#allocation11 + $0x1c4] ss:$24 sps:$4 sm:$0xff]   ;;  %v16961_v49 = vld [vmem:[#allocation11 + $0x1c0] ss:$24 sps:$4 sm:$0xff]  }
0x1729   :  { %10060 = vmatprep.subr.bf16.mxu0 %v16906_v54  ;;  %10189 = vmatprep.subr.bf16.mxu1 %v16909_v43  ;;  %v16966_v54 = vld [vmem:[#allocation11 + $0x1f4] ss:$24 sps:$4 sm:$0xff]   ;;  %v16964_v43 = vld [vmem:[#allocation11 + $0x1f0] ss:$24 sps:$4 sm:$0xff]   ;;  %v16969_v15 = vld [vmem:[#allocation11 + $0x224] ss:$24 sps:$4 sm:$0xff]  }
0x172c   :  { %10061 = vmatpush1.bf16.msra.mxu0 %v16904_v20  ;;  %10190 = vmatpush1.bf16.msra.mxu1 %v16907_v14  ;;  %v16967_v20 = vld [vmem:[#allocation11 + $0x220] ss:$24 sps:$4 sm:$0xff]   ;;  %v16972_v14 = vld [vmem:[#allocation11 + $0x254] ss:$24 sps:$4 sm:$0xff]  }
0x172d   :  { %10062 = vmatprep.subr.bf16.mxu0 %v16912_v45  ;;  %10191 = vmatprep.subr.bf16.mxu1 %v16915_v7  ;;  %v16970_v45 = vld [vmem:[#allocation11 + $0x250] ss:$24 sps:$4 sm:$0xff]   ;;  %v16975_v7 = vld [vmem:[#allocation11 + $0x284] ss:$24 sps:$4 sm:$0xff]  }
0x172e   :  { %v17649_v56 = vpop.eup %17648 }
0x172f   :  { %v8053_v13 = vmul.f32 %v17649_v56, %v18761_v19  ;;  %v17651_v36 = vpop.eup %17650  ;;  %v16925_v19 = vld [vmem:[#allocation11 + $0x8a8] ss:$24 sps:$4 sm:$0xff]   ;;  %v16984_v56 = vld [vmem:[#allocation11 + $0x314] ss:$24 sps:$4 sm:$0xff]  }
0x1730   :  { %10063 = vmatpush1.bf16.msra.mxu0 %v16910_v6  ;;  %10192 = vmatpush1.bf16.msra.mxu1 %v16913_v34  ;;  %v7804_v57 = vmul.f32 %v17651_v36, %v18707_v9  ;;  %v16978_v6 = vld [vmem:[#allocation11 + $0x2b4] ss:$24 sps:$4 sm:$0xff]   ;;  %v16976_v34 = vld [vmem:[#allocation11 + $0x2b0] ss:$24 sps:$4 sm:$0xff]   ;;  %v16985_v36 = vld [vmem:[#allocation11 + $0x340] ss:$24 sps:$4 sm:$0xff]  }
0x1731   :  { %10064 = vmatprep.subr.bf16.mxu0 %v16918_v55  ;;  %10193 = vmatprep.subr.bf16.mxu1 %v16921_v12  ;;  %v8054_v24 = vpack.c.bf16 %v8053_v13, %v8052_v11  ;;  %v16981_v55 = vld [vmem:[#allocation11 + $0x2e4] ss:$24 sps:$4 sm:$0xff]   ;;  %v16979_v12 = vld [vmem:[#allocation11 + $0x2e0] ss:$24 sps:$4 sm:$0xff]   ;;  %v16982_v11 = vld [vmem:[#allocation11 + $0x310] ss:$24 sps:$4 sm:$0xff]  }
0x1732   :  { %v17653_v8 = vpop.eup %17652  ;;  %v16987_v13 = vld [vmem:[#allocation11 + $0x344] ss:$24 sps:$4 sm:$0xff]  }
0x1733   :  { %v7803_v46 = vmul.f32 %v17653_v8, %v18705_v5  ;;  %8055 = vst.msk [vmem:[#allocation2 + $0x28] sm:$0xff] %vm6692_vm0, %v8054_v24  ;;  %v16936_v5 = vld [vmem:[#allocation11 + $0x14] ss:$24 sps:$4 sm:$0xff]   ;;  %v16993_v24 = vld [vmem:[#allocation11 + $0x3a4] ss:$24 sps:$4 sm:$0xff]  }
0x1734   :  { %10065 = vmatpush1.bf16.msra.mxu0 %v16916_v22  ;;  %10194 = vmatpush1.bf16.msra.mxu1 %v16919_v48  ;;  %v16990_v22 = vld [vmem:[#allocation11 + $0x374] ss:$24 sps:$4 sm:$0xff]   ;;  %v16988_v48 = vld [vmem:[#allocation11 + $0x370] ss:$24 sps:$4 sm:$0xff]  }
0x1735   :  { %v7805_v47 = vpack.c.bf16 %v7804_v57, %v7803_v46  ;;  %10066 = vmatprep.subr.bf16.mxu0 %v16924_v23  ;;  %10195 = vmatprep.subr.bf16.mxu1 %v16927_v25  ;;  %v16991_v23 = vld [vmem:[#allocation11 + $0x3a0] ss:$24 sps:$4 sm:$0xff]   ;;  %v16996_v25 = vld [vmem:[#allocation11 + $0x3d4] ss:$24 sps:$4 sm:$0xff]   ;;  %v16994_v8 = vld [vmem:[#allocation11 + $0x3d0] ss:$24 sps:$4 sm:$0xff]  }
0x1736   :  { %v16999_v57 = vld [vmem:[#allocation11 + $0x404] ss:$24 sps:$4 sm:$0xff]   ;;  %v17002_v46 = vld [vmem:[#allocation11 + $0x434] ss:$24 sps:$4 sm:$0xff]  }
0x1737   :  { %7806 = vst.msk [vmem:[#allocation2 + $0x20] sm:$0xff] %vm6692_vm0, %v7805_v47  ;;  %v17008_v47 = vld [vmem:[#allocation11 + $0x494] ss:$24 sps:$4 sm:$0xff]  }
0x1738   :  { %10067 = vmatpush1.bf16.msra.mxu0 %v16922_v41  ;;  %10196 = vmatpush1.bf16.msra.mxu1 %v16925_v19  ;;  %v17005_v41 = vld [vmem:[#allocation11 + $0x464] ss:$24 sps:$4 sm:$0xff]   ;;  %v17003_v19 = vld [vmem:[#allocation11 + $0x460] ss:$24 sps:$4 sm:$0xff]  }
0x1739   :  { %10068 = vmatprep.subr.bf16.mxu0 %v16930_v35  ;;  %10197 = vmatprep.subr.bf16.mxu1 %v16933_v37  ;;  %v17006_v35 = vld [vmem:[#allocation11 + $0x490] ss:$24 sps:$4 sm:$0xff]   ;;  %v17011_v37 = vld [vmem:[#allocation11 + $0x4c4] ss:$24 sps:$4 sm:$0xff]  }
0x173c   :  { %10069 = vmatpush1.bf16.msra.mxu0 %v16928_v59  ;;  %10198 = vmatpush1.bf16.msra.mxu1 %v16931_v32  ;;  %v17009_v59 = vld [vmem:[#allocation11 + $0x4c0] ss:$24 sps:$4 sm:$0xff]   ;;  %v17014_v32 = vld [vmem:[#allocation11 + $0x4f4] ss:$24 sps:$4 sm:$0xff]  }
0x173d   :  { %10210 = vmatprep.subr.bf16.mxu0 %v16936_v5  ;;  %v17012_v5 = vld [vmem:[#allocation11 + $0x4f0] ss:$24 sps:$4 sm:$0xff]  }
0x176c   :  { %v7934_v9 = vpop.permute.xlu1 %7933 }
0x176d   :  { %7936 = vst.msk [vmem:[#allocation2 + $0x20] sm:$0xff] %vm6939_vm3, %v7934_v9  ;;  %v17017_v9 = vld [vmem:[#allocation11 + $0x524] ss:$24 sps:$4 sm:$0xff]  }
0x1770   :  { %v8183_v62 = vpop.permute.xlu0 %8182 }
0x1771   :  { %8185 = vst.msk [vmem:[#allocation2 + $0x28] sm:$0xff] %vm6939_vm3, %v8183_v62  ;;  %v17015_v62 = vld [vmem:[#allocation11 + $0x520] ss:$24 sps:$4 sm:$0xff]  }
0x1774   :  { %v18902_v17 = vld [vmem:[#allocation2 + $0x20] sm:$0xff] }
0x1778   :  { %v18898_v16 = vld [vmem:[#allocation2 + $0x28] sm:$0xff] }
0x1779   :  { %10070 = vmatprep.mubr.bf16.mxu0 %v18898_v16  ;;  %10199 = vmatprep.mubr.bf16.mxu1 %v18898_v16 }
0x177a   :  { %10071 = vmatmul.mubr.bf16.vlgmr.msra.gmra.mrb[20].mxu0 %v18902_v17  ;;  %10200 = vmatmul.mubr.bf16.vlgmr.msra.gmra.mrb[112].mxu1 %v18902_v17 }
0x177b   :  { %10211 = vmatpush1.bf16.msra.mxu0 %v16934_v3  ;;  %10242 = vmatprep.mubr.bf16.mxu0 %v18856_v18  ;;  %v16952_v18 = vld [vmem:[#allocation11 + $0x130] ss:$24 sps:$4 sm:$0xff]   ;;  %v17020_v3 = vld [vmem:[#allocation11 + $0x554] ss:$24 sps:$4 sm:$0xff]  }
0x177c   :  { %10212 = vmatprep.subr.bf16.mxu0 %v16939_v61  ;;  %v17018_v61 = vld [vmem:[#allocation11 + $0x550] ss:$24 sps:$4 sm:$0xff]  }
0x177f   :  { %10213 = vmatpush1.bf16.msra.mxu0 %v16937_v50  ;;  %v17023_v50 = vld [vmem:[#allocation11 + $0x584] ss:$24 sps:$4 sm:$0xff]  }
0x1780   :  { %10214 = vmatprep.subr.bf16.mxu0 %v16942_v0  ;;  %v17021_v0 = vld [vmem:[#allocation11 + $0x580] ss:$24 sps:$4 sm:$0xff]  }
0x1783   :  { %10215 = vmatpush1.bf16.msra.mxu0 %v16940_v40  ;;  %v17026_v40 = vld [vmem:[#allocation11 + $0x5b4] ss:$24 sps:$4 sm:$0xff]  }
0x1784   :  { %10216 = vmatprep.subr.bf16.mxu0 %v16945_v42  ;;  %v17024_v42 = vld [vmem:[#allocation11 + $0x5b0] ss:$24 sps:$4 sm:$0xff]  }
0x1787   :  { %10217 = vmatpush1.bf16.msra.mxu0 %v16943_v26  ;;  %v17029_v26 = vld [vmem:[#allocation11 + $0x5e4] ss:$24 sps:$4 sm:$0xff]  }
0x1788   :  { %10218 = vmatprep.subr.bf16.mxu0 %v16948_v53  ;;  %v17027_v53 = vld [vmem:[#allocation11 + $0x5e0] ss:$24 sps:$4 sm:$0xff]  }
0x178b   :  { %10219 = vmatpush1.bf16.msra.mxu0 %v16946_v33  ;;  %v17032_v33 = vld [vmem:[#allocation11 + $0x614] ss:$24 sps:$4 sm:$0xff]  }
0x178c   :  { %10220 = vmatprep.subr.bf16.mxu0 %v16951_v30  ;;  %v17030_v30 = vld [vmem:[#allocation11 + $0x610] ss:$24 sps:$4 sm:$0xff]  }
0x178f   :  { %10221 = vmatpush1.bf16.msra.mxu0 %v16949_v38  ;;  %v17035_v38 = vld [vmem:[#allocation11 + $0x644] ss:$24 sps:$4 sm:$0xff]  }
0x1790   :  { %10222 = vmatprep.subr.bf16.mxu0 %v16954_v44  ;;  %v17033_v44 = vld [vmem:[#allocation11 + $0x640] ss:$24 sps:$4 sm:$0xff]  }
0x1793   :  { %10223 = vmatpush1.bf16.msra.mxu0 %v16952_v18  ;;  %v17038_v18 = vld [vmem:[#allocation11 + $0x674] ss:$24 sps:$4 sm:$0xff]  }
0x1794   :  { %10224 = vmatprep.subr.bf16.mxu0 %v16957_v2  ;;  %v17036_v2 = vld [vmem:[#allocation11 + $0x670] ss:$24 sps:$4 sm:$0xff]  }
0x1797   :  { %10225 = vmatpush1.bf16.msra.mxu0 %v16955_v60  ;;  %v17041_v60 = vld [vmem:[#allocation11 + $0x6a4] ss:$24 sps:$4 sm:$0xff]  }
0x1798   :  { %10226 = vmatprep.subr.bf16.mxu0 %v16960_v39  ;;  %v17039_v39 = vld [vmem:[#allocation11 + $0x6a0] ss:$24 sps:$4 sm:$0xff]  }
0x179b   :  { %10227 = vmatpush1.bf16.msra.mxu0 %v16958_v21  ;;  %v17044_v21 = vld [vmem:[#allocation11 + $0x6d4] ss:$24 sps:$4 sm:$0xff]  }
0x179c   :  { %10228 = vmatprep.subr.bf16.mxu0 %v16963_v10  ;;  %v17042_v10 = vld [vmem:[#allocation11 + $0x6d0] ss:$24 sps:$4 sm:$0xff]  }
0x179f   :  { %10229 = vmatpush1.bf16.msra.mxu0 %v16961_v49  ;;  %v17047_v49 = vld [vmem:[#allocation11 + $0x704] ss:$24 sps:$4 sm:$0xff]  }
0x17a0   :  { %10230 = vmatprep.subr.bf16.mxu0 %v16966_v54  ;;  %v17050_v54 = vld [vmem:[#allocation11 + $0x734] ss:$24 sps:$4 sm:$0xff]  }
0x17a3   :  { %10231 = vmatpush1.bf16.msra.mxu0 %v16964_v43  ;;  %v17053_v43 = vld [vmem:[#allocation11 + $0x764] ss:$24 sps:$4 sm:$0xff]  }
0x17a4   :  { %10232 = vmatprep.subr.bf16.mxu0 %v16969_v15  ;;  %v17051_v15 = vld [vmem:[#allocation11 + $0x760] ss:$24 sps:$4 sm:$0xff]  }
0x17a7   :  { %10233 = vmatpush1.bf16.msra.mxu0 %v16967_v20  ;;  %v17056_v20 = vld [vmem:[#allocation11 + $0x794] ss:$24 sps:$4 sm:$0xff]  }
0x17a8   :  { %10234 = vmatprep.subr.bf16.mxu0 %v16972_v14  ;;  %v17054_v14 = vld [vmem:[#allocation11 + $0x790] ss:$24 sps:$4 sm:$0xff]  }
0x17ab   :  { %10235 = vmatpush1.bf16.msra.mxu0 %v16970_v45  ;;  %v17059_v45 = vld [vmem:[#allocation11 + $0x7c4] ss:$24 sps:$4 sm:$0xff]  }
0x17ac   :  { %10236 = vmatprep.subr.bf16.mxu0 %v16975_v7  ;;  %v17057_v7 = vld [vmem:[#allocation11 + $0x7c0] ss:$24 sps:$4 sm:$0xff]  }
0x17af   :  { %10237 = vmatpush1.bf16.msra.mxu0 %v16973_v4  ;;  %v17062_v4 = vld [vmem:[#allocation11 + $0x7f4] ss:$24 sps:$4 sm:$0xff]  }
0x17b0   :  { %10238 = vmatprep.subr.bf16.mxu0 %v16978_v6  ;;  %v17060_v6 = vld [vmem:[#allocation11 + $0x7f0] ss:$24 sps:$4 sm:$0xff]  }
0x17b3   :  { %10239 = vmatpush1.bf16.msra.mxu0 %v16976_v34  ;;  %v17065_v34 = vld [vmem:[#allocation11 + $0x824] ss:$24 sps:$4 sm:$0xff]  }
0x17b4   :  { %10240 = vmatprep.subr.bf16.mxu0 %v16981_v55  ;;  %v17063_v55 = vld [vmem:[#allocation11 + $0x820] ss:$24 sps:$4 sm:$0xff]  }
0x17b7   :  { %10241 = vmatpush1.bf16.msra.mxu0 %v16979_v12  ;;  %v17068_v12 = vld [vmem:[#allocation11 + $0x854] ss:$24 sps:$4 sm:$0xff]  }
0x17b8   :  { %10253 = vmatprep.subr.bf16.mxu0 %v16984_v56  ;;  %v17066_v56 = vld [vmem:[#allocation11 + $0x850] ss:$24 sps:$4 sm:$0xff]  }
0x17ba   :  { %10243 = vmatmul.mubr.bf16.vlgmr.msra.gmra.mrb[24].mxu0 %v18860_v29  ;;  %v16997_v29 = vld [vmem:[#allocation11 + $0x400] ss:$24 sps:$4 sm:$0xff]  }
0x17bb   :  { %10254 = vmatpush1.bf16.msra.mxu0 %v16982_v11  ;;  %10285 = vmatprep.mubr.bf16.mxu0 %v18880_v28  ;;  %v17000_v28 = vld [vmem:[#allocation11 + $0x430] ss:$24 sps:$4 sm:$0xff]   ;;  %v17071_v11 = vld [vmem:[#allocation11 + $0x884] ss:$24 sps:$4 sm:$0xff]  }
0x17bc   :  { %10255 = vmatprep.subr.bf16.mxu0 %v16987_v13  ;;  %v17069_v13 = vld [vmem:[#allocation11 + $0x880] ss:$24 sps:$4 sm:$0xff]  }
0x17bf   :  { %10256 = vmatpush1.bf16.msra.mxu0 %v16985_v36  ;;  %v17074_v36 = vld [vmem:[#allocation11 + $0x8b4] ss:$24 sps:$4 sm:$0xff]  }
0x17c0   :  { %10257 = vmatprep.subr.bf16.mxu0 %v16990_v22  ;;  %v17072_v22 = vld [vmem:[#allocation11 + $0x8b0] ss:$24 sps:$4 sm:$0xff]  }
0x17c3   :  { %10258 = vmatpush1.bf16.msra.mxu0 %v16988_v48  ;;  %v17077_v48 = vld [vmem:[#allocation11 + $0x8e4] ss:$24 sps:$4 sm:$0xff]  }
0x17c4   :  { %10259 = vmatprep.subr.bf16.mxu0 %v16993_v24  ;;  %v17075_v24 = vld [vmem:[#allocation11 + $0x8e0] ss:$24 sps:$4 sm:$0xff]  }
0x17c7   :  { %10260 = vmatpush1.bf16.msra.mxu0 %v16991_v23 }
0x17c8   :  { %10261 = vmatprep.subr.bf16.mxu0 %v16996_v25 }
0x17cb   :  { %10262 = vmatpush1.bf16.msra.mxu0 %v16994_v8 }
0x17cc   :  { %10263 = vmatprep.subr.bf16.mxu0 %v16999_v57 }
0x17cf   :  { %10264 = vmatpush1.bf16.msra.mxu0 %v16997_v29 }
0x17d0   :  { %10265 = vmatprep.subr.bf16.mxu0 %v17002_v46 }
0x17d3   :  { %10266 = vmatpush1.bf16.msra.mxu0 %v17000_v28 }
0x17d4   :  { %10267 = vmatprep.subr.bf16.mxu0 %v17005_v41 }
0x17d7   :  { %10268 = vmatpush1.bf16.msra.mxu0 %v17003_v19  ;;  %v8480_v19 = vld [vmem:[#allocation12] sm:$0x3f] }
0x17d8   :  { %10269 = vmatprep.subr.bf16.mxu0 %v17008_v47  ;;  %v8485_v47 = vrot.slane %v8480_v19, %v18352_v27 }
0x17db   :  { %10270 = vmatpush1.bf16.msra.mxu0 %v17006_v35  ;;  %v8489_v35 = vrot.slane %v8480_v19, %v18357_v31 }
0x17dc   :  { %10271 = vmatprep.subr.bf16.mxu0 %v17011_v37 }
0x17df   :  { %10272 = vmatpush1.bf16.msra.mxu0 %v17009_v59 }
0x17e0   :  { %10273 = vmatprep.subr.bf16.mxu0 %v17014_v32  ;;  %v8493_v32 = vrot.slane %v8480_v19, %v18341_v63 }
0x17e3   :  { %10274 = vmatpush1.bf16.msra.mxu0 %v17012_v5 }
0x17e4   :  { %10275 = vmatprep.subr.bf16.mxu0 %v17017_v9 }
0x17e7   :  { %10276 = vmatpush1.bf16.msra.mxu0 %v17015_v62 }
0x17e8   :  { %10277 = vmatprep.subr.bf16.mxu0 %v17020_v3  ;;  %v17664_v3 = vld [vmem:[#allocation3 + $0x8] sm:$0xff] }
0x17eb   :  { %10278 = vmatpush1.bf16.msra.mxu0 %v17018_v61 }
0x17ec   :  { %10279 = vmatprep.subr.bf16.mxu0 %v17023_v50 }
0x17ef   :  { %10280 = vmatpush1.bf16.msra.mxu0 %v17021_v0  ;;  %v8497_v0 = vrot.slane %v8480_v19, %v18344_v1 }
0x17f0   :  { %10281 = vmatprep.subr.bf16.mxu0 %v17026_v40  ;;  %v17665_v40 = vld [vmem:[#allocation3 + $0x30] sm:$0xff] }
0x17f3   :  { %10282 = vmatpush1.bf16.msra.mxu0 %v17024_v42 }
0x17f4   :  { %10283 = vmatprep.subr.bf16.mxu0 %v17029_v26  ;;  %v17666_v26 = vld [vmem:[#allocation3 + $0x38] sm:$0xff] }
0x17f7   :  { %10284 = vmatpush1.bf16.msra.mxu0 %v17027_v53 }
0x17f8   :  { %10296 = vmatprep.subr.bf16.mxu0 %v17032_v33 }
0x17fa   :  { %10286 = vmatmul.mubr.bf16.vlgmr.msra.gmra.mrb[24].mxu0 %v18886_v52  ;;  %v17045_v52 = vld [vmem:[#allocation11 + $0x700] ss:$24 sps:$4 sm:$0xff]  }
0x17fb   :  { %10297 = vmatpush1.bf16.msra.mxu0 %v17030_v30  ;;  %10328 = vmatprep.mubr.bf16.mxu0 %v18898_v16  ;;  %v17048_v16 = vld [vmem:[#allocation11 + $0x730] ss:$24 sps:$4 sm:$0xff]  }
0x17fc   :  { %10298 = vmatprep.subr.bf16.mxu0 %v17035_v38  ;;  %v17667_v38 = vld [vmem:[#allocation3 + $0x10] sm:$0xff] }
0x17ff   :  { %10299 = vmatpush1.bf16.msra.mxu0 %v17033_v44 }
0x1800   :  { %10300 = vmatprep.subr.bf16.mxu0 %v17038_v18 }
0x1803   :  { %10301 = vmatpush1.bf16.msra.mxu0 %v17036_v2 }
0x1804   :  { %10302 = vmatprep.subr.bf16.mxu0 %v17041_v60  ;;  %v8501_v60 = vrot.slane %v8480_v19, %v18386_v51 }
0x1807   :  { %10303 = vmatpush1.bf16.msra.mxu0 %v17039_v39  ;;  %v8505_v39 = vrot.slane %v8480_v19, %v18391_v58  ;;  %v17080_v19 = vld [vmem:[#allocation17 + $0x4] ss:$24 sps:$4 sm:$0xff]  }
0x1808   :  { %10304 = vmatprep.subr.bf16.mxu0 %v17044_v21  ;;  %12278 = vmatprep.subr.bf16.mxu1 %v17080_v19 }
0x180b   :  { %10305 = vmatpush1.bf16.msra.mxu0 %v17042_v10  ;;  %v17668_v10 = vld [vmem:[#allocation3 + $0x40] sm:$0xff] }
0x180c   :  { %10306 = vmatprep.subr.bf16.mxu0 %v17047_v49 }
0x180f   :  { %10307 = vmatpush1.bf16.msra.mxu0 %v17045_v52 }
0x1810   :  { %10308 = vmatprep.subr.bf16.mxu0 %v17050_v54 }
0x1813   :  { %10309 = vmatpush1.bf16.msra.mxu0 %v17048_v16  ;;  %v17669_v16 = vld [vmem:[#allocation3 + $0x18] sm:$0xff] }
0x1814   :  { %10310 = vmatprep.subr.bf16.mxu0 %v17053_v43 }
0x1817   :  { %10311 = vmatpush1.bf16.msra.mxu0 %v17051_v15 }
0x1818   :  { %10312 = vmatprep.subr.bf16.mxu0 %v17056_v20 }
0x181b   :  { %10313 = vmatpush1.bf16.msra.mxu0 %v17054_v14 }
0x181c   :  { %10314 = vmatprep.subr.bf16.mxu0 %v17059_v45 }
0x181f   :  { %10315 = vmatpush1.bf16.msra.mxu0 %v17057_v7 }
0x1820   :  { %10316 = vmatprep.subr.bf16.mxu0 %v17062_v4 }
0x1823   :  { %10317 = vmatpush1.bf16.msra.mxu0 %v17060_v6  ;;  %v17670_v6 = vld [vmem:[#allocation3 + $0x48] sm:$0xff] }
0x1824   :  { %10318 = vmatprep.subr.bf16.mxu0 %v17065_v34 }
0x1827   :  { %10319 = vmatpush1.bf16.msra.mxu0 %v17063_v55  ;;  %v17671_v55 = vld [vmem:[#allocation3 + $0x20] sm:$0xff] }
0x1828   :  { %10320 = vmatprep.subr.bf16.mxu0 %v17068_v12 }
0x182b   :  { %10321 = vmatpush1.bf16.msra.mxu0 %v17066_v56 }
0x182c   :  { %10322 = vmatprep.subr.bf16.mxu0 %v17071_v11 }
0x182f   :  { %10323 = vmatpush1.bf16.msra.mxu0 %v17069_v13  ;;  %v17672_v13 = vld [vmem:[#allocation3 + $0x28] sm:$0xff] }
0x1830   :  { %10324 = vmatprep.subr.bf16.mxu0 %v17074_v36 }
0x1833   :  { %10325 = vmatpush1.bf16.msra.mxu0 %v17072_v22 }
0x1834   :  { %10326 = vmatprep.subr.bf16.mxu0 %v17077_v48 }
0x1837   :  { %10327 = vmatpush1.bf16.msra.mxu0 %v17075_v24  ;;  %v17673_v24 = vld [vmem:[#allocation3 + $0x50] sm:$0xff] }
0x183a   :  { %10329 = vmatmul.mubr.bf16.vlgmr.msra.gmra.mrb[24].mxu0 %v18902_v17  ;;  %v17663_v17 = vld [vmem:[#allocation3] sm:$0xff] }
0x184d   :  { %v10072_v23 = vpop.f32.mrb[20].mxu0  ;;  %v10201_v25 = vpop.f32.mrb[112].mxu1 }
0x184e   :  { %v10074_v8 = vpop.f32.mrb[21].mxu0  ;;  %v10203_v57 = vpop.f32.mrb[113].mxu1  ;;  %v15179_v37 = vadd.f32 %v10072_v23, %v8485_v47  ;;  %v15183_v50 = vadd.f32 %v10201_v25, %v8493_v32 }
0x184f   :  { %v10076_v29 = vpop.f32.mrb[22].mxu0  ;;  %v10205_v46 = vpop.f32.mrb[114].mxu1  ;;  %v15180_v59 = vadd.f32 %v10074_v8, %v8489_v35  ;;  %v15184_v18 = vadd.f32 %v10203_v57, %v8497_v0  ;;  %v17674_v8 = vld [vmem:[#allocation3 + $0x58] sm:$0xff] }
0x1850   :  { %v10078_v28 = vpop.f32.mrb[23].mxu0  ;;  %v10207_v41 = vpop.f32.mrb[115].mxu1  ;;  %v15181_v5 = vadd.f32 %v10076_v29, %v8485_v47  ;;  %v18915_v62 = vadd.f32 %v17663_v17, %v15179_v37  ;;  %v15185_v30 = vadd.f32 %v10205_v46, %v8493_v32  ;;  %v18926_v44 = vadd.f32 %v17667_v38, %v15183_v50  ;;  %v17081_v47 = vld [vmem:[#allocation17 + $0x8] ss:$24 sps:$4 sm:$0xff]   ;;  %v17086_v37 = vld [vmem:[#allocation17 + $0x34] ss:$24 sps:$4 sm:$0xff]  }
0x1851   :  { %v15182_v9 = vadd.f32 %v10078_v28, %v8489_v35  ;;  %v18917_v61 = vadd.f32 %v17664_v3, %v15180_v59  ;;  %v15186_v52 = vadd.f32 %v10207_v41, %v8497_v0  ;;  %v18935_v43 = vadd.f32 %v17669_v16, %v15184_v18  ;;  %v17078_v41 = vld [vmem:[#allocation17] ss:$24 sps:$4 sm:$0xff]   ;;  %v17083_v35 = vld [vmem:[#allocation17 + $0xc] ss:$24 sps:$4 sm:$0xff]   ;;  %v17089_v59 = vld [vmem:[#allocation17 + $0x3c] ss:$24 sps:$4 sm:$0xff]  }
0x1852   :  { %v18920_v42 = vadd.f32 %v17665_v40, %v15181_v5  ;;  %v18933_v49 = vadd.f32 %v17668_v10, %v15185_v30  ;;  %12407 = vmatprep.subr.bf16.mxu0 %v17083_v35  ;;  %12279 = vmatpush1.bf16.msra.mxu1 %v17078_v41  ;;  %v17084_v32 = vld [vmem:[#allocation17 + $0x30] ss:$24 sps:$4 sm:$0xff]   ;;  %v17095_v17 = vld [vmem:[#allocation17 + $0x6c] ss:$24 sps:$4 sm:$0xff]   ;;  %v17090_v3 = vld [vmem:[#allocation17 + $0x60] ss:$24 sps:$4 sm:$0xff]  }
0x1853   :  { %v18922_v53 = vadd.f32 %v17666_v26, %v15182_v9  ;;  %v10353_v33 = vadd.f32 %v18917_v61, %v18915_v62  ;;  %v18939_v34 = vadd.f32 %v17670_v6, %v15186_v52  ;;  %12408 = vmatpush1.bf16.msra.mxu0 %v17081_v47  ;;  %12280 = vmatprep.subr.bf16.mxu1 %v17086_v37  ;;  %v17087_v5 = vld [vmem:[#allocation17 + $0x38] ss:$24 sps:$4 sm:$0xff]   ;;  %v17092_v9 = vld [vmem:[#allocation17 + $0x64] ss:$24 sps:$4 sm:$0xff]   ;;  %v17093_v50 = vld [vmem:[#allocation17 + $0x68] ss:$24 sps:$4 sm:$0xff]  }
0x1854   :  { %12409 = vmatprep.subr.bf16.mxu0 %v17089_v59  ;;  %v17098_v0 = vld [vmem:[#allocation17 + $0x94] ss:$24 sps:$4 sm:$0xff]   ;;  %v17096_v26 = vld [vmem:[#allocation17 + $0x90] ss:$24 sps:$4 sm:$0xff]   ;;  %v17104_v30 = vld [vmem:[#allocation17 + $0xc4] ss:$24 sps:$4 sm:$0xff]  }
0x1855   :  { %v10360_v2 = vadd.f32 %v18922_v53, %v18920_v42  ;;  %v10354_v21 = vadd.f32 %v10353_v33, %v18926_v44  ;;  %v17101_v40 = vld [vmem:[#allocation17 + $0x9c] ss:$24 sps:$4 sm:$0xff]   ;;  %v17099_v33 = vld [vmem:[#allocation17 + $0x98] ss:$24 sps:$4 sm:$0xff]   ;;  %v17107_v38 = vld [vmem:[#allocation17 + $0xcc] ss:$24 sps:$4 sm:$0xff]  }
0x1856   :  { %12281 = vmatpush1.bf16.msra.mxu1 %v17084_v32  ;;  %v17102_v18 = vld [vmem:[#allocation17 + $0xc0] ss:$24 sps:$4 sm:$0xff]   ;;  %v17116_v52 = vld [vmem:[#allocation17 + $0x124] ss:$24 sps:$4 sm:$0xff]  }
0x1857   :  { %v10361_v15 = vadd.f32 %v10360_v2, %v18933_v49  ;;  %v10355_v4 = vadd.f32 %v10354_v21, %v18935_v43  ;;  %12410 = vmatpush1.bf16.msra.mxu0 %v17087_v5  ;;  %12282 = vmatprep.subr.bf16.mxu1 %v17092_v9  ;;  %v17105_v2 = vld [vmem:[#allocation17 + $0xc8] ss:$24 sps:$4 sm:$0xff]   ;;  %v17111_v10 = vld [vmem:[#allocation17 + $0xf8] ss:$24 sps:$4 sm:$0xff]   ;;  %v17131_v6 = vld [vmem:[#allocation17 + $0x18c] ss:$24 sps:$4 sm:$0xff]  }
0x1858   :  { %12411 = vmatprep.subr.bf16.mxu0 %v17095_v17  ;;  %v17108_v21 = vld [vmem:[#allocation17 + $0xf0] ss:$24 sps:$4 sm:$0xff]   ;;  %v17114_v16 = vld [vmem:[#allocation17 + $0x120] ss:$24 sps:$4 sm:$0xff]  }
0x1859   :  { %v10362_v48 = vadd.f32 %v10361_v15, %v18939_v34  ;;  %v17117_v15 = vld [vmem:[#allocation17 + $0x128] ss:$24 sps:$4 sm:$0xff]  }
0x185a   :  { %12283 = vmatpush1.bf16.msra.mxu1 %v17090_v3 }
0x185b   :  { %12412 = vmatpush1.bf16.msra.mxu0 %v17093_v50  ;;  %12284 = vmatprep.subr.bf16.mxu1 %v17098_v0 }
0x185c   :  { %12413 = vmatprep.subr.bf16.mxu0 %v17101_v40 }
0x185e   :  { %12285 = vmatpush1.bf16.msra.mxu1 %v17096_v26 }
0x185f   :  { %12414 = vmatpush1.bf16.msra.mxu0 %v17099_v33  ;;  %12286 = vmatprep.subr.bf16.mxu1 %v17104_v30 }
0x1860   :  { %12415 = vmatprep.subr.bf16.mxu0 %v17107_v38 }
0x1862   :  { %12287 = vmatpush1.bf16.msra.mxu1 %v17102_v18 }
0x1863   :  { %12416 = vmatpush1.bf16.msra.mxu0 %v17105_v2 }
0x190d   :  { %v10330_v54 = vpop.f32.mrb[24].mxu0 }
0x190e   :  { %v15187_v20 = vadd.f32 %v10330_v54, %v8501_v60  ;;  %v10332_v14 = vpop.f32.mrb[25].mxu0  ;;  %v17119_v54 = vld [vmem:[#allocation17 + $0x12c] ss:$24 sps:$4 sm:$0xff]  }
0x190f   :  { %v15188_v45 = vadd.f32 %v10332_v14, %v8505_v39  ;;  %v10334_v7 = vpop.f32.mrb[26].mxu0  ;;  %v17125_v14 = vld [vmem:[#allocation17 + $0x15c] ss:$24 sps:$4 sm:$0xff]  }
0x1910   :  { %v18941_v12 = vadd.f32 %v17671_v55, %v15187_v20  ;;  %v15189_v56 = vadd.f32 %v10334_v7, %v8501_v60  ;;  %v10336_v11 = vpop.f32.mrb[27].mxu0  ;;  %v17110_v60 = vld [vmem:[#allocation17 + $0xf4] ss:$24 sps:$4 sm:$0xff]   ;;  %v17123_v7 = vld [vmem:[#allocation17 + $0x158] ss:$24 sps:$4 sm:$0xff]  }
0x1911   :  { %v18943_v36 = vadd.f32 %v17672_v13, %v15188_v45  ;;  %v15190_v22 = vadd.f32 %v10336_v11, %v8505_v39  ;;  %v17113_v39 = vld [vmem:[#allocation17 + $0xfc] ss:$24 sps:$4 sm:$0xff]   ;;  %12288 = vmatprep.subr.bf16.mxu1 %v17110_v60  ;;  %v17120_v45 = vld [vmem:[#allocation17 + $0x150] ss:$24 sps:$4 sm:$0xff]   ;;  %v17126_v55 = vld [vmem:[#allocation17 + $0x180] ss:$24 sps:$4 sm:$0xff]  }
0x1912   :  { %v18946_v23 = vadd.f32 %v17673_v24, %v15189_v56  ;;  %v10356_v25 = vadd.f32 %v10355_v4, %v18941_v12  ;;  %12417 = vmatprep.subr.bf16.mxu0 %v17113_v39  ;;  %12289 = vmatpush1.bf16.msra.mxu1 %v17108_v21  ;;  %v17122_v20 = vld [vmem:[#allocation17 + $0x154] ss:$24 sps:$4 sm:$0xff]   ;;  %v17128_v4 = vld [vmem:[#allocation17 + $0x184] ss:$24 sps:$4 sm:$0xff]   ;;  %v17129_v56 = vld [vmem:[#allocation17 + $0x188] ss:$24 sps:$4 sm:$0xff]  }
0x1913   :  { %v18949_v57 = vadd.f32 %v17674_v8, %v15190_v22  ;;  %12418 = vmatpush1.bf16.msra.mxu0 %v17111_v10  ;;  %12290 = vmatprep.subr.bf16.mxu1 %v17116_v52  ;;  %v17134_v11 = vld [vmem:[#allocation17 + $0x1b4] ss:$24 sps:$4 sm:$0xff]   ;;  %v17132_v22 = vld [vmem:[#allocation17 + $0x1b0] ss:$24 sps:$4 sm:$0xff]   ;;  %v17140_v60 = vld [vmem:[#allocation17 + $0x1e4] ss:$24 sps:$4 sm:$0xff]  }
0x1914   :  { %v10357_v29 = vadd.f32 %v10356_v25, %v18943_v36  ;;  %v10363_v46 = vadd.f32 %v10362_v48, %v18946_v23  ;;  %12419 = vmatprep.subr.bf16.mxu0 %v17119_v54  ;;  %v17137_v13 = vld [vmem:[#allocation17 + $0x1bc] ss:$24 sps:$4 sm:$0xff]   ;;  %v17135_v48 = vld [vmem:[#allocation17 + $0x1b8] ss:$24 sps:$4 sm:$0xff]   ;;  %v17143_v39 = vld [vmem:[#allocation17 + $0x1ec] ss:$24 sps:$4 sm:$0xff]  }
0x1915   :  { %v17138_v21 = vld [vmem:[#allocation17 + $0x1e0] ss:$24 sps:$4 sm:$0xff]   ;;  %v17146_v52 = vld [vmem:[#allocation17 + $0x214] ss:$24 sps:$4 sm:$0xff]  }
0x1916   :  { %10358 = vadd.xlane.f32.xlu1 %v10357_v29  ;;  %v10364_v28 = vadd.f32 %v10363_v46, %v18949_v57  ;;  %12291 = vmatpush1.bf16.msra.mxu1 %v17114_v16  ;;  %v17141_v10 = vld [vmem:[#allocation17 + $0x1e8] ss:$24 sps:$4 sm:$0xff]   ;;  %v17149_v54 = vld [vmem:[#allocation17 + $0x21c] ss:$24 sps:$4 sm:$0xff]  }
0x1917   :  { %12420 = vmatpush1.bf16.msra.mxu0 %v17117_v15  ;;  %12292 = vmatprep.subr.bf16.mxu1 %v17122_v20  ;;  %v17144_v16 = vld [vmem:[#allocation17 + $0x210] ss:$24 sps:$4 sm:$0xff]   ;;  %v17152_v20 = vld [vmem:[#allocation17 + $0x244] ss:$24 sps:$4 sm:$0xff]  }
0x1918   :  { %10365 = vadd.xlane.f32.xlu0 %v10364_v28  ;;  %12421 = vmatprep.subr.bf16.mxu0 %v17125_v14  ;;  %v17147_v15 = vld [vmem:[#allocation17 + $0x218] ss:$24 sps:$4 sm:$0xff]   ;;  %v17155_v14 = vld [vmem:[#allocation17 + $0x24c] ss:$24 sps:$4 sm:$0xff]  }
0x191a   :  { %12293 = vmatpush1.bf16.msra.mxu1 %v17120_v45  ;;  %v17150_v45 = vld [vmem:[#allocation17 + $0x240] ss:$24 sps:$4 sm:$0xff]  }
0x191b   :  { %12422 = vmatpush1.bf16.msra.mxu0 %v17123_v7  ;;  %12294 = vmatprep.subr.bf16.mxu1 %v17128_v4  ;;  %v17153_v7 = vld [vmem:[#allocation17 + $0x248] ss:$24 sps:$4 sm:$0xff]   ;;  %v17158_v4 = vld [vmem:[#allocation17 + $0x274] ss:$24 sps:$4 sm:$0xff]  }
0x191c   :  { %12423 = vmatprep.subr.bf16.mxu0 %v17131_v6  ;;  %v17161_v6 = vld [vmem:[#allocation17 + $0x27c] ss:$24 sps:$4 sm:$0xff]  }
0x191e   :  { %12295 = vmatpush1.bf16.msra.mxu1 %v17126_v55  ;;  %v17156_v55 = vld [vmem:[#allocation17 + $0x270] ss:$24 sps:$4 sm:$0xff]  }
0x191f   :  { %12424 = vmatpush1.bf16.msra.mxu0 %v17129_v56  ;;  %12296 = vmatprep.subr.bf16.mxu1 %v17134_v11  ;;  %v17159_v56 = vld [vmem:[#allocation17 + $0x278] ss:$24 sps:$4 sm:$0xff]   ;;  %v17164_v11 = vld [vmem:[#allocation17 + $0x2a4] ss:$24 sps:$4 sm:$0xff]  }
0x1920   :  { %12425 = vmatprep.subr.bf16.mxu0 %v17137_v13  ;;  %v17167_v13 = vld [vmem:[#allocation17 + $0x2ac] ss:$24 sps:$4 sm:$0xff]  }
0x1922   :  { %12297 = vmatpush1.bf16.msra.mxu1 %v17132_v22  ;;  %v17162_v22 = vld [vmem:[#allocation17 + $0x2a0] ss:$24 sps:$4 sm:$0xff]  }
0x1923   :  { %12426 = vmatpush1.bf16.msra.mxu0 %v17135_v48  ;;  %12298 = vmatprep.subr.bf16.mxu1 %v17140_v60  ;;  %v17165_v48 = vld [vmem:[#allocation17 + $0x2a8] ss:$24 sps:$4 sm:$0xff]  }
0x1924   :  { %12427 = vmatprep.subr.bf16.mxu0 %v17143_v39 }
0x1926   :  { %12299 = vmatpush1.bf16.msra.mxu1 %v17138_v21 }
0x1927   :  { %12428 = vmatpush1.bf16.msra.mxu0 %v17141_v10  ;;  %12300 = vmatprep.subr.bf16.mxu1 %v17146_v52 }
0x1928   :  { %12429 = vmatprep.subr.bf16.mxu0 %v17149_v54 }
0x192a   :  { %12301 = vmatpush1.bf16.msra.mxu1 %v17144_v16 }
0x192b   :  { %12430 = vmatpush1.bf16.msra.mxu0 %v17147_v15  ;;  %12302 = vmatprep.subr.bf16.mxu1 %v17152_v20 }
0x192c   :  { %12431 = vmatprep.subr.bf16.mxu0 %v17155_v14 }
0x192e   :  { %12303 = vmatpush1.bf16.msra.mxu1 %v17150_v45 }
0x192f   :  { %12432 = vmatpush1.bf16.msra.mxu0 %v17153_v7  ;;  %12304 = vmatprep.subr.bf16.mxu1 %v17158_v4 }
0x1930   :  { %12433 = vmatprep.subr.bf16.mxu0 %v17161_v6 }
0x1932   :  { %12305 = vmatpush1.bf16.msra.mxu1 %v17156_v55 }
0x1933   :  { %12434 = vmatpush1.bf16.msra.mxu0 %v17159_v56  ;;  %12306 = vmatprep.subr.bf16.mxu1 %v17164_v11 }
0x1934   :  { %12435 = vmatprep.subr.bf16.mxu0 %v17167_v13 }
0x1936   :  { %12307 = vmatpush1.bf16.msra.mxu1 %v17162_v22 }
0x1937   :  { %12436 = vmatpush1.bf16.msra.mxu0 %v17165_v48 }
0x19a3   :  { %v10359_v24 = vpop.xlane.xlu1 %10358 }
0x19a4   :  { %v10368_v25 = vmul.f32 0.0013020834, %v10359_v24  ;;  %v17170_v24 = vld [vmem:[#allocation17 + $0x2d4] ss:$24 sps:$4 sm:$0xff]  }
0x19a5   :  { %v10366_v8 = vpop.xlane.xlu0 %10365  ;;  %12308 = vmatprep.subr.bf16.mxu1 %v17170_v24 }
0x19a6   :  { %v10369_v29 = vmul.f32 0.0013020834, %v10366_v8  ;;  %v18955_v46 = vsub.f32 %v18915_v62, %v10368_v25  ;;  %v18958_v28 = vsub.f32 %v18917_v61, %v10368_v25  ;;  %v18961_v41 = vsub.f32 %v18926_v44, %v10368_v25  ;;  %v17168_v8 = vld [vmem:[#allocation17 + $0x2d0] ss:$24 sps:$4 sm:$0xff]  }
0x19a7   :  { %v18964_v19 = vsub.f32 %v18935_v43, %v10368_v25  ;;  %v18977_v61 = vsub.f32 %v18941_v12, %v10368_v25  ;;  %v18992_v5 = vsub.f32 %v18943_v36, %v10368_v25  ;;  %v17173_v25 = vld [vmem:[#allocation17 + $0x2dc] ss:$24 sps:$4 sm:$0xff]   ;;  %12309 = vmatpush1.bf16.msra.mxu1 %v17168_v8 }
0x19a8   :  { %v10382_v47 = vmul.f32 %v18955_v46, %v18955_v46  ;;  %v10383_v35 = vmul.f32 %v18958_v28, %v18958_v28  ;;  %v18971_v37 = vsub.f32 %v18920_v42, %v10369_v29  ;;  %v18974_v62 = vsub.f32 %v18922_v53, %v10369_v29  ;;  %12437 = vmatprep.subr.bf16.mxu0 %v17173_v25 }
0x19a9   :  { %v10384_v44 = vmul.f32 %v18961_v41, %v18961_v41  ;;  %v18982_v59 = vsub.f32 %v18933_v49, %v10369_v29  ;;  %v18985_v32 = vsub.f32 %v18939_v34, %v10369_v29  ;;  %v10385_v12 = vmul.f32 %v18964_v19, %v18964_v19 }
0x19aa   :  { %v10394_v43 = vadd.f32 %v10383_v35, %v10382_v47  ;;  %v10388_v42 = vmul.f32 %v18971_v37, %v18971_v37  ;;  %v10389_v53 = vmul.f32 %v18974_v62, %v18974_v62  ;;  %v18997_v17 = vsub.f32 %v18946_v23, %v10369_v29  ;;  %v17176_v47 = vld [vmem:[#allocation17 + $0x304] ss:$24 sps:$4 sm:$0xff]  }
0x19ab   :  { %v10390_v49 = vmul.f32 %v18982_v59, %v18982_v59  ;;  %v10386_v3 = vmul.f32 %v18977_v61, %v18977_v61  ;;  %v19004_v0 = vsub.f32 %v18949_v57, %v10369_v29  ;;  %v10391_v36 = vmul.f32 %v18985_v32, %v18985_v32  ;;  %v17171_v29 = vld [vmem:[#allocation17 + $0x2d8] ss:$24 sps:$4 sm:$0xff]   ;;  %v17179_v35 = vld [vmem:[#allocation17 + $0x30c] ss:$24 sps:$4 sm:$0xff]   ;;  %12321 = vmatprep.subr.bf16.mxu1 %v17176_v47 }
0x19ac   :  { %v10395_v9 = vadd.f32 %v10394_v43, %v10384_v44  ;;  %v10401_v34 = vadd.f32 %v10389_v53, %v10388_v42  ;;  %v10387_v26 = vmul.f32 %v18992_v5, %v18992_v5  ;;  %v10392_v33 = vmul.f32 %v18997_v17, %v18997_v17  ;;  %12438 = vmatpush1.bf16.msra.mxu0 %v17171_v29 }
0x19ad   :  { %v10393_v18 = vmul.f32 %v19004_v0, %v19004_v0  ;;  %12450 = vmatprep.subr.bf16.mxu0 %v17179_v35 }
0x19ae   :  { %v10396_v50 = vadd.f32 %v10395_v9, %v10385_v12  ;;  %v10402_v40 = vadd.f32 %v10401_v34, %v10390_v49  ;;  %v10351_v49 = vld [vmem:[#allocation14] sm:$0x3f]  ;;  %v10352_v34 = vld [vmem:[#allocation15] sm:$0x3f] }
0x19af   :  { %v10485_v21 = vrot.slane %v10352_v34, %v18344_v1  ;;  %v10493_v52 = vrot.slane %v10352_v34, %v18391_v58  ;;  %v10489_v54 = vrot.slane %v10352_v34, %v18386_v51 }
0x19b0   :  { %v10397_v23 = vadd.f32 %v10396_v50, %v10386_v3  ;;  %v10403_v30 = vadd.f32 %v10402_v40, %v10391_v36  ;;  %v10434_v3 = vrot.slane %v10351_v49, %v18357_v31  ;;  %v10430_v50 = vrot.slane %v10351_v49, %v18352_v27 }
0x19b1   :  { %v10442_v36 = vrot.slane %v10351_v49, %v18344_v1  ;;  %v10438_v40 = vrot.slane %v10351_v49, %v18341_v63 }
0x19b2   :  { %v10398_v38 = vadd.f32 %v10397_v23, %v10387_v26  ;;  %v10404_v2 = vadd.f32 %v10403_v30, %v10392_v33  ;;  %v10450_v26 = vrot.slane %v10351_v49, %v18391_v58  ;;  %v10477_v33 = vrot.slane %v10352_v34, %v18357_v31 }
0x19b3   :  { %v10473_v30 = vrot.slane %v10352_v34, %v18352_v27 }
0x19b4   :  { %10399 = vadd.xlane.f32.xlu0 %v10398_v38  ;;  %v10405_v57 = vadd.f32 %v10404_v2, %v10393_v18  ;;  %v10481_v38 = vrot.slane %v10352_v34, %v18341_v63  ;;  %v10446_v18 = vrot.slane %v10351_v49, %v18386_v51  ;;  %v17185_v49 = vld [vmem:[#allocation17 + $0x33c] ss:$24 sps:$4 sm:$0xff]  }
0x19b6   :  { %10406 = vadd.xlane.f32.xlu1 %v10405_v57 }
0x1a41   :  { %v10400_v44 = vpop.xlane.xlu0 %10399 }
0x1a42   :  { %v10408_v43 = vmul.f32 0.0013020834, %v10400_v44  ;;  %v17174_v44 = vld [vmem:[#allocation17 + $0x300] ss:$24 sps:$4 sm:$0xff]  }
0x1a43   :  { %v10407_v53 = vpop.xlane.xlu1 %10406 }
0x1a44   :  { %v10410_v42 = vadd.f32 1e-12, %v10408_v43  ;;  %v10409_v12 = vmul.f32 0.0013020834, %v10407_v53  ;;  %v17177_v43 = vld [vmem:[#allocation17 + $0x308] ss:$24 sps:$4 sm:$0xff]  }
0x1a46   :  { %17654 = vrsqrt.f32 %v10410_v42  ;;  %v10411_v9 = vadd.f32 1e-12, %v10409_v12 }
0x1a48   :  { %17656 = vrsqrt.f32 %v10411_v9  ;;  %v17182_v9 = vld [vmem:[#allocation17 + $0x334] ss:$24 sps:$4 sm:$0xff]  }
0x1a50   :  { %v17655_v23 = vpop.eup %17654 }
0x1a51   :  { %v10415_v2 = vmul.f32 %v17655_v23, %v18958_v28  ;;  %v10414_v57 = vmul.f32 %v17655_v23, %v18955_v46  ;;  %v10417_v60 = vmul.f32 %v17655_v23, %v18964_v19  ;;  %v10416_v39 = vmul.f32 %v17655_v23, %v18961_v41 }
0x1a52   :  { %v10419_v10 = vmul.f32 %v17655_v23, %v18992_v5  ;;  %v17657_v16 = vpop.eup %17656  ;;  %v10418_v28 = vmul.f32 %v17655_v23, %v18977_v61  ;;  %v17191_v23 = vld [vmem:[#allocation17 + $0x36c] ss:$24 sps:$4 sm:$0xff]  }
0x1a53   :  { %v10458_v15 = vmul.f32 %v10434_v3, %v10415_v2  ;;  %v10457_v20 = vmul.f32 %v10430_v50, %v10414_v57  ;;  %v10459_v14 = vmul.f32 %v10438_v40, %v10416_v39  ;;  %v10421_v46 = vmul.f32 %v17657_v16, %v18974_v62  ;;  %v17192_v2 = vld [vmem:[#allocation17 + $0x390] ss:$24 sps:$4 sm:$0xff]   ;;  %v17203_v39 = vld [vmem:[#allocation17 + $0x3cc] ss:$24 sps:$4 sm:$0xff]  }
0x1a54   :  { %v10420_v19 = vmul.f32 %v17657_v16, %v18971_v37  ;;  %v10423_v41 = vmul.f32 %v17657_v16, %v18985_v32  ;;  %v10422_v45 = vmul.f32 %v17657_v16, %v18982_v59  ;;  %v10460_v4 = vmul.f32 %v10442_v36, %v10417_v60  ;;  %v17195_v57 = vld [vmem:[#allocation17 + $0x398] ss:$24 sps:$4 sm:$0xff]   ;;  %v17200_v60 = vld [vmem:[#allocation17 + $0x3c4] ss:$24 sps:$4 sm:$0xff]  }
0x1a55   :  { %v10501_v7 = vadd.f32 %v10477_v33, %v10458_v15  ;;  %v10500_v5 = vadd.f32 %v10473_v30, %v10457_v20  ;;  %v10502_v6 = vadd.f32 %v10481_v38, %v10459_v14  ;;  %v10464_v55 = vmul.f32 %v10434_v3, %v10421_v46  ;;  %v17207_v15 = vld [vmem:[#allocation17 + $0x3f8] ss:$24 sps:$4 sm:$0xff]   ;;  %v17212_v20 = vld [vmem:[#allocation17 + $0x424] ss:$24 sps:$4 sm:$0xff]   ;;  %v17213_v46 = vld [vmem:[#allocation17 + $0x428] ss:$24 sps:$4 sm:$0xff]  }
0x1a56   :  { %v10463_v56 = vmul.f32 %v10430_v50, %v10420_v19  ;;  %v10466_v11 = vmul.f32 %v10442_v36, %v10423_v41  ;;  %v10465_v13 = vmul.f32 %v10438_v40, %v10422_v45  ;;  %v10425_v22 = vmul.f32 %v17657_v16, %v19004_v0  ;;  %v17180_v36 = vld [vmem:[#allocation17 + $0x330] ss:$24 sps:$4 sm:$0xff]   ;;  %v17215_v14 = vld [vmem:[#allocation17 + $0x42c] ss:$24 sps:$4 sm:$0xff]   ;;  %v17221_v41 = vld [vmem:[#allocation17 + $0x45c] ss:$24 sps:$4 sm:$0xff]  }
0x1a57   :  { %v10462_v48 = vmul.f32 %v10450_v26, %v10419_v10  ;;  %v10424_v61 = vmul.f32 %v17657_v16, %v18997_v17  ;;  %v10461_v62 = vmul.f32 %v10446_v18, %v10418_v28  ;;  %v10507_v24 = vadd.f32 %v10477_v33, %v10464_v55  ;;  %v17183_v40 = vld [vmem:[#allocation17 + $0x338] ss:$24 sps:$4 sm:$0xff]   ;;  %v17201_v10 = vld [vmem:[#allocation17 + $0x3c8] ss:$24 sps:$4 sm:$0xff]   ;;  %v17218_v19 = vld [vmem:[#allocation17 + $0x454] ss:$24 sps:$4 sm:$0xff]  }
0x1a58   :  { %v10506_v37 = vadd.f32 %v10473_v30, %v10463_v56  ;;  %v10509_v25 = vadd.f32 %v10485_v21, %v10466_v11  ;;  %v10508_v32 = vadd.f32 %v10481_v38, %v10465_v13  ;;  %v10468_v8 = vmul.f32 %v10450_v26, %v10425_v22  ;;  %v17188_v26 = vld [vmem:[#allocation17 + $0x364] ss:$24 sps:$4 sm:$0xff]   ;;  %v17186_v33 = vld [vmem:[#allocation17 + $0x360] ss:$24 sps:$4 sm:$0xff]   ;;  %v17194_v38 = vld [vmem:[#allocation17 + $0x394] ss:$24 sps:$4 sm:$0xff]  }
0x1a59   :  { %v10505_v59 = vadd.f32 %v10493_v52, %v10462_v48  ;;  %v10467_v29 = vmul.f32 %v10446_v18, %v10424_v61  ;;  %v10504_v47 = vadd.f32 %v10489_v54, %v10461_v62  ;;  %v19038_v35 = vpack.c.bf16 %v10507_v24, %v10501_v7  ;;  %v17189_v30 = vld [vmem:[#allocation17 + $0x368] ss:$24 sps:$4 sm:$0xff]   ;;  %v17197_v18 = vld [vmem:[#allocation17 + $0x39c] ss:$24 sps:$4 sm:$0xff]   ;;  %v17219_v7 = vld [vmem:[#allocation17 + $0x458] ss:$24 sps:$4 sm:$0xff]  }
0x1a5a   :  { %v19040_v42 = vpack.c.bf16 %v10506_v37, %v10500_v5  ;;  %v19042_v53 = vpack.c.bf16 %v10508_v32, %v10502_v6  ;;  %v10503_v0 = vadd.f32 %v10485_v21, %v10460_v4  ;;  %v10511_v12 = vadd.f32 %v10493_v52, %v10468_v8  ;;  %v17198_v21 = vld [vmem:[#allocation17 + $0x3c0] ss:$24 sps:$4 sm:$0xff]   ;;  %v17206_v52 = vld [vmem:[#allocation17 + $0x3f4] ss:$24 sps:$4 sm:$0xff]   ;;  %v17204_v16 = vld [vmem:[#allocation17 + $0x3f0] ss:$24 sps:$4 sm:$0xff]  }
0x1a5b   :  { %v10510_v17 = vadd.f32 %v10489_v54, %v10467_v29  ;;  %12310 = vmatprep.mubr.bf16.mxu1 %v19038_v35  ;;  %12439 = vmatprep.mubr.bf16.mxu0 %v19038_v35  ;;  %v17209_v54 = vld [vmem:[#allocation17 + $0x3fc] ss:$24 sps:$4 sm:$0xff]   ;;  %v17210_v28 = vld [vmem:[#allocation17 + $0x420] ss:$24 sps:$4 sm:$0xff]   ;;  %v17216_v45 = vld [vmem:[#allocation17 + $0x450] ss:$24 sps:$4 sm:$0xff]  }
0x1a5c   :  { %12311 = vmatmul.mubr.bf16.vlgmr.msra.gmra.mrb[116].mxu1 %v19040_v42  ;;  %12440 = vmatmul.mubr.bf16.vlgmr.msra.gmra.mrb[28].mxu0 %v19040_v42  ;;  %v19048_v34 = vpack.c.bf16 %v10509_v25, %v10503_v0  ;;  %v19050_v3 = vpack.c.bf16 %v10511_v12, %v10505_v59  ;;  %v17224_v5 = vld [vmem:[#allocation17 + $0x484] ss:$24 sps:$4 sm:$0xff]   ;;  %v17222_v6 = vld [vmem:[#allocation17 + $0x480] ss:$24 sps:$4 sm:$0xff]   ;;  %v17230_v56 = vld [vmem:[#allocation17 + $0x4b4] ss:$24 sps:$4 sm:$0xff]  }
0x1a5d   :  { %v19052_v50 = vpack.c.bf16 %v10510_v17, %v10504_v47  ;;  %12322 = vmatpush1.bf16.msra.mxu1 %v17174_v44  ;;  %12451 = vmatpush1.bf16.msra.mxu0 %v17177_v43  ;;  %v17227_v4 = vld [vmem:[#allocation17 + $0x48c] ss:$24 sps:$4 sm:$0xff]   ;;  %v17225_v55 = vld [vmem:[#allocation17 + $0x488] ss:$24 sps:$4 sm:$0xff]   ;;  %v17233_v11 = vld [vmem:[#allocation17 + $0x4bc] ss:$24 sps:$4 sm:$0xff]  }
0x1a5e   :  { %12353 = vmatprep.mubr.bf16.mxu1 %v19048_v34  ;;  %12482 = vmatprep.mubr.bf16.mxu0 %v19048_v34  ;;  %v17228_v13 = vld [vmem:[#allocation17 + $0x4b0] ss:$24 sps:$4 sm:$0xff]   ;;  %v17236_v48 = vld [vmem:[#allocation17 + $0x4e4] ss:$24 sps:$4 sm:$0xff]   ;;  %v17234_v62 = vld [vmem:[#allocation17 + $0x4e0] ss:$24 sps:$4 sm:$0xff]  }
0x1a5f   :  { %12323 = vmatprep.subr.bf16.mxu1 %v17182_v9  ;;  %12452 = vmatprep.subr.bf16.mxu0 %v17185_v49  ;;  %v17231_v22 = vld [vmem:[#allocation17 + $0x4b8] ss:$24 sps:$4 sm:$0xff]   ;;  %v17239_v61 = vld [vmem:[#allocation17 + $0x4ec] ss:$24 sps:$4 sm:$0xff]   ;;  %v17237_v24 = vld [vmem:[#allocation17 + $0x4e8] ss:$24 sps:$4 sm:$0xff]  }
0x1a60   :  { %v17242_v37 = vld [vmem:[#allocation17 + $0x514] ss:$24 sps:$4 sm:$0xff]   ;;  %v17240_v32 = vld [vmem:[#allocation17 + $0x510] ss:$24 sps:$4 sm:$0xff]   ;;  %v17248_v59 = vld [vmem:[#allocation17 + $0x544] ss:$24 sps:$4 sm:$0xff]  }
0x1a61   :  { %12324 = vmatpush1.bf16.msra.mxu1 %v17180_v36  ;;  %12453 = vmatpush1.bf16.msra.mxu0 %v17183_v40  ;;  %v17245_v25 = vld [vmem:[#allocation17 + $0x51c] ss:$24 sps:$4 sm:$0xff]   ;;  %v17243_v8 = vld [vmem:[#allocation17 + $0x518] ss:$24 sps:$4 sm:$0xff]   ;;  %v17251_v29 = vld [vmem:[#allocation17 + $0x54c] ss:$24 sps:$4 sm:$0xff]  }
0x1a62   :  { %12325 = vmatprep.subr.bf16.mxu1 %v17188_v26  ;;  %12454 = vmatprep.subr.bf16.mxu0 %v17191_v23  ;;  %v17246_v47 = vld [vmem:[#allocation17 + $0x540] ss:$24 sps:$4 sm:$0xff]   ;;  %v17254_v43 = vld [vmem:[#allocation17 + $0x574] ss:$24 sps:$4 sm:$0xff]   ;;  %v17252_v12 = vld [vmem:[#allocation17 + $0x570] ss:$24 sps:$4 sm:$0xff]  }
0x1a63   :  { %v17249_v44 = vld [vmem:[#allocation17 + $0x548] ss:$24 sps:$4 sm:$0xff]   ;;  %v17257_v0 = vld [vmem:[#allocation17 + $0x57c] ss:$24 sps:$4 sm:$0xff]   ;;  %v17255_v17 = vld [vmem:[#allocation17 + $0x578] ss:$24 sps:$4 sm:$0xff]  }
0x1a64   :  { %v17260_v9 = vld [vmem:[#allocation17 + $0x5a4] ss:$24 sps:$4 sm:$0xff]   ;;  %v17258_v36 = vld [vmem:[#allocation17 + $0x5a0] ss:$24 sps:$4 sm:$0xff]   ;;  %v17266_v26 = vld [vmem:[#allocation17 + $0x5d4] ss:$24 sps:$4 sm:$0xff]  }
0x1a65   :  { %12326 = vmatpush1.bf16.msra.mxu1 %v17186_v33  ;;  %12455 = vmatpush1.bf16.msra.mxu0 %v17189_v30  ;;  %v17263_v49 = vld [vmem:[#allocation17 + $0x5ac] ss:$24 sps:$4 sm:$0xff]   ;;  %v17261_v40 = vld [vmem:[#allocation17 + $0x5a8] ss:$24 sps:$4 sm:$0xff]   ;;  %v17269_v23 = vld [vmem:[#allocation17 + $0x5dc] ss:$24 sps:$4 sm:$0xff]  }
0x1a66   :  { %12327 = vmatprep.subr.bf16.mxu1 %v17194_v38  ;;  %12456 = vmatprep.subr.bf16.mxu0 %v17197_v18  ;;  %v17264_v33 = vld [vmem:[#allocation17 + $0x5d0] ss:$24 sps:$4 sm:$0xff]   ;;  %v17272_v38 = vld [vmem:[#allocation17 + $0x604] ss:$24 sps:$4 sm:$0xff]  }
0x1a67   :  { %v17267_v30 = vld [vmem:[#allocation17 + $0x5d8] ss:$24 sps:$4 sm:$0xff]   ;;  %v17275_v18 = vld [vmem:[#allocation17 + $0x60c] ss:$24 sps:$4 sm:$0xff]  }
0x1a69   :  { %12328 = vmatpush1.bf16.msra.mxu1 %v17192_v2  ;;  %12457 = vmatpush1.bf16.msra.mxu0 %v17195_v57  ;;  %v17270_v2 = vld [vmem:[#allocation17 + $0x600] ss:$24 sps:$4 sm:$0xff]  }
0x1a6a   :  { %12329 = vmatprep.subr.bf16.mxu1 %v17200_v60  ;;  %12458 = vmatprep.subr.bf16.mxu0 %v17203_v39  ;;  %v17273_v57 = vld [vmem:[#allocation17 + $0x608] ss:$24 sps:$4 sm:$0xff]   ;;  %v17278_v60 = vld [vmem:[#allocation17 + $0x634] ss:$24 sps:$4 sm:$0xff]  }
0x1a6b   :  { %v17281_v39 = vld [vmem:[#allocation17 + $0x63c] ss:$24 sps:$4 sm:$0xff]  }
0x1a6d   :  { %12330 = vmatpush1.bf16.msra.mxu1 %v17198_v21  ;;  %12459 = vmatpush1.bf16.msra.mxu0 %v17201_v10  ;;  %v17276_v21 = vld [vmem:[#allocation17 + $0x630] ss:$24 sps:$4 sm:$0xff]  }
0x1a6e   :  { %12331 = vmatprep.subr.bf16.mxu1 %v17206_v52  ;;  %12460 = vmatprep.subr.bf16.mxu0 %v17209_v54  ;;  %v17279_v10 = vld [vmem:[#allocation17 + $0x638] ss:$24 sps:$4 sm:$0xff]   ;;  %v17284_v52 = vld [vmem:[#allocation17 + $0x664] ss:$24 sps:$4 sm:$0xff]  }
0x1a6f   :  { %v17287_v54 = vld [vmem:[#allocation17 + $0x66c] ss:$24 sps:$4 sm:$0xff]  }
0x1a71   :  { %12332 = vmatpush1.bf16.msra.mxu1 %v17204_v16  ;;  %12461 = vmatpush1.bf16.msra.mxu0 %v17207_v15  ;;  %v17282_v16 = vld [vmem:[#allocation17 + $0x660] ss:$24 sps:$4 sm:$0xff]  }
0x1a72   :  { %12333 = vmatprep.subr.bf16.mxu1 %v17212_v20  ;;  %12462 = vmatprep.subr.bf16.mxu0 %v17215_v14  ;;  %v17285_v15 = vld [vmem:[#allocation17 + $0x668] ss:$24 sps:$4 sm:$0xff]   ;;  %v17290_v20 = vld [vmem:[#allocation17 + $0x694] ss:$24 sps:$4 sm:$0xff]  }
0x1a73   :  { %v17293_v14 = vld [vmem:[#allocation17 + $0x69c] ss:$24 sps:$4 sm:$0xff]  }
0x1a75   :  { %12334 = vmatpush1.bf16.msra.mxu1 %v17210_v28  ;;  %12463 = vmatpush1.bf16.msra.mxu0 %v17213_v46  ;;  %v17288_v28 = vld [vmem:[#allocation17 + $0x690] ss:$24 sps:$4 sm:$0xff]  }
0x1a76   :  { %12335 = vmatprep.subr.bf16.mxu1 %v17218_v19  ;;  %12464 = vmatprep.subr.bf16.mxu0 %v17221_v41  ;;  %v17291_v46 = vld [vmem:[#allocation17 + $0x698] ss:$24 sps:$4 sm:$0xff]   ;;  %v17296_v19 = vld [vmem:[#allocation17 + $0x6c4] ss:$24 sps:$4 sm:$0xff]  }
0x1a77   :  { %v17299_v41 = vld [vmem:[#allocation17 + $0x6cc] ss:$24 sps:$4 sm:$0xff]  }
0x1a79   :  { %12336 = vmatpush1.bf16.msra.mxu1 %v17216_v45  ;;  %12465 = vmatpush1.bf16.msra.mxu0 %v17219_v7  ;;  %v17294_v45 = vld [vmem:[#allocation17 + $0x6c0] ss:$24 sps:$4 sm:$0xff]  }
0x1a7a   :  { %12337 = vmatprep.subr.bf16.mxu1 %v17224_v5  ;;  %12466 = vmatprep.subr.bf16.mxu0 %v17227_v4  ;;  %v17297_v7 = vld [vmem:[#allocation17 + $0x6c8] ss:$24 sps:$4 sm:$0xff]   ;;  %v17302_v5 = vld [vmem:[#allocation17 + $0x6f4] ss:$24 sps:$4 sm:$0xff]  }
0x1a7b   :  { %v17305_v4 = vld [vmem:[#allocation17 + $0x6fc] ss:$24 sps:$4 sm:$0xff]  }
0x1a7d   :  { %12338 = vmatpush1.bf16.msra.mxu1 %v17222_v6  ;;  %12467 = vmatpush1.bf16.msra.mxu0 %v17225_v55  ;;  %v17300_v6 = vld [vmem:[#allocation17 + $0x6f0] ss:$24 sps:$4 sm:$0xff]  }
0x1a7e   :  { %12339 = vmatprep.subr.bf16.mxu1 %v17230_v56  ;;  %12468 = vmatprep.subr.bf16.mxu0 %v17233_v11  ;;  %v17303_v55 = vld [vmem:[#allocation17 + $0x6f8] ss:$24 sps:$4 sm:$0xff]   ;;  %v17308_v56 = vld [vmem:[#allocation17 + $0x724] ss:$24 sps:$4 sm:$0xff]  }
0x1a7f   :  { %v17311_v11 = vld [vmem:[#allocation17 + $0x72c] ss:$24 sps:$4 sm:$0xff]  }
0x1a81   :  { %12340 = vmatpush1.bf16.msra.mxu1 %v17228_v13  ;;  %12469 = vmatpush1.bf16.msra.mxu0 %v17231_v22  ;;  %v17306_v13 = vld [vmem:[#allocation17 + $0x720] ss:$24 sps:$4 sm:$0xff]  }
0x1a82   :  { %12341 = vmatprep.subr.bf16.mxu1 %v17236_v48  ;;  %12470 = vmatprep.subr.bf16.mxu0 %v17239_v61  ;;  %v17309_v22 = vld [vmem:[#allocation17 + $0x728] ss:$24 sps:$4 sm:$0xff]   ;;  %v17314_v48 = vld [vmem:[#allocation17 + $0x754] ss:$24 sps:$4 sm:$0xff]  }
0x1a83   :  { %v17317_v61 = vld [vmem:[#allocation17 + $0x75c] ss:$24 sps:$4 sm:$0xff]  }
0x1a85   :  { %12342 = vmatpush1.bf16.msra.mxu1 %v17234_v62  ;;  %12471 = vmatpush1.bf16.msra.mxu0 %v17237_v24  ;;  %v17312_v62 = vld [vmem:[#allocation17 + $0x750] ss:$24 sps:$4 sm:$0xff]  }
0x1a86   :  { %12343 = vmatprep.subr.bf16.mxu1 %v17242_v37  ;;  %12472 = vmatprep.subr.bf16.mxu0 %v17245_v25  ;;  %v17315_v24 = vld [vmem:[#allocation17 + $0x758] ss:$24 sps:$4 sm:$0xff]   ;;  %v17320_v37 = vld [vmem:[#allocation17 + $0x784] ss:$24 sps:$4 sm:$0xff]  }
0x1a87   :  { %v17323_v25 = vld [vmem:[#allocation17 + $0x78c] ss:$24 sps:$4 sm:$0xff]  }
0x1a89   :  { %12344 = vmatpush1.bf16.msra.mxu1 %v17240_v32  ;;  %12473 = vmatpush1.bf16.msra.mxu0 %v17243_v8  ;;  %v17318_v32 = vld [vmem:[#allocation17 + $0x780] ss:$24 sps:$4 sm:$0xff]  }
0x1a8a   :  { %12345 = vmatprep.subr.bf16.mxu1 %v17248_v59  ;;  %12474 = vmatprep.subr.bf16.mxu0 %v17251_v29  ;;  %v17321_v8 = vld [vmem:[#allocation17 + $0x788] ss:$24 sps:$4 sm:$0xff]   ;;  %v17326_v59 = vld [vmem:[#allocation17 + $0x7b4] ss:$24 sps:$4 sm:$0xff]  }
0x1a8b   :  { %v17329_v29 = vld [vmem:[#allocation17 + $0x7bc] ss:$24 sps:$4 sm:$0xff]  }
0x1a8d   :  { %12346 = vmatpush1.bf16.msra.mxu1 %v17246_v47  ;;  %12475 = vmatpush1.bf16.msra.mxu0 %v17249_v44  ;;  %v17324_v47 = vld [vmem:[#allocation17 + $0x7b0] ss:$24 sps:$4 sm:$0xff]  }
0x1a8e   :  { %12347 = vmatprep.subr.bf16.mxu1 %v17254_v43  ;;  %12476 = vmatprep.subr.bf16.mxu0 %v17257_v0  ;;  %v17327_v44 = vld [vmem:[#allocation17 + $0x7b8] ss:$24 sps:$4 sm:$0xff]   ;;  %v17332_v43 = vld [vmem:[#allocation17 + $0x7e4] ss:$24 sps:$4 sm:$0xff]  }
0x1a8f   :  { %v17335_v0 = vld [vmem:[#allocation17 + $0x7ec] ss:$24 sps:$4 sm:$0xff]  }
0x1a91   :  { %12348 = vmatpush1.bf16.msra.mxu1 %v17252_v12  ;;  %12477 = vmatpush1.bf16.msra.mxu0 %v17255_v17  ;;  %v17330_v12 = vld [vmem:[#allocation17 + $0x7e0] ss:$24 sps:$4 sm:$0xff]  }
0x1a92   :  { %12349 = vmatprep.subr.bf16.mxu1 %v17260_v9  ;;  %12478 = vmatprep.subr.bf16.mxu0 %v17263_v49  ;;  %v17333_v17 = vld [vmem:[#allocation17 + $0x7e8] ss:$24 sps:$4 sm:$0xff]   ;;  %v17338_v9 = vld [vmem:[#allocation17 + $0x814] ss:$24 sps:$4 sm:$0xff]  }
0x1a93   :  { %v17341_v49 = vld [vmem:[#allocation17 + $0x81c] ss:$24 sps:$4 sm:$0xff]  }
0x1a95   :  { %12350 = vmatpush1.bf16.msra.mxu1 %v17258_v36  ;;  %12479 = vmatpush1.bf16.msra.mxu0 %v17261_v40  ;;  %v17336_v36 = vld [vmem:[#allocation17 + $0x810] ss:$24 sps:$4 sm:$0xff]  }
0x1a96   :  { %12351 = vmatprep.subr.bf16.mxu1 %v17266_v26  ;;  %12480 = vmatprep.subr.bf16.mxu0 %v17269_v23  ;;  %v17339_v40 = vld [vmem:[#allocation17 + $0x818] ss:$24 sps:$4 sm:$0xff]   ;;  %v17344_v26 = vld [vmem:[#allocation17 + $0x844] ss:$24 sps:$4 sm:$0xff]  }
0x1a97   :  { %v17347_v23 = vld [vmem:[#allocation17 + $0x84c] ss:$24 sps:$4 sm:$0xff]  }
0x1a99   :  { %12352 = vmatpush1.bf16.msra.mxu1 %v17264_v33  ;;  %12481 = vmatpush1.bf16.msra.mxu0 %v17267_v30  ;;  %v17342_v33 = vld [vmem:[#allocation17 + $0x840] ss:$24 sps:$4 sm:$0xff]  }
0x1a9a   :  { %12364 = vmatprep.subr.bf16.mxu1 %v17272_v38  ;;  %12493 = vmatprep.subr.bf16.mxu0 %v17275_v18  ;;  %v17345_v30 = vld [vmem:[#allocation17 + $0x848] ss:$24 sps:$4 sm:$0xff]   ;;  %v17350_v38 = vld [vmem:[#allocation17 + $0x874] ss:$24 sps:$4 sm:$0xff]  }
0x1a9b   :  { %v17353_v18 = vld [vmem:[#allocation17 + $0x87c] ss:$24 sps:$4 sm:$0xff]  }
0x1a9c   :  { %12354 = vmatmul.mubr.bf16.vlgmr.msra.gmra.mrb[116].mxu1 %v19042_v53  ;;  %12483 = vmatmul.mubr.bf16.vlgmr.msra.gmra.mrb[28].mxu0 %v19042_v53 }
0x1a9d   :  { %12365 = vmatpush1.bf16.msra.mxu1 %v17270_v2  ;;  %12396 = vmatprep.mubr.bf16.mxu1 %v19050_v3  ;;  %v17348_v2 = vld [vmem:[#allocation17 + $0x870] ss:$24 sps:$4 sm:$0xff]  }
0x1a9e   :  { %12494 = vmatpush1.bf16.msra.mxu0 %v17273_v57  ;;  %12525 = vmatprep.mubr.bf16.mxu0 %v19050_v3  ;;  %v17351_v57 = vld [vmem:[#allocation17 + $0x878] ss:$24 sps:$4 sm:$0xff]  }
0x1a9f   :  { %12366 = vmatprep.subr.bf16.mxu1 %v17278_v60  ;;  %12495 = vmatprep.subr.bf16.mxu0 %v17281_v39  ;;  %v17356_v60 = vld [vmem:[#allocation17 + $0x8a4] ss:$24 sps:$4 sm:$0xff]  }
0x1aa0   :  { %v17359_v39 = vld [vmem:[#allocation17 + $0x8ac] ss:$24 sps:$4 sm:$0xff]  }
0x1aa1   :  { %12367 = vmatpush1.bf16.msra.mxu1 %v17276_v21  ;;  %v17354_v21 = vld [vmem:[#allocation17 + $0x8a0] ss:$24 sps:$4 sm:$0xff]  }
0x1aa2   :  { %12496 = vmatpush1.bf16.msra.mxu0 %v17279_v10  ;;  %12368 = vmatprep.subr.bf16.mxu1 %v17284_v52  ;;  %v17357_v10 = vld [vmem:[#allocation17 + $0x8a8] ss:$24 sps:$4 sm:$0xff]   ;;  %v17362_v52 = vld [vmem:[#allocation17 + $0x8d4] ss:$24 sps:$4 sm:$0xff]  }
0x1aa3   :  { %12497 = vmatprep.subr.bf16.mxu0 %v17287_v54  ;;  %v17365_v54 = vld [vmem:[#allocation17 + $0x8dc] ss:$24 sps:$4 sm:$0xff]  }
0x1aa5   :  { %12369 = vmatpush1.bf16.msra.mxu1 %v17282_v16  ;;  %v17360_v16 = vld [vmem:[#allocation17 + $0x8d0] ss:$24 sps:$4 sm:$0xff]  }
0x1aa6   :  { %12498 = vmatpush1.bf16.msra.mxu0 %v17285_v15  ;;  %12370 = vmatprep.subr.bf16.mxu1 %v17290_v20  ;;  %v17363_v15 = vld [vmem:[#allocation17 + $0x8d8] ss:$24 sps:$4 sm:$0xff]   ;;  %v17368_v20 = vld [vmem:[#allocation17 + $0x14] ss:$24 sps:$4 sm:$0xff]  }
0x1aa7   :  { %12499 = vmatprep.subr.bf16.mxu0 %v17293_v14  ;;  %v17366_v14 = vld [vmem:[#allocation17 + $0x10] ss:$24 sps:$4 sm:$0xff]  }
0x1aa9   :  { %12371 = vmatpush1.bf16.msra.mxu1 %v17288_v28  ;;  %v17371_v28 = vld [vmem:[#allocation17 + $0x44] ss:$24 sps:$4 sm:$0xff]  }
0x1aaa   :  { %12500 = vmatpush1.bf16.msra.mxu0 %v17291_v46  ;;  %12372 = vmatprep.subr.bf16.mxu1 %v17296_v19  ;;  %v17369_v46 = vld [vmem:[#allocation17 + $0x40] ss:$24 sps:$4 sm:$0xff]   ;;  %v17374_v19 = vld [vmem:[#allocation17 + $0x74] ss:$24 sps:$4 sm:$0xff]  }
0x1aab   :  { %12501 = vmatprep.subr.bf16.mxu0 %v17299_v41  ;;  %v17372_v41 = vld [vmem:[#allocation17 + $0x70] ss:$24 sps:$4 sm:$0xff]  }
0x1aad   :  { %12373 = vmatpush1.bf16.msra.mxu1 %v17294_v45  ;;  %v17377_v45 = vld [vmem:[#allocation17 + $0xa4] ss:$24 sps:$4 sm:$0xff]  }
0x1aae   :  { %12502 = vmatpush1.bf16.msra.mxu0 %v17297_v7  ;;  %12374 = vmatprep.subr.bf16.mxu1 %v17302_v5  ;;  %v17375_v7 = vld [vmem:[#allocation17 + $0xa0] ss:$24 sps:$4 sm:$0xff]   ;;  %v17380_v5 = vld [vmem:[#allocation17 + $0xd4] ss:$24 sps:$4 sm:$0xff]  }
0x1aaf   :  { %12503 = vmatprep.subr.bf16.mxu0 %v17305_v4  ;;  %v17378_v4 = vld [vmem:[#allocation17 + $0xd0] ss:$24 sps:$4 sm:$0xff]  }
0x1ab1   :  { %12375 = vmatpush1.bf16.msra.mxu1 %v17300_v6  ;;  %v17383_v6 = vld [vmem:[#allocation17 + $0x104] ss:$24 sps:$4 sm:$0xff]  }
0x1ab2   :  { %12504 = vmatpush1.bf16.msra.mxu0 %v17303_v55  ;;  %12376 = vmatprep.subr.bf16.mxu1 %v17308_v56  ;;  %v17381_v55 = vld [vmem:[#allocation17 + $0x100] ss:$24 sps:$4 sm:$0xff]   ;;  %v17386_v56 = vld [vmem:[#allocation17 + $0x134] ss:$24 sps:$4 sm:$0xff]  }
0x1ab3   :  { %12505 = vmatprep.subr.bf16.mxu0 %v17311_v11  ;;  %v17389_v11 = vld [vmem:[#allocation17 + $0x164] ss:$24 sps:$4 sm:$0xff]  }
0x1ab5   :  { %12377 = vmatpush1.bf16.msra.mxu1 %v17306_v13  ;;  %v17387_v13 = vld [vmem:[#allocation17 + $0x160] ss:$24 sps:$4 sm:$0xff]  }
0x1ab6   :  { %12506 = vmatpush1.bf16.msra.mxu0 %v17309_v22  ;;  %12378 = vmatprep.subr.bf16.mxu1 %v17314_v48  ;;  %v17392_v22 = vld [vmem:[#allocation17 + $0x194] ss:$24 sps:$4 sm:$0xff]   ;;  %v17390_v48 = vld [vmem:[#allocation17 + $0x190] ss:$24 sps:$4 sm:$0xff]  }
0x1ab7   :  { %12507 = vmatprep.subr.bf16.mxu0 %v17317_v61  ;;  %v17395_v61 = vld [vmem:[#allocation17 + $0x1c4] ss:$24 sps:$4 sm:$0xff]  }
0x1ab9   :  { %12379 = vmatpush1.bf16.msra.mxu1 %v17312_v62  ;;  %v17393_v62 = vld [vmem:[#allocation17 + $0x1c0] ss:$24 sps:$4 sm:$0xff]  }
0x1aba   :  { %12508 = vmatpush1.bf16.msra.mxu0 %v17315_v24  ;;  %12380 = vmatprep.subr.bf16.mxu1 %v17320_v37  ;;  %v17398_v24 = vld [vmem:[#allocation17 + $0x1f4] ss:$24 sps:$4 sm:$0xff]   ;;  %v17396_v37 = vld [vmem:[#allocation17 + $0x1f0] ss:$24 sps:$4 sm:$0xff]  }
0x1abb   :  { %12509 = vmatprep.subr.bf16.mxu0 %v17323_v25  ;;  %v17401_v25 = vld [vmem:[#allocation17 + $0x224] ss:$24 sps:$4 sm:$0xff]  }
0x1abd   :  { %12381 = vmatpush1.bf16.msra.mxu1 %v17318_v32  ;;  %v17399_v32 = vld [vmem:[#allocation17 + $0x220] ss:$24 sps:$4 sm:$0xff]  }
0x1abe   :  { %12510 = vmatpush1.bf16.msra.mxu0 %v17321_v8  ;;  %12382 = vmatprep.subr.bf16.mxu1 %v17326_v59  ;;  %v17404_v8 = vld [vmem:[#allocation17 + $0x254] ss:$24 sps:$4 sm:$0xff]   ;;  %v17402_v59 = vld [vmem:[#allocation17 + $0x250] ss:$24 sps:$4 sm:$0xff]  }
0x1abf   :  { %12511 = vmatprep.subr.bf16.mxu0 %v17329_v29  ;;  %v17407_v29 = vld [vmem:[#allocation17 + $0x284] ss:$24 sps:$4 sm:$0xff]  }
0x1ac1   :  { %12383 = vmatpush1.bf16.msra.mxu1 %v17324_v47  ;;  %v17405_v47 = vld [vmem:[#allocation17 + $0x280] ss:$24 sps:$4 sm:$0xff]  }
0x1ac2   :  { %12512 = vmatpush1.bf16.msra.mxu0 %v17327_v44  ;;  %12384 = vmatprep.subr.bf16.mxu1 %v17332_v43  ;;  %v17410_v44 = vld [vmem:[#allocation17 + $0x2b4] ss:$24 sps:$4 sm:$0xff]   ;;  %v17408_v43 = vld [vmem:[#allocation17 + $0x2b0] ss:$24 sps:$4 sm:$0xff]  }
0x1ac3   :  { %12513 = vmatprep.subr.bf16.mxu0 %v17335_v0  ;;  %v17413_v0 = vld [vmem:[#allocation17 + $0x2e4] ss:$24 sps:$4 sm:$0xff]  }
0x1ac5   :  { %12385 = vmatpush1.bf16.msra.mxu1 %v17330_v12  ;;  %v17411_v12 = vld [vmem:[#allocation17 + $0x2e0] ss:$24 sps:$4 sm:$0xff]  }
0x1ac6   :  { %12514 = vmatpush1.bf16.msra.mxu0 %v17333_v17  ;;  %12386 = vmatprep.subr.bf16.mxu1 %v17338_v9  ;;  %v17416_v17 = vld [vmem:[#allocation17 + $0x314] ss:$24 sps:$4 sm:$0xff]   ;;  %v17414_v9 = vld [vmem:[#allocation17 + $0x310] ss:$24 sps:$4 sm:$0xff]  }
0x1ac7   :  { %12515 = vmatprep.subr.bf16.mxu0 %v17341_v49  ;;  %v17419_v49 = vld [vmem:[#allocation17 + $0x344] ss:$24 sps:$4 sm:$0xff]  }
0x1ac9   :  { %12387 = vmatpush1.bf16.msra.mxu1 %v17336_v36  ;;  %v17417_v36 = vld [vmem:[#allocation17 + $0x340] ss:$24 sps:$4 sm:$0xff]  }
0x1aca   :  { %12516 = vmatpush1.bf16.msra.mxu0 %v17339_v40  ;;  %12388 = vmatprep.subr.bf16.mxu1 %v17344_v26  ;;  %v17422_v40 = vld [vmem:[#allocation17 + $0x374] ss:$24 sps:$4 sm:$0xff]   ;;  %v17420_v26 = vld [vmem:[#allocation17 + $0x370] ss:$24 sps:$4 sm:$0xff]  }
0x1acb   :  { %12517 = vmatprep.subr.bf16.mxu0 %v17347_v23  ;;  %v17425_v23 = vld [vmem:[#allocation17 + $0x3a4] ss:$24 sps:$4 sm:$0xff]  }
0x1acd   :  { %12389 = vmatpush1.bf16.msra.mxu1 %v17342_v33  ;;  %v17423_v33 = vld [vmem:[#allocation17 + $0x3a0] ss:$24 sps:$4 sm:$0xff]  }
0x1ace   :  { %12518 = vmatpush1.bf16.msra.mxu0 %v17345_v30  ;;  %12390 = vmatprep.subr.bf16.mxu1 %v17350_v38  ;;  %v17428_v30 = vld [vmem:[#allocation17 + $0x3d4] ss:$24 sps:$4 sm:$0xff]   ;;  %v17426_v38 = vld [vmem:[#allocation17 + $0x3d0] ss:$24 sps:$4 sm:$0xff]  }
0x1acf   :  { %12519 = vmatprep.subr.bf16.mxu0 %v17353_v18  ;;  %v17431_v18 = vld [vmem:[#allocation17 + $0x404] ss:$24 sps:$4 sm:$0xff]  }
0x1ad1   :  { %12391 = vmatpush1.bf16.msra.mxu1 %v17348_v2  ;;  %v17434_v2 = vld [vmem:[#allocation17 + $0x434] ss:$24 sps:$4 sm:$0xff]  }
0x1ad2   :  { %12520 = vmatpush1.bf16.msra.mxu0 %v17351_v57  ;;  %12392 = vmatprep.subr.bf16.mxu1 %v17356_v60  ;;  %v17437_v57 = vld [vmem:[#allocation17 + $0x464] ss:$24 sps:$4 sm:$0xff]   ;;  %v17435_v60 = vld [vmem:[#allocation17 + $0x460] ss:$24 sps:$4 sm:$0xff]  }
0x1ad3   :  { %12521 = vmatprep.subr.bf16.mxu0 %v17359_v39  ;;  %v17440_v39 = vld [vmem:[#allocation17 + $0x494] ss:$24 sps:$4 sm:$0xff]  }
0x1ad5   :  { %12393 = vmatpush1.bf16.msra.mxu1 %v17354_v21  ;;  %v17438_v21 = vld [vmem:[#allocation17 + $0x490] ss:$24 sps:$4 sm:$0xff]  }
0x1ad6   :  { %12522 = vmatpush1.bf16.msra.mxu0 %v17357_v10  ;;  %12394 = vmatprep.subr.bf16.mxu1 %v17362_v52  ;;  %v17443_v10 = vld [vmem:[#allocation17 + $0x4c4] ss:$24 sps:$4 sm:$0xff]   ;;  %v17441_v52 = vld [vmem:[#allocation17 + $0x4c0] ss:$24 sps:$4 sm:$0xff]  }
0x1ad7   :  { %12523 = vmatprep.subr.bf16.mxu0 %v17365_v54  ;;  %v17446_v54 = vld [vmem:[#allocation17 + $0x4f4] ss:$24 sps:$4 sm:$0xff]  }
0x1ad9   :  { %12395 = vmatpush1.bf16.msra.mxu1 %v17360_v16  ;;  %v17444_v16 = vld [vmem:[#allocation17 + $0x4f0] ss:$24 sps:$4 sm:$0xff]  }
0x1ada   :  { %12524 = vmatpush1.bf16.msra.mxu0 %v17363_v15  ;;  %12536 = vmatprep.subr.bf16.mxu1 %v17368_v20  ;;  %v17449_v15 = vld [vmem:[#allocation17 + $0x524] ss:$24 sps:$4 sm:$0xff]   ;;  %v17447_v20 = vld [vmem:[#allocation17 + $0x520] ss:$24 sps:$4 sm:$0xff]  }
0x1adc   :  { %12397 = vmatmul.mubr.bf16.vlgmr.msra.gmra.mrb[116].mxu1 %v19052_v50 }
0x1add   :  { %12526 = vmatmul.mubr.bf16.vlgmr.msra.gmra.mrb[28].mxu0 %v19052_v50  ;;  %12537 = vmatpush1.bf16.msra.mxu1 %v17366_v14  ;;  %v17452_v14 = vld [vmem:[#allocation17 + $0x554] ss:$24 sps:$4 sm:$0xff]  }
0x1ade   :  { %12568 = vmatprep.mubr.bf16.mxu1 %v19038_v35  ;;  %12538 = vmatprep.subr.bf16.mxu1 %v17371_v28  ;;  %v17384_v35 = vld [vmem:[#allocation17 + $0x130] ss:$24 sps:$4 sm:$0xff]  }
0x1adf   :  { %v17450_v28 = vld [vmem:[#allocation17 + $0x550] ss:$24 sps:$4 sm:$0xff]  }
0x1ae1   :  { %12539 = vmatpush1.bf16.msra.mxu1 %v17369_v46  ;;  %v17455_v46 = vld [vmem:[#allocation17 + $0x584] ss:$24 sps:$4 sm:$0xff]  }
0x1ae2   :  { %12540 = vmatprep.subr.bf16.mxu1 %v17374_v19  ;;  %v17453_v19 = vld [vmem:[#allocation17 + $0x580] ss:$24 sps:$4 sm:$0xff]  }
0x1ae5   :  { %12541 = vmatpush1.bf16.msra.mxu1 %v17372_v41  ;;  %v17458_v41 = vld [vmem:[#allocation17 + $0x5b4] ss:$24 sps:$4 sm:$0xff]  }
0x1ae6   :  { %12542 = vmatprep.subr.bf16.mxu1 %v17377_v45  ;;  %v17456_v45 = vld [vmem:[#allocation17 + $0x5b0] ss:$24 sps:$4 sm:$0xff]  }
0x1ae9   :  { %12543 = vmatpush1.bf16.msra.mxu1 %v17375_v7  ;;  %v17461_v7 = vld [vmem:[#allocation17 + $0x5e4] ss:$24 sps:$4 sm:$0xff]  }
0x1aea   :  { %12544 = vmatprep.subr.bf16.mxu1 %v17380_v5  ;;  %v17459_v5 = vld [vmem:[#allocation17 + $0x5e0] ss:$24 sps:$4 sm:$0xff]  }
0x1aed   :  { %12545 = vmatpush1.bf16.msra.mxu1 %v17378_v4  ;;  %v17464_v4 = vld [vmem:[#allocation17 + $0x614] ss:$24 sps:$4 sm:$0xff]  }
0x1aee   :  { %12546 = vmatprep.subr.bf16.mxu1 %v17383_v6  ;;  %v17462_v6 = vld [vmem:[#allocation17 + $0x610] ss:$24 sps:$4 sm:$0xff]  }
0x1af1   :  { %12547 = vmatpush1.bf16.msra.mxu1 %v17381_v55  ;;  %v17467_v55 = vld [vmem:[#allocation17 + $0x644] ss:$24 sps:$4 sm:$0xff]  }
0x1af2   :  { %12548 = vmatprep.subr.bf16.mxu1 %v17386_v56  ;;  %v17465_v56 = vld [vmem:[#allocation17 + $0x640] ss:$24 sps:$4 sm:$0xff]  }
0x1af5   :  { %12549 = vmatpush1.bf16.msra.mxu1 %v17384_v35  ;;  %v17470_v35 = vld [vmem:[#allocation17 + $0x674] ss:$24 sps:$4 sm:$0xff]  }
0x1af6   :  { %12550 = vmatprep.subr.bf16.mxu1 %v17389_v11  ;;  %v17468_v11 = vld [vmem:[#allocation17 + $0x670] ss:$24 sps:$4 sm:$0xff]  }
0x1af9   :  { %12551 = vmatpush1.bf16.msra.mxu1 %v17387_v13  ;;  %v17473_v13 = vld [vmem:[#allocation17 + $0x6a4] ss:$24 sps:$4 sm:$0xff]  }
0x1afa   :  { %12552 = vmatprep.subr.bf16.mxu1 %v17392_v22  ;;  %v17471_v22 = vld [vmem:[#allocation17 + $0x6a0] ss:$24 sps:$4 sm:$0xff]  }
0x1afd   :  { %12553 = vmatpush1.bf16.msra.mxu1 %v17390_v48  ;;  %v17476_v48 = vld [vmem:[#allocation17 + $0x6d4] ss:$24 sps:$4 sm:$0xff]  }
0x1afe   :  { %12554 = vmatprep.subr.bf16.mxu1 %v17395_v61  ;;  %v17474_v61 = vld [vmem:[#allocation17 + $0x6d0] ss:$24 sps:$4 sm:$0xff]  }
0x1b01   :  { %12555 = vmatpush1.bf16.msra.mxu1 %v17393_v62  ;;  %v17479_v62 = vld [vmem:[#allocation17 + $0x704] ss:$24 sps:$4 sm:$0xff]  }
0x1b02   :  { %12556 = vmatprep.subr.bf16.mxu1 %v17398_v24  ;;  %v17482_v24 = vld [vmem:[#allocation17 + $0x734] ss:$24 sps:$4 sm:$0xff]  }
0x1b05   :  { %12557 = vmatpush1.bf16.msra.mxu1 %v17396_v37  ;;  %v17485_v37 = vld [vmem:[#allocation17 + $0x764] ss:$24 sps:$4 sm:$0xff]  }
0x1b06   :  { %12558 = vmatprep.subr.bf16.mxu1 %v17401_v25  ;;  %v17483_v25 = vld [vmem:[#allocation17 + $0x760] ss:$24 sps:$4 sm:$0xff]  }
0x1b09   :  { %12559 = vmatpush1.bf16.msra.mxu1 %v17399_v32  ;;  %v17488_v32 = vld [vmem:[#allocation17 + $0x794] ss:$24 sps:$4 sm:$0xff]  }
0x1b0a   :  { %12560 = vmatprep.subr.bf16.mxu1 %v17404_v8  ;;  %v17486_v8 = vld [vmem:[#allocation17 + $0x790] ss:$24 sps:$4 sm:$0xff]  }
0x1b0d   :  { %12561 = vmatpush1.bf16.msra.mxu1 %v17402_v59  ;;  %v17491_v59 = vld [vmem:[#allocation17 + $0x7c4] ss:$24 sps:$4 sm:$0xff]  }
0x1b0e   :  { %12562 = vmatprep.subr.bf16.mxu1 %v17407_v29  ;;  %v17489_v29 = vld [vmem:[#allocation17 + $0x7c0] ss:$24 sps:$4 sm:$0xff]  }
0x1b11   :  { %12563 = vmatpush1.bf16.msra.mxu1 %v17405_v47  ;;  %v17494_v47 = vld [vmem:[#allocation17 + $0x7f4] ss:$24 sps:$4 sm:$0xff]  }
0x1b12   :  { %12564 = vmatprep.subr.bf16.mxu1 %v17410_v44  ;;  %v17492_v44 = vld [vmem:[#allocation17 + $0x7f0] ss:$24 sps:$4 sm:$0xff]  }
0x1b15   :  { %12565 = vmatpush1.bf16.msra.mxu1 %v17408_v43  ;;  %v17497_v43 = vld [vmem:[#allocation17 + $0x824] ss:$24 sps:$4 sm:$0xff]  }
0x1b16   :  { %12566 = vmatprep.subr.bf16.mxu1 %v17413_v0  ;;  %v17495_v0 = vld [vmem:[#allocation17 + $0x820] ss:$24 sps:$4 sm:$0xff]  }
0x1b19   :  { %12567 = vmatpush1.bf16.msra.mxu1 %v17411_v12  ;;  %v17500_v12 = vld [vmem:[#allocation17 + $0x854] ss:$24 sps:$4 sm:$0xff]  }
0x1b1a   :  { %12579 = vmatprep.subr.bf16.mxu1 %v17416_v17  ;;  %v17498_v17 = vld [vmem:[#allocation17 + $0x850] ss:$24 sps:$4 sm:$0xff]  }
0x1b1c   :  { %12569 = vmatmul.mubr.bf16.vlgmr.msra.gmra.mrb[120].mxu1 %v19040_v42  ;;  %v17429_v42 = vld [vmem:[#allocation17 + $0x400] ss:$24 sps:$4 sm:$0xff]  }
0x1b1d   :  { %12580 = vmatpush1.bf16.msra.mxu1 %v17414_v9  ;;  %12611 = vmatprep.mubr.bf16.mxu1 %v19048_v34  ;;  %v17432_v34 = vld [vmem:[#allocation17 + $0x430] ss:$24 sps:$4 sm:$0xff]   ;;  %v17503_v9 = vld [vmem:[#allocation17 + $0x884] ss:$24 sps:$4 sm:$0xff]  }
0x1b1e   :  { %12581 = vmatprep.subr.bf16.mxu1 %v17419_v49  ;;  %v17501_v49 = vld [vmem:[#allocation17 + $0x880] ss:$24 sps:$4 sm:$0xff]  }
0x1b21   :  { %12582 = vmatpush1.bf16.msra.mxu1 %v17417_v36  ;;  %v17506_v36 = vld [vmem:[#allocation17 + $0x8b4] ss:$24 sps:$4 sm:$0xff]  }
0x1b22   :  { %12583 = vmatprep.subr.bf16.mxu1 %v17422_v40  ;;  %v17504_v40 = vld [vmem:[#allocation17 + $0x8b0] ss:$24 sps:$4 sm:$0xff]  }
0x1b25   :  { %12584 = vmatpush1.bf16.msra.mxu1 %v17420_v26  ;;  %v17509_v26 = vld [vmem:[#allocation17 + $0x8e4] ss:$24 sps:$4 sm:$0xff]  }
0x1b26   :  { %12585 = vmatprep.subr.bf16.mxu1 %v17425_v23  ;;  %v17507_v23 = vld [vmem:[#allocation17 + $0x8e0] ss:$24 sps:$4 sm:$0xff]  }
0x1b29   :  { %12586 = vmatpush1.bf16.msra.mxu1 %v17423_v33 }
0x1b2a   :  { %12587 = vmatprep.subr.bf16.mxu1 %v17428_v30 }
0x1b2d   :  { %12588 = vmatpush1.bf16.msra.mxu1 %v17426_v38 }
0x1b2e   :  { %12589 = vmatprep.subr.bf16.mxu1 %v17431_v18 }
0x1b31   :  { %12590 = vmatpush1.bf16.msra.mxu1 %v17429_v42 }
0x1b32   :  { %12591 = vmatprep.subr.bf16.mxu1 %v17434_v2 }
0x1b35   :  { %12592 = vmatpush1.bf16.msra.mxu1 %v17432_v34 }
0x1b36   :  { %12593 = vmatprep.subr.bf16.mxu1 %v17437_v57 }
0x1b39   :  { %12594 = vmatpush1.bf16.msra.mxu1 %v17435_v60  ;;  %v10806_v60 = vld [vmem:[#allocation18] sm:$0x3f] }
0x1b3a   :  { %12595 = vmatprep.subr.bf16.mxu1 %v17440_v39  ;;  %v10811_v39 = vrot.slane %v10806_v60, %v18352_v27 }
0x1b3d   :  { %12596 = vmatpush1.bf16.msra.mxu1 %v17438_v21  ;;  %v10815_v21 = vrot.slane %v10806_v60, %v18357_v31 }
0x1b3e   :  { %12597 = vmatprep.subr.bf16.mxu1 %v17443_v10 }
0x1b41   :  { %12598 = vmatpush1.bf16.msra.mxu1 %v17441_v52 }
0x1b42   :  { %12599 = vmatprep.subr.bf16.mxu1 %v17446_v54  ;;  %v10819_v54 = vrot.slane %v10806_v60, %v18341_v63 }
0x1b45   :  { %12600 = vmatpush1.bf16.msra.mxu1 %v17444_v16 }
0x1b46   :  { %12601 = vmatprep.subr.bf16.mxu1 %v17449_v15 }
0x1b49   :  { %12602 = vmatpush1.bf16.msra.mxu1 %v17447_v20 }
0x1b4a   :  { %12603 = vmatprep.subr.bf16.mxu1 %v17452_v14  ;;  %v10823_v14 = vrot.slane %v10806_v60, %v18344_v1 }
0x1b4d   :  { %12604 = vmatpush1.bf16.msra.mxu1 %v17450_v28 }
0x1b4e   :  { %12605 = vmatprep.subr.bf16.mxu1 %v17455_v46 }
0x1b51   :  { %12606 = vmatpush1.bf16.msra.mxu1 %v17453_v19 }
0x1b52   :  { %12607 = vmatprep.subr.bf16.mxu1 %v17458_v41  ;;  %v10827_v41 = vrot.slane %v10806_v60, %v18386_v51 }
0x1b55   :  { %12608 = vmatpush1.bf16.msra.mxu1 %v17456_v45  ;;  %v10831_v45 = vrot.slane %v10806_v60, %v18391_v58 }
0x1b56   :  { %12609 = vmatprep.subr.bf16.mxu1 %v17461_v7 }
0x1b59   :  { %12610 = vmatpush1.bf16.msra.mxu1 %v17459_v5 }
0x1b5a   :  { %12622 = vmatprep.subr.bf16.mxu1 %v17464_v4 }
0x1b5c   :  { %12612 = vmatmul.mubr.bf16.vlgmr.msra.gmra.mrb[120].mxu1 %v19042_v53  ;;  %v17477_v53 = vld [vmem:[#allocation17 + $0x700] ss:$24 sps:$4 sm:$0xff]  }
0x1b5d   :  { %12623 = vmatpush1.bf16.msra.mxu1 %v17462_v6  ;;  %12654 = vmatprep.mubr.bf16.mxu1 %v19050_v3  ;;  %v17480_v3 = vld [vmem:[#allocation17 + $0x730] ss:$24 sps:$4 sm:$0xff]  }
0x1b5e   :  { %12624 = vmatprep.subr.bf16.mxu1 %v17467_v55 }
0x1b61   :  { %12625 = vmatpush1.bf16.msra.mxu1 %v17465_v56 }
0x1b62   :  { %12626 = vmatprep.subr.bf16.mxu1 %v17470_v35 }
0x1b65   :  { %12627 = vmatpush1.bf16.msra.mxu1 %v17468_v11 }
0x1b66   :  { %12628 = vmatprep.subr.bf16.mxu1 %v17473_v13 }
0x1b69   :  { %12629 = vmatpush1.bf16.msra.mxu1 %v17471_v22 }
0x1b6a   :  { %12630 = vmatprep.subr.bf16.mxu1 %v17476_v48 }
0x1b6d   :  { %12631 = vmatpush1.bf16.msra.mxu1 %v17474_v61 }
0x1b6e   :  { %12632 = vmatprep.subr.bf16.mxu1 %v17479_v62 }
0x1b71   :  { %12633 = vmatpush1.bf16.msra.mxu1 %v17477_v53 }
0x1b72   :  { %12634 = vmatprep.subr.bf16.mxu1 %v17482_v24 }
0x1b75   :  { %12635 = vmatpush1.bf16.msra.mxu1 %v17480_v3 }
0x1b76   :  { %12636 = vmatprep.subr.bf16.mxu1 %v17485_v37 }
0x1b79   :  { %12637 = vmatpush1.bf16.msra.mxu1 %v17483_v25  ;;  %v17510_v25 = vld [vmem:[#allocation23 + $0x40] sm:$0xff]  }
0x1b7a   :  { %12638 = vmatprep.subr.bf16.mxu1 %v17488_v32  ;;  %v17511_v32 = vld [vmem:[#allocation23] sm:$0xff]   ;;  %14933 = vmatprep.subr.bf16.mxu0 %v17510_v25  ;;  %v17530_v25 = vld [vmem:[#allocation23 + $0x68] sm:$0xff]  }
0x1b7b   :  { %14934 = vmatpush3.bf16.msra.mxu0 %v17511_v32  ;;  %v17532_v32 = vld [vmem:[#allocation23 + $0xe8] sm:$0xff]  }
0x1b7d   :  { %12639 = vmatpush1.bf16.msra.mxu1 %v17486_v8  ;;  %v17512_v8 = vld [vmem:[#allocation23 + $0xc0] sm:$0xff]  }
0x1b7e   :  { %12640 = vmatprep.subr.bf16.mxu1 %v17491_v59  ;;  %v17513_v59 = vld [vmem:[#allocation23 + $0x80] sm:$0xff]  }
0x1b81   :  { %12641 = vmatpush1.bf16.msra.mxu1 %v17489_v29  ;;  %v17514_v29 = vld [vmem:[#allocation23 + $0x48] sm:$0xff]  }
0x1b82   :  { %12642 = vmatprep.subr.bf16.mxu1 %v17494_v47  ;;  %v17516_v47 = vld [vmem:[#allocation23 + $0xc8] sm:$0xff]   ;;  %14935 = vmatprep.subr.bf16.mxu0 %v17514_v29  ;;  %v17534_v29 = vld [vmem:[#allocation23 + $0x70] sm:$0xff]  }
0x1b85   :  { %12643 = vmatpush1.bf16.msra.mxu1 %v17492_v44  ;;  %v17515_v44 = vld [vmem:[#allocation23 + $0x8] sm:$0xff]  }
0x1b86   :  { %12644 = vmatprep.subr.bf16.mxu1 %v17497_v43  ;;  %v17517_v43 = vld [vmem:[#allocation23 + $0x88] sm:$0xff]   ;;  %14936 = vmatpush3.bf16.msra.mxu0 %v17515_v44  ;;  %v17535_v44 = vld [vmem:[#allocation23 + $0x30] sm:$0xff]  }
0x1b89   :  { %12645 = vmatpush1.bf16.msra.mxu1 %v17495_v0 }
0x1b8a   :  { %12646 = vmatprep.subr.bf16.mxu1 %v17500_v12 }
0x1b8d   :  { %12647 = vmatpush1.bf16.msra.mxu1 %v17498_v17 }
0x1b8e   :  { %12648 = vmatprep.subr.bf16.mxu1 %v17503_v9 }
0x1b91   :  { %12649 = vmatpush1.bf16.msra.mxu1 %v17501_v49 }
0x1b92   :  { %12650 = vmatprep.subr.bf16.mxu1 %v17506_v36 }
0x1b95   :  { %12651 = vmatpush1.bf16.msra.mxu1 %v17504_v40 }
0x1b96   :  { %12652 = vmatprep.subr.bf16.mxu1 %v17509_v26 }
0x1b99   :  { %12653 = vmatpush1.bf16.msra.mxu1 %v17507_v23 }
0x1b9a   :  { %14955 = vmatprep.subr.bf16.mxu1 %v17512_v8  ;;  %v17531_v8 = vld [vmem:[#allocation23 + $0x28] sm:$0xff]  }
0x1b9c   :  { %12655 = vmatmul.mubr.bf16.vlgmr.msra.gmra.mrb[120].mxu1 %v19052_v50 }
0x1b9d   :  { %14956 = vmatpush3.bf16.msra.mxu1 %v17513_v59  ;;  %v17533_v59 = vld [vmem:[#allocation23 + $0xa8] sm:$0xff]  }
0x1b9e   :  { %14957 = vmatprep.subr.bf16.mxu1 %v17516_v47  ;;  %v17536_v47 = vld [vmem:[#allocation23 + $0xf0] sm:$0xff]  }
0x1ba1   :  { %14958 = vmatpush3.bf16.msra.mxu1 %v17517_v43  ;;  %v17537_v43 = vld [vmem:[#allocation23 + $0xb0] sm:$0xff]  }
0x1baf   :  { %v12398_v33 = vpop.f32.mrb[116].mxu1 }
0x1bb0   :  { %v12527_v30 = vpop.f32.mrb[28].mxu0  ;;  %v12400_v38 = vpop.f32.mrb[117].mxu1  ;;  %v15191_v10 = vadd.f32 %v12398_v33, %v10811_v39 }
0x1bb1   :  { %v12529_v18 = vpop.f32.mrb[29].mxu0  ;;  %v12402_v42 = vpop.f32.mrb[118].mxu1  ;;  %v15192_v52 = vadd.f32 %v12400_v38, %v10815_v21  ;;  %v15195_v20 = vadd.f32 %v12527_v30, %v10819_v54 }
0x1bb2   :  { %v12531_v2 = vpop.f32.mrb[30].mxu0  ;;  %v12404_v34 = vpop.f32.mrb[119].mxu1  ;;  %v15193_v16 = vadd.f32 %v12402_v42, %v10811_v39  ;;  %v15196_v7 = vadd.f32 %v12529_v18, %v10823_v14 }
0x1bb3   :  { %v12533_v57 = vpop.f32.mrb[31].mxu0  ;;  %v15194_v15 = vadd.f32 %v12404_v34, %v10815_v21  ;;  %v12667_v50 = vadd.f32 %v15192_v52, %v15191_v10  ;;  %v15197_v19 = vadd.f32 %v12531_v2, %v10819_v54 }
0x1bb4   :  { %v15198_v55 = vadd.f32 %v12533_v57, %v10823_v14 }
0x1bb5   :  { %v12674_v28 = vadd.f32 %v15194_v15, %v15193_v16  ;;  %v12668_v46 = vadd.f32 %v15195_v20, %v12667_v50 }
0x1bb7   :  { %v12675_v5 = vadd.f32 %v15197_v19, %v12674_v28  ;;  %v12669_v6 = vadd.f32 %v15196_v7, %v12668_v46 }
0x1bb9   :  { %v12676_v22 = vadd.f32 %v15198_v55, %v12675_v5 }
0x1c6f   :  { %v12656_v4 = vpop.f32.mrb[120].mxu1 }
0x1c70   :  { %v15199_v56 = vadd.f32 %v12656_v4, %v10827_v41  ;;  %v12658_v35 = vpop.f32.mrb[121].mxu1 }
0x1c71   :  { %v15200_v11 = vadd.f32 %v12658_v35, %v10831_v45  ;;  %v12660_v13 = vpop.f32.mrb[122].mxu1  ;;  %v17519_v35 = vld [vmem:[#allocation23 + $0x10] sm:$0xff]  }
0x1c72   :  { %v12670_v48 = vadd.f32 %v15199_v56, %v12669_v6  ;;  %v15201_v61 = vadd.f32 %v12660_v13, %v10827_v41  ;;  %v12662_v62 = vpop.f32.mrb[123].mxu1  ;;  %v17521_v13 = vld [vmem:[#allocation23 + $0x90] sm:$0xff]  }
0x1c73   :  { %v15202_v53 = vadd.f32 %v12662_v62, %v10831_v45  ;;  %v17525_v62 = vld [vmem:[#allocation23 + $0x98] sm:$0xff]  }
0x1c74   :  { %v12677_v24 = vadd.f32 %v15201_v61, %v12676_v22  ;;  %v12671_v3 = vadd.f32 %v15200_v11, %v12670_v48  ;;  %v17522_v22 = vld [vmem:[#allocation23 + $0x58] sm:$0xff]  }
0x1c75   :  { %v17523_v48 = vld [vmem:[#allocation23 + $0x18] sm:$0xff]  }
0x1c76   :  { %12672 = vadd.xlane.f32.xlu0 %v12671_v3  ;;  %v12678_v37 = vadd.f32 %v15202_v53, %v12677_v24  ;;  %v17528_v24 = vld [vmem:[#allocation23 + $0xe0] sm:$0xff]  }
0x1c77   :  { %v17527_v3 = vld [vmem:[#allocation23 + $0x20] sm:$0xff]  }
0x1c78   :  { %12679 = vadd.xlane.f32.xlu1 %v12678_v37  ;;  %v17529_v37 = vld [vmem:[#allocation23 + $0xa0] sm:$0xff]  }
0x1d03   :  { %v12673_v0 = vpop.xlane.xlu0 %12672 }
0x1d04   :  { %v12681_v12 = vmul.f32 0.0013020834, %v12673_v0  ;;  %v17538_v0 = vld [vmem:[#allocation23 + $0x78] sm:$0xff]  }
0x1d05   :  { %v12680_v17 = vpop.xlane.xlu1 %12679 }
0x1d06   :  { %v12682_v9 = vmul.f32 0.0013020834, %v12680_v17  ;;  %v19074_v49 = vsub.f32 %v15191_v10, %v12681_v12  ;;  %v19076_v36 = vsub.f32 %v15192_v52, %v12681_v12  ;;  %v19078_v40 = vsub.f32 %v15195_v20, %v12681_v12  ;;  %v17539_v17 = vld [vmem:[#allocation23 + $0x38] sm:$0xff]  }
0x1d07   :  { %v19080_v26 = vsub.f32 %v15196_v7, %v12681_v12  ;;  %v19090_v18 = vsub.f32 %v15199_v56, %v12681_v12  ;;  %v19102_v21 = vsub.f32 %v15200_v11, %v12681_v12  ;;  %v17518_v56 = vld [vmem:[#allocation23 + $0x50] sm:$0xff]   ;;  %v17540_v12 = vld [vmem:[#allocation23 + $0xf8] sm:$0xff]  }
0x1d08   :  { %v12695_v23 = vmul.f32 %v19074_v49, %v19074_v49  ;;  %v12696_v33 = vmul.f32 %v19076_v36, %v19076_v36  ;;  %v19086_v30 = vsub.f32 %v15193_v16, %v12682_v9  ;;  %v19088_v38 = vsub.f32 %v15194_v15, %v12682_v9  ;;  %v17520_v11 = vld [vmem:[#allocation23 + $0xd0] sm:$0xff]   ;;  %14937 = vmatprep.subr.bf16.mxu0 %v17518_v56 }
0x1d09   :  { %v12697_v42 = vmul.f32 %v19078_v40, %v19078_v40  ;;  %v19094_v34 = vsub.f32 %v15197_v19, %v12682_v9  ;;  %v19096_v57 = vsub.f32 %v15198_v55, %v12682_v9  ;;  %v12698_v10 = vmul.f32 %v19080_v26, %v19080_v26  ;;  %14938 = vmatpush3.bf16.msra.mxu0 %v17519_v35 }
0x1d0a   :  { %v12707_v2 = vadd.f32 %v12696_v33, %v12695_v23  ;;  %v12701_v60 = vmul.f32 %v19086_v30, %v19086_v30  ;;  %v12702_v39 = vmul.f32 %v19088_v38, %v19088_v38  ;;  %v19106_v54 = vsub.f32 %v15201_v61, %v12682_v9  ;;  %14959 = vmatprep.subr.bf16.mxu1 %v17520_v11  ;;  %v17524_v61 = vld [vmem:[#allocation23 + $0xd8] sm:$0xff]   ;;  %v17542_v23 = vld [vmem:[#allocation23 + $0x140] sm:$0xff]  }
0x1d0b   :  { %v12703_v16 = vmul.f32 %v19094_v34, %v19094_v34  ;;  %v12699_v50 = vmul.f32 %v19090_v18, %v19090_v18  ;;  %v19112_v14 = vsub.f32 %v15202_v53, %v12682_v9  ;;  %v12704_v28 = vmul.f32 %v19096_v57, %v19096_v57  ;;  %14960 = vmatpush3.bf16.msra.mxu1 %v17521_v13  ;;  %v17526_v53 = vld [vmem:[#allocation23 + $0x60] sm:$0xff]   ;;  %v17541_v9 = vld [vmem:[#allocation23 + $0xb8] sm:$0xff]  }
0x1d0c   :  { %v12708_v52 = vadd.f32 %v12707_v2, %v12697_v42  ;;  %v12714_v15 = vadd.f32 %v12702_v39, %v12701_v60  ;;  %v12700_v19 = vmul.f32 %v19102_v21, %v19102_v21  ;;  %v12705_v45 = vmul.f32 %v19106_v54, %v19106_v54  ;;  %14939 = vmatprep.subr.bf16.mxu0 %v17522_v22 }
0x1d0d   :  { %v12706_v4 = vmul.f32 %v19112_v14, %v19112_v14  ;;  %14940 = vmatpush3.bf16.msra.mxu0 %v17523_v48  ;;  %14961 = vmatprep.subr.bf16.mxu1 %v17524_v61 }
0x1d0e   :  { %v12709_v20 = vadd.f32 %v12708_v52, %v12698_v10  ;;  %v12715_v46 = vadd.f32 %v12714_v15, %v12703_v16  ;;  %14941 = vmatprep.subr.bf16.mxu0 %v17526_v53  ;;  %v19122_v52 = vld [vmem:[#allocation20] sm:$0x3f]  ;;  %v19124_v16 = vld [vmem:[#allocation21] sm:$0x3f] }
0x1d0f   :  { %14962 = vmatpush3.bf16.msra.mxu1 %v17525_v62  ;;  %v12747_v15 = vrot.slane %v19122_v52, %v18357_v31 }
0x1d10   :  { %v12710_v41 = vadd.f32 %v12709_v20, %v12699_v50  ;;  %v12716_v7 = vadd.f32 %v12715_v46, %v12704_v28  ;;  %14963 = vmatprep.subr.bf16.mxu1 %v17528_v24  ;;  %v12755_v50 = vrot.slane %v19122_v52, %v18344_v1  ;;  %v12743_v20 = vrot.slane %v19122_v52, %v18352_v27 }
0x1d11   :  { %14942 = vmatpush3.bf16.msra.mxu0 %v17527_v3  ;;  %v12751_v28 = vrot.slane %v19122_v52, %v18341_v63 }
0x1d12   :  { %v12711_v5 = vadd.f32 %v12710_v41, %v12700_v19  ;;  %v12717_v6 = vadd.f32 %v12716_v7, %v12705_v45  ;;  %14943 = vmatprep.subr.bf16.mxu0 %v17530_v25  ;;  %v12790_v19 = vrot.slane %v19124_v16, %v18357_v31  ;;  %v12798_v41 = vrot.slane %v19124_v16, %v18344_v1 }
0x1d13   :  { %14964 = vmatpush3.bf16.msra.mxu1 %v17529_v37  ;;  %v12794_v31 = vrot.slane %v19124_v16, %v18341_v63 }
0x1d14   :  { %12712 = vadd.xlane.f32.xlu0 %v12711_v5  ;;  %v12718_v55 = vadd.f32 %v12717_v6, %v12706_v4  ;;  %14965 = vmatprep.subr.bf16.mxu1 %v17532_v32  ;;  %v12786_v6 = vrot.slane %v19124_v16, %v18352_v27 }
0x1d15   :  { %14944 = vmatpush3.bf16.msra.mxu0 %v17531_v8 }
0x1d16   :  { %12719 = vadd.xlane.f32.xlu1 %v12718_v55  ;;  %14945 = vmatprep.subr.bf16.mxu0 %v17534_v29 }
0x1d17   :  { %14966 = vmatpush3.bf16.msra.mxu1 %v17533_v59 }
0x1d18   :  { %14967 = vmatprep.subr.bf16.mxu1 %v17536_v47 }
0x1d19   :  { %14946 = vmatpush3.bf16.msra.mxu0 %v17535_v44  ;;  %v17543_v44 = vld [vmem:[#allocation23 + $0x100] sm:$0xff]  }
0x1d1a   :  { %14947 = vmatprep.subr.bf16.mxu0 %v17538_v0  ;;  %v17544_v0 = vld [vmem:[#allocation23 + $0x148] sm:$0xff]  }
0x1d1b   :  { %14968 = vmatpush3.bf16.msra.mxu1 %v17537_v43 }
0x1d1c   :  { %14969 = vmatprep.subr.bf16.mxu1 %v17540_v12 }
0x1d1d   :  { %14948 = vmatpush3.bf16.msra.mxu0 %v17539_v17  ;;  %v17546_v17 = vld [vmem:[#allocation23 + $0x150] sm:$0xff]  }
0x1d1e   :  { %14977 = vmatprep.subr.bf16.mxu0 %v17542_v23  ;;  %v17548_v23 = vld [vmem:[#allocation23 + $0x158] sm:$0xff]  }
0x1d1f   :  { %14970 = vmatpush3.bf16.msra.mxu1 %v17541_v9  ;;  %v17547_v9 = vld [vmem:[#allocation23 + $0x110] sm:$0xff]  }
0x1da1   :  { %v12713_v33 = vpop.xlane.xlu0 %12712 }
0x1da2   :  { %v12721_v42 = vmul.f32 0.0013020834, %v12713_v33  ;;  %v17549_v33 = vld [vmem:[#allocation23 + $0x118] sm:$0xff]  }
0x1da3   :  { %v12720_v60 = vpop.xlane.xlu1 %12719 }
0x1da4   :  { %v12723_v2 = vadd.f32 1e-12, %v12721_v42  ;;  %v12722_v39 = vmul.f32 0.0013020834, %v12720_v60  ;;  %v17550_v42 = vld [vmem:[#allocation23 + $0x160] sm:$0xff]   ;;  %v17552_v60 = vld [vmem:[#allocation23 + $0x168] sm:$0xff]  }
0x1da6   :  { %17658 = vrsqrt.f32 %v12723_v2  ;;  %v12724_v10 = vadd.f32 1e-12, %v12722_v39  ;;  %v17551_v2 = vld [vmem:[#allocation23 + $0x120] sm:$0xff]   ;;  %v17553_v39 = vld [vmem:[#allocation23 + $0x128] sm:$0xff]  }
0x1da8   :  { %17660 = vrsqrt.f32 %v12724_v10  ;;  %v17554_v10 = vld [vmem:[#allocation23 + $0x170] sm:$0xff]  }
0x1db0   :  { %v19134_v46 = vpop.eup %17658 }
0x1db1   :  { %v12728_v45 = vmul.f32 %v19134_v46, %v19076_v36  ;;  %v12730_v7 = vmul.f32 %v19134_v46, %v19080_v26  ;;  %v12727_v5 = vmul.f32 %v19134_v46, %v19074_v49  ;;  %v12729_v4 = vmul.f32 %v19134_v46, %v19078_v40 }
0x1db2   :  { %v12732_v1 = vmul.f32 %v19134_v46, %v19102_v21  ;;  %v12763_v36 = vrot.slane %v19122_v52, %v18391_v58  ;;  %v17661_v55 = vpop.eup %17660  ;;  %v12806_v21 = vrot.slane %v19124_v16, %v18391_v58 }
0x1db3   :  { %v12771_v26 = vmul.f32 %v12747_v15, %v12728_v45  ;;  %v12773_v56 = vmul.f32 %v12755_v50, %v12730_v7  ;;  %v12770_v35 = vmul.f32 %v12743_v20, %v12727_v5  ;;  %v12772_v49 = vmul.f32 %v12751_v28, %v12729_v4  ;;  %v17557_v5 = vld [vmem:[#allocation23 + $0x138] sm:$0xff]  }
0x1db4   :  { %v12734_v11 = vmul.f32 %v17661_v55, %v19088_v38  ;;  %v12736_v40 = vmul.f32 %v17661_v55, %v19096_v57  ;;  %v12733_v27 = vmul.f32 %v17661_v55, %v19086_v30  ;;  %v12735_v13 = vmul.f32 %v17661_v55, %v19094_v34 }
0x1db5   :  { %v12814_v63 = vadd.f32 %v12790_v19, %v12771_v26  ;;  %v12816_v22 = vadd.f32 %v12798_v41, %v12773_v56  ;;  %v12813_v24 = vadd.f32 %v12786_v6, %v12770_v35  ;;  %v12815_v3 = vadd.f32 %v12794_v31, %v12772_v49 }
0x1db6   :  { %v12777_v48 = vmul.f32 %v12747_v15, %v12734_v11  ;;  %v12779_v61 = vmul.f32 %v12755_v50, %v12736_v40  ;;  %v12776_v62 = vmul.f32 %v12743_v20, %v12733_v27  ;;  %v12778_v53 = vmul.f32 %v12751_v28, %v12735_v13  ;;  %v17555_v28 = vld [vmem:[#allocation23 + $0x130] sm:$0xff]  }
0x1db7   :  { %v12738_v37 = vmul.f32 %v17661_v55, %v19112_v14  ;;  %v12775_v38 = vmul.f32 %v12763_v36, %v12732_v1  ;;  %v17545_v14 = vld [vmem:[#allocation23 + $0x108] sm:$0xff]   ;;  %v12737_v15 = vmul.f32 %v17661_v55, %v19106_v54  ;;  %v12731_v50 = vmul.f32 %v19134_v46, %v19090_v18 }
0x1db8   :  { %v12820_v25 = vadd.f32 %v12790_v19, %v12777_v48  ;;  %v12822_v57 = vadd.f32 %v12798_v41, %v12779_v61  ;;  %v12819_v32 = vadd.f32 %v12786_v6, %v12776_v62  ;;  %v12821_v30 = vadd.f32 %v12794_v31, %v12778_v53  ;;  %v17556_v19 = vld [vmem:[#allocation23 + $0x178] sm:$0xff]  }
0x1db9   :  { %v12781_v8 = vmul.f32 %v12763_v36, %v12738_v37  ;;  %v12818_v58 = vadd.f32 %v12806_v21, %v12775_v38  ;;  %v12759_v20 = vrot.slane %v19122_v52, %v18386_v51  ;;  %v12802_v7 = vrot.slane %v19124_v16, %v18386_v51  ;;  %v14836_v52 = vld [vmem:[#allocation24] ss:$0 sm:$0xff] }
0x1dba   :  { %v12826_v34 = vpack.c.bf16 %v12820_v25, %v12814_v63  ;;  %v12828_v59 = vpack.c.bf16 %v12822_v57, %v12816_v22  ;;  %v12825_v29 = vpack.c.bf16 %v12819_v32, %v12813_v24  ;;  %v12827_v47 = vpack.c.bf16 %v12821_v30, %v12815_v3 }
0x1dbb   :  { %v12824_v43 = vadd.f32 %v12806_v21, %v12781_v8  ;;  %v12780_v41 = vmul.f32 %v12759_v20, %v12737_v15  ;;  %v12774_v45 = vmul.f32 %v12759_v20, %v12731_v50 }
0x1dbc   :  { %13254 = vmatprep.mubr.bf16.mxu0 %v12826_v34  ;;  %13295 = vmatprep.mubr.bf16.mxu1 %v12828_v59 }
0x1dbd   :  { %13255 = vmatmul.mubr.bf16.vlgmr.msra.gmra.mrb[32].mxu0 %v12825_v29  ;;  %13296 = vmatmul.mubr.bf16.vlgmr.msra.gmra.mrb[124].mxu1 %v12827_v47  ;;  %v12830_v12 = vpack.c.bf16 %v12824_v43, %v12818_v58  ;;  %v12823_v4 = vadd.f32 %v12802_v7, %v12780_v41  ;;  %v12817_v54 = vadd.f32 %v12802_v7, %v12774_v45 }
0x1dbe   :  { %14978 = vmatpush3.bf16.msra.mxu0 %v17543_v44 }
0x1dbf   :  { %13336 = vmatprep.mubr.bf16.mxu0 %v12830_v12  ;;  %14979 = vmatprep.subr.bf16.mxu0 %v17544_v0  ;;  %v12829_v6 = vpack.c.bf16 %v12823_v4, %v12817_v54 }
0x1dc2   :  { %14980 = vmatpush3.bf16.msra.mxu0 %v17545_v14 }
0x1dc3   :  { %14981 = vmatprep.subr.bf16.mxu0 %v17546_v17 }
0x1dc6   :  { %14982 = vmatpush3.bf16.msra.mxu0 %v17547_v9 }
0x1dc7   :  { %14983 = vmatprep.subr.bf16.mxu0 %v17548_v23 }
0x1dca   :  { %14984 = vmatpush3.bf16.msra.mxu0 %v17549_v33 }
0x1dcb   :  { %14985 = vmatprep.subr.bf16.mxu0 %v17550_v42 }
0x1dce   :  { %14986 = vmatpush3.bf16.msra.mxu0 %v17551_v2 }
0x1dcf   :  { %14987 = vmatprep.subr.bf16.mxu0 %v17552_v60 }
0x1dd2   :  { %14988 = vmatpush3.bf16.msra.mxu0 %v17553_v39 }
0x1dd3   :  { %14989 = vmatprep.subr.bf16.mxu0 %v17554_v10 }
0x1dd6   :  { %14990 = vmatpush3.bf16.msra.mxu0 %v17555_v28 }
0x1dd7   :  { %14991 = vmatprep.subr.bf16.mxu0 %v17556_v19 }
0x1dda   :  { %14992 = vmatpush3.bf16.msra.mxu0 %v17557_v5 }
0x1ddd   :  { %13337 = vmatmul.mubr.bf16.vlgmr.msra.gmra.mrb[36].mxu0 %v12829_v6 }
0x1e90   :  { %v14949_v18 = vpop.f32.mrb[32].mxu0  ;;  %v14971_v46 = vpop.f32.mrb[124].mxu1 }
0x1e91   :  { %v14950_v31 = vpop.f32.mrb[33].mxu0  ;;  %v14972_v1 = vpop.f32.mrb[125].mxu1 }
0x1e92   :  { %v14951_v36 = vadd.f32 %v14950_v31, %v14949_v18  ;;  %v14973_v55 = vadd.f32 %v14972_v1, %v14971_v46  ;;  %v14952_v26 = vpop.f32.mrb[34].mxu0  ;;  %v14974_v56 = vpop.f32.mrb[126].mxu1 }
0x1e93   :  { %v14953_v35 = vpop.f32.mrb[35].mxu0  ;;  %v14975_v49 = vpop.f32.mrb[127].mxu1 }
0x1e94   :  { %v13257_v51 = vadd.f32 %v14951_v36, %v14836_v52  ;;  %v14954_v16 = vadd.f32 %v14953_v35, %v14952_v26  ;;  %v14976_v11 = vadd.f32 %v14975_v49, %v14974_v56 }
0x1e96   :  { %v13298_v40 = vadd.f32 %v14973_v55, %v13257_v51  ;;  %v13260_v27 = vadd.f32 %v14954_v16, %v14836_v52 }
0x1e98   :  { %v13301_v13 = vadd.f32 %v14976_v11, %v13260_v27 }
0x1eb0   :  { %v14993_v63 = vpop.f32.mrb[36].mxu0 }
0x1eb1   :  { %v14994_v22 = vpop.f32.mrb[37].mxu0 }
0x1eb2   :  { %v14995_v21 = vadd.f32 %v14994_v22, %v14993_v63  ;;  %v14996_v48 = vpop.f32.mrb[38].mxu0 }
0x1eb3   :  { %v14997_v61 = vpop.f32.mrb[39].mxu0 }
0x1eb4   :  { %v13339_v62 = vadd.f32 %v14995_v21, %v13298_v40  ;;  %v14998_v53 = vadd.f32 %v14997_v61, %v14996_v48 }
0x1eb6   :  { %13345 = vst [vmem:[#allocation26] sm:$0xff] %v13339_v62  ;;  %v13342_v24 = vadd.f32 %v14998_v53, %v13301_v13 }
0x1eb8   :  { %13346 = vst [vmem:[#allocation26 + $0x8] sm:$0xff] %v13342_v24 }
0x1eb9   :  { %17994 = shalt.err (!%p17991_p4)
}
0x1eba   :  { %s17995_s29 = scalar_lea.hbm %s19196_s14, 256 }
0x1ebb   :  { %p17996_p5 = scmp.ne.s32.totalorder %s19196_s14, %s17995_s29  ;;  %p17999_p6 = scmp.lt.u32.totalorder %s17995_s29, %s19196_s14 }
0x1ebd   :  { %p18001_p7 = pnand %p17999_p6, %p17996_p5 }
0x1ebf   :  { %18004 = shalt.err (!%p18001_p7)
}
0x1ec0   :  { %s18048_s11 = smov 128   ;;  %s18049_s17 = smov 8  }
0x1ec1   :  { %13358 = dma.vmem_to_hbm [thread:$0]  %s13353_s4, 256, %s19196_s14, [#allocation5], %s18048_s11, %s18048_s11, %s18049_s17  }
0x1ec2   :  { %18021 = dma.done.wait [#allocation5], 256  }
0x1ec3   :  { %18022 = vsyncadd [#allocation5], 4294967040 }
0x1ec4   :  { %13362 = vsyncpa [#allocation4], 1 }
0x1ec5   :  { %13363 = vsyncpa [#allocation7], 1 }
0x1ec6   :  { %13364 = vsyncpa [#allocation10], 1 }
0x1ec7   :  { %13365 = vsyncpa [#allocation13], 1 }
0x1ec8   :  { %13366 = vsyncpa [#allocation16], 1 }
0x1ec9   :  { %13367 = vsyncpa [#allocation19], 1 }
0x1eca   :  { %13368 = vsyncpa [#allocation22], 1 }
0x1ecb   :  { %13369 = vsyncpa [#allocation25], 1 }
0x1ecc   :  { %13370 = vsyncpa [#allocation5], 1 }

</bundles_post_ra>
